<compile_context>
chip_gen: v7x
topology: tpu7x:2x2x1
jax: 0.10.0
libtpu: 0.0.40
codegen_flags: <defaults>
</compile_context>

<pallas_src>
import functools

import jax
import jax.numpy as jnp
from jax.experimental import pallas as pl
from jax.experimental.pallas import tpu as pltpu

IN_DIM = 2048 * 3          # 6144, fixed by the module
HIDDEN = 256


def _vmem_capacity_bytes():
    """Physical VMEM per TensorCore; conservative (v7x, 64 MiB) fallback."""
    try:
        return int(pltpu.get_tpu_info().vmem_capacity_bytes)
    except Exception:
        return 64 * 1024 * 1024


_VMEM_CAP = _vmem_capacity_bytes()
if _VMEM_CAP >= 100 * 1024 * 1024:      # v5e / v6e: 128 MiB physical
    _TM_MAX = 512
    _VMEM_LIMIT = 64 * 1024 * 1024
else:                                   # v7x: 64 MiB physical per TensorCore
    _TM_MAX = 256
    _VMEM_LIMIT = 40 * 1024 * 1024


def _pick_tm(batch, tm_max):
    """Batch tile: big tiles for DMA efficiency, >=2 grid steps once B is large."""
    tm = min(tm_max, ((batch + 7) // 8) * 8)          # sublane multiple of 8
    if batch >= 256 and pl.cdiv(batch, tm) < 2:
        # Split into (at least) two tiles so the "parallel" axis spans both
        # TensorCores on v7x; round to 128 rows for full MXU tiles.
        tm = max(128, (((batch + 1) // 2 + 127) // 128) * 128)
    return tm


def _mlp_kernel(x_ref, w1_ref, w23_ref, o_ref):
    """Fused o = relu(x @ w1) @ (w2 @ w3) for one batch tile, f32 accumulation."""
    x_bf16 = x_ref[...].astype(jnp.bfloat16)          # in-kernel cast (VPU)
    h1 = jnp.dot(x_bf16, w1_ref[...], preferred_element_type=jnp.float32)
    h1 = jnp.maximum(h1, 0.0).astype(jnp.bfloat16)    # Dropout (eval) + ReLU
    o_ref[...] = jnp.dot(h1, w23_ref[...],
                         preferred_element_type=jnp.float32).astype(o_ref.dtype)


@functools.partial(jax.jit, static_argnames=("out_dim", "single_buffer_weights"))
def mlp_forward(x, w1_t, w23_pad, out_dim, single_buffer_weights=True):
    """x: (B, 3, 2048) f32.  w1_t: (6144, 256) bf16.  w23_pad: (256, out_pad) bf16."""
    B = x.shape[0]
    x2d = x.reshape(B, IN_DIM)                 # row-major flatten == torch .view; stays f32
    out_pad = w23_pad.shape[1]

    tm = _pick_tm(B, _TM_MAX)
    grid_m = pl.cdiv(B, tm)                    # ragged last tile handled by Pallas masking

    if single_buffer_weights:
        w1_spec = pl.BlockSpec((IN_DIM, HIDDEN), lambda i: (0, 0),
                               pipeline_mode=pl.Buffered(1))
        w23_spec = pl.BlockSpec((HIDDEN, out_pad), lambda i: (0, 0),
                                pipeline_mode=pl.Buffered(1))
    else:
        w1_spec = pl.BlockSpec((IN_DIM, HIDDEN), lambda i: (0, 0))
        w23_spec = pl.BlockSpec((HIDDEN, out_pad), lambda i: (0, 0))

    cost = pl.CostEstimate(
        flops=2 * B * IN_DIM * HIDDEN + 2 * B * HIDDEN * out_pad,
        transcendentals=0,
        bytes_accessed=4 * x2d.size + 2 * (w1_t.size + w23_pad.size) + 4 * B * out_pad,
    )

    out = pl.pallas_call(
        _mlp_kernel,
        out_shape=jax.ShapeDtypeStruct((B, out_pad), jnp.float32),
        grid_spec=pltpu.PrefetchScalarGridSpec(
            num_scalar_prefetch=0,
            grid=(grid_m,),                                     # batch tiles only
            in_specs=[
                pl.BlockSpec((tm, IN_DIM), lambda i: (i, 0)),   # f32 x batch tile
                w1_spec,                                        # w1 resident in VMEM
                w23_spec,                                       # fused w2@w3 resident
            ],
            out_specs=pl.BlockSpec((tm, out_pad), lambda i: (i, 0)),
        ),
        compiler_params=pltpu.CompilerParams(
            dimension_semantics=("parallel",),   # batch axis -> megacore / v7x 2nd TC
            vmem_limit_bytes=_VMEM_LIMIT,
        ),
        cost_estimate=cost,
    )(x2d, w1_t, w23_pad)

    return out[:, :out_dim]


def make_params(key, out_dim):
    """Deterministic params, PyTorch Linear convention (out_features, in_features)."""
    k1, k2, k3 = jax.random.split(key, 3)
    w1 = jax.random.normal(k1, (HIDDEN, IN_DIM), jnp.float32) * 0.02
    w2 = jax.random.normal(k2, (HIDDEN, HIDDEN), jnp.float32) * 0.02
    w3 = jax.random.normal(k3, (out_dim, HIDDEN), jnp.float32) * 0.02
    # Kernel-side weights: transpose to (in, out); fold w2 @ w3 (no nonlinearity
    # between them, eval dropout = identity); pad logits dim to a lane multiple
    # of 128; cast once to bf16 (f32 accumulation happens inside the kernel).
    out_pad = max(128, ((out_dim + 127) // 128) * 128)
    w23 = w2.T @ w3.T                                            # (HIDDEN, out_dim) f32
    w23_pad = jnp.zeros((HIDDEN, out_pad), jnp.float32).at[:, :out_dim].set(w23)
    return w1.T.astype(jnp.bfloat16), w23_pad.astype(jnp.bfloat16), (w1, w2, w3)


if __name__ == "__main__":
    key = jax.random.PRNGKey(0)
    kx, kp = jax.random.split(key)

    B, OUT_DIM = 8, 10
    x = jax.random.normal(kx, (B, 3, 2048), jnp.float32)   # viewed as (B, 6144)

    w1_t, w23_pad, (w1, w2, w3) = make_params(kp, OUT_DIM)

    try:
        y = mlp_forward(x, w1_t, w23_pad, OUT_DIM, single_buffer_weights=True)
    except Exception:
        # This JAX version rejects pl.Buffered(1) -> default double buffering.
        y = mlp_forward(x, w1_t, w23_pad, OUT_DIM, single_buffer_weights=False)
    y = jax.block_until_ready(y)

    # Pure-JAX f32 reference (eval-mode dropout = identity); bf16 weights /
    # in-kernel bf16 cast give ~0.1-1% deviation, inside the tolerance below.
    x2d = x.reshape(B, IN_DIM)
    ref = jnp.maximum(x2d @ w1.T, 0.0) @ w2.T @ w3.T
    assert y.shape == (B, OUT_DIM)
    assert jnp.allclose(y, ref, atol=2e-2, rtol=2e-2), "mismatch vs reference"

    print("KERNEL_OK")
</pallas_src>

<mosaic_0001>
module attributes {stable_mosaic.version = 11 : i64} {
  func.func @_mlp_kernel(%arg0: i32, %arg1: memref<8x6144xf32, #tpu.memory_space<vmem>>, %arg2: memref<6144x256xbf16, #tpu.memory_space<vmem>>, %arg3: memref<256x128xbf16, #tpu.memory_space<vmem>>, %arg4: memref<8x128xf32, #tpu.memory_space<vmem>>) attributes {dimension_semantics = [#tpu.dimension_semantics<parallel>], iteration_bounds = array<i64: 1>, scalar_prefetch = 0 : i64, scratch_operands = 0 : i64, tpu.core_type = #tpu.core_type<tc>, window_params = [{transform_indices = @transform_0, window_bounds = array<i64: 8, 6144>}, {pipeline_mode = #tpu.pipeline_mode<synchronous>, transform_indices = @transform_1, window_bounds = array<i64: 6144, 256>}, {pipeline_mode = #tpu.pipeline_mode<synchronous>, transform_indices = @transform_2, window_bounds = array<i64: 256, 128>}, {transform_indices = @transform_3, window_bounds = array<i64: 8, 128>}]} {
    %c0 = arith.constant 0 : index
    %c0_0 = arith.constant 0 : index
    %0 = vector.load %arg1[%c0, %c0_0] : memref<8x6144xf32, #tpu.memory_space<vmem>>, vector<8x6144xf32>
    %1 = arith.truncf %0 : vector<8x6144xf32> to vector<8x6144xbf16>
    %c0_1 = arith.constant 0 : index
    %c0_2 = arith.constant 0 : index
    %2 = vector.load %arg2[%c0_1, %c0_2] : memref<6144x256xbf16, #tpu.memory_space<vmem>>, vector<6144x256xbf16>
    %cst = arith.constant dense<0.000000e+00> : vector<8x256xf32>
    %3 = tpu.matmul %1, %2, %cst {dimension_numbers = #tpu.dot_dimension_numbers<[1], [0], [0], [1], [0, 0, 1, 1], [], []>} : vector<8x6144xbf16>, vector<6144x256xbf16>, vector<8x256xf32> -> vector<8x256xf32>
    %cst_3 = arith.constant 0.000000e+00 : f32
    %4 = vector.broadcast %cst_3 : f32 to vector<8x256xf32>
    %5 = arith.maximumf %3, %4 : vector<8x256xf32>
    %6 = arith.truncf %5 : vector<8x256xf32> to vector<8x256xbf16>
    %c0_4 = arith.constant 0 : index
    %c0_5 = arith.constant 0 : index
    %7 = vector.load %arg3[%c0_4, %c0_5] : memref<256x128xbf16, #tpu.memory_space<vmem>>, vector<256x128xbf16>
    %cst_6 = arith.constant dense<0.000000e+00> : vector<8x128xf32>
    %8 = tpu.matmul %6, %7, %cst_6 {dimension_numbers = #tpu.dot_dimension_numbers<[1], [0], [0], [1], [0, 0, 1, 1], [], []>} : vector<8x256xbf16>, vector<256x128xbf16>, vector<8x128xf32> -> vector<8x128xf32>
    %c0_7 = arith.constant 0 : index
    %c0_8 = arith.constant 0 : index
    %9 = vector.load %arg4[%c0_7, %c0_8] : memref<8x128xf32, #tpu.memory_space<vmem>>, vector<8x128xf32>
    tpu.vector_store %arg4[%c0_7, %c0_8], %8 {strides = array<i32>} : memref<8x128xf32, #tpu.memory_space<vmem>>, vector<8x128xf32>,
    return
  }
  func.func @transform_0(%arg0: i32) -> (i32, i32) {
    %c0_i32 = arith.constant 0 : i32
    %c0_i32_0 = arith.constant 0 : i32
    return %arg0, %c0_i32 : i32, i32
  }
  func.func @transform_1(%arg0: i32) -> (i32, i32) {
    %c0_i32 = arith.constant 0 : i32
    %c0_i32_0 = arith.constant 0 : i32
    %c0_i32_1 = arith.constant 0 : i32
    return %c0_i32, %c0_i32_0 : i32, i32
  }
  func.func @transform_2(%arg0: i32) -> (i32, i32) {
    %c0_i32 = arith.constant 0 : i32
    %c0_i32_0 = arith.constant 0 : i32
    %c0_i32_1 = arith.constant 0 : i32
    return %c0_i32, %c0_i32_0 : i32, i32
  }
  func.func @transform_3(%arg0: i32) -> (i32, i32) {
    %c0_i32 = arith.constant 0 : i32
    %c0_i32_0 = arith.constant 0 : i32
    return %arg0, %c0_i32 : i32, i32
  }
}

module attributes {stable_mosaic.version = 11 : i64} {
  func.func @_mlp_kernel(%arg0: i32, %arg1: memref<8x6144xf32, #tpu.memory_space<vmem>>, %arg2: memref<6144x256xbf16, #tpu.memory_space<vmem>>, %arg3: memref<256x128xbf16, #tpu.memory_space<vmem>>, %arg4: memref<8x128xf32, #tpu.memory_space<vmem>>) attributes {dimension_semantics = [#tpu.dimension_semantics<parallel>], iteration_bounds = array<i64: 1>, scalar_prefetch = 0 : i64, scratch_operands = 0 : i64, tpu.core_type = #tpu.core_type<tc>, window_params = [{transform_indices = @transform_0, window_bounds = array<i64: 8, 6144>}, {pipeline_mode = #tpu.pipeline_mode<synchronous>, transform_indices = @transform_1, window_bounds = array<i64: 6144, 256>}, {pipeline_mode = #tpu.pipeline_mode<synchronous>, transform_indices = @transform_2, window_bounds = array<i64: 256, 128>}, {transform_indices = @transform_3, window_bounds = array<i64: 8, 128>}]} {
    %c0 = arith.constant 0 : index
    %c0_0 = arith.constant 0 : index
    %0 = vector.load %arg1[%c0, %c0_0] : memref<8x6144xf32, #tpu.memory_space<vmem>>, vector<8x6144xf32>
    %1 = arith.truncf %0 : vector<8x6144xf32> to vector<8x6144xbf16>
    %c0_1 = arith.constant 0 : index
    %c0_2 = arith.constant 0 : index
    %2 = vector.load %arg2[%c0_1, %c0_2] : memref<6144x256xbf16, #tpu.memory_space<vmem>>, vector<6144x256xbf16>
    %cst = arith.constant dense<0.000000e+00> : vector<8x256xf32>
    %3 = tpu.matmul %1, %2, %cst {dimension_numbers = #tpu.dot_dimension_numbers<[1], [0], [0], [1], [0, 0, 1, 1], [], []>} : vector<8x6144xbf16>, vector<6144x256xbf16>, vector<8x256xf32> -> vector<8x256xf32>
    %cst_3 = arith.constant 0.000000e+00 : f32
    %4 = vector.broadcast %cst_3 : f32 to vector<8x256xf32>
    %5 = arith.maximumf %3, %4 : vector<8x256xf32>
    %6 = arith.truncf %5 : vector<8x256xf32> to vector<8x256xbf16>
    %c0_4 = arith.constant 0 : index
    %c0_5 = arith.constant 0 : index
    %7 = vector.load %arg3[%c0_4, %c0_5] : memref<256x128xbf16, #tpu.memory_space<vmem>>, vector<256x128xbf16>
    %cst_6 = arith.constant dense<0.000000e+00> : vector<8x128xf32>
    %8 = tpu.matmul %6, %7, %cst_6 {dimension_numbers = #tpu.dot_dimension_numbers<[1], [0], [0], [1], [0, 0, 1, 1], [], []>} : vector<8x256xbf16>, vector<256x128xbf16>, vector<8x128xf32> -> vector<8x128xf32>
    %c0_7 = arith.constant 0 : index
    %c0_8 = arith.constant 0 : index
    %9 = vector.load %arg4[%c0_7, %c0_8] : memref<8x128xf32, #tpu.memory_space<vmem>>, vector<8x128xf32>
    tpu.vector_store %arg4[%c0_7, %c0_8], %8 {strides = array<i32>} : memref<8x128xf32, #tpu.memory_space<vmem>>, vector<8x128xf32>,
    return
  }
  func.func @transform_0(%arg0: i32) -> (i32, i32) {
    %c0_i32 = arith.constant 0 : i32
    %c0_i32_0 = arith.constant 0 : i32
    return %arg0, %c0_i32 : i32, i32
  }
  func.func @transform_1(%arg0: i32) -> (i32, i32) {
    %c0_i32 = arith.constant 0 : i32
    %c0_i32_0 = arith.constant 0 : i32
    %c0_i32_1 = arith.constant 0 : i32
    return %c0_i32, %c0_i32_0 : i32, i32
  }
  func.func @transform_2(%arg0: i32) -> (i32, i32) {
    %c0_i32 = arith.constant 0 : i32
    %c0_i32_0 = arith.constant 0 : i32
    %c0_i32_1 = arith.constant 0 : i32
    return %c0_i32, %c0_i32_0 : i32, i32
  }
  func.func @transform_3(%arg0: i32) -> (i32, i32) {
    %c0_i32 = arith.constant 0 : i32
    %c0_i32_0 = arith.constant 0 : i32
    return %arg0, %c0_i32 : i32, i32
  }
}

</mosaic_0001>

<bundles_post_ra>
// kernel: mlp_forward.1
= control target key start
LH: loop header
LB: loop body
LE: loop exit
PB: predicated region body
PF: predicated region fallthrough
CT: control target
= control target key end

     0   :  { %8 = vsyncpa [#allocation3], 0  ;;  %s8174_s0 = inlined_call_operand.hbm [shape: f32[8,6144], index: 0, kind: input, shape index: {}]   ;;  %s8175_s1 = inlined_call_operand.hbm [shape: bf16[6144,256], index: 1, kind: input, shape index: {}]   ;;  %s8176_s2 = inlined_call_operand.hbm [shape: bf16[256,128], index: 2, kind: input, shape index: {}]   ;;  %s8177_s3 = inlined_call_operand.hbm [shape: f32[8,128], index: 3, kind: output, shape index: {}]  }
   0x1   :  { %9 = vsyncpa [#allocation6], 0 }
   0x2   :  { %10 = vsyncpa [#allocation4], 0  ;;  %s8098_s12 = smov [#allocation5]   ;;  %s8004_s16 = scalar_lea.hbm %s8175_s1, 98304 }
   0x3   :  { %s26_s13 = sshll.u32 %s8098_s12, 4  ;;  %p8005_p0 = scmp.ne.s32.totalorder %s8175_s1, %s8004_s16  ;;  %s27_s13 = int_to_ptr.vmem [resolvable:$true] %s26_s13 }
   0x4   :  { %p8008_p1 = scmp.lt.u32.totalorder %s8004_s16, %s8175_s1 }
   0x6   :  { %p8010_p2 = pnand %p8008_p1, %p8005_p0 }
   0x8   :  { %8013 = shalt.err (!%p8010_p2)
}
   0x9   :  { %s8014_s21 = scalar_lea.vmem %s27_s13, 98304  ;;  %p8019_p4 = scmp.lt.s32.totalorder %s27_s13, %s27_s13 }
   0xa   :  { %p8015_p3 = scmp.ne.s32.totalorder %s27_s13, %s8014_s21  ;;  %p8020_p5 = scmp.lt.s32.totalorder %s8014_s21, %s8014_s21 }
   0xc   :  { %p8021_p6 = por %p8020_p5, %p8019_p4 }
   0xe   :  { %p8022_p7 = pnand %p8021_p6, %p8015_p3 }
  0x10   :  { %8025 = shalt.err (!%p8022_p7)
}
  0x11   :  { %s8099_s22 = smov 128   ;;  %s8100_s23 = smov 8  }
  0x12   :  { %32 = dma.hbm_to_vmem [thread:$0]  %s8175_s1, 98304, %s27_s13, [#allocation6], %s8099_s22, %s8099_s22, %s8100_s23  }
  0x13   :  { %s8101_s26 = smov [#allocation2]   ;;  %s8102_s28 = smov [#allocation7]  }
  0x14   :  { %s17_s27 = sshll.u32 %s8101_s26, 4  ;;  %s38_s29 = sshll.u32 %s8102_s28, 4  ;;  %s18_s27 = int_to_ptr.vmem [resolvable:$true] %s17_s27  ;;  %s39_s29 = int_to_ptr.vmem [resolvable:$true] %s38_s29 }
  0x15   :  { %s8026_s5 = scalar_lea.hbm %s8174_s0, 6144 }
  0x16   :  { %p8027_p8 = scmp.ne.s32.totalorder %s8174_s0, %s8026_s5  ;;  %p8030_p9 = scmp.lt.u32.totalorder %s8026_s5, %s8174_s0 }
  0x18   :  { %p8032_p10 = pnand %p8030_p9, %p8027_p8 }
  0x1a   :  { %8035 = shalt.err (!%p8032_p10)
}
  0x1b   :  { %s8036_s1 = scalar_lea.vmem %s18_s27, 6144  ;;  %p8041_p12 = scmp.lt.s32.totalorder %s18_s27, %s18_s27 }
  0x1c   :  { %p8037_p11 = scmp.ne.s32.totalorder %s18_s27, %s8036_s1  ;;  %p8042_p13 = scmp.lt.s32.totalorder %s8036_s1, %s8036_s1 }
  0x1e   :  { %p8043_p0 = por %p8042_p13, %p8041_p12 }
  0x20   :  { %p8044_p1 = pnand %p8043_p0, %p8037_p11 }
  0x22   :  { %8047 = shalt.err (!%p8044_p1)
}
  0x23   :  { %20 = dma.hbm_to_vmem [thread:$0]  %s8174_s0, 6144, %s18_s27, [#allocation3]  }
  0x24   :  { %s8048_s14 = scalar_lea.hbm %s8176_s2, 2048 }
  0x25   :  { %p8049_p2 = scmp.ne.s32.totalorder %s8176_s2, %s8048_s14  ;;  %p8052_p3 = scmp.lt.u32.totalorder %s8048_s14, %s8176_s2 }
  0x27   :  { %p8054_p4 = pnand %p8052_p3, %p8049_p2 }
  0x29   :  { %8057 = shalt.err (!%p8054_p4)
}
  0x2a   :  { %s8058_s19 = scalar_lea.vmem %s39_s29, 2048  ;;  %p8063_p6 = scmp.lt.s32.totalorder %s39_s29, %s39_s29 }
  0x2b   :  { %p8059_p5 = scmp.ne.s32.totalorder %s39_s29, %s8058_s19  ;;  %p8064_p7 = scmp.lt.s32.totalorder %s8058_s19, %s8058_s19 }
  0x2d   :  { %p8065_p8 = por %p8064_p7, %p8063_p6 }
  0x2f   :  { %p8066_p9 = pnand %p8065_p8, %p8059_p5 }
  0x31   :  { %8069 = shalt.err (!%p8066_p9)
}
  0x32   :  { %s8103_s0 = smov 64   ;;  %s8104_s20 = smov 4  }
  0x33   :  { %44 = dma.hbm_to_vmem [thread:$0]  %s8176_s2, 2048, %s39_s29, [#allocation6], %s8103_s0, %s8103_s0, %s8104_s20  }
  0x34   :  { %8092 = dma.done.wait [#allocation3], 6144  }
  0x35   :  { %8093 = vsyncadd [#allocation3], 4294961152 }
  0x36   :  { %8094 = dma.done.wait [#allocation6], 100352  }
  0x37   :  { %8095 = vsyncadd [#allocation6], 4294866944  ;;  %v6836_v0 = vld [vmem:[#allocation5 + $0x4] ss:$8 sps:$4 sm:$0xff]   ;;  %v6840_v2 = vld [vmem:[#allocation5] ss:$8 sps:$4 sm:$0xff]  }
  0x38   :  { %v6838_v1 = vld [vmem:[#allocation5 + $0xc04] ss:$8 sps:$4 sm:$0xff]   ;;  %4759 = vmatprep.subr.bf16.mxu1 %v6836_v0  ;;  %v6841_v3 = vld [vmem:[#allocation5 + $0xc00] ss:$8 sps:$4 sm:$0xff]   ;;  %v6842_v4 = vld [vmem:[#allocation5 + $0x14] ss:$8 sps:$4 sm:$0xff]  }
  0x39   :  { %5251 = vmatprep.subr.bf16.mxu0 %v6838_v1  ;;  %4760 = vmatpush1.bf16.msra.mxu1 %v6840_v2  ;;  %v6844_v5 = vld [vmem:[#allocation5 + $0xc14] ss:$8 sps:$4 sm:$0xff]   ;;  %v6846_v6 = vld [vmem:[#allocation5 + $0x10] ss:$8 sps:$4 sm:$0xff]   ;;  %v6848_v8 = vld [vmem:[#allocation5 + $0x24] ss:$8 sps:$4 sm:$0xff]  }
  0x3a   :  { %5252 = vmatpush1.bf16.msra.mxu0 %v6841_v3  ;;  %4761 = vmatprep.subr.bf16.mxu1 %v6842_v4  ;;  %v6847_v7 = vld [vmem:[#allocation5 + $0xc10] ss:$8 sps:$4 sm:$0xff]   ;;  %v6850_v9 = vld [vmem:[#allocation5 + $0xc24] ss:$8 sps:$4 sm:$0xff]   ;;  %v6852_v10 = vld [vmem:[#allocation5 + $0x20] ss:$8 sps:$4 sm:$0xff]  }
  0x3b   :  { %5253 = vmatprep.subr.bf16.mxu0 %v6844_v5  ;;  %v6853_v11 = vld [vmem:[#allocation5 + $0xc20] ss:$8 sps:$4 sm:$0xff]   ;;  %v6854_v12 = vld [vmem:[#allocation5 + $0x34] ss:$8 sps:$4 sm:$0xff]   ;;  %v6858_v14 = vld [vmem:[#allocation5 + $0x30] ss:$8 sps:$4 sm:$0xff]  }
  0x3c   :  { %v6856_v13 = vld [vmem:[#allocation5 + $0xc34] ss:$8 sps:$4 sm:$0xff]   ;;  %v6859_v15 = vld [vmem:[#allocation5 + $0xc30] ss:$8 sps:$4 sm:$0xff]   ;;  %v6860_v16 = vld [vmem:[#allocation5 + $0x44] ss:$8 sps:$4 sm:$0xff]  }
  0x3d   :  { %4762 = vmatpush1.bf16.msra.mxu1 %v6846_v6  ;;  %v6862_v17 = vld [vmem:[#allocation5 + $0xc44] ss:$8 sps:$4 sm:$0xff]   ;;  %v6864_v18 = vld [vmem:[#allocation5 + $0x40] ss:$8 sps:$4 sm:$0xff]   ;;  %v6866_v20 = vld [vmem:[#allocation5 + $0x54] ss:$8 sps:$4 sm:$0xff]  }
  0x3e   :  { %5254 = vmatpush1.bf16.msra.mxu0 %v6847_v7  ;;  %4763 = vmatprep.subr.bf16.mxu1 %v6848_v8  ;;  %v6865_v19 = vld [vmem:[#allocation5 + $0xc40] ss:$8 sps:$4 sm:$0xff]   ;;  %v6868_v21 = vld [vmem:[#allocation5 + $0xc54] ss:$8 sps:$4 sm:$0xff]   ;;  %v6870_v22 = vld [vmem:[#allocation5 + $0x50] ss:$8 sps:$4 sm:$0xff]  }
  0x3f   :  { %5255 = vmatprep.subr.bf16.mxu0 %v6850_v9  ;;  %v6871_v23 = vld [vmem:[#allocation5 + $0xc50] ss:$8 sps:$4 sm:$0xff]   ;;  %v6872_v24 = vld [vmem:[#allocation5 + $0x64] ss:$8 sps:$4 sm:$0xff]   ;;  %v6876_v26 = vld [vmem:[#allocation5 + $0x60] ss:$8 sps:$4 sm:$0xff]  }
  0x40   :  { %v6874_v25 = vld [vmem:[#allocation5 + $0xc64] ss:$8 sps:$4 sm:$0xff]   ;;  %v6877_v27 = vld [vmem:[#allocation5 + $0xc60] ss:$8 sps:$4 sm:$0xff]   ;;  %v6878_v28 = vld [vmem:[#allocation5 + $0x74] ss:$8 sps:$4 sm:$0xff]  }
  0x41   :  { %4764 = vmatpush1.bf16.msra.mxu1 %v6852_v10  ;;  %v6880_v29 = vld [vmem:[#allocation5 + $0xc74] ss:$8 sps:$4 sm:$0xff]   ;;  %v6882_v30 = vld [vmem:[#allocation5 + $0x70] ss:$8 sps:$4 sm:$0xff]   ;;  %v6884_v32 = vld [vmem:[#allocation5 + $0x84] ss:$8 sps:$4 sm:$0xff]  }
  0x42   :  { %5256 = vmatpush1.bf16.msra.mxu0 %v6853_v11  ;;  %4765 = vmatprep.subr.bf16.mxu1 %v6854_v12  ;;  %v6883_v31 = vld [vmem:[#allocation5 + $0xc70] ss:$8 sps:$4 sm:$0xff]   ;;  %v6886_v33 = vld [vmem:[#allocation5 + $0xc84] ss:$8 sps:$4 sm:$0xff]   ;;  %v6888_v34 = vld [vmem:[#allocation5 + $0x80] ss:$8 sps:$4 sm:$0xff]  }
  0x43   :  { %5257 = vmatprep.subr.bf16.mxu0 %v6856_v13  ;;  %v6889_v35 = vld [vmem:[#allocation5 + $0xc80] ss:$8 sps:$4 sm:$0xff]   ;;  %v6890_v36 = vld [vmem:[#allocation5 + $0x94] ss:$8 sps:$4 sm:$0xff]   ;;  %v6894_v38 = vld [vmem:[#allocation5 + $0x90] ss:$8 sps:$4 sm:$0xff]  }
  0x44   :  { %v6892_v37 = vld [vmem:[#allocation5 + $0xc94] ss:$8 sps:$4 sm:$0xff]   ;;  %v6895_v39 = vld [vmem:[#allocation5 + $0xc90] ss:$8 sps:$4 sm:$0xff]   ;;  %v6896_v40 = vld [vmem:[#allocation5 + $0xa4] ss:$8 sps:$4 sm:$0xff]  }
  0x45   :  { %4766 = vmatpush1.bf16.msra.mxu1 %v6858_v14  ;;  %v6898_v41 = vld [vmem:[#allocation5 + $0xca4] ss:$8 sps:$4 sm:$0xff]   ;;  %v6900_v42 = vld [vmem:[#allocation5 + $0xa0] ss:$8 sps:$4 sm:$0xff]   ;;  %v6902_v44 = vld [vmem:[#allocation5 + $0xb4] ss:$8 sps:$4 sm:$0xff]  }
  0x46   :  { %5258 = vmatpush1.bf16.msra.mxu0 %v6859_v15  ;;  %4767 = vmatprep.subr.bf16.mxu1 %v6860_v16  ;;  %v6901_v43 = vld [vmem:[#allocation5 + $0xca0] ss:$8 sps:$4 sm:$0xff]   ;;  %v6904_v45 = vld [vmem:[#allocation5 + $0xcb4] ss:$8 sps:$4 sm:$0xff]   ;;  %v6906_v47 = vld [vmem:[#allocation5 + $0xb0] ss:$8 sps:$4 sm:$0xff]  }
  0x47   :  { %5259 = vmatprep.subr.bf16.mxu0 %v6862_v17  ;;  %v56_v46 = vld [vmem:[#allocation2 + $0x8] sm:$0xff]  ;;  %v6907_v49 = vld [vmem:[#allocation5 + $0xcb0] ss:$8 sps:$4 sm:$0xff]   ;;  %v6914_v56 = vld [vmem:[#allocation5 + $0xd4] ss:$8 sps:$4 sm:$0xff]   ;;  %s8105_s2 = smov [#allocation8]  }
  0x48   :  { %v104_v48 = vpack.c.bf16 %v56_v46, %v56_v46  ;;  %v80_v50 = vld [vmem:[#allocation2 + $0xc8] sm:$0xff]  ;;  %v6916_v57 = vld [vmem:[#allocation5 + $0xcd4] ss:$8 sps:$4 sm:$0xff]   ;;  %v6918_v58 = vld [vmem:[#allocation5 + $0xd0] ss:$8 sps:$4 sm:$0xff]   ;;  %s5922_s23 = sshll.u32 %s8105_s2, 4  ;;  %s5923_s23 = int_to_ptr.vmem [resolvable:$true] %s5922_s23 }
  0x49   :  { %4768 = vmatpush1.bf16.msra.mxu1 %v6864_v18  ;;  %v6908_v51 = vld [vmem:[#allocation5 + $0xc4] ss:$8 sps:$4 sm:$0xff]   ;;  %v128_v53 = vpack.c.bf16 %v80_v50, %v80_v50  ;;  %v6912_v54 = vld [vmem:[#allocation5 + $0xc0] ss:$8 sps:$4 sm:$0xff]   ;;  %v6919_v59 = vld [vmem:[#allocation5 + $0xcd0] ss:$8 sps:$4 sm:$0xff]   ;;  %p8075_p11 = scmp.lt.s32.totalorder %s5923_s23, %s5923_s23 }
  0x4a   :  { %5260 = vmatpush1.bf16.msra.mxu0 %v6865_v19  ;;  %4769 = vmatprep.subr.bf16.mxu1 %v6866_v20  ;;  %v6910_v52 = vld [vmem:[#allocation5 + $0xcc4] ss:$8 sps:$4 sm:$0xff]   ;;  %v6913_v55 = vld [vmem:[#allocation5 + $0xcc0] ss:$8 sps:$4 sm:$0xff]   ;;  %v6926_v0 = vld [vmem:[#allocation5 + $0xf4] ss:$8 sps:$4 sm:$0xff]  }
  0x4b   :  { %5261 = vmatprep.subr.bf16.mxu0 %v6868_v21  ;;  %4791 = vmatprep.mubr.bf16.mxu1 %v104_v48  ;;  %v6920_v60 = vld [vmem:[#allocation5 + $0xe4] ss:$8 sps:$4 sm:$0xff]   ;;  %v6924_v62 = vld [vmem:[#allocation5 + $0xe0] ss:$8 sps:$4 sm:$0xff]   ;;  %v6928_v1 = vld [vmem:[#allocation5 + $0xcf4] ss:$8 sps:$4 sm:$0xff]  }
  0x4c   :  { %5283 = vmatprep.mubr.bf16.mxu0 %v128_v53  ;;  %v6922_v61 = vld [vmem:[#allocation5 + $0xce4] ss:$8 sps:$4 sm:$0xff]   ;;  %v6925_v63 = vld [vmem:[#allocation5 + $0xce0] ss:$8 sps:$4 sm:$0xff]   ;;  %v6930_v2 = vld [vmem:[#allocation5 + $0xf0] ss:$8 sps:$4 sm:$0xff]  }
  0x4d   :  { %4770 = vmatpush1.bf16.msra.mxu1 %v6870_v22  ;;  %v6931_v3 = vld [vmem:[#allocation5 + $0xcf0] ss:$8 sps:$4 sm:$0xff]   ;;  %v6934_v4 = vld [vmem:[#allocation5 + $0x104] ss:$8 sps:$4 sm:$0xff]   ;;  %v6932_v8 = vld [vmem:[#allocation5 + $0x100] ss:$8 sps:$4 sm:$0xff]  }
  0x4e   :  { %5262 = vmatpush1.bf16.msra.mxu0 %v6871_v23  ;;  %4771 = vmatprep.subr.bf16.mxu1 %v6872_v24  ;;  %v55_v5 = vld [vmem:[#allocation2] sm:$0xff]  ;;  %v6940_v12 = vld [vmem:[#allocation5 + $0x114] ss:$8 sps:$4 sm:$0xff]   ;;  %v6938_v14 = vld [vmem:[#allocation5 + $0x110] ss:$8 sps:$4 sm:$0xff]   ;;  %s8070_s24 = scalar_lea.vmem %s5923_s23, 128 }
  0x4f   :  { %5263 = vmatprep.subr.bf16.mxu0 %v6874_v25  ;;  %v79_v6 = vld [vmem:[#allocation2 + $0xc0] sm:$0xff]  ;;  %v103_v10 = vpack.c.bf16 %v55_v5, %v55_v5  ;;  %v6943_v13 = vld [vmem:[#allocation5 + $0xd14] ss:$8 sps:$4 sm:$0xff]   ;;  %v6941_v15 = vld [vmem:[#allocation5 + $0xd10] ss:$8 sps:$4 sm:$0xff]   ;;  %p8071_p10 = scmp.ne.s32.totalorder %s5923_s23, %s8070_s24  ;;  %p8076_p12 = scmp.lt.s32.totalorder %s8070_s24, %s8070_s24 }
  0x50   :  { %v6937_v7 = vld [vmem:[#allocation5 + $0xd04] ss:$8 sps:$4 sm:$0xff]   ;;  %v6935_v9 = vld [vmem:[#allocation5 + $0xd00] ss:$8 sps:$4 sm:$0xff]   ;;  %v127_v11 = vpack.c.bf16 %v79_v6, %v79_v6  ;;  %v6952_v20 = vld [vmem:[#allocation5 + $0x134] ss:$8 sps:$4 sm:$0xff]  }
  0x51   :  { %4772 = vmatpush1.bf16.msra.mxu1 %v6876_v26  ;;  %v6946_v16 = vld [vmem:[#allocation5 + $0x124] ss:$8 sps:$4 sm:$0xff]   ;;  %v6944_v18 = vld [vmem:[#allocation5 + $0x120] ss:$8 sps:$4 sm:$0xff]   ;;  %v6955_v21 = vld [vmem:[#allocation5 + $0xd34] ss:$8 sps:$4 sm:$0xff]   ;;  %p8077_p13 = por %p8076_p12, %p8075_p11 }
  0x52   :  { %5264 = vmatpush1.bf16.msra.mxu0 %v6877_v27  ;;  %4773 = vmatprep.subr.bf16.mxu1 %v6878_v28  ;;  %v6949_v17 = vld [vmem:[#allocation5 + $0xd24] ss:$8 sps:$4 sm:$0xff]   ;;  %v6947_v19 = vld [vmem:[#allocation5 + $0xd20] ss:$8 sps:$4 sm:$0xff]   ;;  %v6950_v22 = vld [vmem:[#allocation5 + $0x130] ss:$8 sps:$4 sm:$0xff]  }
  0x53   :  { %5265 = vmatprep.subr.bf16.mxu0 %v6880_v29  ;;  %v6953_v23 = vld [vmem:[#allocation5 + $0xd30] ss:$8 sps:$4 sm:$0xff]   ;;  %v6958_v24 = vld [vmem:[#allocation5 + $0x144] ss:$8 sps:$4 sm:$0xff]   ;;  %v6956_v26 = vld [vmem:[#allocation5 + $0x140] ss:$8 sps:$4 sm:$0xff]   ;;  %p8078_p0 = pnand %p8077_p13, %p8071_p10 }
  0x54   :  { %v6961_v25 = vld [vmem:[#allocation5 + $0xd44] ss:$8 sps:$4 sm:$0xff]   ;;  %v6959_v27 = vld [vmem:[#allocation5 + $0xd40] ss:$8 sps:$4 sm:$0xff]   ;;  %v6964_v28 = vld [vmem:[#allocation5 + $0x154] ss:$8 sps:$4 sm:$0xff]  }
  0x55   :  { %4774 = vmatpush1.bf16.msra.mxu1 %v6882_v30  ;;  %v6967_v29 = vld [vmem:[#allocation5 + $0xd54] ss:$8 sps:$4 sm:$0xff]   ;;  %v6962_v30 = vld [vmem:[#allocation5 + $0x150] ss:$8 sps:$4 sm:$0xff]   ;;  %v6980_v46 = vld [vmem:[#allocation5 + $0x180] ss:$8 sps:$4 sm:$0xff]  }
  0x56   :  { %5266 = vmatpush1.bf16.msra.mxu0 %v6883_v31  ;;  %4775 = vmatprep.subr.bf16.mxu1 %v6884_v32  ;;  %v6965_v31 = vld [vmem:[#allocation5 + $0xd50] ss:$8 sps:$4 sm:$0xff]   ;;  %v6970_v32 = vld [vmem:[#allocation5 + $0x164] ss:$8 sps:$4 sm:$0xff]   ;;  %v6988_v48 = vld [vmem:[#allocation5 + $0x194] ss:$8 sps:$4 sm:$0xff]  }
  0x57   :  { %5267 = vmatprep.subr.bf16.mxu0 %v6886_v33  ;;  %v6973_v33 = vld [vmem:[#allocation5 + $0xd64] ss:$8 sps:$4 sm:$0xff]   ;;  %v6986_v50 = vld [vmem:[#allocation5 + $0x190] ss:$8 sps:$4 sm:$0xff]   ;;  %v7016_v6 = vld [vmem:[#allocation5 + $0x1e0] ss:$8 sps:$4 sm:$0xff]  }
  0x58   :  { %v6997_v53 = vld [vmem:[#allocation5 + $0xda4] ss:$8 sps:$4 sm:$0xff]  }
  0x59   :  { %4776 = vmatpush1.bf16.msra.mxu1 %v6888_v34  ;;  %v58_v34 = vld [vmem:[#allocation2 + $0x18] sm:$0xff]  ;;  %v7021_v5 = vld [vmem:[#allocation5 + $0xde4] ss:$8 sps:$4 sm:$0xff]  }
  0x5a   :  { %5268 = vmatpush1.bf16.msra.mxu0 %v6889_v35  ;;  %4777 = vmatprep.subr.bf16.mxu1 %v6890_v36  ;;  %v6968_v35 = vld [vmem:[#allocation5 + $0x160] ss:$8 sps:$4 sm:$0xff]   ;;  %v106_v36 = vpack.c.bf16 %v58_v34, %v58_v34  ;;  %v7046_v34 = vld [vmem:[#allocation5 + $0x230] ss:$8 sps:$4 sm:$0xff]  }
  0x5b   :  { %5269 = vmatprep.subr.bf16.mxu0 %v6892_v37  ;;  %v6971_v37 = vld [vmem:[#allocation5 + $0xd60] ss:$8 sps:$4 sm:$0xff]  }
  0x5d   :  { %4778 = vmatpush1.bf16.msra.mxu1 %v6894_v38  ;;  %v82_v38 = vld [vmem:[#allocation2 + $0xd8] sm:$0xff] }
  0x5e   :  { %5270 = vmatpush1.bf16.msra.mxu0 %v6895_v39  ;;  %4779 = vmatprep.subr.bf16.mxu1 %v6896_v40  ;;  %v6976_v39 = vld [vmem:[#allocation5 + $0x174] ss:$8 sps:$4 sm:$0xff]  }
  0x5f   :  { %5271 = vmatprep.subr.bf16.mxu0 %v6898_v41  ;;  %v6979_v40 = vld [vmem:[#allocation5 + $0xd74] ss:$8 sps:$4 sm:$0xff]   ;;  %v130_v41 = vpack.c.bf16 %v82_v38, %v82_v38  ;;  %v7052_v38 = vld [vmem:[#allocation5 + $0x240] ss:$8 sps:$4 sm:$0xff]  }
  0x61   :  { %4780 = vmatpush1.bf16.msra.mxu1 %v6900_v42  ;;  %v6974_v42 = vld [vmem:[#allocation5 + $0x170] ss:$8 sps:$4 sm:$0xff]  }
  0x62   :  { %5272 = vmatpush1.bf16.msra.mxu0 %v6901_v43  ;;  %4781 = vmatprep.subr.bf16.mxu1 %v6902_v44  ;;  %v6977_v43 = vld [vmem:[#allocation5 + $0xd70] ss:$8 sps:$4 sm:$0xff]   ;;  %v6982_v44 = vld [vmem:[#allocation5 + $0x184] ss:$8 sps:$4 sm:$0xff]  }
  0x63   :  { %5273 = vmatprep.subr.bf16.mxu0 %v6904_v45  ;;  %v6985_v45 = vld [vmem:[#allocation5 + $0xd84] ss:$8 sps:$4 sm:$0xff]  }
  0x65   :  { %4782 = vmatpush1.bf16.msra.mxu1 %v6906_v47  ;;  %v6983_v47 = vld [vmem:[#allocation5 + $0xd80] ss:$8 sps:$4 sm:$0xff]  }
  0x66   :  { %5274 = vmatpush1.bf16.msra.mxu0 %v6907_v49  ;;  %4783 = vmatprep.subr.bf16.mxu1 %v6908_v51  ;;  %v6991_v49 = vld [vmem:[#allocation5 + $0xd94] ss:$8 sps:$4 sm:$0xff]   ;;  %v6989_v51 = vld [vmem:[#allocation5 + $0xd90] ss:$8 sps:$4 sm:$0xff]  }
  0x67   :  { %5275 = vmatprep.subr.bf16.mxu0 %v6910_v52  ;;  %v6994_v52 = vld [vmem:[#allocation5 + $0x1a4] ss:$8 sps:$4 sm:$0xff]  }
  0x69   :  { %4784 = vmatpush1.bf16.msra.mxu1 %v6912_v54  ;;  %v6992_v54 = vld [vmem:[#allocation5 + $0x1a0] ss:$8 sps:$4 sm:$0xff]  }
  0x6a   :  { %5276 = vmatpush1.bf16.msra.mxu0 %v6913_v55  ;;  %4785 = vmatprep.subr.bf16.mxu1 %v6914_v56  ;;  %v6995_v55 = vld [vmem:[#allocation5 + $0xda0] ss:$8 sps:$4 sm:$0xff]   ;;  %v7000_v56 = vld [vmem:[#allocation5 + $0x1b4] ss:$8 sps:$4 sm:$0xff]  }
  0x6b   :  { %5277 = vmatprep.subr.bf16.mxu0 %v6916_v57  ;;  %v7003_v57 = vld [vmem:[#allocation5 + $0xdb4] ss:$8 sps:$4 sm:$0xff]  }
  0x6d   :  { %4786 = vmatpush1.bf16.msra.mxu1 %v6918_v58  ;;  %v6998_v58 = vld [vmem:[#allocation5 + $0x1b0] ss:$8 sps:$4 sm:$0xff]  }
  0x6e   :  { %5278 = vmatpush1.bf16.msra.mxu0 %v6919_v59  ;;  %4787 = vmatprep.subr.bf16.mxu1 %v6920_v60  ;;  %v7001_v59 = vld [vmem:[#allocation5 + $0xdb0] ss:$8 sps:$4 sm:$0xff]   ;;  %v7006_v60 = vld [vmem:[#allocation5 + $0x1c4] ss:$8 sps:$4 sm:$0xff]  }
  0x6f   :  { %5279 = vmatprep.subr.bf16.mxu0 %v6922_v61  ;;  %v7009_v61 = vld [vmem:[#allocation5 + $0xdc4] ss:$8 sps:$4 sm:$0xff]  }
  0x71   :  { %4788 = vmatpush1.bf16.msra.mxu1 %v6924_v62  ;;  %v7004_v62 = vld [vmem:[#allocation5 + $0x1c0] ss:$8 sps:$4 sm:$0xff]  }
  0x72   :  { %5280 = vmatpush1.bf16.msra.mxu0 %v6925_v63  ;;  %4789 = vmatprep.subr.bf16.mxu1 %v6926_v0  ;;  %v7007_v63 = vld [vmem:[#allocation5 + $0xdc0] ss:$8 sps:$4 sm:$0xff]   ;;  %v7012_v0 = vld [vmem:[#allocation5 + $0x1d4] ss:$8 sps:$4 sm:$0xff]  }
  0x73   :  { %5281 = vmatprep.subr.bf16.mxu0 %v6928_v1  ;;  %v7015_v1 = vld [vmem:[#allocation5 + $0xdd4] ss:$8 sps:$4 sm:$0xff]  }
  0x75   :  { %4790 = vmatpush1.bf16.msra.mxu1 %v6930_v2  ;;  %v7010_v2 = vld [vmem:[#allocation5 + $0x1d0] ss:$8 sps:$4 sm:$0xff]  }
  0x76   :  { %5282 = vmatpush1.bf16.msra.mxu0 %v6931_v3  ;;  %4800 = vmatprep.subr.bf16.mxu1 %v6934_v4  ;;  %v7013_v3 = vld [vmem:[#allocation5 + $0xdd0] ss:$8 sps:$4 sm:$0xff]   ;;  %v7018_v4 = vld [vmem:[#allocation5 + $0x1e4] ss:$8 sps:$4 sm:$0xff]  }
  0x77   :  { %5292 = vmatprep.subr.bf16.mxu0 %v6937_v7  ;;  %v7019_v7 = vld [vmem:[#allocation5 + $0xde0] ss:$8 sps:$4 sm:$0xff]  }
  0x78   :  { %4792 = vmatmul.mubr.bf16.vlgmr.msra.gmra.mrb[0].mxu1 %v103_v10  ;;  %v7022_v10 = vld [vmem:[#allocation5 + $0x1f0] ss:$8 sps:$4 sm:$0xff]  }
  0x79   :  { %5284 = vmatmul.mubr.bf16.vlgmr.msra.gmra.mrb[0].mxu0 %v127_v11  ;;  %4801 = vmatpush1.bf16.msra.mxu1 %v6932_v8  ;;  %v7024_v8 = vld [vmem:[#allocation5 + $0x1f4] ss:$8 sps:$4 sm:$0xff]   ;;  %v7025_v11 = vld [vmem:[#allocation5 + $0xdf0] ss:$8 sps:$4 sm:$0xff]  }
  0x7a   :  { %5293 = vmatpush1.bf16.msra.mxu0 %v6935_v9  ;;  %4802 = vmatprep.subr.bf16.mxu1 %v6940_v12  ;;  %v7027_v9 = vld [vmem:[#allocation5 + $0xdf4] ss:$8 sps:$4 sm:$0xff]   ;;  %v7030_v12 = vld [vmem:[#allocation5 + $0x204] ss:$8 sps:$4 sm:$0xff]  }
  0x7b   :  { %5294 = vmatprep.subr.bf16.mxu0 %v6943_v13  ;;  %4832 = vmatprep.mubr.bf16.mxu1 %v106_v36  ;;  %v57_v13 = vld [vmem:[#allocation2 + $0x10] sm:$0xff]  ;;  %v7054_v36 = vld [vmem:[#allocation5 + $0x244] ss:$8 sps:$4 sm:$0xff]  }
  0x7c   :  { %5324 = vmatprep.mubr.bf16.mxu0 %v130_v41  ;;  %v7063_v41 = vld [vmem:[#allocation5 + $0xe54] ss:$8 sps:$4 sm:$0xff]  }
  0x7d   :  { %4803 = vmatpush1.bf16.msra.mxu1 %v6938_v14  ;;  %v81_v14 = vld [vmem:[#allocation2 + $0xd0] sm:$0xff] }
  0x7e   :  { %5295 = vmatpush1.bf16.msra.mxu0 %v6941_v15  ;;  %4804 = vmatprep.subr.bf16.mxu1 %v6946_v16  ;;  %v7033_v15 = vld [vmem:[#allocation5 + $0xe04] ss:$8 sps:$4 sm:$0xff]   ;;  %v7028_v16 = vld [vmem:[#allocation5 + $0x200] ss:$8 sps:$4 sm:$0xff]  }
  0x7f   :  { %5296 = vmatprep.subr.bf16.mxu0 %v6949_v17  ;;  %v7031_v17 = vld [vmem:[#allocation5 + $0xe00] ss:$8 sps:$4 sm:$0xff]  }
  0x81   :  { %4805 = vmatpush1.bf16.msra.mxu1 %v6944_v18  ;;  %v105_v18 = vpack.c.bf16 %v57_v13, %v57_v13  ;;  %v7117_v13 = vld [vmem:[#allocation5 + $0xee4] ss:$8 sps:$4 sm:$0xff]  }
  0x82   :  { %5297 = vmatpush1.bf16.msra.mxu0 %v6947_v19  ;;  %4806 = vmatprep.subr.bf16.mxu1 %v6952_v20  ;;  %v129_v19 = vpack.c.bf16 %v81_v14, %v81_v14  ;;  %v7036_v20 = vld [vmem:[#allocation5 + $0x214] ss:$8 sps:$4 sm:$0xff]   ;;  %v7112_v14 = vld [vmem:[#allocation5 + $0x2e0] ss:$8 sps:$4 sm:$0xff]  }
  0x83   :  { %5298 = vmatprep.subr.bf16.mxu0 %v6955_v21  ;;  %v7039_v21 = vld [vmem:[#allocation5 + $0xe14] ss:$8 sps:$4 sm:$0xff]  }
  0x85   :  { %4807 = vmatpush1.bf16.msra.mxu1 %v6950_v22  ;;  %v60_v22 = vld [vmem:[#allocation2 + $0x28] sm:$0xff] }
  0x86   :  { %5299 = vmatpush1.bf16.msra.mxu0 %v6953_v23  ;;  %4808 = vmatprep.subr.bf16.mxu1 %v6958_v24  ;;  %v7034_v23 = vld [vmem:[#allocation5 + $0x210] ss:$8 sps:$4 sm:$0xff]   ;;  %v108_v24 = vpack.c.bf16 %v60_v22, %v60_v22  ;;  %v83_v22 = vld [vmem:[#allocation2 + $0xe0] sm:$0xff] }
  0x87   :  { %5300 = vmatprep.subr.bf16.mxu0 %v6961_v25  ;;  %v7037_v25 = vld [vmem:[#allocation5 + $0xe10] ss:$8 sps:$4 sm:$0xff]  }
  0x89   :  { %4809 = vmatpush1.bf16.msra.mxu1 %v6956_v26  ;;  %v84_v26 = vld [vmem:[#allocation2 + $0xe8] sm:$0xff] }
  0x8a   :  { %5301 = vmatpush1.bf16.msra.mxu0 %v6959_v27  ;;  %4810 = vmatprep.subr.bf16.mxu1 %v6964_v28  ;;  %v7042_v27 = vld [vmem:[#allocation5 + $0x224] ss:$8 sps:$4 sm:$0xff]  }
  0x8b   :  { %5302 = vmatprep.subr.bf16.mxu0 %v6967_v29  ;;  %v7045_v28 = vld [vmem:[#allocation5 + $0xe24] ss:$8 sps:$4 sm:$0xff]   ;;  %v132_v29 = vpack.c.bf16 %v84_v26, %v84_v26 }
  0x8d   :  { %4811 = vmatpush1.bf16.msra.mxu1 %v6962_v30  ;;  %v7040_v30 = vld [vmem:[#allocation5 + $0x220] ss:$8 sps:$4 sm:$0xff]  }
  0x8e   :  { %5303 = vmatpush1.bf16.msra.mxu0 %v6965_v31  ;;  %4812 = vmatprep.subr.bf16.mxu1 %v6970_v32  ;;  %v7043_v31 = vld [vmem:[#allocation5 + $0xe20] ss:$8 sps:$4 sm:$0xff]   ;;  %v7048_v32 = vld [vmem:[#allocation5 + $0x234] ss:$8 sps:$4 sm:$0xff]  }
  0x8f   :  { %5304 = vmatprep.subr.bf16.mxu0 %v6973_v33  ;;  %v7051_v33 = vld [vmem:[#allocation5 + $0xe34] ss:$8 sps:$4 sm:$0xff]  }
  0x91   :  { %4813 = vmatpush1.bf16.msra.mxu1 %v6968_v35  ;;  %v7049_v35 = vld [vmem:[#allocation5 + $0xe30] ss:$8 sps:$4 sm:$0xff]  }
  0x92   :  { %5305 = vmatpush1.bf16.msra.mxu0 %v6971_v37  ;;  %4814 = vmatprep.subr.bf16.mxu1 %v6976_v39  ;;  %v7057_v37 = vld [vmem:[#allocation5 + $0xe44] ss:$8 sps:$4 sm:$0xff]   ;;  %v7055_v39 = vld [vmem:[#allocation5 + $0xe40] ss:$8 sps:$4 sm:$0xff]  }
  0x93   :  { %5306 = vmatprep.subr.bf16.mxu0 %v6979_v40  ;;  %v7060_v40 = vld [vmem:[#allocation5 + $0x254] ss:$8 sps:$4 sm:$0xff]  }
  0x95   :  { %4815 = vmatpush1.bf16.msra.mxu1 %v6974_v42  ;;  %v7058_v42 = vld [vmem:[#allocation5 + $0x250] ss:$8 sps:$4 sm:$0xff]  }
  0x96   :  { %5307 = vmatpush1.bf16.msra.mxu0 %v6977_v43  ;;  %4816 = vmatprep.subr.bf16.mxu1 %v6982_v44  ;;  %v7061_v43 = vld [vmem:[#allocation5 + $0xe50] ss:$8 sps:$4 sm:$0xff]   ;;  %v7066_v44 = vld [vmem:[#allocation5 + $0x264] ss:$8 sps:$4 sm:$0xff]  }
  0x97   :  { %5308 = vmatprep.subr.bf16.mxu0 %v6985_v45  ;;  %v7069_v45 = vld [vmem:[#allocation5 + $0xe64] ss:$8 sps:$4 sm:$0xff]  }
  0x99   :  { %4817 = vmatpush1.bf16.msra.mxu1 %v6980_v46  ;;  %v7064_v46 = vld [vmem:[#allocation5 + $0x260] ss:$8 sps:$4 sm:$0xff]  }
  0x9a   :  { %5309 = vmatpush1.bf16.msra.mxu0 %v6983_v47  ;;  %4818 = vmatprep.subr.bf16.mxu1 %v6988_v48  ;;  %v7067_v47 = vld [vmem:[#allocation5 + $0xe60] ss:$8 sps:$4 sm:$0xff]   ;;  %v7072_v48 = vld [vmem:[#allocation5 + $0x274] ss:$8 sps:$4 sm:$0xff]  }
  0x9b   :  { %5310 = vmatprep.subr.bf16.mxu0 %v6991_v49  ;;  %v7075_v49 = vld [vmem:[#allocation5 + $0xe74] ss:$8 sps:$4 sm:$0xff]  }
  0x9d   :  { %4819 = vmatpush1.bf16.msra.mxu1 %v6986_v50  ;;  %v7070_v50 = vld [vmem:[#allocation5 + $0x270] ss:$8 sps:$4 sm:$0xff]  }
  0x9e   :  { %5311 = vmatpush1.bf16.msra.mxu0 %v6989_v51  ;;  %4820 = vmatprep.subr.bf16.mxu1 %v6994_v52  ;;  %v7073_v51 = vld [vmem:[#allocation5 + $0xe70] ss:$8 sps:$4 sm:$0xff]   ;;  %v7078_v52 = vld [vmem:[#allocation5 + $0x284] ss:$8 sps:$4 sm:$0xff]  }
  0x9f   :  { %5312 = vmatprep.subr.bf16.mxu0 %v6997_v53  ;;  %v7081_v53 = vld [vmem:[#allocation5 + $0xe84] ss:$8 sps:$4 sm:$0xff]  }
  0xa1   :  { %4821 = vmatpush1.bf16.msra.mxu1 %v6992_v54  ;;  %v7076_v54 = vld [vmem:[#allocation5 + $0x280] ss:$8 sps:$4 sm:$0xff]  }
  0xa2   :  { %5313 = vmatpush1.bf16.msra.mxu0 %v6995_v55  ;;  %4822 = vmatprep.subr.bf16.mxu1 %v7000_v56  ;;  %v7079_v55 = vld [vmem:[#allocation5 + $0xe80] ss:$8 sps:$4 sm:$0xff]   ;;  %v7084_v56 = vld [vmem:[#allocation5 + $0x294] ss:$8 sps:$4 sm:$0xff]  }
  0xa3   :  { %5314 = vmatprep.subr.bf16.mxu0 %v7003_v57  ;;  %v7087_v57 = vld [vmem:[#allocation5 + $0xe94] ss:$8 sps:$4 sm:$0xff]  }
  0xa5   :  { %4823 = vmatpush1.bf16.msra.mxu1 %v6998_v58  ;;  %v7082_v58 = vld [vmem:[#allocation5 + $0x290] ss:$8 sps:$4 sm:$0xff]  }
  0xa6   :  { %5315 = vmatpush1.bf16.msra.mxu0 %v7001_v59  ;;  %4824 = vmatprep.subr.bf16.mxu1 %v7006_v60  ;;  %v7085_v59 = vld [vmem:[#allocation5 + $0xe90] ss:$8 sps:$4 sm:$0xff]   ;;  %v7090_v60 = vld [vmem:[#allocation5 + $0x2a4] ss:$8 sps:$4 sm:$0xff]  }
  0xa7   :  { %5316 = vmatprep.subr.bf16.mxu0 %v7009_v61  ;;  %v7093_v61 = vld [vmem:[#allocation5 + $0xea4] ss:$8 sps:$4 sm:$0xff]  }
  0xa9   :  { %4825 = vmatpush1.bf16.msra.mxu1 %v7004_v62  ;;  %v7088_v62 = vld [vmem:[#allocation5 + $0x2a0] ss:$8 sps:$4 sm:$0xff]  }
  0xaa   :  { %5317 = vmatpush1.bf16.msra.mxu0 %v7007_v63  ;;  %4826 = vmatprep.subr.bf16.mxu1 %v7012_v0  ;;  %v7091_v63 = vld [vmem:[#allocation5 + $0xea0] ss:$8 sps:$4 sm:$0xff]   ;;  %v7096_v0 = vld [vmem:[#allocation5 + $0x2b4] ss:$8 sps:$4 sm:$0xff]  }
  0xab   :  { %5318 = vmatprep.subr.bf16.mxu0 %v7015_v1  ;;  %v7099_v1 = vld [vmem:[#allocation5 + $0xeb4] ss:$8 sps:$4 sm:$0xff]  }
  0xad   :  { %4827 = vmatpush1.bf16.msra.mxu1 %v7010_v2  ;;  %v7094_v2 = vld [vmem:[#allocation5 + $0x2b0] ss:$8 sps:$4 sm:$0xff]  }
  0xae   :  { %5319 = vmatpush1.bf16.msra.mxu0 %v7013_v3  ;;  %4828 = vmatprep.subr.bf16.mxu1 %v7018_v4  ;;  %v7097_v3 = vld [vmem:[#allocation5 + $0xeb0] ss:$8 sps:$4 sm:$0xff]   ;;  %v7102_v4 = vld [vmem:[#allocation5 + $0x2c4] ss:$8 sps:$4 sm:$0xff]  }
  0xaf   :  { %5320 = vmatprep.subr.bf16.mxu0 %v7021_v5  ;;  %v7105_v5 = vld [vmem:[#allocation5 + $0xec4] ss:$8 sps:$4 sm:$0xff]  }
  0xb1   :  { %4829 = vmatpush1.bf16.msra.mxu1 %v7016_v6  ;;  %v7100_v6 = vld [vmem:[#allocation5 + $0x2c0] ss:$8 sps:$4 sm:$0xff]  }
  0xb2   :  { %5321 = vmatpush1.bf16.msra.mxu0 %v7019_v7  ;;  %4830 = vmatprep.subr.bf16.mxu1 %v7024_v8  ;;  %v7103_v7 = vld [vmem:[#allocation5 + $0xec0] ss:$8 sps:$4 sm:$0xff]   ;;  %v7108_v8 = vld [vmem:[#allocation5 + $0x2d4] ss:$8 sps:$4 sm:$0xff]  }
  0xb3   :  { %5322 = vmatprep.subr.bf16.mxu0 %v7027_v9  ;;  %v7111_v9 = vld [vmem:[#allocation5 + $0xed4] ss:$8 sps:$4 sm:$0xff]  }
  0xb5   :  { %4831 = vmatpush1.bf16.msra.mxu1 %v7022_v10  ;;  %v7106_v10 = vld [vmem:[#allocation5 + $0x2d0] ss:$8 sps:$4 sm:$0xff]  }
  0xb6   :  { %5323 = vmatpush1.bf16.msra.mxu0 %v7025_v11  ;;  %4841 = vmatprep.subr.bf16.mxu1 %v7030_v12  ;;  %v7109_v11 = vld [vmem:[#allocation5 + $0xed0] ss:$8 sps:$4 sm:$0xff]   ;;  %v7114_v12 = vld [vmem:[#allocation5 + $0x2e4] ss:$8 sps:$4 sm:$0xff]  }
  0xb7   :  { %5333 = vmatprep.subr.bf16.mxu0 %v7033_v15  ;;  %v7115_v15 = vld [vmem:[#allocation5 + $0xee0] ss:$8 sps:$4 sm:$0xff]  }
  0xb8   :  { %4833 = vmatmul.mubr.bf16.vlgmr.msra.gmra.mrb[0].mxu1 %v105_v18  ;;  %v7118_v18 = vld [vmem:[#allocation5 + $0x2f0] ss:$8 sps:$4 sm:$0xff]  }
  0xb9   :  { %5325 = vmatmul.mubr.bf16.vlgmr.msra.gmra.mrb[0].mxu0 %v129_v19  ;;  %4842 = vmatpush1.bf16.msra.mxu1 %v7028_v16  ;;  %v7120_v16 = vld [vmem:[#allocation5 + $0x2f4] ss:$8 sps:$4 sm:$0xff]   ;;  %v7121_v19 = vld [vmem:[#allocation5 + $0xef0] ss:$8 sps:$4 sm:$0xff]  }
  0xba   :  { %5334 = vmatpush1.bf16.msra.mxu0 %v7031_v17  ;;  %4843 = vmatprep.subr.bf16.mxu1 %v7036_v20  ;;  %v7123_v17 = vld [vmem:[#allocation5 + $0xef4] ss:$8 sps:$4 sm:$0xff]   ;;  %v7126_v20 = vld [vmem:[#allocation5 + $0x304] ss:$8 sps:$4 sm:$0xff]  }
  0xbb   :  { %5335 = vmatprep.subr.bf16.mxu0 %v7039_v21  ;;  %4873 = vmatprep.mubr.bf16.mxu1 %v108_v24  ;;  %v59_v21 = vld [vmem:[#allocation2 + $0x20] sm:$0xff] }
  0xbc   :  { %5365 = vmatprep.mubr.bf16.mxu0 %v132_v29  ;;  %v7124_v24 = vld [vmem:[#allocation5 + $0x300] ss:$8 sps:$4 sm:$0xff]   ;;  %v107_v26 = vpack.c.bf16 %v59_v21, %v59_v21  ;;  %v86_v29 = vld [vmem:[#allocation2 + $0xf8] sm:$0xff]  ;;  %v7213_v21 = vld [vmem:[#allocation5 + $0xfe4] ss:$8 sps:$4 sm:$0xff]  }
  0xbd   :  { %4844 = vmatpush1.bf16.msra.mxu1 %v7034_v23  ;;  %v7129_v23 = vld [vmem:[#allocation5 + $0xf04] ss:$8 sps:$4 sm:$0xff]  }
  0xbe   :  { %5336 = vmatpush1.bf16.msra.mxu0 %v7037_v25  ;;  %4845 = vmatprep.subr.bf16.mxu1 %v7042_v27  ;;  %v7127_v25 = vld [vmem:[#allocation5 + $0xf00] ss:$8 sps:$4 sm:$0xff]   ;;  %v131_v27 = vpack.c.bf16 %v83_v22, %v83_v22 }
  0xbf   :  { %5337 = vmatprep.subr.bf16.mxu0 %v7045_v28  ;;  %v62_v28 = vld [vmem:[#allocation2 + $0x38] sm:$0xff]  ;;  %v7208_v22 = vld [vmem:[#allocation5 + $0x3e0] ss:$8 sps:$4 sm:$0xff]  }
  0xc1   :  { %4846 = vmatpush1.bf16.msra.mxu1 %v7040_v30  ;;  %v7132_v30 = vld [vmem:[#allocation5 + $0x314] ss:$8 sps:$4 sm:$0xff]  }
  0xc2   :  { %5338 = vmatpush1.bf16.msra.mxu0 %v7043_v31  ;;  %4847 = vmatprep.subr.bf16.mxu1 %v7048_v32  ;;  %v7135_v31 = vld [vmem:[#allocation5 + $0xf14] ss:$8 sps:$4 sm:$0xff]   ;;  %v110_v32 = vpack.c.bf16 %v62_v28, %v62_v28  ;;  %v7222_v28 = vld [vmem:[#allocation5 + $0x404] ss:$8 sps:$4 sm:$0xff]  }
  0xc3   :  { %5339 = vmatprep.subr.bf16.mxu0 %v7051_v33  ;;  %v134_v33 = vpack.c.bf16 %v86_v29, %v86_v29  ;;  %v61_v29 = vld [vmem:[#allocation2 + $0x30] sm:$0xff] }
  0xc5   :  { %4848 = vmatpush1.bf16.msra.mxu1 %v7046_v34  ;;  %v7130_v34 = vld [vmem:[#allocation5 + $0x310] ss:$8 sps:$4 sm:$0xff]  }
  0xc6   :  { %5340 = vmatpush1.bf16.msra.mxu0 %v7049_v35  ;;  %4849 = vmatprep.subr.bf16.mxu1 %v7054_v36  ;;  %v7133_v35 = vld [vmem:[#allocation5 + $0xf10] ss:$8 sps:$4 sm:$0xff]   ;;  %v7138_v36 = vld [vmem:[#allocation5 + $0x324] ss:$8 sps:$4 sm:$0xff]  }
  0xc7   :  { %5341 = vmatprep.subr.bf16.mxu0 %v7057_v37  ;;  %v7141_v37 = vld [vmem:[#allocation5 + $0xf24] ss:$8 sps:$4 sm:$0xff]  }
  0xc9   :  { %4850 = vmatpush1.bf16.msra.mxu1 %v7052_v38  ;;  %v7136_v38 = vld [vmem:[#allocation5 + $0x320] ss:$8 sps:$4 sm:$0xff]  }
  0xca   :  { %5342 = vmatpush1.bf16.msra.mxu0 %v7055_v39  ;;  %4851 = vmatprep.subr.bf16.mxu1 %v7060_v40  ;;  %v7139_v39 = vld [vmem:[#allocation5 + $0xf20] ss:$8 sps:$4 sm:$0xff]   ;;  %v7144_v40 = vld [vmem:[#allocation5 + $0x334] ss:$8 sps:$4 sm:$0xff]  }
  0xcb   :  { %5343 = vmatprep.subr.bf16.mxu0 %v7063_v41  ;;  %v7147_v41 = vld [vmem:[#allocation5 + $0xf34] ss:$8 sps:$4 sm:$0xff]  }
  0xcd   :  { %4852 = vmatpush1.bf16.msra.mxu1 %v7058_v42  ;;  %v7142_v42 = vld [vmem:[#allocation5 + $0x330] ss:$8 sps:$4 sm:$0xff]  }
  0xce   :  { %5344 = vmatpush1.bf16.msra.mxu0 %v7061_v43  ;;  %4853 = vmatprep.subr.bf16.mxu1 %v7066_v44  ;;  %v7145_v43 = vld [vmem:[#allocation5 + $0xf30] ss:$8 sps:$4 sm:$0xff]   ;;  %v7150_v44 = vld [vmem:[#allocation5 + $0x344] ss:$8 sps:$4 sm:$0xff]  }
  0xcf   :  { %5345 = vmatprep.subr.bf16.mxu0 %v7069_v45  ;;  %v7153_v45 = vld [vmem:[#allocation5 + $0xf44] ss:$8 sps:$4 sm:$0xff]  }
  0xd1   :  { %4854 = vmatpush1.bf16.msra.mxu1 %v7064_v46  ;;  %v7148_v46 = vld [vmem:[#allocation5 + $0x340] ss:$8 sps:$4 sm:$0xff]  }
  0xd2   :  { %5346 = vmatpush1.bf16.msra.mxu0 %v7067_v47  ;;  %4855 = vmatprep.subr.bf16.mxu1 %v7072_v48  ;;  %v7151_v47 = vld [vmem:[#allocation5 + $0xf40] ss:$8 sps:$4 sm:$0xff]   ;;  %v7156_v48 = vld [vmem:[#allocation5 + $0x354] ss:$8 sps:$4 sm:$0xff]  }
  0xd3   :  { %5347 = vmatprep.subr.bf16.mxu0 %v7075_v49  ;;  %v7159_v49 = vld [vmem:[#allocation5 + $0xf54] ss:$8 sps:$4 sm:$0xff]  }
  0xd5   :  { %4856 = vmatpush1.bf16.msra.mxu1 %v7070_v50  ;;  %v7154_v50 = vld [vmem:[#allocation5 + $0x350] ss:$8 sps:$4 sm:$0xff]  }
  0xd6   :  { %5348 = vmatpush1.bf16.msra.mxu0 %v7073_v51  ;;  %4857 = vmatprep.subr.bf16.mxu1 %v7078_v52  ;;  %v7157_v51 = vld [vmem:[#allocation5 + $0xf50] ss:$8 sps:$4 sm:$0xff]   ;;  %v7162_v52 = vld [vmem:[#allocation5 + $0x364] ss:$8 sps:$4 sm:$0xff]  }
  0xd7   :  { %5349 = vmatprep.subr.bf16.mxu0 %v7081_v53  ;;  %v7165_v53 = vld [vmem:[#allocation5 + $0xf64] ss:$8 sps:$4 sm:$0xff]  }
  0xd9   :  { %4858 = vmatpush1.bf16.msra.mxu1 %v7076_v54  ;;  %v7160_v54 = vld [vmem:[#allocation5 + $0x360] ss:$8 sps:$4 sm:$0xff]  }
  0xda   :  { %5350 = vmatpush1.bf16.msra.mxu0 %v7079_v55  ;;  %4859 = vmatprep.subr.bf16.mxu1 %v7084_v56  ;;  %v7163_v55 = vld [vmem:[#allocation5 + $0xf60] ss:$8 sps:$4 sm:$0xff]   ;;  %v7168_v56 = vld [vmem:[#allocation5 + $0x374] ss:$8 sps:$4 sm:$0xff]  }
  0xdb   :  { %5351 = vmatprep.subr.bf16.mxu0 %v7087_v57  ;;  %v7171_v57 = vld [vmem:[#allocation5 + $0xf74] ss:$8 sps:$4 sm:$0xff]  }
  0xdd   :  { %4860 = vmatpush1.bf16.msra.mxu1 %v7082_v58  ;;  %v7166_v58 = vld [vmem:[#allocation5 + $0x370] ss:$8 sps:$4 sm:$0xff]  }
  0xde   :  { %5352 = vmatpush1.bf16.msra.mxu0 %v7085_v59  ;;  %4861 = vmatprep.subr.bf16.mxu1 %v7090_v60  ;;  %v7169_v59 = vld [vmem:[#allocation5 + $0xf70] ss:$8 sps:$4 sm:$0xff]   ;;  %v7174_v60 = vld [vmem:[#allocation5 + $0x384] ss:$8 sps:$4 sm:$0xff]  }
  0xdf   :  { %5353 = vmatprep.subr.bf16.mxu0 %v7093_v61  ;;  %v7177_v61 = vld [vmem:[#allocation5 + $0xf84] ss:$8 sps:$4 sm:$0xff]  }
  0xe1   :  { %4862 = vmatpush1.bf16.msra.mxu1 %v7088_v62  ;;  %v7172_v62 = vld [vmem:[#allocation5 + $0x380] ss:$8 sps:$4 sm:$0xff]  }
  0xe2   :  { %5354 = vmatpush1.bf16.msra.mxu0 %v7091_v63  ;;  %4863 = vmatprep.subr.bf16.mxu1 %v7096_v0  ;;  %v7175_v63 = vld [vmem:[#allocation5 + $0xf80] ss:$8 sps:$4 sm:$0xff]   ;;  %v7180_v0 = vld [vmem:[#allocation5 + $0x394] ss:$8 sps:$4 sm:$0xff]  }
  0xe3   :  { %5355 = vmatprep.subr.bf16.mxu0 %v7099_v1  ;;  %v7183_v1 = vld [vmem:[#allocation5 + $0xf94] ss:$8 sps:$4 sm:$0xff]  }
  0xe5   :  { %4864 = vmatpush1.bf16.msra.mxu1 %v7094_v2  ;;  %v7178_v2 = vld [vmem:[#allocation5 + $0x390] ss:$8 sps:$4 sm:$0xff]  }
  0xe6   :  { %5356 = vmatpush1.bf16.msra.mxu0 %v7097_v3  ;;  %4865 = vmatprep.subr.bf16.mxu1 %v7102_v4  ;;  %v7181_v3 = vld [vmem:[#allocation5 + $0xf90] ss:$8 sps:$4 sm:$0xff]   ;;  %v7186_v4 = vld [vmem:[#allocation5 + $0x3a4] ss:$8 sps:$4 sm:$0xff]  }
  0xe7   :  { %5357 = vmatprep.subr.bf16.mxu0 %v7105_v5  ;;  %v7189_v5 = vld [vmem:[#allocation5 + $0xfa4] ss:$8 sps:$4 sm:$0xff]  }
  0xe9   :  { %4866 = vmatpush1.bf16.msra.mxu1 %v7100_v6  ;;  %v7184_v6 = vld [vmem:[#allocation5 + $0x3a0] ss:$8 sps:$4 sm:$0xff]  }
  0xea   :  { %5358 = vmatpush1.bf16.msra.mxu0 %v7103_v7  ;;  %4867 = vmatprep.subr.bf16.mxu1 %v7108_v8  ;;  %v7187_v7 = vld [vmem:[#allocation5 + $0xfa0] ss:$8 sps:$4 sm:$0xff]   ;;  %v7192_v8 = vld [vmem:[#allocation5 + $0x3b4] ss:$8 sps:$4 sm:$0xff]  }
  0xeb   :  { %5359 = vmatprep.subr.bf16.mxu0 %v7111_v9  ;;  %v7195_v9 = vld [vmem:[#allocation5 + $0xfb4] ss:$8 sps:$4 sm:$0xff]  }
  0xed   :  { %4868 = vmatpush1.bf16.msra.mxu1 %v7106_v10  ;;  %v7190_v10 = vld [vmem:[#allocation5 + $0x3b0] ss:$8 sps:$4 sm:$0xff]  }
  0xee   :  { %5360 = vmatpush1.bf16.msra.mxu0 %v7109_v11  ;;  %4869 = vmatprep.subr.bf16.mxu1 %v7114_v12  ;;  %v7193_v11 = vld [vmem:[#allocation5 + $0xfb0] ss:$8 sps:$4 sm:$0xff]   ;;  %v7198_v12 = vld [vmem:[#allocation5 + $0x3c4] ss:$8 sps:$4 sm:$0xff]  }
  0xef   :  { %5361 = vmatprep.subr.bf16.mxu0 %v7117_v13  ;;  %v7201_v13 = vld [vmem:[#allocation5 + $0xfc4] ss:$8 sps:$4 sm:$0xff]  }
  0xf1   :  { %4870 = vmatpush1.bf16.msra.mxu1 %v7112_v14  ;;  %v7196_v14 = vld [vmem:[#allocation5 + $0x3c0] ss:$8 sps:$4 sm:$0xff]  }
  0xf2   :  { %5362 = vmatpush1.bf16.msra.mxu0 %v7115_v15  ;;  %4871 = vmatprep.subr.bf16.mxu1 %v7120_v16  ;;  %v7199_v15 = vld [vmem:[#allocation5 + $0xfc0] ss:$8 sps:$4 sm:$0xff]   ;;  %v7204_v16 = vld [vmem:[#allocation5 + $0x3d4] ss:$8 sps:$4 sm:$0xff]  }
  0xf3   :  { %5363 = vmatprep.subr.bf16.mxu0 %v7123_v17  ;;  %v7207_v17 = vld [vmem:[#allocation5 + $0xfd4] ss:$8 sps:$4 sm:$0xff]  }
  0xf5   :  { %4872 = vmatpush1.bf16.msra.mxu1 %v7118_v18  ;;  %v7202_v18 = vld [vmem:[#allocation5 + $0x3d0] ss:$8 sps:$4 sm:$0xff]  }
  0xf6   :  { %5364 = vmatpush1.bf16.msra.mxu0 %v7121_v19  ;;  %4882 = vmatprep.subr.bf16.mxu1 %v7126_v20  ;;  %v7205_v19 = vld [vmem:[#allocation5 + $0xfd0] ss:$8 sps:$4 sm:$0xff]   ;;  %v7210_v20 = vld [vmem:[#allocation5 + $0x3e4] ss:$8 sps:$4 sm:$0xff]  }
  0xf7   :  { %5374 = vmatprep.subr.bf16.mxu0 %v7129_v23  ;;  %v7211_v23 = vld [vmem:[#allocation5 + $0xfe0] ss:$8 sps:$4 sm:$0xff]  }
  0xf8   :  { %4874 = vmatmul.mubr.bf16.vlgmr.msra.gmra.mrb[0].mxu1 %v107_v26  ;;  %v7214_v26 = vld [vmem:[#allocation5 + $0x3f0] ss:$8 sps:$4 sm:$0xff]  }
  0xf9   :  { %5366 = vmatmul.mubr.bf16.vlgmr.msra.gmra.mrb[0].mxu0 %v131_v27  ;;  %4883 = vmatpush1.bf16.msra.mxu1 %v7124_v24  ;;  %v7216_v24 = vld [vmem:[#allocation5 + $0x3f4] ss:$8 sps:$4 sm:$0xff]   ;;  %v7217_v27 = vld [vmem:[#allocation5 + $0xff0] ss:$8 sps:$4 sm:$0xff]  }
  0xfa   :  { %5375 = vmatpush1.bf16.msra.mxu0 %v7127_v25  ;;  %4884 = vmatprep.subr.bf16.mxu1 %v7132_v30  ;;  %v7219_v25 = vld [vmem:[#allocation5 + $0xff4] ss:$8 sps:$4 sm:$0xff]  }
  0xfb   :  { %5376 = vmatprep.subr.bf16.mxu0 %v7135_v31  ;;  %4914 = vmatprep.mubr.bf16.mxu1 %v110_v32  ;;  %v85_v30 = vld [vmem:[#allocation2 + $0xf0] sm:$0xff]  ;;  %v7225_v31 = vld [vmem:[#allocation5 + $0x1004] ss:$8 sps:$4 sm:$0xff]   ;;  %v7220_v32 = vld [vmem:[#allocation5 + $0x400] ss:$8 sps:$4 sm:$0xff]  }
  0xfc   :  { %5406 = vmatprep.mubr.bf16.mxu0 %v134_v33  ;;  %v7223_v33 = vld [vmem:[#allocation5 + $0x1000] ss:$8 sps:$4 sm:$0xff]  }
  0xfd   :  { %4885 = vmatpush1.bf16.msra.mxu1 %v7130_v34  ;;  %v109_v34 = vpack.c.bf16 %v61_v29, %v61_v29  ;;  %v7309_v29 = vld [vmem:[#allocation5 + $0x10e4] ss:$8 sps:$4 sm:$0xff]  }
  0xfe   :  { %5377 = vmatpush1.bf16.msra.mxu0 %v7133_v35  ;;  %4886 = vmatprep.subr.bf16.mxu1 %v7138_v36  ;;  %v133_v35 = vpack.c.bf16 %v85_v30, %v85_v30  ;;  %v64_v36 = vld [vmem:[#allocation2 + $0x48] sm:$0xff] }
  0xff   :  { %5378 = vmatprep.subr.bf16.mxu0 %v7141_v37  ;;  %v88_v37 = vld [vmem:[#allocation2 + $0x108] sm:$0xff] }
 0x100   :  { %v7304_v30 = vld [vmem:[#allocation5 + $0x4e0] ss:$8 sps:$4 sm:$0xff]  }
 0x101   :  { %4887 = vmatpush1.bf16.msra.mxu1 %v7136_v38  ;;  %v7228_v38 = vld [vmem:[#allocation5 + $0x414] ss:$8 sps:$4 sm:$0xff]  }
 0x102   :  { %5379 = vmatpush1.bf16.msra.mxu0 %v7139_v39  ;;  %4888 = vmatprep.subr.bf16.mxu1 %v7144_v40  ;;  %v7231_v39 = vld [vmem:[#allocation5 + $0x1014] ss:$8 sps:$4 sm:$0xff]   ;;  %v112_v40 = vpack.c.bf16 %v64_v36, %v64_v36  ;;  %v7318_v36 = vld [vmem:[#allocation5 + $0x504] ss:$8 sps:$4 sm:$0xff]  }
 0x103   :  { %5380 = vmatprep.subr.bf16.mxu0 %v7147_v41  ;;  %v136_v41 = vpack.c.bf16 %v88_v37, %v88_v37  ;;  %v7321_v37 = vld [vmem:[#allocation5 + $0x1104] ss:$8 sps:$4 sm:$0xff]  }
 0x105   :  { %4889 = vmatpush1.bf16.msra.mxu1 %v7142_v42  ;;  %v7226_v42 = vld [vmem:[#allocation5 + $0x410] ss:$8 sps:$4 sm:$0xff]  }
 0x106   :  { %5381 = vmatpush1.bf16.msra.mxu0 %v7145_v43  ;;  %4890 = vmatprep.subr.bf16.mxu1 %v7150_v44  ;;  %v7229_v43 = vld [vmem:[#allocation5 + $0x1010] ss:$8 sps:$4 sm:$0xff]   ;;  %v7234_v44 = vld [vmem:[#allocation5 + $0x424] ss:$8 sps:$4 sm:$0xff]  }
 0x107   :  { %5382 = vmatprep.subr.bf16.mxu0 %v7153_v45  ;;  %v7237_v45 = vld [vmem:[#allocation5 + $0x1024] ss:$8 sps:$4 sm:$0xff]  }
 0x109   :  { %4891 = vmatpush1.bf16.msra.mxu1 %v7148_v46  ;;  %v7232_v46 = vld [vmem:[#allocation5 + $0x420] ss:$8 sps:$4 sm:$0xff]  }
 0x10a   :  { %5383 = vmatpush1.bf16.msra.mxu0 %v7151_v47  ;;  %4892 = vmatprep.subr.bf16.mxu1 %v7156_v48  ;;  %v7235_v47 = vld [vmem:[#allocation5 + $0x1020] ss:$8 sps:$4 sm:$0xff]   ;;  %v7240_v48 = vld [vmem:[#allocation5 + $0x434] ss:$8 sps:$4 sm:$0xff]  }
 0x10b   :  { %5384 = vmatprep.subr.bf16.mxu0 %v7159_v49  ;;  %v7243_v49 = vld [vmem:[#allocation5 + $0x1034] ss:$8 sps:$4 sm:$0xff]  }
 0x10d   :  { %4893 = vmatpush1.bf16.msra.mxu1 %v7154_v50  ;;  %v7238_v50 = vld [vmem:[#allocation5 + $0x430] ss:$8 sps:$4 sm:$0xff]  }
 0x10e   :  { %5385 = vmatpush1.bf16.msra.mxu0 %v7157_v51  ;;  %4894 = vmatprep.subr.bf16.mxu1 %v7162_v52  ;;  %v7241_v51 = vld [vmem:[#allocation5 + $0x1030] ss:$8 sps:$4 sm:$0xff]   ;;  %v7246_v52 = vld [vmem:[#allocation5 + $0x444] ss:$8 sps:$4 sm:$0xff]  }
 0x10f   :  { %5386 = vmatprep.subr.bf16.mxu0 %v7165_v53  ;;  %v7249_v53 = vld [vmem:[#allocation5 + $0x1044] ss:$8 sps:$4 sm:$0xff]  }
 0x111   :  { %4895 = vmatpush1.bf16.msra.mxu1 %v7160_v54  ;;  %v7244_v54 = vld [vmem:[#allocation5 + $0x440] ss:$8 sps:$4 sm:$0xff]  }
 0x112   :  { %5387 = vmatpush1.bf16.msra.mxu0 %v7163_v55  ;;  %4896 = vmatprep.subr.bf16.mxu1 %v7168_v56  ;;  %v7247_v55 = vld [vmem:[#allocation5 + $0x1040] ss:$8 sps:$4 sm:$0xff]   ;;  %v7252_v56 = vld [vmem:[#allocation5 + $0x454] ss:$8 sps:$4 sm:$0xff]  }
 0x113   :  { %5388 = vmatprep.subr.bf16.mxu0 %v7171_v57  ;;  %v7255_v57 = vld [vmem:[#allocation5 + $0x1054] ss:$8 sps:$4 sm:$0xff]  }
 0x115   :  { %4897 = vmatpush1.bf16.msra.mxu1 %v7166_v58  ;;  %v7250_v58 = vld [vmem:[#allocation5 + $0x450] ss:$8 sps:$4 sm:$0xff]  }
 0x116   :  { %5389 = vmatpush1.bf16.msra.mxu0 %v7169_v59  ;;  %4898 = vmatprep.subr.bf16.mxu1 %v7174_v60  ;;  %v7253_v59 = vld [vmem:[#allocation5 + $0x1050] ss:$8 sps:$4 sm:$0xff]   ;;  %v7258_v60 = vld [vmem:[#allocation5 + $0x464] ss:$8 sps:$4 sm:$0xff]  }
 0x117   :  { %5390 = vmatprep.subr.bf16.mxu0 %v7177_v61  ;;  %v7261_v61 = vld [vmem:[#allocation5 + $0x1064] ss:$8 sps:$4 sm:$0xff]  }
 0x119   :  { %4899 = vmatpush1.bf16.msra.mxu1 %v7172_v62  ;;  %v7256_v62 = vld [vmem:[#allocation5 + $0x460] ss:$8 sps:$4 sm:$0xff]  }
 0x11a   :  { %5391 = vmatpush1.bf16.msra.mxu0 %v7175_v63  ;;  %4900 = vmatprep.subr.bf16.mxu1 %v7180_v0  ;;  %v7259_v63 = vld [vmem:[#allocation5 + $0x1060] ss:$8 sps:$4 sm:$0xff]   ;;  %v7264_v0 = vld [vmem:[#allocation5 + $0x474] ss:$8 sps:$4 sm:$0xff]  }
 0x11b   :  { %5392 = vmatprep.subr.bf16.mxu0 %v7183_v1  ;;  %v7267_v1 = vld [vmem:[#allocation5 + $0x1074] ss:$8 sps:$4 sm:$0xff]  }
 0x11d   :  { %4901 = vmatpush1.bf16.msra.mxu1 %v7178_v2  ;;  %v7262_v2 = vld [vmem:[#allocation5 + $0x470] ss:$8 sps:$4 sm:$0xff]  }
 0x11e   :  { %5393 = vmatpush1.bf16.msra.mxu0 %v7181_v3  ;;  %4902 = vmatprep.subr.bf16.mxu1 %v7186_v4  ;;  %v7265_v3 = vld [vmem:[#allocation5 + $0x1070] ss:$8 sps:$4 sm:$0xff]   ;;  %v7270_v4 = vld [vmem:[#allocation5 + $0x484] ss:$8 sps:$4 sm:$0xff]  }
 0x11f   :  { %5394 = vmatprep.subr.bf16.mxu0 %v7189_v5  ;;  %v7273_v5 = vld [vmem:[#allocation5 + $0x1084] ss:$8 sps:$4 sm:$0xff]  }
 0x121   :  { %4903 = vmatpush1.bf16.msra.mxu1 %v7184_v6  ;;  %v7268_v6 = vld [vmem:[#allocation5 + $0x480] ss:$8 sps:$4 sm:$0xff]  }
 0x122   :  { %5395 = vmatpush1.bf16.msra.mxu0 %v7187_v7  ;;  %4904 = vmatprep.subr.bf16.mxu1 %v7192_v8  ;;  %v7271_v7 = vld [vmem:[#allocation5 + $0x1080] ss:$8 sps:$4 sm:$0xff]   ;;  %v7276_v8 = vld [vmem:[#allocation5 + $0x494] ss:$8 sps:$4 sm:$0xff]  }
 0x123   :  { %5396 = vmatprep.subr.bf16.mxu0 %v7195_v9  ;;  %v7279_v9 = vld [vmem:[#allocation5 + $0x1094] ss:$8 sps:$4 sm:$0xff]  }
 0x125   :  { %4905 = vmatpush1.bf16.msra.mxu1 %v7190_v10  ;;  %v7274_v10 = vld [vmem:[#allocation5 + $0x490] ss:$8 sps:$4 sm:$0xff]  }
 0x126   :  { %5397 = vmatpush1.bf16.msra.mxu0 %v7193_v11  ;;  %4906 = vmatprep.subr.bf16.mxu1 %v7198_v12  ;;  %v7277_v11 = vld [vmem:[#allocation5 + $0x1090] ss:$8 sps:$4 sm:$0xff]   ;;  %v7282_v12 = vld [vmem:[#allocation5 + $0x4a4] ss:$8 sps:$4 sm:$0xff]  }
 0x127   :  { %5398 = vmatprep.subr.bf16.mxu0 %v7201_v13  ;;  %v7285_v13 = vld [vmem:[#allocation5 + $0x10a4] ss:$8 sps:$4 sm:$0xff]  }
 0x129   :  { %4907 = vmatpush1.bf16.msra.mxu1 %v7196_v14  ;;  %v7280_v14 = vld [vmem:[#allocation5 + $0x4a0] ss:$8 sps:$4 sm:$0xff]  }
 0x12a   :  { %5399 = vmatpush1.bf16.msra.mxu0 %v7199_v15  ;;  %4908 = vmatprep.subr.bf16.mxu1 %v7204_v16  ;;  %v7283_v15 = vld [vmem:[#allocation5 + $0x10a0] ss:$8 sps:$4 sm:$0xff]   ;;  %v7288_v16 = vld [vmem:[#allocation5 + $0x4b4] ss:$8 sps:$4 sm:$0xff]  }
 0x12b   :  { %5400 = vmatprep.subr.bf16.mxu0 %v7207_v17  ;;  %v7291_v17 = vld [vmem:[#allocation5 + $0x10b4] ss:$8 sps:$4 sm:$0xff]  }
 0x12d   :  { %4909 = vmatpush1.bf16.msra.mxu1 %v7202_v18  ;;  %v7286_v18 = vld [vmem:[#allocation5 + $0x4b0] ss:$8 sps:$4 sm:$0xff]  }
 0x12e   :  { %5401 = vmatpush1.bf16.msra.mxu0 %v7205_v19  ;;  %4910 = vmatprep.subr.bf16.mxu1 %v7210_v20  ;;  %v7289_v19 = vld [vmem:[#allocation5 + $0x10b0] ss:$8 sps:$4 sm:$0xff]   ;;  %v7294_v20 = vld [vmem:[#allocation5 + $0x4c4] ss:$8 sps:$4 sm:$0xff]  }
 0x12f   :  { %5402 = vmatprep.subr.bf16.mxu0 %v7213_v21  ;;  %v7297_v21 = vld [vmem:[#allocation5 + $0x10c4] ss:$8 sps:$4 sm:$0xff]  }
 0x131   :  { %4911 = vmatpush1.bf16.msra.mxu1 %v7208_v22  ;;  %v7292_v22 = vld [vmem:[#allocation5 + $0x4c0] ss:$8 sps:$4 sm:$0xff]  }
 0x132   :  { %5403 = vmatpush1.bf16.msra.mxu0 %v7211_v23  ;;  %4912 = vmatprep.subr.bf16.mxu1 %v7216_v24  ;;  %v7295_v23 = vld [vmem:[#allocation5 + $0x10c0] ss:$8 sps:$4 sm:$0xff]   ;;  %v7300_v24 = vld [vmem:[#allocation5 + $0x4d4] ss:$8 sps:$4 sm:$0xff]  }
 0x133   :  { %5404 = vmatprep.subr.bf16.mxu0 %v7219_v25  ;;  %v7303_v25 = vld [vmem:[#allocation5 + $0x10d4] ss:$8 sps:$4 sm:$0xff]  }
 0x135   :  { %4913 = vmatpush1.bf16.msra.mxu1 %v7214_v26  ;;  %v7298_v26 = vld [vmem:[#allocation5 + $0x4d0] ss:$8 sps:$4 sm:$0xff]  }
 0x136   :  { %5405 = vmatpush1.bf16.msra.mxu0 %v7217_v27  ;;  %4923 = vmatprep.subr.bf16.mxu1 %v7222_v28  ;;  %v7301_v27 = vld [vmem:[#allocation5 + $0x10d0] ss:$8 sps:$4 sm:$0xff]   ;;  %v7306_v28 = vld [vmem:[#allocation5 + $0x4e4] ss:$8 sps:$4 sm:$0xff]  }
 0x137   :  { %5415 = vmatprep.subr.bf16.mxu0 %v7225_v31  ;;  %v7307_v31 = vld [vmem:[#allocation5 + $0x10e0] ss:$8 sps:$4 sm:$0xff]  }
 0x138   :  { %4915 = vmatmul.mubr.bf16.vlgmr.msra.gmra.mrb[0].mxu1 %v109_v34  ;;  %v7310_v34 = vld [vmem:[#allocation5 + $0x4f0] ss:$8 sps:$4 sm:$0xff]  }
 0x139   :  { %5407 = vmatmul.mubr.bf16.vlgmr.msra.gmra.mrb[0].mxu0 %v133_v35  ;;  %4924 = vmatpush1.bf16.msra.mxu1 %v7220_v32  ;;  %v7312_v32 = vld [vmem:[#allocation5 + $0x4f4] ss:$8 sps:$4 sm:$0xff]   ;;  %v7313_v35 = vld [vmem:[#allocation5 + $0x10f0] ss:$8 sps:$4 sm:$0xff]  }
 0x13a   :  { %5416 = vmatpush1.bf16.msra.mxu0 %v7223_v33  ;;  %4925 = vmatprep.subr.bf16.mxu1 %v7228_v38  ;;  %v7315_v33 = vld [vmem:[#allocation5 + $0x10f4] ss:$8 sps:$4 sm:$0xff]   ;;  %v63_v38 = vld [vmem:[#allocation2 + $0x40] sm:$0xff] }
 0x13b   :  { %5417 = vmatprep.subr.bf16.mxu0 %v7231_v39  ;;  %4955 = vmatprep.mubr.bf16.mxu1 %v112_v40  ;;  %v87_v39 = vld [vmem:[#allocation2 + $0x100] sm:$0xff]  ;;  %v66_v40 = vld [vmem:[#allocation2 + $0x58] sm:$0xff] }
 0x13c   :  { %5447 = vmatprep.mubr.bf16.mxu0 %v136_v41  ;;  %v90_v41 = vld [vmem:[#allocation2 + $0x118] sm:$0xff] }
 0x13d   :  { %4926 = vmatpush1.bf16.msra.mxu1 %v7226_v42  ;;  %v111_v42 = vpack.c.bf16 %v63_v38, %v63_v38  ;;  %v7400_v38 = vld [vmem:[#allocation5 + $0x5e0] ss:$8 sps:$4 sm:$0xff]  }
 0x13e   :  { %5418 = vmatpush1.bf16.msra.mxu0 %v7229_v43  ;;  %4927 = vmatprep.subr.bf16.mxu1 %v7234_v44  ;;  %v135_v43 = vpack.c.bf16 %v87_v39, %v87_v39  ;;  %v7316_v44 = vld [vmem:[#allocation5 + $0x500] ss:$8 sps:$4 sm:$0xff]  }
 0x13f   :  { %5419 = vmatprep.subr.bf16.mxu0 %v7237_v45  ;;  %v7319_v45 = vld [vmem:[#allocation5 + $0x1100] ss:$8 sps:$4 sm:$0xff]  }
 0x140   :  { %v7403_v39 = vld [vmem:[#allocation5 + $0x11e0] ss:$8 sps:$4 sm:$0xff]  }
 0x141   :  { %4928 = vmatpush1.bf16.msra.mxu1 %v7232_v46  ;;  %v7324_v46 = vld [vmem:[#allocation5 + $0x514] ss:$8 sps:$4 sm:$0xff]  }
 0x142   :  { %5420 = vmatpush1.bf16.msra.mxu0 %v7235_v47  ;;  %4929 = vmatprep.subr.bf16.mxu1 %v7240_v48  ;;  %v7327_v47 = vld [vmem:[#allocation5 + $0x1114] ss:$8 sps:$4 sm:$0xff]   ;;  %v114_v48 = vpack.c.bf16 %v66_v40, %v66_v40 }
 0x143   :  { %5421 = vmatprep.subr.bf16.mxu0 %v7243_v49  ;;  %v138_v49 = vpack.c.bf16 %v90_v41, %v90_v41  ;;  %v7408_v40 = vld [vmem:[#allocation5 + $0x5f4] ss:$8 sps:$4 sm:$0xff]  }
 0x144   :  { %v7411_v41 = vld [vmem:[#allocation5 + $0x11f4] ss:$8 sps:$4 sm:$0xff]  }
 0x145   :  { %4930 = vmatpush1.bf16.msra.mxu1 %v7238_v50  ;;  %v7322_v50 = vld [vmem:[#allocation5 + $0x510] ss:$8 sps:$4 sm:$0xff]  }
 0x146   :  { %5422 = vmatpush1.bf16.msra.mxu0 %v7241_v51  ;;  %4931 = vmatprep.subr.bf16.mxu1 %v7246_v52  ;;  %v7325_v51 = vld [vmem:[#allocation5 + $0x1110] ss:$8 sps:$4 sm:$0xff]   ;;  %v7330_v52 = vld [vmem:[#allocation5 + $0x524] ss:$8 sps:$4 sm:$0xff]  }
 0x147   :  { %5423 = vmatprep.subr.bf16.mxu0 %v7249_v53  ;;  %v7333_v53 = vld [vmem:[#allocation5 + $0x1124] ss:$8 sps:$4 sm:$0xff]  }
 0x149   :  { %4932 = vmatpush1.bf16.msra.mxu1 %v7244_v54  ;;  %v7328_v54 = vld [vmem:[#allocation5 + $0x520] ss:$8 sps:$4 sm:$0xff]  }
 0x14a   :  { %5424 = vmatpush1.bf16.msra.mxu0 %v7247_v55  ;;  %4933 = vmatprep.subr.bf16.mxu1 %v7252_v56  ;;  %v7331_v55 = vld [vmem:[#allocation5 + $0x1120] ss:$8 sps:$4 sm:$0xff]   ;;  %v7336_v56 = vld [vmem:[#allocation5 + $0x534] ss:$8 sps:$4 sm:$0xff]  }
 0x14b   :  { %5425 = vmatprep.subr.bf16.mxu0 %v7255_v57  ;;  %v7339_v57 = vld [vmem:[#allocation5 + $0x1134] ss:$8 sps:$4 sm:$0xff]  }
 0x14d   :  { %4934 = vmatpush1.bf16.msra.mxu1 %v7250_v58  ;;  %v7334_v58 = vld [vmem:[#allocation5 + $0x530] ss:$8 sps:$4 sm:$0xff]  }
 0x14e   :  { %5426 = vmatpush1.bf16.msra.mxu0 %v7253_v59  ;;  %4935 = vmatprep.subr.bf16.mxu1 %v7258_v60  ;;  %v7337_v59 = vld [vmem:[#allocation5 + $0x1130] ss:$8 sps:$4 sm:$0xff]   ;;  %v7342_v60 = vld [vmem:[#allocation5 + $0x544] ss:$8 sps:$4 sm:$0xff]  }
 0x14f   :  { %5427 = vmatprep.subr.bf16.mxu0 %v7261_v61  ;;  %v7345_v61 = vld [vmem:[#allocation5 + $0x1144] ss:$8 sps:$4 sm:$0xff]  }
 0x151   :  { %4936 = vmatpush1.bf16.msra.mxu1 %v7256_v62  ;;  %v7340_v62 = vld [vmem:[#allocation5 + $0x540] ss:$8 sps:$4 sm:$0xff]  }
 0x152   :  { %5428 = vmatpush1.bf16.msra.mxu0 %v7259_v63  ;;  %4937 = vmatprep.subr.bf16.mxu1 %v7264_v0  ;;  %v7343_v63 = vld [vmem:[#allocation5 + $0x1140] ss:$8 sps:$4 sm:$0xff]   ;;  %v7348_v0 = vld [vmem:[#allocation5 + $0x554] ss:$8 sps:$4 sm:$0xff]  }
 0x153   :  { %5429 = vmatprep.subr.bf16.mxu0 %v7267_v1  ;;  %v7351_v1 = vld [vmem:[#allocation5 + $0x1154] ss:$8 sps:$4 sm:$0xff]  }
 0x155   :  { %4938 = vmatpush1.bf16.msra.mxu1 %v7262_v2  ;;  %v7346_v2 = vld [vmem:[#allocation5 + $0x550] ss:$8 sps:$4 sm:$0xff]  }
 0x156   :  { %5430 = vmatpush1.bf16.msra.mxu0 %v7265_v3  ;;  %4939 = vmatprep.subr.bf16.mxu1 %v7270_v4  ;;  %v7349_v3 = vld [vmem:[#allocation5 + $0x1150] ss:$8 sps:$4 sm:$0xff]   ;;  %v7354_v4 = vld [vmem:[#allocation5 + $0x564] ss:$8 sps:$4 sm:$0xff]  }
 0x157   :  { %5431 = vmatprep.subr.bf16.mxu0 %v7273_v5  ;;  %v7357_v5 = vld [vmem:[#allocation5 + $0x1164] ss:$8 sps:$4 sm:$0xff]  }
 0x159   :  { %4940 = vmatpush1.bf16.msra.mxu1 %v7268_v6  ;;  %v7352_v6 = vld [vmem:[#allocation5 + $0x560] ss:$8 sps:$4 sm:$0xff]  }
 0x15a   :  { %5432 = vmatpush1.bf16.msra.mxu0 %v7271_v7  ;;  %4941 = vmatprep.subr.bf16.mxu1 %v7276_v8  ;;  %v7355_v7 = vld [vmem:[#allocation5 + $0x1160] ss:$8 sps:$4 sm:$0xff]   ;;  %v7360_v8 = vld [vmem:[#allocation5 + $0x574] ss:$8 sps:$4 sm:$0xff]  }
 0x15b   :  { %5433 = vmatprep.subr.bf16.mxu0 %v7279_v9  ;;  %v7363_v9 = vld [vmem:[#allocation5 + $0x1174] ss:$8 sps:$4 sm:$0xff]  }
 0x15d   :  { %4942 = vmatpush1.bf16.msra.mxu1 %v7274_v10  ;;  %v7358_v10 = vld [vmem:[#allocation5 + $0x570] ss:$8 sps:$4 sm:$0xff]  }
 0x15e   :  { %5434 = vmatpush1.bf16.msra.mxu0 %v7277_v11  ;;  %4943 = vmatprep.subr.bf16.mxu1 %v7282_v12  ;;  %v7361_v11 = vld [vmem:[#allocation5 + $0x1170] ss:$8 sps:$4 sm:$0xff]   ;;  %v7366_v12 = vld [vmem:[#allocation5 + $0x584] ss:$8 sps:$4 sm:$0xff]  }
 0x15f   :  { %5435 = vmatprep.subr.bf16.mxu0 %v7285_v13  ;;  %v7369_v13 = vld [vmem:[#allocation5 + $0x1184] ss:$8 sps:$4 sm:$0xff]  }
 0x161   :  { %4944 = vmatpush1.bf16.msra.mxu1 %v7280_v14  ;;  %v7364_v14 = vld [vmem:[#allocation5 + $0x580] ss:$8 sps:$4 sm:$0xff]  }
 0x162   :  { %5436 = vmatpush1.bf16.msra.mxu0 %v7283_v15  ;;  %4945 = vmatprep.subr.bf16.mxu1 %v7288_v16  ;;  %v7367_v15 = vld [vmem:[#allocation5 + $0x1180] ss:$8 sps:$4 sm:$0xff]   ;;  %v7372_v16 = vld [vmem:[#allocation5 + $0x594] ss:$8 sps:$4 sm:$0xff]  }
 0x163   :  { %5437 = vmatprep.subr.bf16.mxu0 %v7291_v17  ;;  %v7375_v17 = vld [vmem:[#allocation5 + $0x1194] ss:$8 sps:$4 sm:$0xff]  }
 0x165   :  { %4946 = vmatpush1.bf16.msra.mxu1 %v7286_v18  ;;  %v7370_v18 = vld [vmem:[#allocation5 + $0x590] ss:$8 sps:$4 sm:$0xff]  }
 0x166   :  { %5438 = vmatpush1.bf16.msra.mxu0 %v7289_v19  ;;  %4947 = vmatprep.subr.bf16.mxu1 %v7294_v20  ;;  %v7373_v19 = vld [vmem:[#allocation5 + $0x1190] ss:$8 sps:$4 sm:$0xff]   ;;  %v7378_v20 = vld [vmem:[#allocation5 + $0x5a4] ss:$8 sps:$4 sm:$0xff]  }
 0x167   :  { %5439 = vmatprep.subr.bf16.mxu0 %v7297_v21  ;;  %v7381_v21 = vld [vmem:[#allocation5 + $0x11a4] ss:$8 sps:$4 sm:$0xff]  }
 0x169   :  { %4948 = vmatpush1.bf16.msra.mxu1 %v7292_v22  ;;  %v7376_v22 = vld [vmem:[#allocation5 + $0x5a0] ss:$8 sps:$4 sm:$0xff]  }
 0x16a   :  { %5440 = vmatpush1.bf16.msra.mxu0 %v7295_v23  ;;  %4949 = vmatprep.subr.bf16.mxu1 %v7300_v24  ;;  %v7379_v23 = vld [vmem:[#allocation5 + $0x11a0] ss:$8 sps:$4 sm:$0xff]   ;;  %v7384_v24 = vld [vmem:[#allocation5 + $0x5b4] ss:$8 sps:$4 sm:$0xff]  }
 0x16b   :  { %5441 = vmatprep.subr.bf16.mxu0 %v7303_v25  ;;  %v7387_v25 = vld [vmem:[#allocation5 + $0x11b4] ss:$8 sps:$4 sm:$0xff]  }
 0x16d   :  { %4950 = vmatpush1.bf16.msra.mxu1 %v7298_v26  ;;  %v7382_v26 = vld [vmem:[#allocation5 + $0x5b0] ss:$8 sps:$4 sm:$0xff]  }
 0x16e   :  { %5442 = vmatpush1.bf16.msra.mxu0 %v7301_v27  ;;  %4951 = vmatprep.subr.bf16.mxu1 %v7306_v28  ;;  %v7385_v27 = vld [vmem:[#allocation5 + $0x11b0] ss:$8 sps:$4 sm:$0xff]   ;;  %v7390_v28 = vld [vmem:[#allocation5 + $0x5c4] ss:$8 sps:$4 sm:$0xff]  }
 0x16f   :  { %5443 = vmatprep.subr.bf16.mxu0 %v7309_v29  ;;  %v7393_v29 = vld [vmem:[#allocation5 + $0x11c4] ss:$8 sps:$4 sm:$0xff]  }
 0x171   :  { %4952 = vmatpush1.bf16.msra.mxu1 %v7304_v30  ;;  %v7388_v30 = vld [vmem:[#allocation5 + $0x5c0] ss:$8 sps:$4 sm:$0xff]  }
 0x172   :  { %5444 = vmatpush1.bf16.msra.mxu0 %v7307_v31  ;;  %4953 = vmatprep.subr.bf16.mxu1 %v7312_v32  ;;  %v7391_v31 = vld [vmem:[#allocation5 + $0x11c0] ss:$8 sps:$4 sm:$0xff]   ;;  %v7396_v32 = vld [vmem:[#allocation5 + $0x5d4] ss:$8 sps:$4 sm:$0xff]  }
 0x173   :  { %5445 = vmatprep.subr.bf16.mxu0 %v7315_v33  ;;  %v7399_v33 = vld [vmem:[#allocation5 + $0x11d4] ss:$8 sps:$4 sm:$0xff]  }
 0x175   :  { %4954 = vmatpush1.bf16.msra.mxu1 %v7310_v34  ;;  %v7394_v34 = vld [vmem:[#allocation5 + $0x5d0] ss:$8 sps:$4 sm:$0xff]  }
 0x176   :  { %5446 = vmatpush1.bf16.msra.mxu0 %v7313_v35  ;;  %4964 = vmatprep.subr.bf16.mxu1 %v7318_v36  ;;  %v7397_v35 = vld [vmem:[#allocation5 + $0x11d0] ss:$8 sps:$4 sm:$0xff]   ;;  %v7402_v36 = vld [vmem:[#allocation5 + $0x5e4] ss:$8 sps:$4 sm:$0xff]  }
 0x177   :  { %5456 = vmatprep.subr.bf16.mxu0 %v7321_v37  ;;  %v7405_v37 = vld [vmem:[#allocation5 + $0x11e4] ss:$8 sps:$4 sm:$0xff]  }
 0x178   :  { %4956 = vmatmul.mubr.bf16.vlgmr.msra.gmra.mrb[0].mxu1 %v111_v42  ;;  %v7406_v42 = vld [vmem:[#allocation5 + $0x5f0] ss:$8 sps:$4 sm:$0xff]  }
 0x179   :  { %5448 = vmatmul.mubr.bf16.vlgmr.msra.gmra.mrb[0].mxu0 %v135_v43  ;;  %4965 = vmatpush1.bf16.msra.mxu1 %v7316_v44  ;;  %v7409_v43 = vld [vmem:[#allocation5 + $0x11f0] ss:$8 sps:$4 sm:$0xff]   ;;  %v7414_v44 = vld [vmem:[#allocation5 + $0x604] ss:$8 sps:$4 sm:$0xff]  }
 0x17a   :  { %5457 = vmatpush1.bf16.msra.mxu0 %v7319_v45  ;;  %4966 = vmatprep.subr.bf16.mxu1 %v7324_v46  ;;  %v7417_v45 = vld [vmem:[#allocation5 + $0x1204] ss:$8 sps:$4 sm:$0xff]   ;;  %v65_v46 = vld [vmem:[#allocation2 + $0x50] sm:$0xff] }
 0x17b   :  { %5458 = vmatprep.subr.bf16.mxu0 %v7327_v47  ;;  %4996 = vmatprep.mubr.bf16.mxu1 %v114_v48  ;;  %v89_v47 = vld [vmem:[#allocation2 + $0x110] sm:$0xff]  ;;  %v68_v48 = vld [vmem:[#allocation2 + $0x68] sm:$0xff] }
 0x17c   :  { %5488 = vmatprep.mubr.bf16.mxu0 %v138_v49  ;;  %v92_v49 = vld [vmem:[#allocation2 + $0x128] sm:$0xff] }
 0x17d   :  { %4967 = vmatpush1.bf16.msra.mxu1 %v7322_v50  ;;  %v113_v50 = vpack.c.bf16 %v65_v46, %v65_v46  ;;  %v7496_v46 = vld [vmem:[#allocation5 + $0x6e0] ss:$8 sps:$4 sm:$0xff]  }
 0x17e   :  { %5459 = vmatpush1.bf16.msra.mxu0 %v7325_v51  ;;  %4968 = vmatprep.subr.bf16.mxu1 %v7330_v52  ;;  %v137_v51 = vpack.c.bf16 %v89_v47, %v89_v47  ;;  %v7412_v52 = vld [vmem:[#allocation5 + $0x600] ss:$8 sps:$4 sm:$0xff]  }
 0x17f   :  { %5460 = vmatprep.subr.bf16.mxu0 %v7333_v53  ;;  %v7415_v53 = vld [vmem:[#allocation5 + $0x1200] ss:$8 sps:$4 sm:$0xff]  }
 0x180   :  { %v7499_v47 = vld [vmem:[#allocation5 + $0x12e0] ss:$8 sps:$4 sm:$0xff]  }
 0x181   :  { %4969 = vmatpush1.bf16.msra.mxu1 %v7328_v54  ;;  %v7420_v54 = vld [vmem:[#allocation5 + $0x614] ss:$8 sps:$4 sm:$0xff]  }
 0x182   :  { %5461 = vmatpush1.bf16.msra.mxu0 %v7331_v55  ;;  %4970 = vmatprep.subr.bf16.mxu1 %v7336_v56  ;;  %v7423_v55 = vld [vmem:[#allocation5 + $0x1214] ss:$8 sps:$4 sm:$0xff]   ;;  %v116_v56 = vpack.c.bf16 %v68_v48, %v68_v48 }
 0x183   :  { %5462 = vmatprep.subr.bf16.mxu0 %v7339_v57  ;;  %v140_v57 = vpack.c.bf16 %v92_v49, %v92_v49  ;;  %v7504_v48 = vld [vmem:[#allocation5 + $0x6f4] ss:$8 sps:$4 sm:$0xff]  }
 0x184   :  { %v7507_v49 = vld [vmem:[#allocation5 + $0x12f4] ss:$8 sps:$4 sm:$0xff]  }
 0x185   :  { %4971 = vmatpush1.bf16.msra.mxu1 %v7334_v58  ;;  %v7418_v58 = vld [vmem:[#allocation5 + $0x610] ss:$8 sps:$4 sm:$0xff]  }
 0x186   :  { %5463 = vmatpush1.bf16.msra.mxu0 %v7337_v59  ;;  %4972 = vmatprep.subr.bf16.mxu1 %v7342_v60  ;;  %v7421_v59 = vld [vmem:[#allocation5 + $0x1210] ss:$8 sps:$4 sm:$0xff]   ;;  %v7426_v60 = vld [vmem:[#allocation5 + $0x624] ss:$8 sps:$4 sm:$0xff]  }
 0x187   :  { %5464 = vmatprep.subr.bf16.mxu0 %v7345_v61  ;;  %v7429_v61 = vld [vmem:[#allocation5 + $0x1224] ss:$8 sps:$4 sm:$0xff]  }
 0x189   :  { %4973 = vmatpush1.bf16.msra.mxu1 %v7340_v62  ;;  %v7424_v62 = vld [vmem:[#allocation5 + $0x620] ss:$8 sps:$4 sm:$0xff]  }
 0x18a   :  { %5465 = vmatpush1.bf16.msra.mxu0 %v7343_v63  ;;  %4974 = vmatprep.subr.bf16.mxu1 %v7348_v0  ;;  %v7427_v63 = vld [vmem:[#allocation5 + $0x1220] ss:$8 sps:$4 sm:$0xff]   ;;  %v7432_v0 = vld [vmem:[#allocation5 + $0x634] ss:$8 sps:$4 sm:$0xff]  }
 0x18b   :  { %5466 = vmatprep.subr.bf16.mxu0 %v7351_v1  ;;  %v7435_v1 = vld [vmem:[#allocation5 + $0x1234] ss:$8 sps:$4 sm:$0xff]  }
 0x18d   :  { %4975 = vmatpush1.bf16.msra.mxu1 %v7346_v2  ;;  %v7430_v2 = vld [vmem:[#allocation5 + $0x630] ss:$8 sps:$4 sm:$0xff]  }
 0x18e   :  { %5467 = vmatpush1.bf16.msra.mxu0 %v7349_v3  ;;  %4976 = vmatprep.subr.bf16.mxu1 %v7354_v4  ;;  %v7433_v3 = vld [vmem:[#allocation5 + $0x1230] ss:$8 sps:$4 sm:$0xff]   ;;  %v7438_v4 = vld [vmem:[#allocation5 + $0x644] ss:$8 sps:$4 sm:$0xff]  }
 0x18f   :  { %5468 = vmatprep.subr.bf16.mxu0 %v7357_v5  ;;  %v7441_v5 = vld [vmem:[#allocation5 + $0x1244] ss:$8 sps:$4 sm:$0xff]  }
 0x191   :  { %4977 = vmatpush1.bf16.msra.mxu1 %v7352_v6  ;;  %v7436_v6 = vld [vmem:[#allocation5 + $0x640] ss:$8 sps:$4 sm:$0xff]  }
 0x192   :  { %5469 = vmatpush1.bf16.msra.mxu0 %v7355_v7  ;;  %4978 = vmatprep.subr.bf16.mxu1 %v7360_v8  ;;  %v7439_v7 = vld [vmem:[#allocation5 + $0x1240] ss:$8 sps:$4 sm:$0xff]   ;;  %v7444_v8 = vld [vmem:[#allocation5 + $0x654] ss:$8 sps:$4 sm:$0xff]  }
 0x193   :  { %5470 = vmatprep.subr.bf16.mxu0 %v7363_v9  ;;  %v7447_v9 = vld [vmem:[#allocation5 + $0x1254] ss:$8 sps:$4 sm:$0xff]  }
 0x195   :  { %4979 = vmatpush1.bf16.msra.mxu1 %v7358_v10  ;;  %v7442_v10 = vld [vmem:[#allocation5 + $0x650] ss:$8 sps:$4 sm:$0xff]  }
 0x196   :  { %5471 = vmatpush1.bf16.msra.mxu0 %v7361_v11  ;;  %4980 = vmatprep.subr.bf16.mxu1 %v7366_v12  ;;  %v7445_v11 = vld [vmem:[#allocation5 + $0x1250] ss:$8 sps:$4 sm:$0xff]   ;;  %v7450_v12 = vld [vmem:[#allocation5 + $0x664] ss:$8 sps:$4 sm:$0xff]  }
 0x197   :  { %5472 = vmatprep.subr.bf16.mxu0 %v7369_v13  ;;  %v7453_v13 = vld [vmem:[#allocation5 + $0x1264] ss:$8 sps:$4 sm:$0xff]  }
 0x199   :  { %4981 = vmatpush1.bf16.msra.mxu1 %v7364_v14  ;;  %v7448_v14 = vld [vmem:[#allocation5 + $0x660] ss:$8 sps:$4 sm:$0xff]  }
 0x19a   :  { %5473 = vmatpush1.bf16.msra.mxu0 %v7367_v15  ;;  %4982 = vmatprep.subr.bf16.mxu1 %v7372_v16  ;;  %v7451_v15 = vld [vmem:[#allocation5 + $0x1260] ss:$8 sps:$4 sm:$0xff]   ;;  %v7456_v16 = vld [vmem:[#allocation5 + $0x674] ss:$8 sps:$4 sm:$0xff]  }
 0x19b   :  { %5474 = vmatprep.subr.bf16.mxu0 %v7375_v17  ;;  %v7459_v17 = vld [vmem:[#allocation5 + $0x1274] ss:$8 sps:$4 sm:$0xff]  }
 0x19d   :  { %4983 = vmatpush1.bf16.msra.mxu1 %v7370_v18  ;;  %v7454_v18 = vld [vmem:[#allocation5 + $0x670] ss:$8 sps:$4 sm:$0xff]  }
 0x19e   :  { %5475 = vmatpush1.bf16.msra.mxu0 %v7373_v19  ;;  %4984 = vmatprep.subr.bf16.mxu1 %v7378_v20  ;;  %v7457_v19 = vld [vmem:[#allocation5 + $0x1270] ss:$8 sps:$4 sm:$0xff]   ;;  %v7462_v20 = vld [vmem:[#allocation5 + $0x684] ss:$8 sps:$4 sm:$0xff]  }
 0x19f   :  { %5476 = vmatprep.subr.bf16.mxu0 %v7381_v21  ;;  %v7465_v21 = vld [vmem:[#allocation5 + $0x1284] ss:$8 sps:$4 sm:$0xff]  }
 0x1a1   :  { %4985 = vmatpush1.bf16.msra.mxu1 %v7376_v22  ;;  %v7460_v22 = vld [vmem:[#allocation5 + $0x680] ss:$8 sps:$4 sm:$0xff]  }
 0x1a2   :  { %5477 = vmatpush1.bf16.msra.mxu0 %v7379_v23  ;;  %4986 = vmatprep.subr.bf16.mxu1 %v7384_v24  ;;  %v7463_v23 = vld [vmem:[#allocation5 + $0x1280] ss:$8 sps:$4 sm:$0xff]   ;;  %v7468_v24 = vld [vmem:[#allocation5 + $0x694] ss:$8 sps:$4 sm:$0xff]  }
 0x1a3   :  { %5478 = vmatprep.subr.bf16.mxu0 %v7387_v25  ;;  %v7471_v25 = vld [vmem:[#allocation5 + $0x1294] ss:$8 sps:$4 sm:$0xff]  }
 0x1a5   :  { %4987 = vmatpush1.bf16.msra.mxu1 %v7382_v26  ;;  %v7466_v26 = vld [vmem:[#allocation5 + $0x690] ss:$8 sps:$4 sm:$0xff]  }
 0x1a6   :  { %5479 = vmatpush1.bf16.msra.mxu0 %v7385_v27  ;;  %4988 = vmatprep.subr.bf16.mxu1 %v7390_v28  ;;  %v7469_v27 = vld [vmem:[#allocation5 + $0x1290] ss:$8 sps:$4 sm:$0xff]   ;;  %v7474_v28 = vld [vmem:[#allocation5 + $0x6a4] ss:$8 sps:$4 sm:$0xff]  }
 0x1a7   :  { %5480 = vmatprep.subr.bf16.mxu0 %v7393_v29  ;;  %v7477_v29 = vld [vmem:[#allocation5 + $0x12a4] ss:$8 sps:$4 sm:$0xff]  }
 0x1a9   :  { %4989 = vmatpush1.bf16.msra.mxu1 %v7388_v30  ;;  %v7472_v30 = vld [vmem:[#allocation5 + $0x6a0] ss:$8 sps:$4 sm:$0xff]  }
 0x1aa   :  { %5481 = vmatpush1.bf16.msra.mxu0 %v7391_v31  ;;  %4990 = vmatprep.subr.bf16.mxu1 %v7396_v32  ;;  %v7475_v31 = vld [vmem:[#allocation5 + $0x12a0] ss:$8 sps:$4 sm:$0xff]   ;;  %v7480_v32 = vld [vmem:[#allocation5 + $0x6b4] ss:$8 sps:$4 sm:$0xff]  }
 0x1ab   :  { %5482 = vmatprep.subr.bf16.mxu0 %v7399_v33  ;;  %v7483_v33 = vld [vmem:[#allocation5 + $0x12b4] ss:$8 sps:$4 sm:$0xff]  }
 0x1ad   :  { %4991 = vmatpush1.bf16.msra.mxu1 %v7394_v34  ;;  %v7478_v34 = vld [vmem:[#allocation5 + $0x6b0] ss:$8 sps:$4 sm:$0xff]  }
 0x1ae   :  { %5483 = vmatpush1.bf16.msra.mxu0 %v7397_v35  ;;  %4992 = vmatprep.subr.bf16.mxu1 %v7402_v36  ;;  %v7481_v35 = vld [vmem:[#allocation5 + $0x12b0] ss:$8 sps:$4 sm:$0xff]   ;;  %v7486_v36 = vld [vmem:[#allocation5 + $0x6c4] ss:$8 sps:$4 sm:$0xff]  }
 0x1af   :  { %5484 = vmatprep.subr.bf16.mxu0 %v7405_v37  ;;  %v7489_v37 = vld [vmem:[#allocation5 + $0x12c4] ss:$8 sps:$4 sm:$0xff]  }
 0x1b1   :  { %4993 = vmatpush1.bf16.msra.mxu1 %v7400_v38  ;;  %v7484_v38 = vld [vmem:[#allocation5 + $0x6c0] ss:$8 sps:$4 sm:$0xff]  }
 0x1b2   :  { %5485 = vmatpush1.bf16.msra.mxu0 %v7403_v39  ;;  %4994 = vmatprep.subr.bf16.mxu1 %v7408_v40  ;;  %v7487_v39 = vld [vmem:[#allocation5 + $0x12c0] ss:$8 sps:$4 sm:$0xff]   ;;  %v7492_v40 = vld [vmem:[#allocation5 + $0x6d4] ss:$8 sps:$4 sm:$0xff]  }
 0x1b3   :  { %5486 = vmatprep.subr.bf16.mxu0 %v7411_v41  ;;  %v7495_v41 = vld [vmem:[#allocation5 + $0x12d4] ss:$8 sps:$4 sm:$0xff]  }
 0x1b5   :  { %4995 = vmatpush1.bf16.msra.mxu1 %v7406_v42  ;;  %v7490_v42 = vld [vmem:[#allocation5 + $0x6d0] ss:$8 sps:$4 sm:$0xff]  }
 0x1b6   :  { %5487 = vmatpush1.bf16.msra.mxu0 %v7409_v43  ;;  %5005 = vmatprep.subr.bf16.mxu1 %v7414_v44  ;;  %v7493_v43 = vld [vmem:[#allocation5 + $0x12d0] ss:$8 sps:$4 sm:$0xff]   ;;  %v7498_v44 = vld [vmem:[#allocation5 + $0x6e4] ss:$8 sps:$4 sm:$0xff]  }
 0x1b7   :  { %5497 = vmatprep.subr.bf16.mxu0 %v7417_v45  ;;  %v7501_v45 = vld [vmem:[#allocation5 + $0x12e4] ss:$8 sps:$4 sm:$0xff]  }
 0x1b8   :  { %4997 = vmatmul.mubr.bf16.vlgmr.msra.gmra.mrb[0].mxu1 %v113_v50  ;;  %v7502_v50 = vld [vmem:[#allocation5 + $0x6f0] ss:$8 sps:$4 sm:$0xff]  }
 0x1b9   :  { %5489 = vmatmul.mubr.bf16.vlgmr.msra.gmra.mrb[0].mxu0 %v137_v51  ;;  %5006 = vmatpush1.bf16.msra.mxu1 %v7412_v52  ;;  %v7505_v51 = vld [vmem:[#allocation5 + $0x12f0] ss:$8 sps:$4 sm:$0xff]   ;;  %v7510_v52 = vld [vmem:[#allocation5 + $0x704] ss:$8 sps:$4 sm:$0xff]  }
 0x1ba   :  { %5498 = vmatpush1.bf16.msra.mxu0 %v7415_v53  ;;  %5007 = vmatprep.subr.bf16.mxu1 %v7420_v54  ;;  %v7513_v53 = vld [vmem:[#allocation5 + $0x1304] ss:$8 sps:$4 sm:$0xff]  }
 0x1bb   :  { %5499 = vmatprep.subr.bf16.mxu0 %v7423_v55  ;;  %5037 = vmatprep.mubr.bf16.mxu1 %v116_v56  ;;  %v67_v54 = vld [vmem:[#allocation2 + $0x60] sm:$0xff]  ;;  %v70_v56 = vld [vmem:[#allocation2 + $0x78] sm:$0xff] }
 0x1bc   :  { %5529 = vmatprep.mubr.bf16.mxu0 %v140_v57  ;;  %v91_v55 = vld [vmem:[#allocation2 + $0x120] sm:$0xff]  ;;  %v94_v57 = vld [vmem:[#allocation2 + $0x138] sm:$0xff] }
 0x1bd   :  { %5008 = vmatpush1.bf16.msra.mxu1 %v7418_v58  ;;  %v115_v58 = vpack.c.bf16 %v67_v54, %v67_v54  ;;  %v7592_v54 = vld [vmem:[#allocation5 + $0x7e0] ss:$8 sps:$4 sm:$0xff]  }
 0x1be   :  { %5500 = vmatpush1.bf16.msra.mxu0 %v7421_v59  ;;  %5009 = vmatprep.subr.bf16.mxu1 %v7426_v60  ;;  %v139_v59 = vpack.c.bf16 %v91_v55, %v91_v55  ;;  %v7508_v60 = vld [vmem:[#allocation5 + $0x700] ss:$8 sps:$4 sm:$0xff]  }
 0x1bf   :  { %5501 = vmatprep.subr.bf16.mxu0 %v7429_v61  ;;  %v7511_v61 = vld [vmem:[#allocation5 + $0x1300] ss:$8 sps:$4 sm:$0xff]  }
 0x1c0   :  { %v7595_v55 = vld [vmem:[#allocation5 + $0x13e0] ss:$8 sps:$4 sm:$0xff]  }
 0x1c1   :  { %5010 = vmatpush1.bf16.msra.mxu1 %v7424_v62  ;;  %v7516_v62 = vld [vmem:[#allocation5 + $0x714] ss:$8 sps:$4 sm:$0xff]  }
 0x1c2   :  { %5502 = vmatpush1.bf16.msra.mxu0 %v7427_v63  ;;  %5011 = vmatprep.subr.bf16.mxu1 %v7432_v0  ;;  %v7519_v63 = vld [vmem:[#allocation5 + $0x1314] ss:$8 sps:$4 sm:$0xff]   ;;  %v118_v0 = vpack.c.bf16 %v70_v56, %v70_v56 }
 0x1c3   :  { %5503 = vmatprep.subr.bf16.mxu0 %v7435_v1  ;;  %v142_v1 = vpack.c.bf16 %v94_v57, %v94_v57  ;;  %v7600_v56 = vld [vmem:[#allocation5 + $0x7f4] ss:$8 sps:$4 sm:$0xff]  }
 0x1c4   :  { %v7603_v57 = vld [vmem:[#allocation5 + $0x13f4] ss:$8 sps:$4 sm:$0xff]  }
 0x1c5   :  { %5012 = vmatpush1.bf16.msra.mxu1 %v7430_v2  ;;  %v7514_v2 = vld [vmem:[#allocation5 + $0x710] ss:$8 sps:$4 sm:$0xff]  }
 0x1c6   :  { %5504 = vmatpush1.bf16.msra.mxu0 %v7433_v3  ;;  %5013 = vmatprep.subr.bf16.mxu1 %v7438_v4  ;;  %v7517_v3 = vld [vmem:[#allocation5 + $0x1310] ss:$8 sps:$4 sm:$0xff]   ;;  %v7522_v4 = vld [vmem:[#allocation5 + $0x724] ss:$8 sps:$4 sm:$0xff]  }
 0x1c7   :  { %5505 = vmatprep.subr.bf16.mxu0 %v7441_v5  ;;  %v7525_v5 = vld [vmem:[#allocation5 + $0x1324] ss:$8 sps:$4 sm:$0xff]  }
 0x1c9   :  { %5014 = vmatpush1.bf16.msra.mxu1 %v7436_v6  ;;  %v7520_v6 = vld [vmem:[#allocation5 + $0x720] ss:$8 sps:$4 sm:$0xff]  }
 0x1ca   :  { %5506 = vmatpush1.bf16.msra.mxu0 %v7439_v7  ;;  %5015 = vmatprep.subr.bf16.mxu1 %v7444_v8  ;;  %v7523_v7 = vld [vmem:[#allocation5 + $0x1320] ss:$8 sps:$4 sm:$0xff]   ;;  %v7528_v8 = vld [vmem:[#allocation5 + $0x734] ss:$8 sps:$4 sm:$0xff]  }
 0x1cb   :  { %5507 = vmatprep.subr.bf16.mxu0 %v7447_v9  ;;  %v7531_v9 = vld [vmem:[#allocation5 + $0x1334] ss:$8 sps:$4 sm:$0xff]  }
 0x1cd   :  { %5016 = vmatpush1.bf16.msra.mxu1 %v7442_v10  ;;  %v7526_v10 = vld [vmem:[#allocation5 + $0x730] ss:$8 sps:$4 sm:$0xff]  }
 0x1ce   :  { %5508 = vmatpush1.bf16.msra.mxu0 %v7445_v11  ;;  %5017 = vmatprep.subr.bf16.mxu1 %v7450_v12  ;;  %v7529_v11 = vld [vmem:[#allocation5 + $0x1330] ss:$8 sps:$4 sm:$0xff]   ;;  %v7534_v12 = vld [vmem:[#allocation5 + $0x744] ss:$8 sps:$4 sm:$0xff]  }
 0x1cf   :  { %5509 = vmatprep.subr.bf16.mxu0 %v7453_v13  ;;  %v7537_v13 = vld [vmem:[#allocation5 + $0x1344] ss:$8 sps:$4 sm:$0xff]  }
 0x1d1   :  { %5018 = vmatpush1.bf16.msra.mxu1 %v7448_v14  ;;  %v7532_v14 = vld [vmem:[#allocation5 + $0x740] ss:$8 sps:$4 sm:$0xff]  }
 0x1d2   :  { %5510 = vmatpush1.bf16.msra.mxu0 %v7451_v15  ;;  %5019 = vmatprep.subr.bf16.mxu1 %v7456_v16  ;;  %v7535_v15 = vld [vmem:[#allocation5 + $0x1340] ss:$8 sps:$4 sm:$0xff]   ;;  %v7540_v16 = vld [vmem:[#allocation5 + $0x754] ss:$8 sps:$4 sm:$0xff]  }
 0x1d3   :  { %5511 = vmatprep.subr.bf16.mxu0 %v7459_v17  ;;  %v7543_v17 = vld [vmem:[#allocation5 + $0x1354] ss:$8 sps:$4 sm:$0xff]  }
 0x1d5   :  { %5020 = vmatpush1.bf16.msra.mxu1 %v7454_v18  ;;  %v7538_v18 = vld [vmem:[#allocation5 + $0x750] ss:$8 sps:$4 sm:$0xff]  }
 0x1d6   :  { %5512 = vmatpush1.bf16.msra.mxu0 %v7457_v19  ;;  %5021 = vmatprep.subr.bf16.mxu1 %v7462_v20  ;;  %v7541_v19 = vld [vmem:[#allocation5 + $0x1350] ss:$8 sps:$4 sm:$0xff]   ;;  %v7546_v20 = vld [vmem:[#allocation5 + $0x764] ss:$8 sps:$4 sm:$0xff]  }
 0x1d7   :  { %5513 = vmatprep.subr.bf16.mxu0 %v7465_v21  ;;  %v7549_v21 = vld [vmem:[#allocation5 + $0x1364] ss:$8 sps:$4 sm:$0xff]  }
 0x1d9   :  { %5022 = vmatpush1.bf16.msra.mxu1 %v7460_v22  ;;  %v7544_v22 = vld [vmem:[#allocation5 + $0x760] ss:$8 sps:$4 sm:$0xff]  }
 0x1da   :  { %5514 = vmatpush1.bf16.msra.mxu0 %v7463_v23  ;;  %5023 = vmatprep.subr.bf16.mxu1 %v7468_v24  ;;  %v7547_v23 = vld [vmem:[#allocation5 + $0x1360] ss:$8 sps:$4 sm:$0xff]   ;;  %v7552_v24 = vld [vmem:[#allocation5 + $0x774] ss:$8 sps:$4 sm:$0xff]  }
 0x1db   :  { %5515 = vmatprep.subr.bf16.mxu0 %v7471_v25  ;;  %v7555_v25 = vld [vmem:[#allocation5 + $0x1374] ss:$8 sps:$4 sm:$0xff]  }
 0x1dd   :  { %5024 = vmatpush1.bf16.msra.mxu1 %v7466_v26  ;;  %v7550_v26 = vld [vmem:[#allocation5 + $0x770] ss:$8 sps:$4 sm:$0xff]  }
 0x1de   :  { %5516 = vmatpush1.bf16.msra.mxu0 %v7469_v27  ;;  %5025 = vmatprep.subr.bf16.mxu1 %v7474_v28  ;;  %v7553_v27 = vld [vmem:[#allocation5 + $0x1370] ss:$8 sps:$4 sm:$0xff]   ;;  %v7558_v28 = vld [vmem:[#allocation5 + $0x784] ss:$8 sps:$4 sm:$0xff]  }
 0x1df   :  { %5517 = vmatprep.subr.bf16.mxu0 %v7477_v29  ;;  %v7561_v29 = vld [vmem:[#allocation5 + $0x1384] ss:$8 sps:$4 sm:$0xff]  }
 0x1e1   :  { %5026 = vmatpush1.bf16.msra.mxu1 %v7472_v30  ;;  %v7556_v30 = vld [vmem:[#allocation5 + $0x780] ss:$8 sps:$4 sm:$0xff]  }
 0x1e2   :  { %5518 = vmatpush1.bf16.msra.mxu0 %v7475_v31  ;;  %5027 = vmatprep.subr.bf16.mxu1 %v7480_v32  ;;  %v7559_v31 = vld [vmem:[#allocation5 + $0x1380] ss:$8 sps:$4 sm:$0xff]   ;;  %v7564_v32 = vld [vmem:[#allocation5 + $0x794] ss:$8 sps:$4 sm:$0xff]  }
 0x1e3   :  { %5519 = vmatprep.subr.bf16.mxu0 %v7483_v33  ;;  %v7567_v33 = vld [vmem:[#allocation5 + $0x1394] ss:$8 sps:$4 sm:$0xff]  }
 0x1e5   :  { %5028 = vmatpush1.bf16.msra.mxu1 %v7478_v34  ;;  %v7562_v34 = vld [vmem:[#allocation5 + $0x790] ss:$8 sps:$4 sm:$0xff]  }
 0x1e6   :  { %5520 = vmatpush1.bf16.msra.mxu0 %v7481_v35  ;;  %5029 = vmatprep.subr.bf16.mxu1 %v7486_v36  ;;  %v7565_v35 = vld [vmem:[#allocation5 + $0x1390] ss:$8 sps:$4 sm:$0xff]   ;;  %v7570_v36 = vld [vmem:[#allocation5 + $0x7a4] ss:$8 sps:$4 sm:$0xff]  }
 0x1e7   :  { %5521 = vmatprep.subr.bf16.mxu0 %v7489_v37  ;;  %v7573_v37 = vld [vmem:[#allocation5 + $0x13a4] ss:$8 sps:$4 sm:$0xff]  }
 0x1e9   :  { %5030 = vmatpush1.bf16.msra.mxu1 %v7484_v38  ;;  %v7568_v38 = vld [vmem:[#allocation5 + $0x7a0] ss:$8 sps:$4 sm:$0xff]  }
 0x1ea   :  { %5522 = vmatpush1.bf16.msra.mxu0 %v7487_v39  ;;  %5031 = vmatprep.subr.bf16.mxu1 %v7492_v40  ;;  %v7571_v39 = vld [vmem:[#allocation5 + $0x13a0] ss:$8 sps:$4 sm:$0xff]   ;;  %v7576_v40 = vld [vmem:[#allocation5 + $0x7b4] ss:$8 sps:$4 sm:$0xff]  }
 0x1eb   :  { %5523 = vmatprep.subr.bf16.mxu0 %v7495_v41  ;;  %v7579_v41 = vld [vmem:[#allocation5 + $0x13b4] ss:$8 sps:$4 sm:$0xff]  }
 0x1ed   :  { %5032 = vmatpush1.bf16.msra.mxu1 %v7490_v42  ;;  %v7574_v42 = vld [vmem:[#allocation5 + $0x7b0] ss:$8 sps:$4 sm:$0xff]  }
 0x1ee   :  { %5524 = vmatpush1.bf16.msra.mxu0 %v7493_v43  ;;  %5033 = vmatprep.subr.bf16.mxu1 %v7498_v44  ;;  %v7577_v43 = vld [vmem:[#allocation5 + $0x13b0] ss:$8 sps:$4 sm:$0xff]   ;;  %v7582_v44 = vld [vmem:[#allocation5 + $0x7c4] ss:$8 sps:$4 sm:$0xff]  }
 0x1ef   :  { %5525 = vmatprep.subr.bf16.mxu0 %v7501_v45  ;;  %v7585_v45 = vld [vmem:[#allocation5 + $0x13c4] ss:$8 sps:$4 sm:$0xff]  }
 0x1f1   :  { %5034 = vmatpush1.bf16.msra.mxu1 %v7496_v46  ;;  %v7580_v46 = vld [vmem:[#allocation5 + $0x7c0] ss:$8 sps:$4 sm:$0xff]  }
 0x1f2   :  { %5526 = vmatpush1.bf16.msra.mxu0 %v7499_v47  ;;  %5035 = vmatprep.subr.bf16.mxu1 %v7504_v48  ;;  %v7583_v47 = vld [vmem:[#allocation5 + $0x13c0] ss:$8 sps:$4 sm:$0xff]   ;;  %v7588_v48 = vld [vmem:[#allocation5 + $0x7d4] ss:$8 sps:$4 sm:$0xff]  }
 0x1f3   :  { %5527 = vmatprep.subr.bf16.mxu0 %v7507_v49  ;;  %v7591_v49 = vld [vmem:[#allocation5 + $0x13d4] ss:$8 sps:$4 sm:$0xff]  }
 0x1f5   :  { %5036 = vmatpush1.bf16.msra.mxu1 %v7502_v50  ;;  %v7586_v50 = vld [vmem:[#allocation5 + $0x7d0] ss:$8 sps:$4 sm:$0xff]  }
 0x1f6   :  { %5528 = vmatpush1.bf16.msra.mxu0 %v7505_v51  ;;  %5046 = vmatprep.subr.bf16.mxu1 %v7510_v52  ;;  %v7589_v51 = vld [vmem:[#allocation5 + $0x13d0] ss:$8 sps:$4 sm:$0xff]   ;;  %v7594_v52 = vld [vmem:[#allocation5 + $0x7e4] ss:$8 sps:$4 sm:$0xff]  }
 0x1f7   :  { %5538 = vmatprep.subr.bf16.mxu0 %v7513_v53  ;;  %v7597_v53 = vld [vmem:[#allocation5 + $0x13e4] ss:$8 sps:$4 sm:$0xff]  }
 0x1f8   :  { %5038 = vmatmul.mubr.bf16.vlgmr.msra.gmra.mrb[0].mxu1 %v115_v58  ;;  %v7598_v58 = vld [vmem:[#allocation5 + $0x7f0] ss:$8 sps:$4 sm:$0xff]  }
 0x1f9   :  { %5530 = vmatmul.mubr.bf16.vlgmr.msra.gmra.mrb[0].mxu0 %v139_v59  ;;  %5047 = vmatpush1.bf16.msra.mxu1 %v7508_v60  ;;  %v7601_v59 = vld [vmem:[#allocation5 + $0x13f0] ss:$8 sps:$4 sm:$0xff]  }
 0x1fa   :  { %5539 = vmatpush1.bf16.msra.mxu0 %v7511_v61  ;;  %5048 = vmatprep.subr.bf16.mxu1 %v7516_v62  ;;  %v69_v60 = vld [vmem:[#allocation2 + $0x70] sm:$0xff]  ;;  %v7606_v62 = vld [vmem:[#allocation5 + $0x804] ss:$8 sps:$4 sm:$0xff]  }
 0x1fb   :  { %5540 = vmatprep.subr.bf16.mxu0 %v7519_v63  ;;  %5078 = vmatprep.mubr.bf16.mxu1 %v118_v0  ;;  %v93_v61 = vld [vmem:[#allocation2 + $0x130] sm:$0xff]  ;;  %v7609_v63 = vld [vmem:[#allocation5 + $0x1404] ss:$8 sps:$4 sm:$0xff]   ;;  %v117_v0 = vpack.c.bf16 %v69_v60, %v69_v60 }
 0x1fc   :  { %5570 = vmatprep.mubr.bf16.mxu0 %v142_v1  ;;  %v141_v1 = vpack.c.bf16 %v93_v61, %v93_v61  ;;  %v7690_v60 = vld [vmem:[#allocation5 + $0x8e4] ss:$8 sps:$4 sm:$0xff]  }
 0x1fd   :  { %5049 = vmatpush1.bf16.msra.mxu1 %v7514_v2  ;;  %v72_v2 = vld [vmem:[#allocation2 + $0x88] sm:$0xff] }
 0x1fe   :  { %5541 = vmatpush1.bf16.msra.mxu0 %v7517_v3  ;;  %5050 = vmatprep.subr.bf16.mxu1 %v7522_v4  ;;  %v96_v3 = vld [vmem:[#allocation2 + $0x148] sm:$0xff] }
 0x1ff   :  { %5542 = vmatprep.subr.bf16.mxu0 %v7525_v5  ;;  %v7604_v4 = vld [vmem:[#allocation5 + $0x800] ss:$8 sps:$4 sm:$0xff]   ;;  %v7693_v61 = vld [vmem:[#allocation5 + $0x14e4] ss:$8 sps:$4 sm:$0xff]  }
 0x200   :  { %v7607_v5 = vld [vmem:[#allocation5 + $0x1400] ss:$8 sps:$4 sm:$0xff]  }
 0x201   :  { %5051 = vmatpush1.bf16.msra.mxu1 %v7520_v6  ;;  %v7612_v6 = vld [vmem:[#allocation5 + $0x814] ss:$8 sps:$4 sm:$0xff]  }
 0x202   :  { %5543 = vmatpush1.bf16.msra.mxu0 %v7523_v7  ;;  %5052 = vmatprep.subr.bf16.mxu1 %v7528_v8  ;;  %v7615_v7 = vld [vmem:[#allocation5 + $0x1414] ss:$8 sps:$4 sm:$0xff]   ;;  %v120_v8 = vpack.c.bf16 %v72_v2, %v72_v2  ;;  %v7694_v2 = vld [vmem:[#allocation5 + $0x8f0] ss:$8 sps:$4 sm:$0xff]  }
 0x203   :  { %5544 = vmatprep.subr.bf16.mxu0 %v7531_v9  ;;  %v144_v9 = vpack.c.bf16 %v96_v3, %v96_v3  ;;  %v7697_v3 = vld [vmem:[#allocation5 + $0x14f0] ss:$8 sps:$4 sm:$0xff]  }
 0x205   :  { %5053 = vmatpush1.bf16.msra.mxu1 %v7526_v10  ;;  %v7610_v10 = vld [vmem:[#allocation5 + $0x810] ss:$8 sps:$4 sm:$0xff]  }
 0x206   :  { %5545 = vmatpush1.bf16.msra.mxu0 %v7529_v11  ;;  %5054 = vmatprep.subr.bf16.mxu1 %v7534_v12  ;;  %v7613_v11 = vld [vmem:[#allocation5 + $0x1410] ss:$8 sps:$4 sm:$0xff]   ;;  %v7618_v12 = vld [vmem:[#allocation5 + $0x824] ss:$8 sps:$4 sm:$0xff]  }
 0x207   :  { %5546 = vmatprep.subr.bf16.mxu0 %v7537_v13  ;;  %v7621_v13 = vld [vmem:[#allocation5 + $0x1424] ss:$8 sps:$4 sm:$0xff]  }
 0x209   :  { %5055 = vmatpush1.bf16.msra.mxu1 %v7532_v14  ;;  %v7616_v14 = vld [vmem:[#allocation5 + $0x820] ss:$8 sps:$4 sm:$0xff]  }
 0x20a   :  { %5547 = vmatpush1.bf16.msra.mxu0 %v7535_v15  ;;  %5056 = vmatprep.subr.bf16.mxu1 %v7540_v16  ;;  %v7619_v15 = vld [vmem:[#allocation5 + $0x1420] ss:$8 sps:$4 sm:$0xff]   ;;  %v7624_v16 = vld [vmem:[#allocation5 + $0x834] ss:$8 sps:$4 sm:$0xff]  }
 0x20b   :  { %5548 = vmatprep.subr.bf16.mxu0 %v7543_v17  ;;  %v7627_v17 = vld [vmem:[#allocation5 + $0x1434] ss:$8 sps:$4 sm:$0xff]  }
 0x20d   :  { %5057 = vmatpush1.bf16.msra.mxu1 %v7538_v18  ;;  %v7622_v18 = vld [vmem:[#allocation5 + $0x830] ss:$8 sps:$4 sm:$0xff]  }
 0x20e   :  { %5549 = vmatpush1.bf16.msra.mxu0 %v7541_v19  ;;  %5058 = vmatprep.subr.bf16.mxu1 %v7546_v20  ;;  %v7625_v19 = vld [vmem:[#allocation5 + $0x1430] ss:$8 sps:$4 sm:$0xff]   ;;  %v7630_v20 = vld [vmem:[#allocation5 + $0x844] ss:$8 sps:$4 sm:$0xff]  }
 0x20f   :  { %5550 = vmatprep.subr.bf16.mxu0 %v7549_v21  ;;  %v7633_v21 = vld [vmem:[#allocation5 + $0x1444] ss:$8 sps:$4 sm:$0xff]  }
 0x211   :  { %5059 = vmatpush1.bf16.msra.mxu1 %v7544_v22  ;;  %v7628_v22 = vld [vmem:[#allocation5 + $0x840] ss:$8 sps:$4 sm:$0xff]  }
 0x212   :  { %5551 = vmatpush1.bf16.msra.mxu0 %v7547_v23  ;;  %5060 = vmatprep.subr.bf16.mxu1 %v7552_v24  ;;  %v7631_v23 = vld [vmem:[#allocation5 + $0x1440] ss:$8 sps:$4 sm:$0xff]   ;;  %v7636_v24 = vld [vmem:[#allocation5 + $0x854] ss:$8 sps:$4 sm:$0xff]  }
 0x213   :  { %5552 = vmatprep.subr.bf16.mxu0 %v7555_v25  ;;  %v7639_v25 = vld [vmem:[#allocation5 + $0x1454] ss:$8 sps:$4 sm:$0xff]  }
 0x215   :  { %5061 = vmatpush1.bf16.msra.mxu1 %v7550_v26  ;;  %v7634_v26 = vld [vmem:[#allocation5 + $0x850] ss:$8 sps:$4 sm:$0xff]  }
 0x216   :  { %5553 = vmatpush1.bf16.msra.mxu0 %v7553_v27  ;;  %5062 = vmatprep.subr.bf16.mxu1 %v7558_v28  ;;  %v7637_v27 = vld [vmem:[#allocation5 + $0x1450] ss:$8 sps:$4 sm:$0xff]   ;;  %v7642_v28 = vld [vmem:[#allocation5 + $0x864] ss:$8 sps:$4 sm:$0xff]  }
 0x217   :  { %5554 = vmatprep.subr.bf16.mxu0 %v7561_v29  ;;  %v7645_v29 = vld [vmem:[#allocation5 + $0x1464] ss:$8 sps:$4 sm:$0xff]  }
 0x219   :  { %5063 = vmatpush1.bf16.msra.mxu1 %v7556_v30  ;;  %v7640_v30 = vld [vmem:[#allocation5 + $0x860] ss:$8 sps:$4 sm:$0xff]  }
 0x21a   :  { %5555 = vmatpush1.bf16.msra.mxu0 %v7559_v31  ;;  %5064 = vmatprep.subr.bf16.mxu1 %v7564_v32  ;;  %v7643_v31 = vld [vmem:[#allocation5 + $0x1460] ss:$8 sps:$4 sm:$0xff]   ;;  %v7648_v32 = vld [vmem:[#allocation5 + $0x874] ss:$8 sps:$4 sm:$0xff]  }
 0x21b   :  { %5556 = vmatprep.subr.bf16.mxu0 %v7567_v33  ;;  %v7651_v33 = vld [vmem:[#allocation5 + $0x1474] ss:$8 sps:$4 sm:$0xff]  }
 0x21d   :  { %5065 = vmatpush1.bf16.msra.mxu1 %v7562_v34  ;;  %v7646_v34 = vld [vmem:[#allocation5 + $0x870] ss:$8 sps:$4 sm:$0xff]  }
 0x21e   :  { %5557 = vmatpush1.bf16.msra.mxu0 %v7565_v35  ;;  %5066 = vmatprep.subr.bf16.mxu1 %v7570_v36  ;;  %v7649_v35 = vld [vmem:[#allocation5 + $0x1470] ss:$8 sps:$4 sm:$0xff]   ;;  %v7654_v36 = vld [vmem:[#allocation5 + $0x884] ss:$8 sps:$4 sm:$0xff]  }
 0x21f   :  { %5558 = vmatprep.subr.bf16.mxu0 %v7573_v37  ;;  %v7657_v37 = vld [vmem:[#allocation5 + $0x1484] ss:$8 sps:$4 sm:$0xff]  }
 0x221   :  { %5067 = vmatpush1.bf16.msra.mxu1 %v7568_v38  ;;  %v7652_v38 = vld [vmem:[#allocation5 + $0x880] ss:$8 sps:$4 sm:$0xff]  }
 0x222   :  { %5559 = vmatpush1.bf16.msra.mxu0 %v7571_v39  ;;  %5068 = vmatprep.subr.bf16.mxu1 %v7576_v40  ;;  %v7655_v39 = vld [vmem:[#allocation5 + $0x1480] ss:$8 sps:$4 sm:$0xff]   ;;  %v7660_v40 = vld [vmem:[#allocation5 + $0x894] ss:$8 sps:$4 sm:$0xff]  }
 0x223   :  { %5560 = vmatprep.subr.bf16.mxu0 %v7579_v41  ;;  %v7663_v41 = vld [vmem:[#allocation5 + $0x1494] ss:$8 sps:$4 sm:$0xff]  }
 0x225   :  { %5069 = vmatpush1.bf16.msra.mxu1 %v7574_v42  ;;  %v7658_v42 = vld [vmem:[#allocation5 + $0x890] ss:$8 sps:$4 sm:$0xff]  }
 0x226   :  { %5561 = vmatpush1.bf16.msra.mxu0 %v7577_v43  ;;  %5070 = vmatprep.subr.bf16.mxu1 %v7582_v44  ;;  %v7661_v43 = vld [vmem:[#allocation5 + $0x1490] ss:$8 sps:$4 sm:$0xff]   ;;  %v7666_v44 = vld [vmem:[#allocation5 + $0x8a4] ss:$8 sps:$4 sm:$0xff]  }
 0x227   :  { %5562 = vmatprep.subr.bf16.mxu0 %v7585_v45  ;;  %v7669_v45 = vld [vmem:[#allocation5 + $0x14a4] ss:$8 sps:$4 sm:$0xff]  }
 0x229   :  { %5071 = vmatpush1.bf16.msra.mxu1 %v7580_v46  ;;  %v7664_v46 = vld [vmem:[#allocation5 + $0x8a0] ss:$8 sps:$4 sm:$0xff]  }
 0x22a   :  { %5563 = vmatpush1.bf16.msra.mxu0 %v7583_v47  ;;  %5072 = vmatprep.subr.bf16.mxu1 %v7588_v48  ;;  %v7667_v47 = vld [vmem:[#allocation5 + $0x14a0] ss:$8 sps:$4 sm:$0xff]   ;;  %v7672_v48 = vld [vmem:[#allocation5 + $0x8b4] ss:$8 sps:$4 sm:$0xff]  }
 0x22b   :  { %5564 = vmatprep.subr.bf16.mxu0 %v7591_v49  ;;  %v7675_v49 = vld [vmem:[#allocation5 + $0x14b4] ss:$8 sps:$4 sm:$0xff]  }
 0x22d   :  { %5073 = vmatpush1.bf16.msra.mxu1 %v7586_v50  ;;  %v7670_v50 = vld [vmem:[#allocation5 + $0x8b0] ss:$8 sps:$4 sm:$0xff]  }
 0x22e   :  { %5565 = vmatpush1.bf16.msra.mxu0 %v7589_v51  ;;  %5074 = vmatprep.subr.bf16.mxu1 %v7594_v52  ;;  %v7673_v51 = vld [vmem:[#allocation5 + $0x14b0] ss:$8 sps:$4 sm:$0xff]   ;;  %v7678_v52 = vld [vmem:[#allocation5 + $0x8c4] ss:$8 sps:$4 sm:$0xff]  }
 0x22f   :  { %5566 = vmatprep.subr.bf16.mxu0 %v7597_v53  ;;  %v7681_v53 = vld [vmem:[#allocation5 + $0x14c4] ss:$8 sps:$4 sm:$0xff]  }
 0x231   :  { %5075 = vmatpush1.bf16.msra.mxu1 %v7592_v54  ;;  %v7676_v54 = vld [vmem:[#allocation5 + $0x8c0] ss:$8 sps:$4 sm:$0xff]  }
 0x232   :  { %5567 = vmatpush1.bf16.msra.mxu0 %v7595_v55  ;;  %5076 = vmatprep.subr.bf16.mxu1 %v7600_v56  ;;  %v7679_v55 = vld [vmem:[#allocation5 + $0x14c0] ss:$8 sps:$4 sm:$0xff]   ;;  %v7684_v56 = vld [vmem:[#allocation5 + $0x8d4] ss:$8 sps:$4 sm:$0xff]  }
 0x233   :  { %5568 = vmatprep.subr.bf16.mxu0 %v7603_v57  ;;  %v7687_v57 = vld [vmem:[#allocation5 + $0x14d4] ss:$8 sps:$4 sm:$0xff]  }
 0x235   :  { %5077 = vmatpush1.bf16.msra.mxu1 %v7598_v58  ;;  %v7682_v58 = vld [vmem:[#allocation5 + $0x8d0] ss:$8 sps:$4 sm:$0xff]  }
 0x236   :  { %5569 = vmatpush1.bf16.msra.mxu0 %v7601_v59  ;;  %5087 = vmatprep.subr.bf16.mxu1 %v7606_v62  ;;  %v7685_v59 = vld [vmem:[#allocation5 + $0x14d0] ss:$8 sps:$4 sm:$0xff]   ;;  %v7688_v62 = vld [vmem:[#allocation5 + $0x8e0] ss:$8 sps:$4 sm:$0xff]  }
 0x237   :  { %5579 = vmatprep.subr.bf16.mxu0 %v7609_v63  ;;  %v7691_v63 = vld [vmem:[#allocation5 + $0x14e0] ss:$8 sps:$4 sm:$0xff]  }
 0x238   :  { %5079 = vmatmul.mubr.bf16.vlgmr.msra.gmra.mrb[0].mxu1 %v117_v0  ;;  %v7696_v0 = vld [vmem:[#allocation5 + $0x8f4] ss:$8 sps:$4 sm:$0xff]  }
 0x239   :  { %5571 = vmatmul.mubr.bf16.vlgmr.msra.gmra.mrb[0].mxu0 %v141_v1  ;;  %5088 = vmatpush1.bf16.msra.mxu1 %v7604_v4  ;;  %v7699_v1 = vld [vmem:[#allocation5 + $0x14f4] ss:$8 sps:$4 sm:$0xff]   ;;  %v71_v4 = vld [vmem:[#allocation2 + $0x80] sm:$0xff] }
 0x23a   :  { %5580 = vmatpush1.bf16.msra.mxu0 %v7607_v5  ;;  %5089 = vmatprep.subr.bf16.mxu1 %v7612_v6  ;;  %v95_v5 = vld [vmem:[#allocation2 + $0x140] sm:$0xff] }
 0x23b   :  { %5581 = vmatprep.subr.bf16.mxu0 %v7615_v7  ;;  %5119 = vmatprep.mubr.bf16.mxu1 %v120_v8  ;;  %v7702_v6 = vld [vmem:[#allocation5 + $0x904] ss:$8 sps:$4 sm:$0xff]   ;;  %v119_v8 = vpack.c.bf16 %v71_v4, %v71_v4 }
 0x23c   :  { %5611 = vmatprep.mubr.bf16.mxu0 %v144_v9  ;;  %v7705_v7 = vld [vmem:[#allocation5 + $0x1504] ss:$8 sps:$4 sm:$0xff]   ;;  %v143_v9 = vpack.c.bf16 %v95_v5, %v95_v5 }
 0x23d   :  { %5090 = vmatpush1.bf16.msra.mxu1 %v7610_v10  ;;  %v74_v10 = vld [vmem:[#allocation2 + $0x98] sm:$0xff]  ;;  %v7786_v4 = vld [vmem:[#allocation5 + $0x9e4] ss:$8 sps:$4 sm:$0xff]  }
 0x23e   :  { %5582 = vmatpush1.bf16.msra.mxu0 %v7613_v11  ;;  %5091 = vmatprep.subr.bf16.mxu1 %v7618_v12  ;;  %v98_v11 = vld [vmem:[#allocation2 + $0x158] sm:$0xff]  ;;  %v7700_v12 = vld [vmem:[#allocation5 + $0x900] ss:$8 sps:$4 sm:$0xff]   ;;  %v7789_v5 = vld [vmem:[#allocation5 + $0x15e4] ss:$8 sps:$4 sm:$0xff]  }
 0x23f   :  { %5583 = vmatprep.subr.bf16.mxu0 %v7621_v13  ;;  %v7703_v13 = vld [vmem:[#allocation5 + $0x1500] ss:$8 sps:$4 sm:$0xff]  }
 0x241   :  { %5092 = vmatpush1.bf16.msra.mxu1 %v7616_v14  ;;  %v7708_v14 = vld [vmem:[#allocation5 + $0x914] ss:$8 sps:$4 sm:$0xff]  }
 0x242   :  { %5584 = vmatpush1.bf16.msra.mxu0 %v7619_v15  ;;  %5093 = vmatprep.subr.bf16.mxu1 %v7624_v16  ;;  %v7711_v15 = vld [vmem:[#allocation5 + $0x1514] ss:$8 sps:$4 sm:$0xff]   ;;  %v122_v16 = vpack.c.bf16 %v74_v10, %v74_v10  ;;  %v7790_v10 = vld [vmem:[#allocation5 + $0x9f0] ss:$8 sps:$4 sm:$0xff]  }
 0x243   :  { %5585 = vmatprep.subr.bf16.mxu0 %v7627_v17  ;;  %v146_v17 = vpack.c.bf16 %v98_v11, %v98_v11  ;;  %v7793_v11 = vld [vmem:[#allocation5 + $0x15f0] ss:$8 sps:$4 sm:$0xff]  }
 0x245   :  { %5094 = vmatpush1.bf16.msra.mxu1 %v7622_v18  ;;  %v7706_v18 = vld [vmem:[#allocation5 + $0x910] ss:$8 sps:$4 sm:$0xff]  }
 0x246   :  { %5586 = vmatpush1.bf16.msra.mxu0 %v7625_v19  ;;  %5095 = vmatprep.subr.bf16.mxu1 %v7630_v20  ;;  %v7709_v19 = vld [vmem:[#allocation5 + $0x1510] ss:$8 sps:$4 sm:$0xff]   ;;  %v7714_v20 = vld [vmem:[#allocation5 + $0x924] ss:$8 sps:$4 sm:$0xff]  }
 0x247   :  { %5587 = vmatprep.subr.bf16.mxu0 %v7633_v21  ;;  %v7717_v21 = vld [vmem:[#allocation5 + $0x1524] ss:$8 sps:$4 sm:$0xff]  }
 0x249   :  { %5096 = vmatpush1.bf16.msra.mxu1 %v7628_v22  ;;  %v7712_v22 = vld [vmem:[#allocation5 + $0x920] ss:$8 sps:$4 sm:$0xff]  }
 0x24a   :  { %5588 = vmatpush1.bf16.msra.mxu0 %v7631_v23  ;;  %5097 = vmatprep.subr.bf16.mxu1 %v7636_v24  ;;  %v7715_v23 = vld [vmem:[#allocation5 + $0x1520] ss:$8 sps:$4 sm:$0xff]   ;;  %v7720_v24 = vld [vmem:[#allocation5 + $0x934] ss:$8 sps:$4 sm:$0xff]  }
 0x24b   :  { %5589 = vmatprep.subr.bf16.mxu0 %v7639_v25  ;;  %v7723_v25 = vld [vmem:[#allocation5 + $0x1534] ss:$8 sps:$4 sm:$0xff]  }
 0x24d   :  { %5098 = vmatpush1.bf16.msra.mxu1 %v7634_v26  ;;  %v7718_v26 = vld [vmem:[#allocation5 + $0x930] ss:$8 sps:$4 sm:$0xff]  }
 0x24e   :  { %5590 = vmatpush1.bf16.msra.mxu0 %v7637_v27  ;;  %5099 = vmatprep.subr.bf16.mxu1 %v7642_v28  ;;  %v7721_v27 = vld [vmem:[#allocation5 + $0x1530] ss:$8 sps:$4 sm:$0xff]   ;;  %v7726_v28 = vld [vmem:[#allocation5 + $0x944] ss:$8 sps:$4 sm:$0xff]  }
 0x24f   :  { %5591 = vmatprep.subr.bf16.mxu0 %v7645_v29  ;;  %v7729_v29 = vld [vmem:[#allocation5 + $0x1544] ss:$8 sps:$4 sm:$0xff]  }
 0x251   :  { %5100 = vmatpush1.bf16.msra.mxu1 %v7640_v30  ;;  %v7724_v30 = vld [vmem:[#allocation5 + $0x940] ss:$8 sps:$4 sm:$0xff]  }
 0x252   :  { %5592 = vmatpush1.bf16.msra.mxu0 %v7643_v31  ;;  %5101 = vmatprep.subr.bf16.mxu1 %v7648_v32  ;;  %v7727_v31 = vld [vmem:[#allocation5 + $0x1540] ss:$8 sps:$4 sm:$0xff]   ;;  %v7732_v32 = vld [vmem:[#allocation5 + $0x954] ss:$8 sps:$4 sm:$0xff]  }
 0x253   :  { %5593 = vmatprep.subr.bf16.mxu0 %v7651_v33  ;;  %v7735_v33 = vld [vmem:[#allocation5 + $0x1554] ss:$8 sps:$4 sm:$0xff]  }
 0x255   :  { %5102 = vmatpush1.bf16.msra.mxu1 %v7646_v34  ;;  %v7730_v34 = vld [vmem:[#allocation5 + $0x950] ss:$8 sps:$4 sm:$0xff]  }
 0x256   :  { %5594 = vmatpush1.bf16.msra.mxu0 %v7649_v35  ;;  %5103 = vmatprep.subr.bf16.mxu1 %v7654_v36  ;;  %v7733_v35 = vld [vmem:[#allocation5 + $0x1550] ss:$8 sps:$4 sm:$0xff]   ;;  %v7738_v36 = vld [vmem:[#allocation5 + $0x964] ss:$8 sps:$4 sm:$0xff]  }
 0x257   :  { %5595 = vmatprep.subr.bf16.mxu0 %v7657_v37  ;;  %v7741_v37 = vld [vmem:[#allocation5 + $0x1564] ss:$8 sps:$4 sm:$0xff]  }
 0x259   :  { %5104 = vmatpush1.bf16.msra.mxu1 %v7652_v38  ;;  %v7736_v38 = vld [vmem:[#allocation5 + $0x960] ss:$8 sps:$4 sm:$0xff]  }
 0x25a   :  { %5596 = vmatpush1.bf16.msra.mxu0 %v7655_v39  ;;  %5105 = vmatprep.subr.bf16.mxu1 %v7660_v40  ;;  %v7739_v39 = vld [vmem:[#allocation5 + $0x1560] ss:$8 sps:$4 sm:$0xff]   ;;  %v7744_v40 = vld [vmem:[#allocation5 + $0x974] ss:$8 sps:$4 sm:$0xff]  }
 0x25b   :  { %5597 = vmatprep.subr.bf16.mxu0 %v7663_v41  ;;  %v7747_v41 = vld [vmem:[#allocation5 + $0x1574] ss:$8 sps:$4 sm:$0xff]  }
 0x25d   :  { %5106 = vmatpush1.bf16.msra.mxu1 %v7658_v42  ;;  %v7742_v42 = vld [vmem:[#allocation5 + $0x970] ss:$8 sps:$4 sm:$0xff]  }
 0x25e   :  { %5598 = vmatpush1.bf16.msra.mxu0 %v7661_v43  ;;  %5107 = vmatprep.subr.bf16.mxu1 %v7666_v44  ;;  %v7745_v43 = vld [vmem:[#allocation5 + $0x1570] ss:$8 sps:$4 sm:$0xff]   ;;  %v7750_v44 = vld [vmem:[#allocation5 + $0x984] ss:$8 sps:$4 sm:$0xff]  }
 0x25f   :  { %5599 = vmatprep.subr.bf16.mxu0 %v7669_v45  ;;  %v7753_v45 = vld [vmem:[#allocation5 + $0x1584] ss:$8 sps:$4 sm:$0xff]  }
 0x261   :  { %5108 = vmatpush1.bf16.msra.mxu1 %v7664_v46  ;;  %v7748_v46 = vld [vmem:[#allocation5 + $0x980] ss:$8 sps:$4 sm:$0xff]  }
 0x262   :  { %5600 = vmatpush1.bf16.msra.mxu0 %v7667_v47  ;;  %5109 = vmatprep.subr.bf16.mxu1 %v7672_v48  ;;  %v7751_v47 = vld [vmem:[#allocation5 + $0x1580] ss:$8 sps:$4 sm:$0xff]   ;;  %v7756_v48 = vld [vmem:[#allocation5 + $0x994] ss:$8 sps:$4 sm:$0xff]  }
 0x263   :  { %5601 = vmatprep.subr.bf16.mxu0 %v7675_v49  ;;  %v7759_v49 = vld [vmem:[#allocation5 + $0x1594] ss:$8 sps:$4 sm:$0xff]  }
 0x265   :  { %5110 = vmatpush1.bf16.msra.mxu1 %v7670_v50  ;;  %v7754_v50 = vld [vmem:[#allocation5 + $0x990] ss:$8 sps:$4 sm:$0xff]  }
 0x266   :  { %5602 = vmatpush1.bf16.msra.mxu0 %v7673_v51  ;;  %5111 = vmatprep.subr.bf16.mxu1 %v7678_v52  ;;  %v7757_v51 = vld [vmem:[#allocation5 + $0x1590] ss:$8 sps:$4 sm:$0xff]   ;;  %v7762_v52 = vld [vmem:[#allocation5 + $0x9a4] ss:$8 sps:$4 sm:$0xff]  }
 0x267   :  { %5603 = vmatprep.subr.bf16.mxu0 %v7681_v53  ;;  %v7765_v53 = vld [vmem:[#allocation5 + $0x15a4] ss:$8 sps:$4 sm:$0xff]  }
 0x269   :  { %5112 = vmatpush1.bf16.msra.mxu1 %v7676_v54  ;;  %v7760_v54 = vld [vmem:[#allocation5 + $0x9a0] ss:$8 sps:$4 sm:$0xff]  }
 0x26a   :  { %5604 = vmatpush1.bf16.msra.mxu0 %v7679_v55  ;;  %5113 = vmatprep.subr.bf16.mxu1 %v7684_v56  ;;  %v7763_v55 = vld [vmem:[#allocation5 + $0x15a0] ss:$8 sps:$4 sm:$0xff]   ;;  %v7768_v56 = vld [vmem:[#allocation5 + $0x9b4] ss:$8 sps:$4 sm:$0xff]  }
 0x26b   :  { %5605 = vmatprep.subr.bf16.mxu0 %v7687_v57  ;;  %v7771_v57 = vld [vmem:[#allocation5 + $0x15b4] ss:$8 sps:$4 sm:$0xff]  }
 0x26d   :  { %5114 = vmatpush1.bf16.msra.mxu1 %v7682_v58  ;;  %v7766_v58 = vld [vmem:[#allocation5 + $0x9b0] ss:$8 sps:$4 sm:$0xff]  }
 0x26e   :  { %5606 = vmatpush1.bf16.msra.mxu0 %v7685_v59  ;;  %5115 = vmatprep.subr.bf16.mxu1 %v7690_v60  ;;  %v7769_v59 = vld [vmem:[#allocation5 + $0x15b0] ss:$8 sps:$4 sm:$0xff]   ;;  %v7774_v60 = vld [vmem:[#allocation5 + $0x9c4] ss:$8 sps:$4 sm:$0xff]  }
 0x26f   :  { %5607 = vmatprep.subr.bf16.mxu0 %v7693_v61  ;;  %v7777_v61 = vld [vmem:[#allocation5 + $0x15c4] ss:$8 sps:$4 sm:$0xff]  }
 0x271   :  { %5116 = vmatpush1.bf16.msra.mxu1 %v7688_v62  ;;  %v7772_v62 = vld [vmem:[#allocation5 + $0x9c0] ss:$8 sps:$4 sm:$0xff]  }
 0x272   :  { %5608 = vmatpush1.bf16.msra.mxu0 %v7691_v63  ;;  %5117 = vmatprep.subr.bf16.mxu1 %v7696_v0  ;;  %v7775_v63 = vld [vmem:[#allocation5 + $0x15c0] ss:$8 sps:$4 sm:$0xff]   ;;  %v7780_v0 = vld [vmem:[#allocation5 + $0x9d4] ss:$8 sps:$4 sm:$0xff]  }
 0x273   :  { %5609 = vmatprep.subr.bf16.mxu0 %v7699_v1  ;;  %v7783_v1 = vld [vmem:[#allocation5 + $0x15d4] ss:$8 sps:$4 sm:$0xff]  }
 0x275   :  { %5118 = vmatpush1.bf16.msra.mxu1 %v7694_v2  ;;  %v7778_v2 = vld [vmem:[#allocation5 + $0x9d0] ss:$8 sps:$4 sm:$0xff]  }
 0x276   :  { %5610 = vmatpush1.bf16.msra.mxu0 %v7697_v3  ;;  %5128 = vmatprep.subr.bf16.mxu1 %v7702_v6  ;;  %v7781_v3 = vld [vmem:[#allocation5 + $0x15d0] ss:$8 sps:$4 sm:$0xff]   ;;  %v7784_v6 = vld [vmem:[#allocation5 + $0x9e0] ss:$8 sps:$4 sm:$0xff]  }
 0x277   :  { %5620 = vmatprep.subr.bf16.mxu0 %v7705_v7  ;;  %v7787_v7 = vld [vmem:[#allocation5 + $0x15e0] ss:$8 sps:$4 sm:$0xff]  }
 0x278   :  { %5120 = vmatmul.mubr.bf16.vlgmr.msra.gmra.mrb[0].mxu1 %v119_v8  ;;  %v7792_v8 = vld [vmem:[#allocation5 + $0x9f4] ss:$8 sps:$4 sm:$0xff]  }
 0x279   :  { %5612 = vmatmul.mubr.bf16.vlgmr.msra.gmra.mrb[0].mxu0 %v143_v9  ;;  %5129 = vmatpush1.bf16.msra.mxu1 %v7700_v12  ;;  %v7795_v9 = vld [vmem:[#allocation5 + $0x15f4] ss:$8 sps:$4 sm:$0xff]  }
 0x27a   :  { %5621 = vmatpush1.bf16.msra.mxu0 %v7703_v13  ;;  %5130 = vmatprep.subr.bf16.mxu1 %v7708_v14  ;;  %v73_v12 = vld [vmem:[#allocation2 + $0x90] sm:$0xff]  ;;  %v7798_v14 = vld [vmem:[#allocation5 + $0xa04] ss:$8 sps:$4 sm:$0xff]  }
 0x27b   :  { %5622 = vmatprep.subr.bf16.mxu0 %v7711_v15  ;;  %5160 = vmatprep.mubr.bf16.mxu1 %v122_v16  ;;  %v97_v13 = vld [vmem:[#allocation2 + $0x150] sm:$0xff]  ;;  %v7801_v15 = vld [vmem:[#allocation5 + $0x1604] ss:$8 sps:$4 sm:$0xff]   ;;  %v121_v16 = vpack.c.bf16 %v73_v12, %v73_v12 }
 0x27c   :  { %5652 = vmatprep.mubr.bf16.mxu0 %v146_v17  ;;  %v145_v17 = vpack.c.bf16 %v97_v13, %v97_v13  ;;  %v7882_v12 = vld [vmem:[#allocation5 + $0xae4] ss:$8 sps:$4 sm:$0xff]  }
 0x27d   :  { %5131 = vmatpush1.bf16.msra.mxu1 %v7706_v18  ;;  %v76_v18 = vld [vmem:[#allocation2 + $0xa8] sm:$0xff] }
 0x27e   :  { %5623 = vmatpush1.bf16.msra.mxu0 %v7709_v19  ;;  %5132 = vmatprep.subr.bf16.mxu1 %v7714_v20  ;;  %v100_v19 = vld [vmem:[#allocation2 + $0x168] sm:$0xff] }
 0x27f   :  { %5624 = vmatprep.subr.bf16.mxu0 %v7717_v21  ;;  %v7796_v20 = vld [vmem:[#allocation5 + $0xa00] ss:$8 sps:$4 sm:$0xff]   ;;  %v7885_v13 = vld [vmem:[#allocation5 + $0x16e4] ss:$8 sps:$4 sm:$0xff]  }
 0x280   :  { %v7799_v21 = vld [vmem:[#allocation5 + $0x1600] ss:$8 sps:$4 sm:$0xff]  }
 0x281   :  { %5133 = vmatpush1.bf16.msra.mxu1 %v7712_v22  ;;  %v7804_v22 = vld [vmem:[#allocation5 + $0xa14] ss:$8 sps:$4 sm:$0xff]  }
 0x282   :  { %5625 = vmatpush1.bf16.msra.mxu0 %v7715_v23  ;;  %5134 = vmatprep.subr.bf16.mxu1 %v7720_v24  ;;  %v7807_v23 = vld [vmem:[#allocation5 + $0x1614] ss:$8 sps:$4 sm:$0xff]   ;;  %v124_v24 = vpack.c.bf16 %v76_v18, %v76_v18  ;;  %v7886_v18 = vld [vmem:[#allocation5 + $0xaf0] ss:$8 sps:$4 sm:$0xff]  }
 0x283   :  { %5626 = vmatprep.subr.bf16.mxu0 %v7723_v25  ;;  %v148_v25 = vpack.c.bf16 %v100_v19, %v100_v19  ;;  %v7889_v19 = vld [vmem:[#allocation5 + $0x16f0] ss:$8 sps:$4 sm:$0xff]  }
 0x285   :  { %5135 = vmatpush1.bf16.msra.mxu1 %v7718_v26  ;;  %v7802_v26 = vld [vmem:[#allocation5 + $0xa10] ss:$8 sps:$4 sm:$0xff]  }
 0x286   :  { %5627 = vmatpush1.bf16.msra.mxu0 %v7721_v27  ;;  %5136 = vmatprep.subr.bf16.mxu1 %v7726_v28  ;;  %v7805_v27 = vld [vmem:[#allocation5 + $0x1610] ss:$8 sps:$4 sm:$0xff]   ;;  %v7810_v28 = vld [vmem:[#allocation5 + $0xa24] ss:$8 sps:$4 sm:$0xff]  }
 0x287   :  { %5628 = vmatprep.subr.bf16.mxu0 %v7729_v29  ;;  %v7813_v29 = vld [vmem:[#allocation5 + $0x1624] ss:$8 sps:$4 sm:$0xff]  }
 0x289   :  { %5137 = vmatpush1.bf16.msra.mxu1 %v7724_v30  ;;  %v7808_v30 = vld [vmem:[#allocation5 + $0xa20] ss:$8 sps:$4 sm:$0xff]  }
 0x28a   :  { %5629 = vmatpush1.bf16.msra.mxu0 %v7727_v31  ;;  %5138 = vmatprep.subr.bf16.mxu1 %v7732_v32  ;;  %v7811_v31 = vld [vmem:[#allocation5 + $0x1620] ss:$8 sps:$4 sm:$0xff]   ;;  %v7816_v32 = vld [vmem:[#allocation5 + $0xa34] ss:$8 sps:$4 sm:$0xff]  }
 0x28b   :  { %5630 = vmatprep.subr.bf16.mxu0 %v7735_v33  ;;  %v7819_v33 = vld [vmem:[#allocation5 + $0x1634] ss:$8 sps:$4 sm:$0xff]  }
 0x28d   :  { %5139 = vmatpush1.bf16.msra.mxu1 %v7730_v34  ;;  %v7814_v34 = vld [vmem:[#allocation5 + $0xa30] ss:$8 sps:$4 sm:$0xff]  }
 0x28e   :  { %5631 = vmatpush1.bf16.msra.mxu0 %v7733_v35  ;;  %5140 = vmatprep.subr.bf16.mxu1 %v7738_v36  ;;  %v7817_v35 = vld [vmem:[#allocation5 + $0x1630] ss:$8 sps:$4 sm:$0xff]   ;;  %v7822_v36 = vld [vmem:[#allocation5 + $0xa44] ss:$8 sps:$4 sm:$0xff]  }
 0x28f   :  { %5632 = vmatprep.subr.bf16.mxu0 %v7741_v37  ;;  %v7825_v37 = vld [vmem:[#allocation5 + $0x1644] ss:$8 sps:$4 sm:$0xff]  }
 0x291   :  { %5141 = vmatpush1.bf16.msra.mxu1 %v7736_v38  ;;  %v7820_v38 = vld [vmem:[#allocation5 + $0xa40] ss:$8 sps:$4 sm:$0xff]  }
 0x292   :  { %5633 = vmatpush1.bf16.msra.mxu0 %v7739_v39  ;;  %5142 = vmatprep.subr.bf16.mxu1 %v7744_v40  ;;  %v7823_v39 = vld [vmem:[#allocation5 + $0x1640] ss:$8 sps:$4 sm:$0xff]   ;;  %v7828_v40 = vld [vmem:[#allocation5 + $0xa54] ss:$8 sps:$4 sm:$0xff]  }
 0x293   :  { %5634 = vmatprep.subr.bf16.mxu0 %v7747_v41  ;;  %v7831_v41 = vld [vmem:[#allocation5 + $0x1654] ss:$8 sps:$4 sm:$0xff]  }
 0x295   :  { %5143 = vmatpush1.bf16.msra.mxu1 %v7742_v42  ;;  %v7826_v42 = vld [vmem:[#allocation5 + $0xa50] ss:$8 sps:$4 sm:$0xff]  }
 0x296   :  { %5635 = vmatpush1.bf16.msra.mxu0 %v7745_v43  ;;  %5144 = vmatprep.subr.bf16.mxu1 %v7750_v44  ;;  %v7829_v43 = vld [vmem:[#allocation5 + $0x1650] ss:$8 sps:$4 sm:$0xff]   ;;  %v7834_v44 = vld [vmem:[#allocation5 + $0xa64] ss:$8 sps:$4 sm:$0xff]  }
 0x297   :  { %5636 = vmatprep.subr.bf16.mxu0 %v7753_v45  ;;  %v7837_v45 = vld [vmem:[#allocation5 + $0x1664] ss:$8 sps:$4 sm:$0xff]  }
 0x299   :  { %5145 = vmatpush1.bf16.msra.mxu1 %v7748_v46  ;;  %v7832_v46 = vld [vmem:[#allocation5 + $0xa60] ss:$8 sps:$4 sm:$0xff]  }
 0x29a   :  { %5637 = vmatpush1.bf16.msra.mxu0 %v7751_v47  ;;  %5146 = vmatprep.subr.bf16.mxu1 %v7756_v48  ;;  %v7835_v47 = vld [vmem:[#allocation5 + $0x1660] ss:$8 sps:$4 sm:$0xff]   ;;  %v7840_v48 = vld [vmem:[#allocation5 + $0xa74] ss:$8 sps:$4 sm:$0xff]  }
 0x29b   :  { %5638 = vmatprep.subr.bf16.mxu0 %v7759_v49  ;;  %v7843_v49 = vld [vmem:[#allocation5 + $0x1674] ss:$8 sps:$4 sm:$0xff]  }
 0x29d   :  { %5147 = vmatpush1.bf16.msra.mxu1 %v7754_v50  ;;  %v7838_v50 = vld [vmem:[#allocation5 + $0xa70] ss:$8 sps:$4 sm:$0xff]  }
 0x29e   :  { %5639 = vmatpush1.bf16.msra.mxu0 %v7757_v51  ;;  %5148 = vmatprep.subr.bf16.mxu1 %v7762_v52  ;;  %v7841_v51 = vld [vmem:[#allocation5 + $0x1670] ss:$8 sps:$4 sm:$0xff]   ;;  %v7846_v52 = vld [vmem:[#allocation5 + $0xa84] ss:$8 sps:$4 sm:$0xff]  }
 0x29f   :  { %5640 = vmatprep.subr.bf16.mxu0 %v7765_v53  ;;  %v7849_v53 = vld [vmem:[#allocation5 + $0x1684] ss:$8 sps:$4 sm:$0xff]  }
 0x2a1   :  { %5149 = vmatpush1.bf16.msra.mxu1 %v7760_v54  ;;  %v7844_v54 = vld [vmem:[#allocation5 + $0xa80] ss:$8 sps:$4 sm:$0xff]  }
 0x2a2   :  { %5641 = vmatpush1.bf16.msra.mxu0 %v7763_v55  ;;  %5150 = vmatprep.subr.bf16.mxu1 %v7768_v56  ;;  %v7847_v55 = vld [vmem:[#allocation5 + $0x1680] ss:$8 sps:$4 sm:$0xff]   ;;  %v7852_v56 = vld [vmem:[#allocation5 + $0xa94] ss:$8 sps:$4 sm:$0xff]  }
 0x2a3   :  { %5642 = vmatprep.subr.bf16.mxu0 %v7771_v57  ;;  %v7855_v57 = vld [vmem:[#allocation5 + $0x1694] ss:$8 sps:$4 sm:$0xff]  }
 0x2a5   :  { %5151 = vmatpush1.bf16.msra.mxu1 %v7766_v58  ;;  %v7850_v58 = vld [vmem:[#allocation5 + $0xa90] ss:$8 sps:$4 sm:$0xff]  }
 0x2a6   :  { %5643 = vmatpush1.bf16.msra.mxu0 %v7769_v59  ;;  %5152 = vmatprep.subr.bf16.mxu1 %v7774_v60  ;;  %v7853_v59 = vld [vmem:[#allocation5 + $0x1690] ss:$8 sps:$4 sm:$0xff]   ;;  %v7858_v60 = vld [vmem:[#allocation5 + $0xaa4] ss:$8 sps:$4 sm:$0xff]  }
 0x2a7   :  { %5644 = vmatprep.subr.bf16.mxu0 %v7777_v61  ;;  %v7861_v61 = vld [vmem:[#allocation5 + $0x16a4] ss:$8 sps:$4 sm:$0xff]  }
 0x2a9   :  { %5153 = vmatpush1.bf16.msra.mxu1 %v7772_v62  ;;  %v7856_v62 = vld [vmem:[#allocation5 + $0xaa0] ss:$8 sps:$4 sm:$0xff]  }
 0x2aa   :  { %5645 = vmatpush1.bf16.msra.mxu0 %v7775_v63  ;;  %5154 = vmatprep.subr.bf16.mxu1 %v7780_v0  ;;  %v7859_v63 = vld [vmem:[#allocation5 + $0x16a0] ss:$8 sps:$4 sm:$0xff]   ;;  %v7864_v0 = vld [vmem:[#allocation5 + $0xab4] ss:$8 sps:$4 sm:$0xff]  }
 0x2ab   :  { %5646 = vmatprep.subr.bf16.mxu0 %v7783_v1  ;;  %v7867_v1 = vld [vmem:[#allocation5 + $0x16b4] ss:$8 sps:$4 sm:$0xff]  }
 0x2ad   :  { %5155 = vmatpush1.bf16.msra.mxu1 %v7778_v2  ;;  %v7862_v2 = vld [vmem:[#allocation5 + $0xab0] ss:$8 sps:$4 sm:$0xff]  }
 0x2ae   :  { %5647 = vmatpush1.bf16.msra.mxu0 %v7781_v3  ;;  %5156 = vmatprep.subr.bf16.mxu1 %v7786_v4  ;;  %v7865_v3 = vld [vmem:[#allocation5 + $0x16b0] ss:$8 sps:$4 sm:$0xff]   ;;  %v7870_v4 = vld [vmem:[#allocation5 + $0xac4] ss:$8 sps:$4 sm:$0xff]  }
 0x2af   :  { %5648 = vmatprep.subr.bf16.mxu0 %v7789_v5  ;;  %v7873_v5 = vld [vmem:[#allocation5 + $0x16c4] ss:$8 sps:$4 sm:$0xff]  }
 0x2b1   :  { %5157 = vmatpush1.bf16.msra.mxu1 %v7784_v6  ;;  %v7868_v6 = vld [vmem:[#allocation5 + $0xac0] ss:$8 sps:$4 sm:$0xff]  }
 0x2b2   :  { %5649 = vmatpush1.bf16.msra.mxu0 %v7787_v7  ;;  %5158 = vmatprep.subr.bf16.mxu1 %v7792_v8  ;;  %v7871_v7 = vld [vmem:[#allocation5 + $0x16c0] ss:$8 sps:$4 sm:$0xff]   ;;  %v7876_v8 = vld [vmem:[#allocation5 + $0xad4] ss:$8 sps:$4 sm:$0xff]  }
 0x2b3   :  { %5650 = vmatprep.subr.bf16.mxu0 %v7795_v9  ;;  %v7879_v9 = vld [vmem:[#allocation5 + $0x16d4] ss:$8 sps:$4 sm:$0xff]  }
 0x2b5   :  { %5159 = vmatpush1.bf16.msra.mxu1 %v7790_v10  ;;  %v7874_v10 = vld [vmem:[#allocation5 + $0xad0] ss:$8 sps:$4 sm:$0xff]  }
 0x2b6   :  { %5651 = vmatpush1.bf16.msra.mxu0 %v7793_v11  ;;  %5169 = vmatprep.subr.bf16.mxu1 %v7798_v14  ;;  %v7877_v11 = vld [vmem:[#allocation5 + $0x16d0] ss:$8 sps:$4 sm:$0xff]   ;;  %v7880_v14 = vld [vmem:[#allocation5 + $0xae0] ss:$8 sps:$4 sm:$0xff]  }
 0x2b7   :  { %5661 = vmatprep.subr.bf16.mxu0 %v7801_v15  ;;  %v7883_v15 = vld [vmem:[#allocation5 + $0x16e0] ss:$8 sps:$4 sm:$0xff]  }
 0x2b8   :  { %5161 = vmatmul.mubr.bf16.vlgmr.msra.gmra.mrb[0].mxu1 %v121_v16  ;;  %v7888_v16 = vld [vmem:[#allocation5 + $0xaf4] ss:$8 sps:$4 sm:$0xff]  }
 0x2b9   :  { %5653 = vmatmul.mubr.bf16.vlgmr.msra.gmra.mrb[0].mxu0 %v145_v17  ;;  %5170 = vmatpush1.bf16.msra.mxu1 %v7796_v20  ;;  %v7891_v17 = vld [vmem:[#allocation5 + $0x16f4] ss:$8 sps:$4 sm:$0xff]   ;;  %v75_v20 = vld [vmem:[#allocation2 + $0xa0] sm:$0xff] }
 0x2ba   :  { %5662 = vmatpush1.bf16.msra.mxu0 %v7799_v21  ;;  %5171 = vmatprep.subr.bf16.mxu1 %v7804_v22  ;;  %v99_v21 = vld [vmem:[#allocation2 + $0x160] sm:$0xff] }
 0x2bb   :  { %5663 = vmatprep.subr.bf16.mxu0 %v7807_v23  ;;  %5201 = vmatprep.mubr.bf16.mxu1 %v124_v24  ;;  %v7894_v22 = vld [vmem:[#allocation5 + $0xb04] ss:$8 sps:$4 sm:$0xff]   ;;  %v123_v24 = vpack.c.bf16 %v75_v20, %v75_v20 }
 0x2bc   :  { %5693 = vmatprep.mubr.bf16.mxu0 %v148_v25  ;;  %v7897_v23 = vld [vmem:[#allocation5 + $0x1704] ss:$8 sps:$4 sm:$0xff]   ;;  %v147_v25 = vpack.c.bf16 %v99_v21, %v99_v21 }
 0x2bd   :  { %5172 = vmatpush1.bf16.msra.mxu1 %v7802_v26  ;;  %v78_v26 = vld [vmem:[#allocation2 + $0xb8] sm:$0xff]  ;;  %v7978_v20 = vld [vmem:[#allocation5 + $0xbe4] ss:$8 sps:$4 sm:$0xff]  }
 0x2be   :  { %5664 = vmatpush1.bf16.msra.mxu0 %v7805_v27  ;;  %5173 = vmatprep.subr.bf16.mxu1 %v7810_v28  ;;  %v102_v27 = vld [vmem:[#allocation2 + $0x178] sm:$0xff]  ;;  %v7892_v28 = vld [vmem:[#allocation5 + $0xb00] ss:$8 sps:$4 sm:$0xff]   ;;  %v7981_v21 = vld [vmem:[#allocation5 + $0x17e4] ss:$8 sps:$4 sm:$0xff]  }
 0x2bf   :  { %5665 = vmatprep.subr.bf16.mxu0 %v7813_v29  ;;  %v7895_v29 = vld [vmem:[#allocation5 + $0x1700] ss:$8 sps:$4 sm:$0xff]  }
 0x2c1   :  { %5174 = vmatpush1.bf16.msra.mxu1 %v7808_v30  ;;  %v7900_v30 = vld [vmem:[#allocation5 + $0xb14] ss:$8 sps:$4 sm:$0xff]  }
 0x2c2   :  { %5666 = vmatpush1.bf16.msra.mxu0 %v7811_v31  ;;  %5175 = vmatprep.subr.bf16.mxu1 %v7816_v32  ;;  %v7903_v31 = vld [vmem:[#allocation5 + $0x1714] ss:$8 sps:$4 sm:$0xff]   ;;  %v126_v32 = vpack.c.bf16 %v78_v26, %v78_v26  ;;  %v7982_v26 = vld [vmem:[#allocation5 + $0xbf0] ss:$8 sps:$4 sm:$0xff]  }
 0x2c3   :  { %5667 = vmatprep.subr.bf16.mxu0 %v7819_v33  ;;  %v150_v33 = vpack.c.bf16 %v102_v27, %v102_v27  ;;  %v7985_v27 = vld [vmem:[#allocation5 + $0x17f0] ss:$8 sps:$4 sm:$0xff]  }
 0x2c5   :  { %5176 = vmatpush1.bf16.msra.mxu1 %v7814_v34  ;;  %v7898_v34 = vld [vmem:[#allocation5 + $0xb10] ss:$8 sps:$4 sm:$0xff]  }
 0x2c6   :  { %5668 = vmatpush1.bf16.msra.mxu0 %v7817_v35  ;;  %5177 = vmatprep.subr.bf16.mxu1 %v7822_v36  ;;  %v7901_v35 = vld [vmem:[#allocation5 + $0x1710] ss:$8 sps:$4 sm:$0xff]   ;;  %v7906_v36 = vld [vmem:[#allocation5 + $0xb24] ss:$8 sps:$4 sm:$0xff]  }
 0x2c7   :  { %5669 = vmatprep.subr.bf16.mxu0 %v7825_v37  ;;  %v7909_v37 = vld [vmem:[#allocation5 + $0x1724] ss:$8 sps:$4 sm:$0xff]  }
 0x2c9   :  { %5178 = vmatpush1.bf16.msra.mxu1 %v7820_v38  ;;  %v7904_v38 = vld [vmem:[#allocation5 + $0xb20] ss:$8 sps:$4 sm:$0xff]  }
 0x2ca   :  { %5670 = vmatpush1.bf16.msra.mxu0 %v7823_v39  ;;  %5179 = vmatprep.subr.bf16.mxu1 %v7828_v40  ;;  %v7907_v39 = vld [vmem:[#allocation5 + $0x1720] ss:$8 sps:$4 sm:$0xff]   ;;  %v7912_v40 = vld [vmem:[#allocation5 + $0xb34] ss:$8 sps:$4 sm:$0xff]  }
 0x2cb   :  { %5671 = vmatprep.subr.bf16.mxu0 %v7831_v41  ;;  %v7915_v41 = vld [vmem:[#allocation5 + $0x1734] ss:$8 sps:$4 sm:$0xff]  }
 0x2cd   :  { %5180 = vmatpush1.bf16.msra.mxu1 %v7826_v42  ;;  %v7910_v42 = vld [vmem:[#allocation5 + $0xb30] ss:$8 sps:$4 sm:$0xff]  }
 0x2ce   :  { %5672 = vmatpush1.bf16.msra.mxu0 %v7829_v43  ;;  %5181 = vmatprep.subr.bf16.mxu1 %v7834_v44  ;;  %v7913_v43 = vld [vmem:[#allocation5 + $0x1730] ss:$8 sps:$4 sm:$0xff]   ;;  %v7918_v44 = vld [vmem:[#allocation5 + $0xb44] ss:$8 sps:$4 sm:$0xff]  }
 0x2cf   :  { %5673 = vmatprep.subr.bf16.mxu0 %v7837_v45  ;;  %v7921_v45 = vld [vmem:[#allocation5 + $0x1744] ss:$8 sps:$4 sm:$0xff]  }
 0x2d1   :  { %5182 = vmatpush1.bf16.msra.mxu1 %v7832_v46  ;;  %v7916_v46 = vld [vmem:[#allocation5 + $0xb40] ss:$8 sps:$4 sm:$0xff]  }
 0x2d2   :  { %5674 = vmatpush1.bf16.msra.mxu0 %v7835_v47  ;;  %5183 = vmatprep.subr.bf16.mxu1 %v7840_v48  ;;  %v7919_v47 = vld [vmem:[#allocation5 + $0x1740] ss:$8 sps:$4 sm:$0xff]   ;;  %v7924_v48 = vld [vmem:[#allocation5 + $0xb54] ss:$8 sps:$4 sm:$0xff]  }
 0x2d3   :  { %5675 = vmatprep.subr.bf16.mxu0 %v7843_v49  ;;  %v7927_v49 = vld [vmem:[#allocation5 + $0x1754] ss:$8 sps:$4 sm:$0xff]  }
 0x2d5   :  { %5184 = vmatpush1.bf16.msra.mxu1 %v7838_v50  ;;  %v7922_v50 = vld [vmem:[#allocation5 + $0xb50] ss:$8 sps:$4 sm:$0xff]  }
 0x2d6   :  { %5676 = vmatpush1.bf16.msra.mxu0 %v7841_v51  ;;  %5185 = vmatprep.subr.bf16.mxu1 %v7846_v52  ;;  %v7925_v51 = vld [vmem:[#allocation5 + $0x1750] ss:$8 sps:$4 sm:$0xff]   ;;  %v7930_v52 = vld [vmem:[#allocation5 + $0xb64] ss:$8 sps:$4 sm:$0xff]  }
 0x2d7   :  { %5677 = vmatprep.subr.bf16.mxu0 %v7849_v53  ;;  %v7933_v53 = vld [vmem:[#allocation5 + $0x1764] ss:$8 sps:$4 sm:$0xff]  }
 0x2d9   :  { %5186 = vmatpush1.bf16.msra.mxu1 %v7844_v54  ;;  %v7928_v54 = vld [vmem:[#allocation5 + $0xb60] ss:$8 sps:$4 sm:$0xff]  }
 0x2da   :  { %5678 = vmatpush1.bf16.msra.mxu0 %v7847_v55  ;;  %5187 = vmatprep.subr.bf16.mxu1 %v7852_v56  ;;  %v7931_v55 = vld [vmem:[#allocation5 + $0x1760] ss:$8 sps:$4 sm:$0xff]   ;;  %v7936_v56 = vld [vmem:[#allocation5 + $0xb74] ss:$8 sps:$4 sm:$0xff]  }
 0x2db   :  { %5679 = vmatprep.subr.bf16.mxu0 %v7855_v57  ;;  %v7939_v57 = vld [vmem:[#allocation5 + $0x1774] ss:$8 sps:$4 sm:$0xff]  }
 0x2dd   :  { %5188 = vmatpush1.bf16.msra.mxu1 %v7850_v58  ;;  %v7934_v58 = vld [vmem:[#allocation5 + $0xb70] ss:$8 sps:$4 sm:$0xff]  }
 0x2de   :  { %5680 = vmatpush1.bf16.msra.mxu0 %v7853_v59  ;;  %5189 = vmatprep.subr.bf16.mxu1 %v7858_v60  ;;  %v7937_v59 = vld [vmem:[#allocation5 + $0x1770] ss:$8 sps:$4 sm:$0xff]   ;;  %v7942_v60 = vld [vmem:[#allocation5 + $0xb84] ss:$8 sps:$4 sm:$0xff]  }
 0x2df   :  { %5681 = vmatprep.subr.bf16.mxu0 %v7861_v61  ;;  %v7945_v61 = vld [vmem:[#allocation5 + $0x1784] ss:$8 sps:$4 sm:$0xff]  }
 0x2e1   :  { %5190 = vmatpush1.bf16.msra.mxu1 %v7856_v62  ;;  %v7940_v62 = vld [vmem:[#allocation5 + $0xb80] ss:$8 sps:$4 sm:$0xff]  }
 0x2e2   :  { %5682 = vmatpush1.bf16.msra.mxu0 %v7859_v63  ;;  %5191 = vmatprep.subr.bf16.mxu1 %v7864_v0  ;;  %v7943_v63 = vld [vmem:[#allocation5 + $0x1780] ss:$8 sps:$4 sm:$0xff]   ;;  %v7948_v0 = vld [vmem:[#allocation5 + $0xb94] ss:$8 sps:$4 sm:$0xff]  }
 0x2e3   :  { %5683 = vmatprep.subr.bf16.mxu0 %v7867_v1  ;;  %v7951_v1 = vld [vmem:[#allocation5 + $0x1794] ss:$8 sps:$4 sm:$0xff]  }
 0x2e5   :  { %5192 = vmatpush1.bf16.msra.mxu1 %v7862_v2  ;;  %v7946_v2 = vld [vmem:[#allocation5 + $0xb90] ss:$8 sps:$4 sm:$0xff]  }
 0x2e6   :  { %5684 = vmatpush1.bf16.msra.mxu0 %v7865_v3  ;;  %5193 = vmatprep.subr.bf16.mxu1 %v7870_v4  ;;  %v7949_v3 = vld [vmem:[#allocation5 + $0x1790] ss:$8 sps:$4 sm:$0xff]   ;;  %v7954_v4 = vld [vmem:[#allocation5 + $0xba4] ss:$8 sps:$4 sm:$0xff]  }
 0x2e7   :  { %5685 = vmatprep.subr.bf16.mxu0 %v7873_v5  ;;  %v7957_v5 = vld [vmem:[#allocation5 + $0x17a4] ss:$8 sps:$4 sm:$0xff]  }
 0x2e9   :  { %5194 = vmatpush1.bf16.msra.mxu1 %v7868_v6  ;;  %v7952_v6 = vld [vmem:[#allocation5 + $0xba0] ss:$8 sps:$4 sm:$0xff]  }
 0x2ea   :  { %5686 = vmatpush1.bf16.msra.mxu0 %v7871_v7  ;;  %5195 = vmatprep.subr.bf16.mxu1 %v7876_v8  ;;  %v7955_v7 = vld [vmem:[#allocation5 + $0x17a0] ss:$8 sps:$4 sm:$0xff]   ;;  %v7960_v8 = vld [vmem:[#allocation5 + $0xbb4] ss:$8 sps:$4 sm:$0xff]  }
 0x2eb   :  { %5687 = vmatprep.subr.bf16.mxu0 %v7879_v9  ;;  %v7963_v9 = vld [vmem:[#allocation5 + $0x17b4] ss:$8 sps:$4 sm:$0xff]  }
 0x2ed   :  { %5196 = vmatpush1.bf16.msra.mxu1 %v7874_v10  ;;  %v7958_v10 = vld [vmem:[#allocation5 + $0xbb0] ss:$8 sps:$4 sm:$0xff]  }
 0x2ee   :  { %5688 = vmatpush1.bf16.msra.mxu0 %v7877_v11  ;;  %5197 = vmatprep.subr.bf16.mxu1 %v7882_v12  ;;  %v7961_v11 = vld [vmem:[#allocation5 + $0x17b0] ss:$8 sps:$4 sm:$0xff]   ;;  %v7966_v12 = vld [vmem:[#allocation5 + $0xbc4] ss:$8 sps:$4 sm:$0xff]  }
 0x2ef   :  { %5689 = vmatprep.subr.bf16.mxu0 %v7885_v13  ;;  %v7969_v13 = vld [vmem:[#allocation5 + $0x17c4] ss:$8 sps:$4 sm:$0xff]  }
 0x2f1   :  { %5198 = vmatpush1.bf16.msra.mxu1 %v7880_v14  ;;  %v7964_v14 = vld [vmem:[#allocation5 + $0xbc0] ss:$8 sps:$4 sm:$0xff]  }
 0x2f2   :  { %5690 = vmatpush1.bf16.msra.mxu0 %v7883_v15  ;;  %5199 = vmatprep.subr.bf16.mxu1 %v7888_v16  ;;  %v7967_v15 = vld [vmem:[#allocation5 + $0x17c0] ss:$8 sps:$4 sm:$0xff]   ;;  %v7972_v16 = vld [vmem:[#allocation5 + $0xbd4] ss:$8 sps:$4 sm:$0xff]  }
 0x2f3   :  { %5691 = vmatprep.subr.bf16.mxu0 %v7891_v17  ;;  %v7975_v17 = vld [vmem:[#allocation5 + $0x17d4] ss:$8 sps:$4 sm:$0xff]  }
 0x2f5   :  { %5200 = vmatpush1.bf16.msra.mxu1 %v7886_v18  ;;  %v7970_v18 = vld [vmem:[#allocation5 + $0xbd0] ss:$8 sps:$4 sm:$0xff]  }
 0x2f6   :  { %5692 = vmatpush1.bf16.msra.mxu0 %v7889_v19  ;;  %5210 = vmatprep.subr.bf16.mxu1 %v7894_v22  ;;  %v7973_v19 = vld [vmem:[#allocation5 + $0x17d0] ss:$8 sps:$4 sm:$0xff]   ;;  %v7976_v22 = vld [vmem:[#allocation5 + $0xbe0] ss:$8 sps:$4 sm:$0xff]  }
 0x2f7   :  { %5702 = vmatprep.subr.bf16.mxu0 %v7897_v23  ;;  %v7979_v23 = vld [vmem:[#allocation5 + $0x17e0] ss:$8 sps:$4 sm:$0xff]  }
 0x2f8   :  { %5202 = vmatmul.mubr.bf16.vlgmr.msra.gmra.mrb[0].mxu1 %v123_v24  ;;  %v7984_v24 = vld [vmem:[#allocation5 + $0xbf4] ss:$8 sps:$4 sm:$0xff]  }
 0x2f9   :  { %5694 = vmatmul.mubr.bf16.vlgmr.msra.gmra.mrb[0].mxu0 %v147_v25  ;;  %5211 = vmatpush1.bf16.msra.mxu1 %v7892_v28  ;;  %v7987_v25 = vld [vmem:[#allocation5 + $0x17f4] ss:$8 sps:$4 sm:$0xff]  }
 0x2fa   :  { %5703 = vmatpush1.bf16.msra.mxu0 %v7895_v29  ;;  %5212 = vmatprep.subr.bf16.mxu1 %v7900_v30  ;;  %v77_v28 = vld [vmem:[#allocation2 + $0xb0] sm:$0xff]  ;;  %v7988_v30 = vld [vmem:[#allocation7 + $0x40] sm:$0xff]  }
 0x2fb   :  { %5704 = vmatprep.subr.bf16.mxu0 %v7903_v31  ;;  %5242 = vmatprep.mubr.bf16.mxu1 %v126_v32  ;;  %v101_v29 = vld [vmem:[#allocation2 + $0x170] sm:$0xff]  ;;  %v125_v31 = vpack.c.bf16 %v77_v28, %v77_v28 }
 0x2fc   :  { %5734 = vmatprep.mubr.bf16.mxu0 %v150_v33  ;;  %v149_v32 = vpack.c.bf16 %v101_v29, %v101_v29  ;;  %v7989_v33 = vld [vmem:[#allocation7] sm:$0xff]  }
 0x2fd   :  { %5213 = vmatpush1.bf16.msra.mxu1 %v7898_v34  ;;  %v7990_v34 = vld [vmem:[#allocation7 + $0x48] sm:$0xff]  }
 0x2fe   :  { %5705 = vmatpush1.bf16.msra.mxu0 %v7901_v35  ;;  %5214 = vmatprep.subr.bf16.mxu1 %v7906_v36  ;;  %v7991_v35 = vld [vmem:[#allocation7 + $0x8] sm:$0xff]   ;;  %v7992_v36 = vld [vmem:[#allocation7 + $0x50] sm:$0xff]  }
 0x2ff   :  { %5706 = vmatprep.subr.bf16.mxu0 %v7909_v37  ;;  %v7993_v37 = vld [vmem:[#allocation7 + $0x10] sm:$0xff]  }
 0x301   :  { %5215 = vmatpush1.bf16.msra.mxu1 %v7904_v38  ;;  %v7994_v38 = vld [vmem:[#allocation7 + $0x58] sm:$0xff]  }
 0x302   :  { %5707 = vmatpush1.bf16.msra.mxu0 %v7907_v39  ;;  %5216 = vmatprep.subr.bf16.mxu1 %v7912_v40  ;;  %v7995_v39 = vld [vmem:[#allocation7 + $0x18] sm:$0xff]   ;;  %v7996_v40 = vld [vmem:[#allocation7 + $0x60] sm:$0xff]  }
 0x303   :  { %5708 = vmatprep.subr.bf16.mxu0 %v7915_v41  ;;  %v7997_v41 = vld [vmem:[#allocation7 + $0x20] sm:$0xff]  }
 0x305   :  { %5217 = vmatpush1.bf16.msra.mxu1 %v7910_v42  ;;  %v7998_v42 = vld [vmem:[#allocation7 + $0x68] sm:$0xff]  }
 0x306   :  { %5709 = vmatpush1.bf16.msra.mxu0 %v7913_v43  ;;  %5218 = vmatprep.subr.bf16.mxu1 %v7918_v44  ;;  %v7999_v43 = vld [vmem:[#allocation7 + $0x28] sm:$0xff]   ;;  %v8000_v44 = vld [vmem:[#allocation7 + $0x70] sm:$0xff]  }
 0x307   :  { %5710 = vmatprep.subr.bf16.mxu0 %v7921_v45  ;;  %v8001_v45 = vld [vmem:[#allocation7 + $0x30] sm:$0xff]  }
 0x309   :  { %5219 = vmatpush1.bf16.msra.mxu1 %v7916_v46  ;;  %v8002_v46 = vld [vmem:[#allocation7 + $0x78] sm:$0xff]  }
 0x30a   :  { %5711 = vmatpush1.bf16.msra.mxu0 %v7919_v47  ;;  %5220 = vmatprep.subr.bf16.mxu1 %v7924_v48  ;;  %v8003_v47 = vld [vmem:[#allocation7 + $0x38] sm:$0xff]  }
 0x30b   :  { %5712 = vmatprep.subr.bf16.mxu0 %v7927_v49 }
 0x30d   :  { %5221 = vmatpush1.bf16.msra.mxu1 %v7922_v50 }
 0x30e   :  { %5713 = vmatpush1.bf16.msra.mxu0 %v7925_v51  ;;  %5222 = vmatprep.subr.bf16.mxu1 %v7930_v52 }
 0x30f   :  { %5714 = vmatprep.subr.bf16.mxu0 %v7933_v53 }
 0x311   :  { %5223 = vmatpush1.bf16.msra.mxu1 %v7928_v54 }
 0x312   :  { %5715 = vmatpush1.bf16.msra.mxu0 %v7931_v55  ;;  %5224 = vmatprep.subr.bf16.mxu1 %v7936_v56 }
 0x313   :  { %5716 = vmatprep.subr.bf16.mxu0 %v7939_v57 }
 0x315   :  { %5225 = vmatpush1.bf16.msra.mxu1 %v7934_v58 }
 0x316   :  { %5717 = vmatpush1.bf16.msra.mxu0 %v7937_v59  ;;  %5226 = vmatprep.subr.bf16.mxu1 %v7942_v60 }
 0x317   :  { %5718 = vmatprep.subr.bf16.mxu0 %v7945_v61 }
 0x319   :  { %5227 = vmatpush1.bf16.msra.mxu1 %v7940_v62 }
 0x31a   :  { %5719 = vmatpush1.bf16.msra.mxu0 %v7943_v63  ;;  %5228 = vmatprep.subr.bf16.mxu1 %v7948_v0 }
 0x31b   :  { %5720 = vmatprep.subr.bf16.mxu0 %v7951_v1 }
 0x31d   :  { %5229 = vmatpush1.bf16.msra.mxu1 %v7946_v2 }
 0x31e   :  { %5721 = vmatpush1.bf16.msra.mxu0 %v7949_v3  ;;  %5230 = vmatprep.subr.bf16.mxu1 %v7954_v4 }
 0x31f   :  { %5722 = vmatprep.subr.bf16.mxu0 %v7957_v5 }
 0x321   :  { %5231 = vmatpush1.bf16.msra.mxu1 %v7952_v6 }
 0x322   :  { %5723 = vmatpush1.bf16.msra.mxu0 %v7955_v7  ;;  %5232 = vmatprep.subr.bf16.mxu1 %v7960_v8 }
 0x323   :  { %5724 = vmatprep.subr.bf16.mxu0 %v7963_v9 }
 0x325   :  { %5233 = vmatpush1.bf16.msra.mxu1 %v7958_v10 }
 0x326   :  { %5725 = vmatpush1.bf16.msra.mxu0 %v7961_v11  ;;  %5234 = vmatprep.subr.bf16.mxu1 %v7966_v12 }
 0x327   :  { %5726 = vmatprep.subr.bf16.mxu0 %v7969_v13 }
 0x329   :  { %5235 = vmatpush1.bf16.msra.mxu1 %v7964_v14 }
 0x32a   :  { %5727 = vmatpush1.bf16.msra.mxu0 %v7967_v15  ;;  %5236 = vmatprep.subr.bf16.mxu1 %v7972_v16 }
 0x32b   :  { %5728 = vmatprep.subr.bf16.mxu0 %v7975_v17 }
 0x32d   :  { %5237 = vmatpush1.bf16.msra.mxu1 %v7970_v18 }
 0x32e   :  { %5729 = vmatpush1.bf16.msra.mxu0 %v7973_v19  ;;  %5238 = vmatprep.subr.bf16.mxu1 %v7978_v20 }
 0x32f   :  { %5730 = vmatprep.subr.bf16.mxu0 %v7981_v21 }
 0x331   :  { %5239 = vmatpush1.bf16.msra.mxu1 %v7976_v22 }
 0x332   :  { %5731 = vmatpush1.bf16.msra.mxu0 %v7979_v23  ;;  %5240 = vmatprep.subr.bf16.mxu1 %v7984_v24 }
 0x333   :  { %5732 = vmatprep.subr.bf16.mxu0 %v7987_v25 }
 0x335   :  { %5241 = vmatpush1.bf16.msra.mxu1 %v7982_v26 }
 0x336   :  { %5733 = vmatpush1.bf16.msra.mxu0 %v7985_v27  ;;  %6716 = vmatprep.subr.bf16.mxu1 %v7988_v30 }
 0x338   :  { %5243 = vmatmul.mubr.bf16.vlgmr.msra.gmra.mrb[0].mxu1 %v125_v31 }
 0x339   :  { %5735 = vmatmul.mubr.bf16.vlgmr.msra.gmra.mrb[0].mxu0 %v149_v32  ;;  %6717 = vmatpush3.bf16.msra.mxu1 %v7989_v33 }
 0x33a   :  { %6718 = vmatprep.subr.bf16.mxu1 %v7990_v34 }
 0x33d   :  { %6719 = vmatpush3.bf16.msra.mxu1 %v7991_v35 }
 0x33e   :  { %6720 = vmatprep.subr.bf16.mxu1 %v7992_v36 }
 0x341   :  { %6721 = vmatpush3.bf16.msra.mxu1 %v7993_v37 }
 0x342   :  { %6722 = vmatprep.subr.bf16.mxu1 %v7994_v38 }
 0x345   :  { %6723 = vmatpush3.bf16.msra.mxu1 %v7995_v39 }
 0x346   :  { %6724 = vmatprep.subr.bf16.mxu1 %v7996_v40 }
 0x349   :  { %6725 = vmatpush3.bf16.msra.mxu1 %v7997_v41 }
 0x34a   :  { %6726 = vmatprep.subr.bf16.mxu1 %v7998_v42 }
 0x34d   :  { %6727 = vmatpush3.bf16.msra.mxu1 %v7999_v43 }
 0x34e   :  { %6728 = vmatprep.subr.bf16.mxu1 %v8000_v44 }
 0x351   :  { %6729 = vmatpush3.bf16.msra.mxu1 %v8001_v45 }
 0x352   :  { %6730 = vmatprep.subr.bf16.mxu1 %v8002_v46 }
 0x355   :  { %6731 = vmatpush3.bf16.msra.mxu1 %v8003_v47 }
 0x40b   :  { %v5244_v48 = vpop.f32.mrb[0].mxu1 }
 0x40c   :  { %v5736_v49 = vpop.f32.mrb[0].mxu0  ;;  %v5246_v51 = vpop.f32.mrb[1].mxu1 }
 0x40d   :  { %v6738_v50 = vadd.f32 %v5736_v49, %v5244_v48  ;;  %v5738_v52 = vpop.f32.mrb[1].mxu0  ;;  %v5248_v54 = vpop.f32.mrb[2].mxu1 }
 0x40e   :  { %v6739_v53 = vadd.f32 %v5738_v52, %v5246_v51  ;;  %v5740_v55 = vpop.f32.mrb[2].mxu0  ;;  %v5249_v57 = vpop.f32.mrb[3].mxu1 }
 0x40f   :  { %v5743_v56 = vmax.f32 %v6738_v50, 0.0  ;;  %v5741_v58 = vpop.f32.mrb[3].mxu0 }
 0x410   :  { %v5744_v59 = vmax.f32 %v6739_v53, 0.0 }
 0x411   :  { %v5745_v61 = vpack.c.bf16 %v5743_v56, %v5743_v56 }
 0x412   :  { %v5746_v60 = vpack.c.bf16 %v5744_v59, %v5744_v59 }
 0x414   :  { %5907 = vmatprep.mubr.bf16.mxu1 %v5746_v60 }
 0x415   :  { %5908 = vmatmul.mubr.bf16.vlgmr.msra.gmra.mrb[4].mxu1 %v5745_v61 }
 0x4e8   :  { %v6732_v62 = vpop.f32.mrb[4].mxu1 }
 0x4e9   :  { %v6733_v63 = vpop.f32.mrb[5].mxu1 }
 0x4ea   :  { %v6734_v0 = vadd.f32 %v6733_v63, %v6732_v62  ;;  %v6735_v1 = vpop.f32.mrb[6].mxu1 }
 0x4eb   :  { %v6736_v2 = vpop.f32.mrb[7].mxu1 }
 0x4ec   :  { %5915 = vst [vmem:[#allocation8] sm:$0xff] %v6734_v0 }
 0x4ed   :  { %8081 = shalt.err (!%p8078_p0)
}
 0x4ee   :  { %s8082_s27 = scalar_lea.hbm %s8177_s3, 128 }
 0x4ef   :  { %p8083_p1 = scmp.ne.s32.totalorder %s8177_s3, %s8082_s27  ;;  %p8086_p2 = scmp.lt.u32.totalorder %s8082_s27, %s8177_s3 }
 0x4f1   :  { %p8088_p3 = pnand %p8086_p2, %p8083_p1 }
 0x4f3   :  { %8091 = shalt.err (!%p8088_p3)
}
 0x4f4   :  { %5925 = dma.vmem_to_hbm [thread:$0]  %s5923_s23, 128, %s8177_s3, [#allocation4]  }
 0x4f5   :  { %8096 = dma.done.wait [#allocation4], 128  }
 0x4f6   :  { %8097 = vsyncadd [#allocation4], 4294967168 }
 0x4f7   :  { %5929 = vsyncpa [#allocation3], 1 }
 0x4f8   :  { %5930 = vsyncpa [#allocation6], 1 }
 0x4f9   :  { %5931 = vsyncpa [#allocation4], 1 }

// kernel: mlp_forward.1
= control target key start
LH: loop header
LB: loop body
LE: loop exit
PB: predicated region body
PF: predicated region fallthrough
CT: control target
= control target key end

     0   :  { %8 = vsyncpa [#allocation3], 0  ;;  %s8174_s0 = inlined_call_operand.hbm [shape: f32[8,6144], index: 0, kind: input, shape index: {}]   ;;  %s8175_s1 = inlined_call_operand.hbm [shape: bf16[6144,256], index: 1, kind: input, shape index: {}]   ;;  %s8176_s2 = inlined_call_operand.hbm [shape: bf16[256,128], index: 2, kind: input, shape index: {}]   ;;  %s8177_s3 = inlined_call_operand.hbm [shape: f32[8,128], index: 3, kind: output, shape index: {}]  }
   0x1   :  { %9 = vsyncpa [#allocation6], 0 }
   0x2   :  { %10 = vsyncpa [#allocation4], 0  ;;  %s8098_s12 = smov [#allocation5]   ;;  %s8004_s16 = scalar_lea.hbm %s8175_s1, 98304 }
   0x3   :  { %s26_s13 = sshll.u32 %s8098_s12, 4  ;;  %p8005_p0 = scmp.ne.s32.totalorder %s8175_s1, %s8004_s16  ;;  %s27_s13 = int_to_ptr.vmem [resolvable:$true] %s26_s13 }
   0x4   :  { %p8008_p1 = scmp.lt.u32.totalorder %s8004_s16, %s8175_s1 }
   0x6   :  { %p8010_p2 = pnand %p8008_p1, %p8005_p0 }
   0x8   :  { %8013 = shalt.err (!%p8010_p2)
}
   0x9   :  { %s8014_s21 = scalar_lea.vmem %s27_s13, 98304  ;;  %p8019_p4 = scmp.lt.s32.totalorder %s27_s13, %s27_s13 }
   0xa   :  { %p8015_p3 = scmp.ne.s32.totalorder %s27_s13, %s8014_s21  ;;  %p8020_p5 = scmp.lt.s32.totalorder %s8014_s21, %s8014_s21 }
   0xc   :  { %p8021_p6 = por %p8020_p5, %p8019_p4 }
   0xe   :  { %p8022_p7 = pnand %p8021_p6, %p8015_p3 }
  0x10   :  { %8025 = shalt.err (!%p8022_p7)
}
  0x11   :  { %s8099_s22 = smov 128   ;;  %s8100_s23 = smov 8  }
  0x12   :  { %32 = dma.hbm_to_vmem [thread:$0]  %s8175_s1, 98304, %s27_s13, [#allocation6], %s8099_s22, %s8099_s22, %s8100_s23  }
  0x13   :  { %s8101_s26 = smov [#allocation2]   ;;  %s8102_s28 = smov [#allocation7]  }
  0x14   :  { %s17_s27 = sshll.u32 %s8101_s26, 4  ;;  %s38_s29 = sshll.u32 %s8102_s28, 4  ;;  %s18_s27 = int_to_ptr.vmem [resolvable:$true] %s17_s27  ;;  %s39_s29 = int_to_ptr.vmem [resolvable:$true] %s38_s29 }
  0x15   :  { %s8026_s5 = scalar_lea.hbm %s8174_s0, 6144 }
  0x16   :  { %p8027_p8 = scmp.ne.s32.totalorder %s8174_s0, %s8026_s5  ;;  %p8030_p9 = scmp.lt.u32.totalorder %s8026_s5, %s8174_s0 }
  0x18   :  { %p8032_p10 = pnand %p8030_p9, %p8027_p8 }
  0x1a   :  { %8035 = shalt.err (!%p8032_p10)
}
  0x1b   :  { %s8036_s1 = scalar_lea.vmem %s18_s27, 6144  ;;  %p8041_p12 = scmp.lt.s32.totalorder %s18_s27, %s18_s27 }
  0x1c   :  { %p8037_p11 = scmp.ne.s32.totalorder %s18_s27, %s8036_s1  ;;  %p8042_p13 = scmp.lt.s32.totalorder %s8036_s1, %s8036_s1 }
  0x1e   :  { %p8043_p0 = por %p8042_p13, %p8041_p12 }
  0x20   :  { %p8044_p1 = pnand %p8043_p0, %p8037_p11 }
  0x22   :  { %8047 = shalt.err (!%p8044_p1)
}
  0x23   :  { %20 = dma.hbm_to_vmem [thread:$0]  %s8174_s0, 6144, %s18_s27, [#allocation3]  }
  0x24   :  { %s8048_s14 = scalar_lea.hbm %s8176_s2, 2048 }
  0x25   :  { %p8049_p2 = scmp.ne.s32.totalorder %s8176_s2, %s8048_s14  ;;  %p8052_p3 = scmp.lt.u32.totalorder %s8048_s14, %s8176_s2 }
  0x27   :  { %p8054_p4 = pnand %p8052_p3, %p8049_p2 }
  0x29   :  { %8057 = shalt.err (!%p8054_p4)
}
  0x2a   :  { %s8058_s19 = scalar_lea.vmem %s39_s29, 2048  ;;  %p8063_p6 = scmp.lt.s32.totalorder %s39_s29, %s39_s29 }
  0x2b   :  { %p8059_p5 = scmp.ne.s32.totalorder %s39_s29, %s8058_s19  ;;  %p8064_p7 = scmp.lt.s32.totalorder %s8058_s19, %s8058_s19 }
  0x2d   :  { %p8065_p8 = por %p8064_p7, %p8063_p6 }
  0x2f   :  { %p8066_p9 = pnand %p8065_p8, %p8059_p5 }
  0x31   :  { %8069 = shalt.err (!%p8066_p9)
}
  0x32   :  { %s8103_s0 = smov 64   ;;  %s8104_s20 = smov 4  }
  0x33   :  { %44 = dma.hbm_to_vmem [thread:$0]  %s8176_s2, 2048, %s39_s29, [#allocation6], %s8103_s0, %s8103_s0, %s8104_s20  }
  0x34   :  { %8092 = dma.done.wait [#allocation3], 6144  }
  0x35   :  { %8093 = vsyncadd [#allocation3], 4294961152 }
  0x36   :  { %8094 = dma.done.wait [#allocation6], 100352  }
  0x37   :  { %8095 = vsyncadd [#allocation6], 4294866944  ;;  %v6836_v0 = vld [vmem:[#allocation5 + $0x4] ss:$8 sps:$4 sm:$0xff]   ;;  %v6840_v2 = vld [vmem:[#allocation5] ss:$8 sps:$4 sm:$0xff]  }
  0x38   :  { %v6838_v1 = vld [vmem:[#allocation5 + $0xc04] ss:$8 sps:$4 sm:$0xff]   ;;  %4759 = vmatprep.subr.bf16.mxu1 %v6836_v0  ;;  %v6841_v3 = vld [vmem:[#allocation5 + $0xc00] ss:$8 sps:$4 sm:$0xff]   ;;  %v6842_v4 = vld [vmem:[#allocation5 + $0x14] ss:$8 sps:$4 sm:$0xff]  }
  0x39   :  { %5251 = vmatprep.subr.bf16.mxu0 %v6838_v1  ;;  %4760 = vmatpush1.bf16.msra.mxu1 %v6840_v2  ;;  %v6844_v5 = vld [vmem:[#allocation5 + $0xc14] ss:$8 sps:$4 sm:$0xff]   ;;  %v6846_v6 = vld [vmem:[#allocation5 + $0x10] ss:$8 sps:$4 sm:$0xff]   ;;  %v6848_v8 = vld [vmem:[#allocation5 + $0x24] ss:$8 sps:$4 sm:$0xff]  }
  0x3a   :  { %5252 = vmatpush1.bf16.msra.mxu0 %v6841_v3  ;;  %4761 = vmatprep.subr.bf16.mxu1 %v6842_v4  ;;  %v6847_v7 = vld [vmem:[#allocation5 + $0xc10] ss:$8 sps:$4 sm:$0xff]   ;;  %v6850_v9 = vld [vmem:[#allocation5 + $0xc24] ss:$8 sps:$4 sm:$0xff]   ;;  %v6852_v10 = vld [vmem:[#allocation5 + $0x20] ss:$8 sps:$4 sm:$0xff]  }
  0x3b   :  { %5253 = vmatprep.subr.bf16.mxu0 %v6844_v5  ;;  %v6853_v11 = vld [vmem:[#allocation5 + $0xc20] ss:$8 sps:$4 sm:$0xff]   ;;  %v6854_v12 = vld [vmem:[#allocation5 + $0x34] ss:$8 sps:$4 sm:$0xff]   ;;  %v6858_v14 = vld [vmem:[#allocation5 + $0x30] ss:$8 sps:$4 sm:$0xff]  }
  0x3c   :  { %v6856_v13 = vld [vmem:[#allocation5 + $0xc34] ss:$8 sps:$4 sm:$0xff]   ;;  %v6859_v15 = vld [vmem:[#allocation5 + $0xc30] ss:$8 sps:$4 sm:$0xff]   ;;  %v6860_v16 = vld [vmem:[#allocation5 + $0x44] ss:$8 sps:$4 sm:$0xff]  }
  0x3d   :  { %4762 = vmatpush1.bf16.msra.mxu1 %v6846_v6  ;;  %v6862_v17 = vld [vmem:[#allocation5 + $0xc44] ss:$8 sps:$4 sm:$0xff]   ;;  %v6864_v18 = vld [vmem:[#allocation5 + $0x40] ss:$8 sps:$4 sm:$0xff]   ;;  %v6866_v20 = vld [vmem:[#allocation5 + $0x54] ss:$8 sps:$4 sm:$0xff]  }
  0x3e   :  { %5254 = vmatpush1.bf16.msra.mxu0 %v6847_v7  ;;  %4763 = vmatprep.subr.bf16.mxu1 %v6848_v8  ;;  %v6865_v19 = vld [vmem:[#allocation5 + $0xc40] ss:$8 sps:$4 sm:$0xff]   ;;  %v6868_v21 = vld [vmem:[#allocation5 + $0xc54] ss:$8 sps:$4 sm:$0xff]   ;;  %v6870_v22 = vld [vmem:[#allocation5 + $0x50] ss:$8 sps:$4 sm:$0xff]  }
  0x3f   :  { %5255 = vmatprep.subr.bf16.mxu0 %v6850_v9  ;;  %v6871_v23 = vld [vmem:[#allocation5 + $0xc50] ss:$8 sps:$4 sm:$0xff]   ;;  %v6872_v24 = vld [vmem:[#allocation5 + $0x64] ss:$8 sps:$4 sm:$0xff]   ;;  %v6876_v26 = vld [vmem:[#allocation5 + $0x60] ss:$8 sps:$4 sm:$0xff]  }
  0x40   :  { %v6874_v25 = vld [vmem:[#allocation5 + $0xc64] ss:$8 sps:$4 sm:$0xff]   ;;  %v6877_v27 = vld [vmem:[#allocation5 + $0xc60] ss:$8 sps:$4 sm:$0xff]   ;;  %v6878_v28 = vld [vmem:[#allocation5 + $0x74] ss:$8 sps:$4 sm:$0xff]  }
  0x41   :  { %4764 = vmatpush1.bf16.msra.mxu1 %v6852_v10  ;;  %v6880_v29 = vld [vmem:[#allocation5 + $0xc74] ss:$8 sps:$4 sm:$0xff]   ;;  %v6882_v30 = vld [vmem:[#allocation5 + $0x70] ss:$8 sps:$4 sm:$0xff]   ;;  %v6884_v32 = vld [vmem:[#allocation5 + $0x84] ss:$8 sps:$4 sm:$0xff]  }
  0x42   :  { %5256 = vmatpush1.bf16.msra.mxu0 %v6853_v11  ;;  %4765 = vmatprep.subr.bf16.mxu1 %v6854_v12  ;;  %v6883_v31 = vld [vmem:[#allocation5 + $0xc70] ss:$8 sps:$4 sm:$0xff]   ;;  %v6886_v33 = vld [vmem:[#allocation5 + $0xc84] ss:$8 sps:$4 sm:$0xff]   ;;  %v6888_v34 = vld [vmem:[#allocation5 + $0x80] ss:$8 sps:$4 sm:$0xff]  }
  0x43   :  { %5257 = vmatprep.subr.bf16.mxu0 %v6856_v13  ;;  %v6889_v35 = vld [vmem:[#allocation5 + $0xc80] ss:$8 sps:$4 sm:$0xff]   ;;  %v6890_v36 = vld [vmem:[#allocation5 + $0x94] ss:$8 sps:$4 sm:$0xff]   ;;  %v6894_v38 = vld [vmem:[#allocation5 + $0x90] ss:$8 sps:$4 sm:$0xff]  }
  0x44   :  { %v6892_v37 = vld [vmem:[#allocation5 + $0xc94] ss:$8 sps:$4 sm:$0xff]   ;;  %v6895_v39 = vld [vmem:[#allocation5 + $0xc90] ss:$8 sps:$4 sm:$0xff]   ;;  %v6896_v40 = vld [vmem:[#allocation5 + $0xa4] ss:$8 sps:$4 sm:$0xff]  }
  0x45   :  { %4766 = vmatpush1.bf16.msra.mxu1 %v6858_v14  ;;  %v6898_v41 = vld [vmem:[#allocation5 + $0xca4] ss:$8 sps:$4 sm:$0xff]   ;;  %v6900_v42 = vld [vmem:[#allocation5 + $0xa0] ss:$8 sps:$4 sm:$0xff]   ;;  %v6902_v44 = vld [vmem:[#allocation5 + $0xb4] ss:$8 sps:$4 sm:$0xff]  }
  0x46   :  { %5258 = vmatpush1.bf16.msra.mxu0 %v6859_v15  ;;  %4767 = vmatprep.subr.bf16.mxu1 %v6860_v16  ;;  %v6901_v43 = vld [vmem:[#allocation5 + $0xca0] ss:$8 sps:$4 sm:$0xff]   ;;  %v6904_v45 = vld [vmem:[#allocation5 + $0xcb4] ss:$8 sps:$4 sm:$0xff]   ;;  %v6906_v47 = vld [vmem:[#allocation5 + $0xb0] ss:$8 sps:$4 sm:$0xff]  }
  0x47   :  { %5259 = vmatprep.subr.bf16.mxu0 %v6862_v17  ;;  %v56_v46 = vld [vmem:[#allocation2 + $0x8] sm:$0xff]  ;;  %v6907_v49 = vld [vmem:[#allocation5 + $0xcb0] ss:$8 sps:$4 sm:$0xff]   ;;  %v6914_v56 = vld [vmem:[#allocation5 + $0xd4] ss:$8 sps:$4 sm:$0xff]   ;;  %s8105_s2 = smov [#allocation8]  }
  0x48   :  { %v104_v48 = vpack.c.bf16 %v56_v46, %v56_v46  ;;  %v80_v50 = vld [vmem:[#allocation2 + $0xc8] sm:$0xff]  ;;  %v6916_v57 = vld [vmem:[#allocation5 + $0xcd4] ss:$8 sps:$4 sm:$0xff]   ;;  %v6918_v58 = vld [vmem:[#allocation5 + $0xd0] ss:$8 sps:$4 sm:$0xff]   ;;  %s5922_s23 = sshll.u32 %s8105_s2, 4  ;;  %s5923_s23 = int_to_ptr.vmem [resolvable:$true] %s5922_s23 }
  0x49   :  { %4768 = vmatpush1.bf16.msra.mxu1 %v6864_v18  ;;  %v6908_v51 = vld [vmem:[#allocation5 + $0xc4] ss:$8 sps:$4 sm:$0xff]   ;;  %v128_v53 = vpack.c.bf16 %v80_v50, %v80_v50  ;;  %v6912_v54 = vld [vmem:[#allocation5 + $0xc0] ss:$8 sps:$4 sm:$0xff]   ;;  %v6919_v59 = vld [vmem:[#allocation5 + $0xcd0] ss:$8 sps:$4 sm:$0xff]   ;;  %p8075_p11 = scmp.lt.s32.totalorder %s5923_s23, %s5923_s23 }
  0x4a   :  { %5260 = vmatpush1.bf16.msra.mxu0 %v6865_v19  ;;  %4769 = vmatprep.subr.bf16.mxu1 %v6866_v20  ;;  %v6910_v52 = vld [vmem:[#allocation5 + $0xcc4] ss:$8 sps:$4 sm:$0xff]   ;;  %v6913_v55 = vld [vmem:[#allocation5 + $0xcc0] ss:$8 sps:$4 sm:$0xff]   ;;  %v6926_v0 = vld [vmem:[#allocation5 + $0xf4] ss:$8 sps:$4 sm:$0xff]  }
  0x4b   :  { %5261 = vmatprep.subr.bf16.mxu0 %v6868_v21  ;;  %4791 = vmatprep.mubr.bf16.mxu1 %v104_v48  ;;  %v6920_v60 = vld [vmem:[#allocation5 + $0xe4] ss:$8 sps:$4 sm:$0xff]   ;;  %v6924_v62 = vld [vmem:[#allocation5 + $0xe0] ss:$8 sps:$4 sm:$0xff]   ;;  %v6928_v1 = vld [vmem:[#allocation5 + $0xcf4] ss:$8 sps:$4 sm:$0xff]  }
  0x4c   :  { %5283 = vmatprep.mubr.bf16.mxu0 %v128_v53  ;;  %v6922_v61 = vld [vmem:[#allocation5 + $0xce4] ss:$8 sps:$4 sm:$0xff]   ;;  %v6925_v63 = vld [vmem:[#allocation5 + $0xce0] ss:$8 sps:$4 sm:$0xff]   ;;  %v6930_v2 = vld [vmem:[#allocation5 + $0xf0] ss:$8 sps:$4 sm:$0xff]  }
  0x4d   :  { %4770 = vmatpush1.bf16.msra.mxu1 %v6870_v22  ;;  %v6931_v3 = vld [vmem:[#allocation5 + $0xcf0] ss:$8 sps:$4 sm:$0xff]   ;;  %v6934_v4 = vld [vmem:[#allocation5 + $0x104] ss:$8 sps:$4 sm:$0xff]   ;;  %v6932_v8 = vld [vmem:[#allocation5 + $0x100] ss:$8 sps:$4 sm:$0xff]  }
  0x4e   :  { %5262 = vmatpush1.bf16.msra.mxu0 %v6871_v23  ;;  %4771 = vmatprep.subr.bf16.mxu1 %v6872_v24  ;;  %v55_v5 = vld [vmem:[#allocation2] sm:$0xff]  ;;  %v6940_v12 = vld [vmem:[#allocation5 + $0x114] ss:$8 sps:$4 sm:$0xff]   ;;  %v6938_v14 = vld [vmem:[#allocation5 + $0x110] ss:$8 sps:$4 sm:$0xff]   ;;  %s8070_s24 = scalar_lea.vmem %s5923_s23, 128 }
  0x4f   :  { %5263 = vmatprep.subr.bf16.mxu0 %v6874_v25  ;;  %v79_v6 = vld [vmem:[#allocation2 + $0xc0] sm:$0xff]  ;;  %v103_v10 = vpack.c.bf16 %v55_v5, %v55_v5  ;;  %v6943_v13 = vld [vmem:[#allocation5 + $0xd14] ss:$8 sps:$4 sm:$0xff]   ;;  %v6941_v15 = vld [vmem:[#allocation5 + $0xd10] ss:$8 sps:$4 sm:$0xff]   ;;  %p8071_p10 = scmp.ne.s32.totalorder %s5923_s23, %s8070_s24  ;;  %p8076_p12 = scmp.lt.s32.totalorder %s8070_s24, %s8070_s24 }
  0x50   :  { %v6937_v7 = vld [vmem:[#allocation5 + $0xd04] ss:$8 sps:$4 sm:$0xff]   ;;  %v6935_v9 = vld [vmem:[#allocation5 + $0xd00] ss:$8 sps:$4 sm:$0xff]   ;;  %v127_v11 = vpack.c.bf16 %v79_v6, %v79_v6  ;;  %v6952_v20 = vld [vmem:[#allocation5 + $0x134] ss:$8 sps:$4 sm:$0xff]  }
  0x51   :  { %4772 = vmatpush1.bf16.msra.mxu1 %v6876_v26  ;;  %v6946_v16 = vld [vmem:[#allocation5 + $0x124] ss:$8 sps:$4 sm:$0xff]   ;;  %v6944_v18 = vld [vmem:[#allocation5 + $0x120] ss:$8 sps:$4 sm:$0xff]   ;;  %v6955_v21 = vld [vmem:[#allocation5 + $0xd34] ss:$8 sps:$4 sm:$0xff]   ;;  %p8077_p13 = por %p8076_p12, %p8075_p11 }
  0x52   :  { %5264 = vmatpush1.bf16.msra.mxu0 %v6877_v27  ;;  %4773 = vmatprep.subr.bf16.mxu1 %v6878_v28  ;;  %v6949_v17 = vld [vmem:[#allocation5 + $0xd24] ss:$8 sps:$4 sm:$0xff]   ;;  %v6947_v19 = vld [vmem:[#allocation5 + $0xd20] ss:$8 sps:$4 sm:$0xff]   ;;  %v6950_v22 = vld [vmem:[#allocation5 + $0x130] ss:$8 sps:$4 sm:$0xff]  }
  0x53   :  { %5265 = vmatprep.subr.bf16.mxu0 %v6880_v29  ;;  %v6953_v23 = vld [vmem:[#allocation5 + $0xd30] ss:$8 sps:$4 sm:$0xff]   ;;  %v6958_v24 = vld [vmem:[#allocation5 + $0x144] ss:$8 sps:$4 sm:$0xff]   ;;  %v6956_v26 = vld [vmem:[#allocation5 + $0x140] ss:$8 sps:$4 sm:$0xff]   ;;  %p8078_p0 = pnand %p8077_p13, %p8071_p10 }
  0x54   :  { %v6961_v25 = vld [vmem:[#allocation5 + $0xd44] ss:$8 sps:$4 sm:$0xff]   ;;  %v6959_v27 = vld [vmem:[#allocation5 + $0xd40] ss:$8 sps:$4 sm:$0xff]   ;;  %v6964_v28 = vld [vmem:[#allocation5 + $0x154] ss:$8 sps:$4 sm:$0xff]  }
  0x55   :  { %4774 = vmatpush1.bf16.msra.mxu1 %v6882_v30  ;;  %v6967_v29 = vld [vmem:[#allocation5 + $0xd54] ss:$8 sps:$4 sm:$0xff]   ;;  %v6962_v30 = vld [vmem:[#allocation5 + $0x150] ss:$8 sps:$4 sm:$0xff]   ;;  %v6980_v46 = vld [vmem:[#allocation5 + $0x180] ss:$8 sps:$4 sm:$0xff]  }
  0x56   :  { %5266 = vmatpush1.bf16.msra.mxu0 %v6883_v31  ;;  %4775 = vmatprep.subr.bf16.mxu1 %v6884_v32  ;;  %v6965_v31 = vld [vmem:[#allocation5 + $0xd50] ss:$8 sps:$4 sm:$0xff]   ;;  %v6970_v32 = vld [vmem:[#allocation5 + $0x164] ss:$8 sps:$4 sm:$0xff]   ;;  %v6988_v48 = vld [vmem:[#allocation5 + $0x194] ss:$8 sps:$4 sm:$0xff]  }
  0x57   :  { %5267 = vmatprep.subr.bf16.mxu0 %v6886_v33  ;;  %v6973_v33 = vld [vmem:[#allocation5 + $0xd64] ss:$8 sps:$4 sm:$0xff]   ;;  %v6986_v50 = vld [vmem:[#allocation5 + $0x190] ss:$8 sps:$4 sm:$0xff]   ;;  %v7016_v6 = vld [vmem:[#allocation5 + $0x1e0] ss:$8 sps:$4 sm:$0xff]  }
  0x58   :  { %v6997_v53 = vld [vmem:[#allocation5 + $0xda4] ss:$8 sps:$4 sm:$0xff]  }
  0x59   :  { %4776 = vmatpush1.bf16.msra.mxu1 %v6888_v34  ;;  %v58_v34 = vld [vmem:[#allocation2 + $0x18] sm:$0xff]  ;;  %v7021_v5 = vld [vmem:[#allocation5 + $0xde4] ss:$8 sps:$4 sm:$0xff]  }
  0x5a   :  { %5268 = vmatpush1.bf16.msra.mxu0 %v6889_v35  ;;  %4777 = vmatprep.subr.bf16.mxu1 %v6890_v36  ;;  %v6968_v35 = vld [vmem:[#allocation5 + $0x160] ss:$8 sps:$4 sm:$0xff]   ;;  %v106_v36 = vpack.c.bf16 %v58_v34, %v58_v34  ;;  %v7046_v34 = vld [vmem:[#allocation5 + $0x230] ss:$8 sps:$4 sm:$0xff]  }
  0x5b   :  { %5269 = vmatprep.subr.bf16.mxu0 %v6892_v37  ;;  %v6971_v37 = vld [vmem:[#allocation5 + $0xd60] ss:$8 sps:$4 sm:$0xff]  }
  0x5d   :  { %4778 = vmatpush1.bf16.msra.mxu1 %v6894_v38  ;;  %v82_v38 = vld [vmem:[#allocation2 + $0xd8] sm:$0xff] }
  0x5e   :  { %5270 = vmatpush1.bf16.msra.mxu0 %v6895_v39  ;;  %4779 = vmatprep.subr.bf16.mxu1 %v6896_v40  ;;  %v6976_v39 = vld [vmem:[#allocation5 + $0x174] ss:$8 sps:$4 sm:$0xff]  }
  0x5f   :  { %5271 = vmatprep.subr.bf16.mxu0 %v6898_v41  ;;  %v6979_v40 = vld [vmem:[#allocation5 + $0xd74] ss:$8 sps:$4 sm:$0xff]   ;;  %v130_v41 = vpack.c.bf16 %v82_v38, %v82_v38  ;;  %v7052_v38 = vld [vmem:[#allocation5 + $0x240] ss:$8 sps:$4 sm:$0xff]  }
  0x61   :  { %4780 = vmatpush1.bf16.msra.mxu1 %v6900_v42  ;;  %v6974_v42 = vld [vmem:[#allocation5 + $0x170] ss:$8 sps:$4 sm:$0xff]  }
  0x62   :  { %5272 = vmatpush1.bf16.msra.mxu0 %v6901_v43  ;;  %4781 = vmatprep.subr.bf16.mxu1 %v6902_v44  ;;  %v6977_v43 = vld [vmem:[#allocation5 + $0xd70] ss:$8 sps:$4 sm:$0xff]   ;;  %v6982_v44 = vld [vmem:[#allocation5 + $0x184] ss:$8 sps:$4 sm:$0xff]  }
  0x63   :  { %5273 = vmatprep.subr.bf16.mxu0 %v6904_v45  ;;  %v6985_v45 = vld [vmem:[#allocation5 + $0xd84] ss:$8 sps:$4 sm:$0xff]  }
  0x65   :  { %4782 = vmatpush1.bf16.msra.mxu1 %v6906_v47  ;;  %v6983_v47 = vld [vmem:[#allocation5 + $0xd80] ss:$8 sps:$4 sm:$0xff]  }
  0x66   :  { %5274 = vmatpush1.bf16.msra.mxu0 %v6907_v49  ;;  %4783 = vmatprep.subr.bf16.mxu1 %v6908_v51  ;;  %v6991_v49 = vld [vmem:[#allocation5 + $0xd94] ss:$8 sps:$4 sm:$0xff]   ;;  %v6989_v51 = vld [vmem:[#allocation5 + $0xd90] ss:$8 sps:$4 sm:$0xff]  }
  0x67   :  { %5275 = vmatprep.subr.bf16.mxu0 %v6910_v52  ;;  %v6994_v52 = vld [vmem:[#allocation5 + $0x1a4] ss:$8 sps:$4 sm:$0xff]  }
  0x69   :  { %4784 = vmatpush1.bf16.msra.mxu1 %v6912_v54  ;;  %v6992_v54 = vld [vmem:[#allocation5 + $0x1a0] ss:$8 sps:$4 sm:$0xff]  }
  0x6a   :  { %5276 = vmatpush1.bf16.msra.mxu0 %v6913_v55  ;;  %4785 = vmatprep.subr.bf16.mxu1 %v6914_v56  ;;  %v6995_v55 = vld [vmem:[#allocation5 + $0xda0] ss:$8 sps:$4 sm:$0xff]   ;;  %v7000_v56 = vld [vmem:[#allocation5 + $0x1b4] ss:$8 sps:$4 sm:$0xff]  }
  0x6b   :  { %5277 = vmatprep.subr.bf16.mxu0 %v6916_v57  ;;  %v7003_v57 = vld [vmem:[#allocation5 + $0xdb4] ss:$8 sps:$4 sm:$0xff]  }
  0x6d   :  { %4786 = vmatpush1.bf16.msra.mxu1 %v6918_v58  ;;  %v6998_v58 = vld [vmem:[#allocation5 + $0x1b0] ss:$8 sps:$4 sm:$0xff]  }
  0x6e   :  { %5278 = vmatpush1.bf16.msra.mxu0 %v6919_v59  ;;  %4787 = vmatprep.subr.bf16.mxu1 %v6920_v60  ;;  %v7001_v59 = vld [vmem:[#allocation5 + $0xdb0] ss:$8 sps:$4 sm:$0xff]   ;;  %v7006_v60 = vld [vmem:[#allocation5 + $0x1c4] ss:$8 sps:$4 sm:$0xff]  }
  0x6f   :  { %5279 = vmatprep.subr.bf16.mxu0 %v6922_v61  ;;  %v7009_v61 = vld [vmem:[#allocation5 + $0xdc4] ss:$8 sps:$4 sm:$0xff]  }
  0x71   :  { %4788 = vmatpush1.bf16.msra.mxu1 %v6924_v62  ;;  %v7004_v62 = vld [vmem:[#allocation5 + $0x1c0] ss:$8 sps:$4 sm:$0xff]  }
  0x72   :  { %5280 = vmatpush1.bf16.msra.mxu0 %v6925_v63  ;;  %4789 = vmatprep.subr.bf16.mxu1 %v6926_v0  ;;  %v7007_v63 = vld [vmem:[#allocation5 + $0xdc0] ss:$8 sps:$4 sm:$0xff]   ;;  %v7012_v0 = vld [vmem:[#allocation5 + $0x1d4] ss:$8 sps:$4 sm:$0xff]  }
  0x73   :  { %5281 = vmatprep.subr.bf16.mxu0 %v6928_v1  ;;  %v7015_v1 = vld [vmem:[#allocation5 + $0xdd4] ss:$8 sps:$4 sm:$0xff]  }
  0x75   :  { %4790 = vmatpush1.bf16.msra.mxu1 %v6930_v2  ;;  %v7010_v2 = vld [vmem:[#allocation5 + $0x1d0] ss:$8 sps:$4 sm:$0xff]  }
  0x76   :  { %5282 = vmatpush1.bf16.msra.mxu0 %v6931_v3  ;;  %4800 = vmatprep.subr.bf16.mxu1 %v6934_v4  ;;  %v7013_v3 = vld [vmem:[#allocation5 + $0xdd0] ss:$8 sps:$4 sm:$0xff]   ;;  %v7018_v4 = vld [vmem:[#allocation5 + $0x1e4] ss:$8 sps:$4 sm:$0xff]  }
  0x77   :  { %5292 = vmatprep.subr.bf16.mxu0 %v6937_v7  ;;  %v7019_v7 = vld [vmem:[#allocation5 + $0xde0] ss:$8 sps:$4 sm:$0xff]  }
  0x78   :  { %4792 = vmatmul.mubr.bf16.vlgmr.msra.gmra.mrb[0].mxu1 %v103_v10  ;;  %v7022_v10 = vld [vmem:[#allocation5 + $0x1f0] ss:$8 sps:$4 sm:$0xff]  }
  0x79   :  { %5284 = vmatmul.mubr.bf16.vlgmr.msra.gmra.mrb[0].mxu0 %v127_v11  ;;  %4801 = vmatpush1.bf16.msra.mxu1 %v6932_v8  ;;  %v7024_v8 = vld [vmem:[#allocation5 + $0x1f4] ss:$8 sps:$4 sm:$0xff]   ;;  %v7025_v11 = vld [vmem:[#allocation5 + $0xdf0] ss:$8 sps:$4 sm:$0xff]  }
  0x7a   :  { %5293 = vmatpush1.bf16.msra.mxu0 %v6935_v9  ;;  %4802 = vmatprep.subr.bf16.mxu1 %v6940_v12  ;;  %v7027_v9 = vld [vmem:[#allocation5 + $0xdf4] ss:$8 sps:$4 sm:$0xff]   ;;  %v7030_v12 = vld [vmem:[#allocation5 + $0x204] ss:$8 sps:$4 sm:$0xff]  }
  0x7b   :  { %5294 = vmatprep.subr.bf16.mxu0 %v6943_v13  ;;  %4832 = vmatprep.mubr.bf16.mxu1 %v106_v36  ;;  %v57_v13 = vld [vmem:[#allocation2 + $0x10] sm:$0xff]  ;;  %v7054_v36 = vld [vmem:[#allocation5 + $0x244] ss:$8 sps:$4 sm:$0xff]  }
  0x7c   :  { %5324 = vmatprep.mubr.bf16.mxu0 %v130_v41  ;;  %v7063_v41 = vld [vmem:[#allocation5 + $0xe54] ss:$8 sps:$4 sm:$0xff]  }
  0x7d   :  { %4803 = vmatpush1.bf16.msra.mxu1 %v6938_v14  ;;  %v81_v14 = vld [vmem:[#allocation2 + $0xd0] sm:$0xff] }
  0x7e   :  { %5295 = vmatpush1.bf16.msra.mxu0 %v6941_v15  ;;  %4804 = vmatprep.subr.bf16.mxu1 %v6946_v16  ;;  %v7033_v15 = vld [vmem:[#allocation5 + $0xe04] ss:$8 sps:$4 sm:$0xff]   ;;  %v7028_v16 = vld [vmem:[#allocation5 + $0x200] ss:$8 sps:$4 sm:$0xff]  }
  0x7f   :  { %5296 = vmatprep.subr.bf16.mxu0 %v6949_v17  ;;  %v7031_v17 = vld [vmem:[#allocation5 + $0xe00] ss:$8 sps:$4 sm:$0xff]  }
  0x81   :  { %4805 = vmatpush1.bf16.msra.mxu1 %v6944_v18  ;;  %v105_v18 = vpack.c.bf16 %v57_v13, %v57_v13  ;;  %v7117_v13 = vld [vmem:[#allocation5 + $0xee4] ss:$8 sps:$4 sm:$0xff]  }
  0x82   :  { %5297 = vmatpush1.bf16.msra.mxu0 %v6947_v19  ;;  %4806 = vmatprep.subr.bf16.mxu1 %v6952_v20  ;;  %v129_v19 = vpack.c.bf16 %v81_v14, %v81_v14  ;;  %v7036_v20 = vld [vmem:[#allocation5 + $0x214] ss:$8 sps:$4 sm:$0xff]   ;;  %v7112_v14 = vld [vmem:[#allocation5 + $0x2e0] ss:$8 sps:$4 sm:$0xff]  }
  0x83   :  { %5298 = vmatprep.subr.bf16.mxu0 %v6955_v21  ;;  %v7039_v21 = vld [vmem:[#allocation5 + $0xe14] ss:$8 sps:$4 sm:$0xff]  }
  0x85   :  { %4807 = vmatpush1.bf16.msra.mxu1 %v6950_v22  ;;  %v60_v22 = vld [vmem:[#allocation2 + $0x28] sm:$0xff] }
  0x86   :  { %5299 = vmatpush1.bf16.msra.mxu0 %v6953_v23  ;;  %4808 = vmatprep.subr.bf16.mxu1 %v6958_v24  ;;  %v7034_v23 = vld [vmem:[#allocation5 + $0x210] ss:$8 sps:$4 sm:$0xff]   ;;  %v108_v24 = vpack.c.bf16 %v60_v22, %v60_v22  ;;  %v83_v22 = vld [vmem:[#allocation2 + $0xe0] sm:$0xff] }
  0x87   :  { %5300 = vmatprep.subr.bf16.mxu0 %v6961_v25  ;;  %v7037_v25 = vld [vmem:[#allocation5 + $0xe10] ss:$8 sps:$4 sm:$0xff]  }
  0x89   :  { %4809 = vmatpush1.bf16.msra.mxu1 %v6956_v26  ;;  %v84_v26 = vld [vmem:[#allocation2 + $0xe8] sm:$0xff] }
  0x8a   :  { %5301 = vmatpush1.bf16.msra.mxu0 %v6959_v27  ;;  %4810 = vmatprep.subr.bf16.mxu1 %v6964_v28  ;;  %v7042_v27 = vld [vmem:[#allocation5 + $0x224] ss:$8 sps:$4 sm:$0xff]  }
  0x8b   :  { %5302 = vmatprep.subr.bf16.mxu0 %v6967_v29  ;;  %v7045_v28 = vld [vmem:[#allocation5 + $0xe24] ss:$8 sps:$4 sm:$0xff]   ;;  %v132_v29 = vpack.c.bf16 %v84_v26, %v84_v26 }
  0x8d   :  { %4811 = vmatpush1.bf16.msra.mxu1 %v6962_v30  ;;  %v7040_v30 = vld [vmem:[#allocation5 + $0x220] ss:$8 sps:$4 sm:$0xff]  }
  0x8e   :  { %5303 = vmatpush1.bf16.msra.mxu0 %v6965_v31  ;;  %4812 = vmatprep.subr.bf16.mxu1 %v6970_v32  ;;  %v7043_v31 = vld [vmem:[#allocation5 + $0xe20] ss:$8 sps:$4 sm:$0xff]   ;;  %v7048_v32 = vld [vmem:[#allocation5 + $0x234] ss:$8 sps:$4 sm:$0xff]  }
  0x8f   :  { %5304 = vmatprep.subr.bf16.mxu0 %v6973_v33  ;;  %v7051_v33 = vld [vmem:[#allocation5 + $0xe34] ss:$8 sps:$4 sm:$0xff]  }
  0x91   :  { %4813 = vmatpush1.bf16.msra.mxu1 %v6968_v35  ;;  %v7049_v35 = vld [vmem:[#allocation5 + $0xe30] ss:$8 sps:$4 sm:$0xff]  }
  0x92   :  { %5305 = vmatpush1.bf16.msra.mxu0 %v6971_v37  ;;  %4814 = vmatprep.subr.bf16.mxu1 %v6976_v39  ;;  %v7057_v37 = vld [vmem:[#allocation5 + $0xe44] ss:$8 sps:$4 sm:$0xff]   ;;  %v7055_v39 = vld [vmem:[#allocation5 + $0xe40] ss:$8 sps:$4 sm:$0xff]  }
  0x93   :  { %5306 = vmatprep.subr.bf16.mxu0 %v6979_v40  ;;  %v7060_v40 = vld [vmem:[#allocation5 + $0x254] ss:$8 sps:$4 sm:$0xff]  }
  0x95   :  { %4815 = vmatpush1.bf16.msra.mxu1 %v6974_v42  ;;  %v7058_v42 = vld [vmem:[#allocation5 + $0x250] ss:$8 sps:$4 sm:$0xff]  }
  0x96   :  { %5307 = vmatpush1.bf16.msra.mxu0 %v6977_v43  ;;  %4816 = vmatprep.subr.bf16.mxu1 %v6982_v44  ;;  %v7061_v43 = vld [vmem:[#allocation5 + $0xe50] ss:$8 sps:$4 sm:$0xff]   ;;  %v7066_v44 = vld [vmem:[#allocation5 + $0x264] ss:$8 sps:$4 sm:$0xff]  }
  0x97   :  { %5308 = vmatprep.subr.bf16.mxu0 %v6985_v45  ;;  %v7069_v45 = vld [vmem:[#allocation5 + $0xe64] ss:$8 sps:$4 sm:$0xff]  }
  0x99   :  { %4817 = vmatpush1.bf16.msra.mxu1 %v6980_v46  ;;  %v7064_v46 = vld [vmem:[#allocation5 + $0x260] ss:$8 sps:$4 sm:$0xff]  }
  0x9a   :  { %5309 = vmatpush1.bf16.msra.mxu0 %v6983_v47  ;;  %4818 = vmatprep.subr.bf16.mxu1 %v6988_v48  ;;  %v7067_v47 = vld [vmem:[#allocation5 + $0xe60] ss:$8 sps:$4 sm:$0xff]   ;;  %v7072_v48 = vld [vmem:[#allocation5 + $0x274] ss:$8 sps:$4 sm:$0xff]  }
  0x9b   :  { %5310 = vmatprep.subr.bf16.mxu0 %v6991_v49  ;;  %v7075_v49 = vld [vmem:[#allocation5 + $0xe74] ss:$8 sps:$4 sm:$0xff]  }
  0x9d   :  { %4819 = vmatpush1.bf16.msra.mxu1 %v6986_v50  ;;  %v7070_v50 = vld [vmem:[#allocation5 + $0x270] ss:$8 sps:$4 sm:$0xff]  }
  0x9e   :  { %5311 = vmatpush1.bf16.msra.mxu0 %v6989_v51  ;;  %4820 = vmatprep.subr.bf16.mxu1 %v6994_v52  ;;  %v7073_v51 = vld [vmem:[#allocation5 + $0xe70] ss:$8 sps:$4 sm:$0xff]   ;;  %v7078_v52 = vld [vmem:[#allocation5 + $0x284] ss:$8 sps:$4 sm:$0xff]  }
  0x9f   :  { %5312 = vmatprep.subr.bf16.mxu0 %v6997_v53  ;;  %v7081_v53 = vld [vmem:[#allocation5 + $0xe84] ss:$8 sps:$4 sm:$0xff]  }
  0xa1   :  { %4821 = vmatpush1.bf16.msra.mxu1 %v6992_v54  ;;  %v7076_v54 = vld [vmem:[#allocation5 + $0x280] ss:$8 sps:$4 sm:$0xff]  }
  0xa2   :  { %5313 = vmatpush1.bf16.msra.mxu0 %v6995_v55  ;;  %4822 = vmatprep.subr.bf16.mxu1 %v7000_v56  ;;  %v7079_v55 = vld [vmem:[#allocation5 + $0xe80] ss:$8 sps:$4 sm:$0xff]   ;;  %v7084_v56 = vld [vmem:[#allocation5 + $0x294] ss:$8 sps:$4 sm:$0xff]  }
  0xa3   :  { %5314 = vmatprep.subr.bf16.mxu0 %v7003_v57  ;;  %v7087_v57 = vld [vmem:[#allocation5 + $0xe94] ss:$8 sps:$4 sm:$0xff]  }
  0xa5   :  { %4823 = vmatpush1.bf16.msra.mxu1 %v6998_v58  ;;  %v7082_v58 = vld [vmem:[#allocation5 + $0x290] ss:$8 sps:$4 sm:$0xff]  }
  0xa6   :  { %5315 = vmatpush1.bf16.msra.mxu0 %v7001_v59  ;;  %4824 = vmatprep.subr.bf16.mxu1 %v7006_v60  ;;  %v7085_v59 = vld [vmem:[#allocation5 + $0xe90] ss:$8 sps:$4 sm:$0xff]   ;;  %v7090_v60 = vld [vmem:[#allocation5 + $0x2a4] ss:$8 sps:$4 sm:$0xff]  }
  0xa7   :  { %5316 = vmatprep.subr.bf16.mxu0 %v7009_v61  ;;  %v7093_v61 = vld [vmem:[#allocation5 + $0xea4] ss:$8 sps:$4 sm:$0xff]  }
  0xa9   :  { %4825 = vmatpush1.bf16.msra.mxu1 %v7004_v62  ;;  %v7088_v62 = vld [vmem:[#allocation5 + $0x2a0] ss:$8 sps:$4 sm:$0xff]  }
  0xaa   :  { %5317 = vmatpush1.bf16.msra.mxu0 %v7007_v63  ;;  %4826 = vmatprep.subr.bf16.mxu1 %v7012_v0  ;;  %v7091_v63 = vld [vmem:[#allocation5 + $0xea0] ss:$8 sps:$4 sm:$0xff]   ;;  %v7096_v0 = vld [vmem:[#allocation5 + $0x2b4] ss:$8 sps:$4 sm:$0xff]  }
  0xab   :  { %5318 = vmatprep.subr.bf16.mxu0 %v7015_v1  ;;  %v7099_v1 = vld [vmem:[#allocation5 + $0xeb4] ss:$8 sps:$4 sm:$0xff]  }
  0xad   :  { %4827 = vmatpush1.bf16.msra.mxu1 %v7010_v2  ;;  %v7094_v2 = vld [vmem:[#allocation5 + $0x2b0] ss:$8 sps:$4 sm:$0xff]  }
  0xae   :  { %5319 = vmatpush1.bf16.msra.mxu0 %v7013_v3  ;;  %4828 = vmatprep.subr.bf16.mxu1 %v7018_v4  ;;  %v7097_v3 = vld [vmem:[#allocation5 + $0xeb0] ss:$8 sps:$4 sm:$0xff]   ;;  %v7102_v4 = vld [vmem:[#allocation5 + $0x2c4] ss:$8 sps:$4 sm:$0xff]  }
  0xaf   :  { %5320 = vmatprep.subr.bf16.mxu0 %v7021_v5  ;;  %v7105_v5 = vld [vmem:[#allocation5 + $0xec4] ss:$8 sps:$4 sm:$0xff]  }
  0xb1   :  { %4829 = vmatpush1.bf16.msra.mxu1 %v7016_v6  ;;  %v7100_v6 = vld [vmem:[#allocation5 + $0x2c0] ss:$8 sps:$4 sm:$0xff]  }
  0xb2   :  { %5321 = vmatpush1.bf16.msra.mxu0 %v7019_v7  ;;  %4830 = vmatprep.subr.bf16.mxu1 %v7024_v8  ;;  %v7103_v7 = vld [vmem:[#allocation5 + $0xec0] ss:$8 sps:$4 sm:$0xff]   ;;  %v7108_v8 = vld [vmem:[#allocation5 + $0x2d4] ss:$8 sps:$4 sm:$0xff]  }
  0xb3   :  { %5322 = vmatprep.subr.bf16.mxu0 %v7027_v9  ;;  %v7111_v9 = vld [vmem:[#allocation5 + $0xed4] ss:$8 sps:$4 sm:$0xff]  }
  0xb5   :  { %4831 = vmatpush1.bf16.msra.mxu1 %v7022_v10  ;;  %v7106_v10 = vld [vmem:[#allocation5 + $0x2d0] ss:$8 sps:$4 sm:$0xff]  }
  0xb6   :  { %5323 = vmatpush1.bf16.msra.mxu0 %v7025_v11  ;;  %4841 = vmatprep.subr.bf16.mxu1 %v7030_v12  ;;  %v7109_v11 = vld [vmem:[#allocation5 + $0xed0] ss:$8 sps:$4 sm:$0xff]   ;;  %v7114_v12 = vld [vmem:[#allocation5 + $0x2e4] ss:$8 sps:$4 sm:$0xff]  }
  0xb7   :  { %5333 = vmatprep.subr.bf16.mxu0 %v7033_v15  ;;  %v7115_v15 = vld [vmem:[#allocation5 + $0xee0] ss:$8 sps:$4 sm:$0xff]  }
  0xb8   :  { %4833 = vmatmul.mubr.bf16.vlgmr.msra.gmra.mrb[0].mxu1 %v105_v18  ;;  %v7118_v18 = vld [vmem:[#allocation5 + $0x2f0] ss:$8 sps:$4 sm:$0xff]  }
  0xb9   :  { %5325 = vmatmul.mubr.bf16.vlgmr.msra.gmra.mrb[0].mxu0 %v129_v19  ;;  %4842 = vmatpush1.bf16.msra.mxu1 %v7028_v16  ;;  %v7120_v16 = vld [vmem:[#allocation5 + $0x2f4] ss:$8 sps:$4 sm:$0xff]   ;;  %v7121_v19 = vld [vmem:[#allocation5 + $0xef0] ss:$8 sps:$4 sm:$0xff]  }
  0xba   :  { %5334 = vmatpush1.bf16.msra.mxu0 %v7031_v17  ;;  %4843 = vmatprep.subr.bf16.mxu1 %v7036_v20  ;;  %v7123_v17 = vld [vmem:[#allocation5 + $0xef4] ss:$8 sps:$4 sm:$0xff]   ;;  %v7126_v20 = vld [vmem:[#allocation5 + $0x304] ss:$8 sps:$4 sm:$0xff]  }
  0xbb   :  { %5335 = vmatprep.subr.bf16.mxu0 %v7039_v21  ;;  %4873 = vmatprep.mubr.bf16.mxu1 %v108_v24  ;;  %v59_v21 = vld [vmem:[#allocation2 + $0x20] sm:$0xff] }
  0xbc   :  { %5365 = vmatprep.mubr.bf16.mxu0 %v132_v29  ;;  %v7124_v24 = vld [vmem:[#allocation5 + $0x300] ss:$8 sps:$4 sm:$0xff]   ;;  %v107_v26 = vpack.c.bf16 %v59_v21, %v59_v21  ;;  %v86_v29 = vld [vmem:[#allocation2 + $0xf8] sm:$0xff]  ;;  %v7213_v21 = vld [vmem:[#allocation5 + $0xfe4] ss:$8 sps:$4 sm:$0xff]  }
  0xbd   :  { %4844 = vmatpush1.bf16.msra.mxu1 %v7034_v23  ;;  %v7129_v23 = vld [vmem:[#allocation5 + $0xf04] ss:$8 sps:$4 sm:$0xff]  }
  0xbe   :  { %5336 = vmatpush1.bf16.msra.mxu0 %v7037_v25  ;;  %4845 = vmatprep.subr.bf16.mxu1 %v7042_v27  ;;  %v7127_v25 = vld [vmem:[#allocation5 + $0xf00] ss:$8 sps:$4 sm:$0xff]   ;;  %v131_v27 = vpack.c.bf16 %v83_v22, %v83_v22 }
  0xbf   :  { %5337 = vmatprep.subr.bf16.mxu0 %v7045_v28  ;;  %v62_v28 = vld [vmem:[#allocation2 + $0x38] sm:$0xff]  ;;  %v7208_v22 = vld [vmem:[#allocation5 + $0x3e0] ss:$8 sps:$4 sm:$0xff]  }
  0xc1   :  { %4846 = vmatpush1.bf16.msra.mxu1 %v7040_v30  ;;  %v7132_v30 = vld [vmem:[#allocation5 + $0x314] ss:$8 sps:$4 sm:$0xff]  }
  0xc2   :  { %5338 = vmatpush1.bf16.msra.mxu0 %v7043_v31  ;;  %4847 = vmatprep.subr.bf16.mxu1 %v7048_v32  ;;  %v7135_v31 = vld [vmem:[#allocation5 + $0xf14] ss:$8 sps:$4 sm:$0xff]   ;;  %v110_v32 = vpack.c.bf16 %v62_v28, %v62_v28  ;;  %v7222_v28 = vld [vmem:[#allocation5 + $0x404] ss:$8 sps:$4 sm:$0xff]  }
  0xc3   :  { %5339 = vmatprep.subr.bf16.mxu0 %v7051_v33  ;;  %v134_v33 = vpack.c.bf16 %v86_v29, %v86_v29  ;;  %v61_v29 = vld [vmem:[#allocation2 + $0x30] sm:$0xff] }
  0xc5   :  { %4848 = vmatpush1.bf16.msra.mxu1 %v7046_v34  ;;  %v7130_v34 = vld [vmem:[#allocation5 + $0x310] ss:$8 sps:$4 sm:$0xff]  }
  0xc6   :  { %5340 = vmatpush1.bf16.msra.mxu0 %v7049_v35  ;;  %4849 = vmatprep.subr.bf16.mxu1 %v7054_v36  ;;  %v7133_v35 = vld [vmem:[#allocation5 + $0xf10] ss:$8 sps:$4 sm:$0xff]   ;;  %v7138_v36 = vld [vmem:[#allocation5 + $0x324] ss:$8 sps:$4 sm:$0xff]  }
  0xc7   :  { %5341 = vmatprep.subr.bf16.mxu0 %v7057_v37  ;;  %v7141_v37 = vld [vmem:[#allocation5 + $0xf24] ss:$8 sps:$4 sm:$0xff]  }
  0xc9   :  { %4850 = vmatpush1.bf16.msra.mxu1 %v7052_v38  ;;  %v7136_v38 = vld [vmem:[#allocation5 + $0x320] ss:$8 sps:$4 sm:$0xff]  }
  0xca   :  { %5342 = vmatpush1.bf16.msra.mxu0 %v7055_v39  ;;  %4851 = vmatprep.subr.bf16.mxu1 %v7060_v40  ;;  %v7139_v39 = vld [vmem:[#allocation5 + $0xf20] ss:$8 sps:$4 sm:$0xff]   ;;  %v7144_v40 = vld [vmem:[#allocation5 + $0x334] ss:$8 sps:$4 sm:$0xff]  }
  0xcb   :  { %5343 = vmatprep.subr.bf16.mxu0 %v7063_v41  ;;  %v7147_v41 = vld [vmem:[#allocation5 + $0xf34] ss:$8 sps:$4 sm:$0xff]  }
  0xcd   :  { %4852 = vmatpush1.bf16.msra.mxu1 %v7058_v42  ;;  %v7142_v42 = vld [vmem:[#allocation5 + $0x330] ss:$8 sps:$4 sm:$0xff]  }
  0xce   :  { %5344 = vmatpush1.bf16.msra.mxu0 %v7061_v43  ;;  %4853 = vmatprep.subr.bf16.mxu1 %v7066_v44  ;;  %v7145_v43 = vld [vmem:[#allocation5 + $0xf30] ss:$8 sps:$4 sm:$0xff]   ;;  %v7150_v44 = vld [vmem:[#allocation5 + $0x344] ss:$8 sps:$4 sm:$0xff]  }
  0xcf   :  { %5345 = vmatprep.subr.bf16.mxu0 %v7069_v45  ;;  %v7153_v45 = vld [vmem:[#allocation5 + $0xf44] ss:$8 sps:$4 sm:$0xff]  }
  0xd1   :  { %4854 = vmatpush1.bf16.msra.mxu1 %v7064_v46  ;;  %v7148_v46 = vld [vmem:[#allocation5 + $0x340] ss:$8 sps:$4 sm:$0xff]  }
  0xd2   :  { %5346 = vmatpush1.bf16.msra.mxu0 %v7067_v47  ;;  %4855 = vmatprep.subr.bf16.mxu1 %v7072_v48  ;;  %v7151_v47 = vld [vmem:[#allocation5 + $0xf40] ss:$8 sps:$4 sm:$0xff]   ;;  %v7156_v48 = vld [vmem:[#allocation5 + $0x354] ss:$8 sps:$4 sm:$0xff]  }
  0xd3   :  { %5347 = vmatprep.subr.bf16.mxu0 %v7075_v49  ;;  %v7159_v49 = vld [vmem:[#allocation5 + $0xf54] ss:$8 sps:$4 sm:$0xff]  }
  0xd5   :  { %4856 = vmatpush1.bf16.msra.mxu1 %v7070_v50  ;;  %v7154_v50 = vld [vmem:[#allocation5 + $0x350] ss:$8 sps:$4 sm:$0xff]  }
  0xd6   :  { %5348 = vmatpush1.bf16.msra.mxu0 %v7073_v51  ;;  %4857 = vmatprep.subr.bf16.mxu1 %v7078_v52  ;;  %v7157_v51 = vld [vmem:[#allocation5 + $0xf50] ss:$8 sps:$4 sm:$0xff]   ;;  %v7162_v52 = vld [vmem:[#allocation5 + $0x364] ss:$8 sps:$4 sm:$0xff]  }
  0xd7   :  { %5349 = vmatprep.subr.bf16.mxu0 %v7081_v53  ;;  %v7165_v53 = vld [vmem:[#allocation5 + $0xf64] ss:$8 sps:$4 sm:$0xff]  }
  0xd9   :  { %4858 = vmatpush1.bf16.msra.mxu1 %v7076_v54  ;;  %v7160_v54 = vld [vmem:[#allocation5 + $0x360] ss:$8 sps:$4 sm:$0xff]  }
  0xda   :  { %5350 = vmatpush1.bf16.msra.mxu0 %v7079_v55  ;;  %4859 = vmatprep.subr.bf16.mxu1 %v7084_v56  ;;  %v7163_v55 = vld [vmem:[#allocation5 + $0xf60] ss:$8 sps:$4 sm:$0xff]   ;;  %v7168_v56 = vld [vmem:[#allocation5 + $0x374] ss:$8 sps:$4 sm:$0xff]  }
  0xdb   :  { %5351 = vmatprep.subr.bf16.mxu0 %v7087_v57  ;;  %v7171_v57 = vld [vmem:[#allocation5 + $0xf74] ss:$8 sps:$4 sm:$0xff]  }
  0xdd   :  { %4860 = vmatpush1.bf16.msra.mxu1 %v7082_v58  ;;  %v7166_v58 = vld [vmem:[#allocation5 + $0x370] ss:$8 sps:$4 sm:$0xff]  }
  0xde   :  { %5352 = vmatpush1.bf16.msra.mxu0 %v7085_v59  ;;  %4861 = vmatprep.subr.bf16.mxu1 %v7090_v60  ;;  %v7169_v59 = vld [vmem:[#allocation5 + $0xf70] ss:$8 sps:$4 sm:$0xff]   ;;  %v7174_v60 = vld [vmem:[#allocation5 + $0x384] ss:$8 sps:$4 sm:$0xff]  }
  0xdf   :  { %5353 = vmatprep.subr.bf16.mxu0 %v7093_v61  ;;  %v7177_v61 = vld [vmem:[#allocation5 + $0xf84] ss:$8 sps:$4 sm:$0xff]  }
  0xe1   :  { %4862 = vmatpush1.bf16.msra.mxu1 %v7088_v62  ;;  %v7172_v62 = vld [vmem:[#allocation5 + $0x380] ss:$8 sps:$4 sm:$0xff]  }
  0xe2   :  { %5354 = vmatpush1.bf16.msra.mxu0 %v7091_v63  ;;  %4863 = vmatprep.subr.bf16.mxu1 %v7096_v0  ;;  %v7175_v63 = vld [vmem:[#allocation5 + $0xf80] ss:$8 sps:$4 sm:$0xff]   ;;  %v7180_v0 = vld [vmem:[#allocation5 + $0x394] ss:$8 sps:$4 sm:$0xff]  }
  0xe3   :  { %5355 = vmatprep.subr.bf16.mxu0 %v7099_v1  ;;  %v7183_v1 = vld [vmem:[#allocation5 + $0xf94] ss:$8 sps:$4 sm:$0xff]  }
  0xe5   :  { %4864 = vmatpush1.bf16.msra.mxu1 %v7094_v2  ;;  %v7178_v2 = vld [vmem:[#allocation5 + $0x390] ss:$8 sps:$4 sm:$0xff]  }
  0xe6   :  { %5356 = vmatpush1.bf16.msra.mxu0 %v7097_v3  ;;  %4865 = vmatprep.subr.bf16.mxu1 %v7102_v4  ;;  %v7181_v3 = vld [vmem:[#allocation5 + $0xf90] ss:$8 sps:$4 sm:$0xff]   ;;  %v7186_v4 = vld [vmem:[#allocation5 + $0x3a4] ss:$8 sps:$4 sm:$0xff]  }
  0xe7   :  { %5357 = vmatprep.subr.bf16.mxu0 %v7105_v5  ;;  %v7189_v5 = vld [vmem:[#allocation5 + $0xfa4] ss:$8 sps:$4 sm:$0xff]  }
  0xe9   :  { %4866 = vmatpush1.bf16.msra.mxu1 %v7100_v6  ;;  %v7184_v6 = vld [vmem:[#allocation5 + $0x3a0] ss:$8 sps:$4 sm:$0xff]  }
  0xea   :  { %5358 = vmatpush1.bf16.msra.mxu0 %v7103_v7  ;;  %4867 = vmatprep.subr.bf16.mxu1 %v7108_v8  ;;  %v7187_v7 = vld [vmem:[#allocation5 + $0xfa0] ss:$8 sps:$4 sm:$0xff]   ;;  %v7192_v8 = vld [vmem:[#allocation5 + $0x3b4] ss:$8 sps:$4 sm:$0xff]  }
  0xeb   :  { %5359 = vmatprep.subr.bf16.mxu0 %v7111_v9  ;;  %v7195_v9 = vld [vmem:[#allocation5 + $0xfb4] ss:$8 sps:$4 sm:$0xff]  }
  0xed   :  { %4868 = vmatpush1.bf16.msra.mxu1 %v7106_v10  ;;  %v7190_v10 = vld [vmem:[#allocation5 + $0x3b0] ss:$8 sps:$4 sm:$0xff]  }
  0xee   :  { %5360 = vmatpush1.bf16.msra.mxu0 %v7109_v11  ;;  %4869 = vmatprep.subr.bf16.mxu1 %v7114_v12  ;;  %v7193_v11 = vld [vmem:[#allocation5 + $0xfb0] ss:$8 sps:$4 sm:$0xff]   ;;  %v7198_v12 = vld [vmem:[#allocation5 + $0x3c4] ss:$8 sps:$4 sm:$0xff]  }
  0xef   :  { %5361 = vmatprep.subr.bf16.mxu0 %v7117_v13  ;;  %v7201_v13 = vld [vmem:[#allocation5 + $0xfc4] ss:$8 sps:$4 sm:$0xff]  }
  0xf1   :  { %4870 = vmatpush1.bf16.msra.mxu1 %v7112_v14  ;;  %v7196_v14 = vld [vmem:[#allocation5 + $0x3c0] ss:$8 sps:$4 sm:$0xff]  }
  0xf2   :  { %5362 = vmatpush1.bf16.msra.mxu0 %v7115_v15  ;;  %4871 = vmatprep.subr.bf16.mxu1 %v7120_v16  ;;  %v7199_v15 = vld [vmem:[#allocation5 + $0xfc0] ss:$8 sps:$4 sm:$0xff]   ;;  %v7204_v16 = vld [vmem:[#allocation5 + $0x3d4] ss:$8 sps:$4 sm:$0xff]  }
  0xf3   :  { %5363 = vmatprep.subr.bf16.mxu0 %v7123_v17  ;;  %v7207_v17 = vld [vmem:[#allocation5 + $0xfd4] ss:$8 sps:$4 sm:$0xff]  }
  0xf5   :  { %4872 = vmatpush1.bf16.msra.mxu1 %v7118_v18  ;;  %v7202_v18 = vld [vmem:[#allocation5 + $0x3d0] ss:$8 sps:$4 sm:$0xff]  }
  0xf6   :  { %5364 = vmatpush1.bf16.msra.mxu0 %v7121_v19  ;;  %4882 = vmatprep.subr.bf16.mxu1 %v7126_v20  ;;  %v7205_v19 = vld [vmem:[#allocation5 + $0xfd0] ss:$8 sps:$4 sm:$0xff]   ;;  %v7210_v20 = vld [vmem:[#allocation5 + $0x3e4] ss:$8 sps:$4 sm:$0xff]  }
  0xf7   :  { %5374 = vmatprep.subr.bf16.mxu0 %v7129_v23  ;;  %v7211_v23 = vld [vmem:[#allocation5 + $0xfe0] ss:$8 sps:$4 sm:$0xff]  }
  0xf8   :  { %4874 = vmatmul.mubr.bf16.vlgmr.msra.gmra.mrb[0].mxu1 %v107_v26  ;;  %v7214_v26 = vld [vmem:[#allocation5 + $0x3f0] ss:$8 sps:$4 sm:$0xff]  }
  0xf9   :  { %5366 = vmatmul.mubr.bf16.vlgmr.msra.gmra.mrb[0].mxu0 %v131_v27  ;;  %4883 = vmatpush1.bf16.msra.mxu1 %v7124_v24  ;;  %v7216_v24 = vld [vmem:[#allocation5 + $0x3f4] ss:$8 sps:$4 sm:$0xff]   ;;  %v7217_v27 = vld [vmem:[#allocation5 + $0xff0] ss:$8 sps:$4 sm:$0xff]  }
  0xfa   :  { %5375 = vmatpush1.bf16.msra.mxu0 %v7127_v25  ;;  %4884 = vmatprep.subr.bf16.mxu1 %v7132_v30  ;;  %v7219_v25 = vld [vmem:[#allocation5 + $0xff4] ss:$8 sps:$4 sm:$0xff]  }
  0xfb   :  { %5376 = vmatprep.subr.bf16.mxu0 %v7135_v31  ;;  %4914 = vmatprep.mubr.bf16.mxu1 %v110_v32  ;;  %v85_v30 = vld [vmem:[#allocation2 + $0xf0] sm:$0xff]  ;;  %v7225_v31 = vld [vmem:[#allocation5 + $0x1004] ss:$8 sps:$4 sm:$0xff]   ;;  %v7220_v32 = vld [vmem:[#allocation5 + $0x400] ss:$8 sps:$4 sm:$0xff]  }
  0xfc   :  { %5406 = vmatprep.mubr.bf16.mxu0 %v134_v33  ;;  %v7223_v33 = vld [vmem:[#allocation5 + $0x1000] ss:$8 sps:$4 sm:$0xff]  }
  0xfd   :  { %4885 = vmatpush1.bf16.msra.mxu1 %v7130_v34  ;;  %v109_v34 = vpack.c.bf16 %v61_v29, %v61_v29  ;;  %v7309_v29 = vld [vmem:[#allocation5 + $0x10e4] ss:$8 sps:$4 sm:$0xff]  }
  0xfe   :  { %5377 = vmatpush1.bf16.msra.mxu0 %v7133_v35  ;;  %4886 = vmatprep.subr.bf16.mxu1 %v7138_v36  ;;  %v133_v35 = vpack.c.bf16 %v85_v30, %v85_v30  ;;  %v64_v36 = vld [vmem:[#allocation2 + $0x48] sm:$0xff] }
  0xff   :  { %5378 = vmatprep.subr.bf16.mxu0 %v7141_v37  ;;  %v88_v37 = vld [vmem:[#allocation2 + $0x108] sm:$0xff] }
 0x100   :  { %v7304_v30 = vld [vmem:[#allocation5 + $0x4e0] ss:$8 sps:$4 sm:$0xff]  }
 0x101   :  { %4887 = vmatpush1.bf16.msra.mxu1 %v7136_v38  ;;  %v7228_v38 = vld [vmem:[#allocation5 + $0x414] ss:$8 sps:$4 sm:$0xff]  }
 0x102   :  { %5379 = vmatpush1.bf16.msra.mxu0 %v7139_v39  ;;  %4888 = vmatprep.subr.bf16.mxu1 %v7144_v40  ;;  %v7231_v39 = vld [vmem:[#allocation5 + $0x1014] ss:$8 sps:$4 sm:$0xff]   ;;  %v112_v40 = vpack.c.bf16 %v64_v36, %v64_v36  ;;  %v7318_v36 = vld [vmem:[#allocation5 + $0x504] ss:$8 sps:$4 sm:$0xff]  }
 0x103   :  { %5380 = vmatprep.subr.bf16.mxu0 %v7147_v41  ;;  %v136_v41 = vpack.c.bf16 %v88_v37, %v88_v37  ;;  %v7321_v37 = vld [vmem:[#allocation5 + $0x1104] ss:$8 sps:$4 sm:$0xff]  }
 0x105   :  { %4889 = vmatpush1.bf16.msra.mxu1 %v7142_v42  ;;  %v7226_v42 = vld [vmem:[#allocation5 + $0x410] ss:$8 sps:$4 sm:$0xff]  }
 0x106   :  { %5381 = vmatpush1.bf16.msra.mxu0 %v7145_v43  ;;  %4890 = vmatprep.subr.bf16.mxu1 %v7150_v44  ;;  %v7229_v43 = vld [vmem:[#allocation5 + $0x1010] ss:$8 sps:$4 sm:$0xff]   ;;  %v7234_v44 = vld [vmem:[#allocation5 + $0x424] ss:$8 sps:$4 sm:$0xff]  }
 0x107   :  { %5382 = vmatprep.subr.bf16.mxu0 %v7153_v45  ;;  %v7237_v45 = vld [vmem:[#allocation5 + $0x1024] ss:$8 sps:$4 sm:$0xff]  }
 0x109   :  { %4891 = vmatpush1.bf16.msra.mxu1 %v7148_v46  ;;  %v7232_v46 = vld [vmem:[#allocation5 + $0x420] ss:$8 sps:$4 sm:$0xff]  }
 0x10a   :  { %5383 = vmatpush1.bf16.msra.mxu0 %v7151_v47  ;;  %4892 = vmatprep.subr.bf16.mxu1 %v7156_v48  ;;  %v7235_v47 = vld [vmem:[#allocation5 + $0x1020] ss:$8 sps:$4 sm:$0xff]   ;;  %v7240_v48 = vld [vmem:[#allocation5 + $0x434] ss:$8 sps:$4 sm:$0xff]  }
 0x10b   :  { %5384 = vmatprep.subr.bf16.mxu0 %v7159_v49  ;;  %v7243_v49 = vld [vmem:[#allocation5 + $0x1034] ss:$8 sps:$4 sm:$0xff]  }
 0x10d   :  { %4893 = vmatpush1.bf16.msra.mxu1 %v7154_v50  ;;  %v7238_v50 = vld [vmem:[#allocation5 + $0x430] ss:$8 sps:$4 sm:$0xff]  }
 0x10e   :  { %5385 = vmatpush1.bf16.msra.mxu0 %v7157_v51  ;;  %4894 = vmatprep.subr.bf16.mxu1 %v7162_v52  ;;  %v7241_v51 = vld [vmem:[#allocation5 + $0x1030] ss:$8 sps:$4 sm:$0xff]   ;;  %v7246_v52 = vld [vmem:[#allocation5 + $0x444] ss:$8 sps:$4 sm:$0xff]  }
 0x10f   :  { %5386 = vmatprep.subr.bf16.mxu0 %v7165_v53  ;;  %v7249_v53 = vld [vmem:[#allocation5 + $0x1044] ss:$8 sps:$4 sm:$0xff]  }
 0x111   :  { %4895 = vmatpush1.bf16.msra.mxu1 %v7160_v54  ;;  %v7244_v54 = vld [vmem:[#allocation5 + $0x440] ss:$8 sps:$4 sm:$0xff]  }
 0x112   :  { %5387 = vmatpush1.bf16.msra.mxu0 %v7163_v55  ;;  %4896 = vmatprep.subr.bf16.mxu1 %v7168_v56  ;;  %v7247_v55 = vld [vmem:[#allocation5 + $0x1040] ss:$8 sps:$4 sm:$0xff]   ;;  %v7252_v56 = vld [vmem:[#allocation5 + $0x454] ss:$8 sps:$4 sm:$0xff]  }
 0x113   :  { %5388 = vmatprep.subr.bf16.mxu0 %v7171_v57  ;;  %v7255_v57 = vld [vmem:[#allocation5 + $0x1054] ss:$8 sps:$4 sm:$0xff]  }
 0x115   :  { %4897 = vmatpush1.bf16.msra.mxu1 %v7166_v58  ;;  %v7250_v58 = vld [vmem:[#allocation5 + $0x450] ss:$8 sps:$4 sm:$0xff]  }
 0x116   :  { %5389 = vmatpush1.bf16.msra.mxu0 %v7169_v59  ;;  %4898 = vmatprep.subr.bf16.mxu1 %v7174_v60  ;;  %v7253_v59 = vld [vmem:[#allocation5 + $0x1050] ss:$8 sps:$4 sm:$0xff]   ;;  %v7258_v60 = vld [vmem:[#allocation5 + $0x464] ss:$8 sps:$4 sm:$0xff]  }
 0x117   :  { %5390 = vmatprep.subr.bf16.mxu0 %v7177_v61  ;;  %v7261_v61 = vld [vmem:[#allocation5 + $0x1064] ss:$8 sps:$4 sm:$0xff]  }
 0x119   :  { %4899 = vmatpush1.bf16.msra.mxu1 %v7172_v62  ;;  %v7256_v62 = vld [vmem:[#allocation5 + $0x460] ss:$8 sps:$4 sm:$0xff]  }
 0x11a   :  { %5391 = vmatpush1.bf16.msra.mxu0 %v7175_v63  ;;  %4900 = vmatprep.subr.bf16.mxu1 %v7180_v0  ;;  %v7259_v63 = vld [vmem:[#allocation5 + $0x1060] ss:$8 sps:$4 sm:$0xff]   ;;  %v7264_v0 = vld [vmem:[#allocation5 + $0x474] ss:$8 sps:$4 sm:$0xff]  }
 0x11b   :  { %5392 = vmatprep.subr.bf16.mxu0 %v7183_v1  ;;  %v7267_v1 = vld [vmem:[#allocation5 + $0x1074] ss:$8 sps:$4 sm:$0xff]  }
 0x11d   :  { %4901 = vmatpush1.bf16.msra.mxu1 %v7178_v2  ;;  %v7262_v2 = vld [vmem:[#allocation5 + $0x470] ss:$8 sps:$4 sm:$0xff]  }
 0x11e   :  { %5393 = vmatpush1.bf16.msra.mxu0 %v7181_v3  ;;  %4902 = vmatprep.subr.bf16.mxu1 %v7186_v4  ;;  %v7265_v3 = vld [vmem:[#allocation5 + $0x1070] ss:$8 sps:$4 sm:$0xff]   ;;  %v7270_v4 = vld [vmem:[#allocation5 + $0x484] ss:$8 sps:$4 sm:$0xff]  }
 0x11f   :  { %5394 = vmatprep.subr.bf16.mxu0 %v7189_v5  ;;  %v7273_v5 = vld [vmem:[#allocation5 + $0x1084] ss:$8 sps:$4 sm:$0xff]  }
 0x121   :  { %4903 = vmatpush1.bf16.msra.mxu1 %v7184_v6  ;;  %v7268_v6 = vld [vmem:[#allocation5 + $0x480] ss:$8 sps:$4 sm:$0xff]  }
 0x122   :  { %5395 = vmatpush1.bf16.msra.mxu0 %v7187_v7  ;;  %4904 = vmatprep.subr.bf16.mxu1 %v7192_v8  ;;  %v7271_v7 = vld [vmem:[#allocation5 + $0x1080] ss:$8 sps:$4 sm:$0xff]   ;;  %v7276_v8 = vld [vmem:[#allocation5 + $0x494] ss:$8 sps:$4 sm:$0xff]  }
 0x123   :  { %5396 = vmatprep.subr.bf16.mxu0 %v7195_v9  ;;  %v7279_v9 = vld [vmem:[#allocation5 + $0x1094] ss:$8 sps:$4 sm:$0xff]  }
 0x125   :  { %4905 = vmatpush1.bf16.msra.mxu1 %v7190_v10  ;;  %v7274_v10 = vld [vmem:[#allocation5 + $0x490] ss:$8 sps:$4 sm:$0xff]  }
 0x126   :  { %5397 = vmatpush1.bf16.msra.mxu0 %v7193_v11  ;;  %4906 = vmatprep.subr.bf16.mxu1 %v7198_v12  ;;  %v7277_v11 = vld [vmem:[#allocation5 + $0x1090] ss:$8 sps:$4 sm:$0xff]   ;;  %v7282_v12 = vld [vmem:[#allocation5 + $0x4a4] ss:$8 sps:$4 sm:$0xff]  }
 0x127   :  { %5398 = vmatprep.subr.bf16.mxu0 %v7201_v13  ;;  %v7285_v13 = vld [vmem:[#allocation5 + $0x10a4] ss:$8 sps:$4 sm:$0xff]  }
 0x129   :  { %4907 = vmatpush1.bf16.msra.mxu1 %v7196_v14  ;;  %v7280_v14 = vld [vmem:[#allocation5 + $0x4a0] ss:$8 sps:$4 sm:$0xff]  }
 0x12a   :  { %5399 = vmatpush1.bf16.msra.mxu0 %v7199_v15  ;;  %4908 = vmatprep.subr.bf16.mxu1 %v7204_v16  ;;  %v7283_v15 = vld [vmem:[#allocation5 + $0x10a0] ss:$8 sps:$4 sm:$0xff]   ;;  %v7288_v16 = vld [vmem:[#allocation5 + $0x4b4] ss:$8 sps:$4 sm:$0xff]  }
 0x12b   :  { %5400 = vmatprep.subr.bf16.mxu0 %v7207_v17  ;;  %v7291_v17 = vld [vmem:[#allocation5 + $0x10b4] ss:$8 sps:$4 sm:$0xff]  }
 0x12d   :  { %4909 = vmatpush1.bf16.msra.mxu1 %v7202_v18  ;;  %v7286_v18 = vld [vmem:[#allocation5 + $0x4b0] ss:$8 sps:$4 sm:$0xff]  }
 0x12e   :  { %5401 = vmatpush1.bf16.msra.mxu0 %v7205_v19  ;;  %4910 = vmatprep.subr.bf16.mxu1 %v7210_v20  ;;  %v7289_v19 = vld [vmem:[#allocation5 + $0x10b0] ss:$8 sps:$4 sm:$0xff]   ;;  %v7294_v20 = vld [vmem:[#allocation5 + $0x4c4] ss:$8 sps:$4 sm:$0xff]  }
 0x12f   :  { %5402 = vmatprep.subr.bf16.mxu0 %v7213_v21  ;;  %v7297_v21 = vld [vmem:[#allocation5 + $0x10c4] ss:$8 sps:$4 sm:$0xff]  }
 0x131   :  { %4911 = vmatpush1.bf16.msra.mxu1 %v7208_v22  ;;  %v7292_v22 = vld [vmem:[#allocation5 + $0x4c0] ss:$8 sps:$4 sm:$0xff]  }
 0x132   :  { %5403 = vmatpush1.bf16.msra.mxu0 %v7211_v23  ;;  %4912 = vmatprep.subr.bf16.mxu1 %v7216_v24  ;;  %v7295_v23 = vld [vmem:[#allocation5 + $0x10c0] ss:$8 sps:$4 sm:$0xff]   ;;  %v7300_v24 = vld [vmem:[#allocation5 + $0x4d4] ss:$8 sps:$4 sm:$0xff]  }
 0x133   :  { %5404 = vmatprep.subr.bf16.mxu0 %v7219_v25  ;;  %v7303_v25 = vld [vmem:[#allocation5 + $0x10d4] ss:$8 sps:$4 sm:$0xff]  }
 0x135   :  { %4913 = vmatpush1.bf16.msra.mxu1 %v7214_v26  ;;  %v7298_v26 = vld [vmem:[#allocation5 + $0x4d0] ss:$8 sps:$4 sm:$0xff]  }
 0x136   :  { %5405 = vmatpush1.bf16.msra.mxu0 %v7217_v27  ;;  %4923 = vmatprep.subr.bf16.mxu1 %v7222_v28  ;;  %v7301_v27 = vld [vmem:[#allocation5 + $0x10d0] ss:$8 sps:$4 sm:$0xff]   ;;  %v7306_v28 = vld [vmem:[#allocation5 + $0x4e4] ss:$8 sps:$4 sm:$0xff]  }
 0x137   :  { %5415 = vmatprep.subr.bf16.mxu0 %v7225_v31  ;;  %v7307_v31 = vld [vmem:[#allocation5 + $0x10e0] ss:$8 sps:$4 sm:$0xff]  }
 0x138   :  { %4915 = vmatmul.mubr.bf16.vlgmr.msra.gmra.mrb[0].mxu1 %v109_v34  ;;  %v7310_v34 = vld [vmem:[#allocation5 + $0x4f0] ss:$8 sps:$4 sm:$0xff]  }
 0x139   :  { %5407 = vmatmul.mubr.bf16.vlgmr.msra.gmra.mrb[0].mxu0 %v133_v35  ;;  %4924 = vmatpush1.bf16.msra.mxu1 %v7220_v32  ;;  %v7312_v32 = vld [vmem:[#allocation5 + $0x4f4] ss:$8 sps:$4 sm:$0xff]   ;;  %v7313_v35 = vld [vmem:[#allocation5 + $0x10f0] ss:$8 sps:$4 sm:$0xff]  }
 0x13a   :  { %5416 = vmatpush1.bf16.msra.mxu0 %v7223_v33  ;;  %4925 = vmatprep.subr.bf16.mxu1 %v7228_v38  ;;  %v7315_v33 = vld [vmem:[#allocation5 + $0x10f4] ss:$8 sps:$4 sm:$0xff]   ;;  %v63_v38 = vld [vmem:[#allocation2 + $0x40] sm:$0xff] }
 0x13b   :  { %5417 = vmatprep.subr.bf16.mxu0 %v7231_v39  ;;  %4955 = vmatprep.mubr.bf16.mxu1 %v112_v40  ;;  %v87_v39 = vld [vmem:[#allocation2 + $0x100] sm:$0xff]  ;;  %v66_v40 = vld [vmem:[#allocation2 + $0x58] sm:$0xff] }
 0x13c   :  { %5447 = vmatprep.mubr.bf16.mxu0 %v136_v41  ;;  %v90_v41 = vld [vmem:[#allocation2 + $0x118] sm:$0xff] }
 0x13d   :  { %4926 = vmatpush1.bf16.msra.mxu1 %v7226_v42  ;;  %v111_v42 = vpack.c.bf16 %v63_v38, %v63_v38  ;;  %v7400_v38 = vld [vmem:[#allocation5 + $0x5e0] ss:$8 sps:$4 sm:$0xff]  }
 0x13e   :  { %5418 = vmatpush1.bf16.msra.mxu0 %v7229_v43  ;;  %4927 = vmatprep.subr.bf16.mxu1 %v7234_v44  ;;  %v135_v43 = vpack.c.bf16 %v87_v39, %v87_v39  ;;  %v7316_v44 = vld [vmem:[#allocation5 + $0x500] ss:$8 sps:$4 sm:$0xff]  }
 0x13f   :  { %5419 = vmatprep.subr.bf16.mxu0 %v7237_v45  ;;  %v7319_v45 = vld [vmem:[#allocation5 + $0x1100] ss:$8 sps:$4 sm:$0xff]  }
 0x140   :  { %v7403_v39 = vld [vmem:[#allocation5 + $0x11e0] ss:$8 sps:$4 sm:$0xff]  }
 0x141   :  { %4928 = vmatpush1.bf16.msra.mxu1 %v7232_v46  ;;  %v7324_v46 = vld [vmem:[#allocation5 + $0x514] ss:$8 sps:$4 sm:$0xff]  }
 0x142   :  { %5420 = vmatpush1.bf16.msra.mxu0 %v7235_v47  ;;  %4929 = vmatprep.subr.bf16.mxu1 %v7240_v48  ;;  %v7327_v47 = vld [vmem:[#allocation5 + $0x1114] ss:$8 sps:$4 sm:$0xff]   ;;  %v114_v48 = vpack.c.bf16 %v66_v40, %v66_v40 }
 0x143   :  { %5421 = vmatprep.subr.bf16.mxu0 %v7243_v49  ;;  %v138_v49 = vpack.c.bf16 %v90_v41, %v90_v41  ;;  %v7408_v40 = vld [vmem:[#allocation5 + $0x5f4] ss:$8 sps:$4 sm:$0xff]  }
 0x144   :  { %v7411_v41 = vld [vmem:[#allocation5 + $0x11f4] ss:$8 sps:$4 sm:$0xff]  }
 0x145   :  { %4930 = vmatpush1.bf16.msra.mxu1 %v7238_v50  ;;  %v7322_v50 = vld [vmem:[#allocation5 + $0x510] ss:$8 sps:$4 sm:$0xff]  }
 0x146   :  { %5422 = vmatpush1.bf16.msra.mxu0 %v7241_v51  ;;  %4931 = vmatprep.subr.bf16.mxu1 %v7246_v52  ;;  %v7325_v51 = vld [vmem:[#allocation5 + $0x1110] ss:$8 sps:$4 sm:$0xff]   ;;  %v7330_v52 = vld [vmem:[#allocation5 + $0x524] ss:$8 sps:$4 sm:$0xff]  }
 0x147   :  { %5423 = vmatprep.subr.bf16.mxu0 %v7249_v53  ;;  %v7333_v53 = vld [vmem:[#allocation5 + $0x1124] ss:$8 sps:$4 sm:$0xff]  }
 0x149   :  { %4932 = vmatpush1.bf16.msra.mxu1 %v7244_v54  ;;  %v7328_v54 = vld [vmem:[#allocation5 + $0x520] ss:$8 sps:$4 sm:$0xff]  }
 0x14a   :  { %5424 = vmatpush1.bf16.msra.mxu0 %v7247_v55  ;;  %4933 = vmatprep.subr.bf16.mxu1 %v7252_v56  ;;  %v7331_v55 = vld [vmem:[#allocation5 + $0x1120] ss:$8 sps:$4 sm:$0xff]   ;;  %v7336_v56 = vld [vmem:[#allocation5 + $0x534] ss:$8 sps:$4 sm:$0xff]  }
 0x14b   :  { %5425 = vmatprep.subr.bf16.mxu0 %v7255_v57  ;;  %v7339_v57 = vld [vmem:[#allocation5 + $0x1134] ss:$8 sps:$4 sm:$0xff]  }
 0x14d   :  { %4934 = vmatpush1.bf16.msra.mxu1 %v7250_v58  ;;  %v7334_v58 = vld [vmem:[#allocation5 + $0x530] ss:$8 sps:$4 sm:$0xff]  }
 0x14e   :  { %5426 = vmatpush1.bf16.msra.mxu0 %v7253_v59  ;;  %4935 = vmatprep.subr.bf16.mxu1 %v7258_v60  ;;  %v7337_v59 = vld [vmem:[#allocation5 + $0x1130] ss:$8 sps:$4 sm:$0xff]   ;;  %v7342_v60 = vld [vmem:[#allocation5 + $0x544] ss:$8 sps:$4 sm:$0xff]  }
 0x14f   :  { %5427 = vmatprep.subr.bf16.mxu0 %v7261_v61  ;;  %v7345_v61 = vld [vmem:[#allocation5 + $0x1144] ss:$8 sps:$4 sm:$0xff]  }
 0x151   :  { %4936 = vmatpush1.bf16.msra.mxu1 %v7256_v62  ;;  %v7340_v62 = vld [vmem:[#allocation5 + $0x540] ss:$8 sps:$4 sm:$0xff]  }
 0x152   :  { %5428 = vmatpush1.bf16.msra.mxu0 %v7259_v63  ;;  %4937 = vmatprep.subr.bf16.mxu1 %v7264_v0  ;;  %v7343_v63 = vld [vmem:[#allocation5 + $0x1140] ss:$8 sps:$4 sm:$0xff]   ;;  %v7348_v0 = vld [vmem:[#allocation5 + $0x554] ss:$8 sps:$4 sm:$0xff]  }
 0x153   :  { %5429 = vmatprep.subr.bf16.mxu0 %v7267_v1  ;;  %v7351_v1 = vld [vmem:[#allocation5 + $0x1154] ss:$8 sps:$4 sm:$0xff]  }
 0x155   :  { %4938 = vmatpush1.bf16.msra.mxu1 %v7262_v2  ;;  %v7346_v2 = vld [vmem:[#allocation5 + $0x550] ss:$8 sps:$4 sm:$0xff]  }
 0x156   :  { %5430 = vmatpush1.bf16.msra.mxu0 %v7265_v3  ;;  %4939 = vmatprep.subr.bf16.mxu1 %v7270_v4  ;;  %v7349_v3 = vld [vmem:[#allocation5 + $0x1150] ss:$8 sps:$4 sm:$0xff]   ;;  %v7354_v4 = vld [vmem:[#allocation5 + $0x564] ss:$8 sps:$4 sm:$0xff]  }
 0x157   :  { %5431 = vmatprep.subr.bf16.mxu0 %v7273_v5  ;;  %v7357_v5 = vld [vmem:[#allocation5 + $0x1164] ss:$8 sps:$4 sm:$0xff]  }
 0x159   :  { %4940 = vmatpush1.bf16.msra.mxu1 %v7268_v6  ;;  %v7352_v6 = vld [vmem:[#allocation5 + $0x560] ss:$8 sps:$4 sm:$0xff]  }
 0x15a   :  { %5432 = vmatpush1.bf16.msra.mxu0 %v7271_v7  ;;  %4941 = vmatprep.subr.bf16.mxu1 %v7276_v8  ;;  %v7355_v7 = vld [vmem:[#allocation5 + $0x1160] ss:$8 sps:$4 sm:$0xff]   ;;  %v7360_v8 = vld [vmem:[#allocation5 + $0x574] ss:$8 sps:$4 sm:$0xff]  }
 0x15b   :  { %5433 = vmatprep.subr.bf16.mxu0 %v7279_v9  ;;  %v7363_v9 = vld [vmem:[#allocation5 + $0x1174] ss:$8 sps:$4 sm:$0xff]  }
 0x15d   :  { %4942 = vmatpush1.bf16.msra.mxu1 %v7274_v10  ;;  %v7358_v10 = vld [vmem:[#allocation5 + $0x570] ss:$8 sps:$4 sm:$0xff]  }
 0x15e   :  { %5434 = vmatpush1.bf16.msra.mxu0 %v7277_v11  ;;  %4943 = vmatprep.subr.bf16.mxu1 %v7282_v12  ;;  %v7361_v11 = vld [vmem:[#allocation5 + $0x1170] ss:$8 sps:$4 sm:$0xff]   ;;  %v7366_v12 = vld [vmem:[#allocation5 + $0x584] ss:$8 sps:$4 sm:$0xff]  }
 0x15f   :  { %5435 = vmatprep.subr.bf16.mxu0 %v7285_v13  ;;  %v7369_v13 = vld [vmem:[#allocation5 + $0x1184] ss:$8 sps:$4 sm:$0xff]  }
 0x161   :  { %4944 = vmatpush1.bf16.msra.mxu1 %v7280_v14  ;;  %v7364_v14 = vld [vmem:[#allocation5 + $0x580] ss:$8 sps:$4 sm:$0xff]  }
 0x162   :  { %5436 = vmatpush1.bf16.msra.mxu0 %v7283_v15  ;;  %4945 = vmatprep.subr.bf16.mxu1 %v7288_v16  ;;  %v7367_v15 = vld [vmem:[#allocation5 + $0x1180] ss:$8 sps:$4 sm:$0xff]   ;;  %v7372_v16 = vld [vmem:[#allocation5 + $0x594] ss:$8 sps:$4 sm:$0xff]  }
 0x163   :  { %5437 = vmatprep.subr.bf16.mxu0 %v7291_v17  ;;  %v7375_v17 = vld [vmem:[#allocation5 + $0x1194] ss:$8 sps:$4 sm:$0xff]  }
 0x165   :  { %4946 = vmatpush1.bf16.msra.mxu1 %v7286_v18  ;;  %v7370_v18 = vld [vmem:[#allocation5 + $0x590] ss:$8 sps:$4 sm:$0xff]  }
 0x166   :  { %5438 = vmatpush1.bf16.msra.mxu0 %v7289_v19  ;;  %4947 = vmatprep.subr.bf16.mxu1 %v7294_v20  ;;  %v7373_v19 = vld [vmem:[#allocation5 + $0x1190] ss:$8 sps:$4 sm:$0xff]   ;;  %v7378_v20 = vld [vmem:[#allocation5 + $0x5a4] ss:$8 sps:$4 sm:$0xff]  }
 0x167   :  { %5439 = vmatprep.subr.bf16.mxu0 %v7297_v21  ;;  %v7381_v21 = vld [vmem:[#allocation5 + $0x11a4] ss:$8 sps:$4 sm:$0xff]  }
 0x169   :  { %4948 = vmatpush1.bf16.msra.mxu1 %v7292_v22  ;;  %v7376_v22 = vld [vmem:[#allocation5 + $0x5a0] ss:$8 sps:$4 sm:$0xff]  }
 0x16a   :  { %5440 = vmatpush1.bf16.msra.mxu0 %v7295_v23  ;;  %4949 = vmatprep.subr.bf16.mxu1 %v7300_v24  ;;  %v7379_v23 = vld [vmem:[#allocation5 + $0x11a0] ss:$8 sps:$4 sm:$0xff]   ;;  %v7384_v24 = vld [vmem:[#allocation5 + $0x5b4] ss:$8 sps:$4 sm:$0xff]  }
 0x16b   :  { %5441 = vmatprep.subr.bf16.mxu0 %v7303_v25  ;;  %v7387_v25 = vld [vmem:[#allocation5 + $0x11b4] ss:$8 sps:$4 sm:$0xff]  }
 0x16d   :  { %4950 = vmatpush1.bf16.msra.mxu1 %v7298_v26  ;;  %v7382_v26 = vld [vmem:[#allocation5 + $0x5b0] ss:$8 sps:$4 sm:$0xff]  }
 0x16e   :  { %5442 = vmatpush1.bf16.msra.mxu0 %v7301_v27  ;;  %4951 = vmatprep.subr.bf16.mxu1 %v7306_v28  ;;  %v7385_v27 = vld [vmem:[#allocation5 + $0x11b0] ss:$8 sps:$4 sm:$0xff]   ;;  %v7390_v28 = vld [vmem:[#allocation5 + $0x5c4] ss:$8 sps:$4 sm:$0xff]  }
 0x16f   :  { %5443 = vmatprep.subr.bf16.mxu0 %v7309_v29  ;;  %v7393_v29 = vld [vmem:[#allocation5 + $0x11c4] ss:$8 sps:$4 sm:$0xff]  }
 0x171   :  { %4952 = vmatpush1.bf16.msra.mxu1 %v7304_v30  ;;  %v7388_v30 = vld [vmem:[#allocation5 + $0x5c0] ss:$8 sps:$4 sm:$0xff]  }
 0x172   :  { %5444 = vmatpush1.bf16.msra.mxu0 %v7307_v31  ;;  %4953 = vmatprep.subr.bf16.mxu1 %v7312_v32  ;;  %v7391_v31 = vld [vmem:[#allocation5 + $0x11c0] ss:$8 sps:$4 sm:$0xff]   ;;  %v7396_v32 = vld [vmem:[#allocation5 + $0x5d4] ss:$8 sps:$4 sm:$0xff]  }
 0x173   :  { %5445 = vmatprep.subr.bf16.mxu0 %v7315_v33  ;;  %v7399_v33 = vld [vmem:[#allocation5 + $0x11d4] ss:$8 sps:$4 sm:$0xff]  }
 0x175   :  { %4954 = vmatpush1.bf16.msra.mxu1 %v7310_v34  ;;  %v7394_v34 = vld [vmem:[#allocation5 + $0x5d0] ss:$8 sps:$4 sm:$0xff]  }
 0x176   :  { %5446 = vmatpush1.bf16.msra.mxu0 %v7313_v35  ;;  %4964 = vmatprep.subr.bf16.mxu1 %v7318_v36  ;;  %v7397_v35 = vld [vmem:[#allocation5 + $0x11d0] ss:$8 sps:$4 sm:$0xff]   ;;  %v7402_v36 = vld [vmem:[#allocation5 + $0x5e4] ss:$8 sps:$4 sm:$0xff]  }
 0x177   :  { %5456 = vmatprep.subr.bf16.mxu0 %v7321_v37  ;;  %v7405_v37 = vld [vmem:[#allocation5 + $0x11e4] ss:$8 sps:$4 sm:$0xff]  }
 0x178   :  { %4956 = vmatmul.mubr.bf16.vlgmr.msra.gmra.mrb[0].mxu1 %v111_v42  ;;  %v7406_v42 = vld [vmem:[#allocation5 + $0x5f0] ss:$8 sps:$4 sm:$0xff]  }
 0x179   :  { %5448 = vmatmul.mubr.bf16.vlgmr.msra.gmra.mrb[0].mxu0 %v135_v43  ;;  %4965 = vmatpush1.bf16.msra.mxu1 %v7316_v44  ;;  %v7409_v43 = vld [vmem:[#allocation5 + $0x11f0] ss:$8 sps:$4 sm:$0xff]   ;;  %v7414_v44 = vld [vmem:[#allocation5 + $0x604] ss:$8 sps:$4 sm:$0xff]  }
 0x17a   :  { %5457 = vmatpush1.bf16.msra.mxu0 %v7319_v45  ;;  %4966 = vmatprep.subr.bf16.mxu1 %v7324_v46  ;;  %v7417_v45 = vld [vmem:[#allocation5 + $0x1204] ss:$8 sps:$4 sm:$0xff]   ;;  %v65_v46 = vld [vmem:[#allocation2 + $0x50] sm:$0xff] }
 0x17b   :  { %5458 = vmatprep.subr.bf16.mxu0 %v7327_v47  ;;  %4996 = vmatprep.mubr.bf16.mxu1 %v114_v48  ;;  %v89_v47 = vld [vmem:[#allocation2 + $0x110] sm:$0xff]  ;;  %v68_v48 = vld [vmem:[#allocation2 + $0x68] sm:$0xff] }
 0x17c   :  { %5488 = vmatprep.mubr.bf16.mxu0 %v138_v49  ;;  %v92_v49 = vld [vmem:[#allocation2 + $0x128] sm:$0xff] }
 0x17d   :  { %4967 = vmatpush1.bf16.msra.mxu1 %v7322_v50  ;;  %v113_v50 = vpack.c.bf16 %v65_v46, %v65_v46  ;;  %v7496_v46 = vld [vmem:[#allocation5 + $0x6e0] ss:$8 sps:$4 sm:$0xff]  }
 0x17e   :  { %5459 = vmatpush1.bf16.msra.mxu0 %v7325_v51  ;;  %4968 = vmatprep.subr.bf16.mxu1 %v7330_v52  ;;  %v137_v51 = vpack.c.bf16 %v89_v47, %v89_v47  ;;  %v7412_v52 = vld [vmem:[#allocation5 + $0x600] ss:$8 sps:$4 sm:$0xff]  }
 0x17f   :  { %5460 = vmatprep.subr.bf16.mxu0 %v7333_v53  ;;  %v7415_v53 = vld [vmem:[#allocation5 + $0x1200] ss:$8 sps:$4 sm:$0xff]  }
 0x180   :  { %v7499_v47 = vld [vmem:[#allocation5 + $0x12e0] ss:$8 sps:$4 sm:$0xff]  }
 0x181   :  { %4969 = vmatpush1.bf16.msra.mxu1 %v7328_v54  ;;  %v7420_v54 = vld [vmem:[#allocation5 + $0x614] ss:$8 sps:$4 sm:$0xff]  }
 0x182   :  { %5461 = vmatpush1.bf16.msra.mxu0 %v7331_v55  ;;  %4970 = vmatprep.subr.bf16.mxu1 %v7336_v56  ;;  %v7423_v55 = vld [vmem:[#allocation5 + $0x1214] ss:$8 sps:$4 sm:$0xff]   ;;  %v116_v56 = vpack.c.bf16 %v68_v48, %v68_v48 }
 0x183   :  { %5462 = vmatprep.subr.bf16.mxu0 %v7339_v57  ;;  %v140_v57 = vpack.c.bf16 %v92_v49, %v92_v49  ;;  %v7504_v48 = vld [vmem:[#allocation5 + $0x6f4] ss:$8 sps:$4 sm:$0xff]  }
 0x184   :  { %v7507_v49 = vld [vmem:[#allocation5 + $0x12f4] ss:$8 sps:$4 sm:$0xff]  }
 0x185   :  { %4971 = vmatpush1.bf16.msra.mxu1 %v7334_v58  ;;  %v7418_v58 = vld [vmem:[#allocation5 + $0x610] ss:$8 sps:$4 sm:$0xff]  }
 0x186   :  { %5463 = vmatpush1.bf16.msra.mxu0 %v7337_v59  ;;  %4972 = vmatprep.subr.bf16.mxu1 %v7342_v60  ;;  %v7421_v59 = vld [vmem:[#allocation5 + $0x1210] ss:$8 sps:$4 sm:$0xff]   ;;  %v7426_v60 = vld [vmem:[#allocation5 + $0x624] ss:$8 sps:$4 sm:$0xff]  }
 0x187   :  { %5464 = vmatprep.subr.bf16.mxu0 %v7345_v61  ;;  %v7429_v61 = vld [vmem:[#allocation5 + $0x1224] ss:$8 sps:$4 sm:$0xff]  }
 0x189   :  { %4973 = vmatpush1.bf16.msra.mxu1 %v7340_v62  ;;  %v7424_v62 = vld [vmem:[#allocation5 + $0x620] ss:$8 sps:$4 sm:$0xff]  }
 0x18a   :  { %5465 = vmatpush1.bf16.msra.mxu0 %v7343_v63  ;;  %4974 = vmatprep.subr.bf16.mxu1 %v7348_v0  ;;  %v7427_v63 = vld [vmem:[#allocation5 + $0x1220] ss:$8 sps:$4 sm:$0xff]   ;;  %v7432_v0 = vld [vmem:[#allocation5 + $0x634] ss:$8 sps:$4 sm:$0xff]  }
 0x18b   :  { %5466 = vmatprep.subr.bf16.mxu0 %v7351_v1  ;;  %v7435_v1 = vld [vmem:[#allocation5 + $0x1234] ss:$8 sps:$4 sm:$0xff]  }
 0x18d   :  { %4975 = vmatpush1.bf16.msra.mxu1 %v7346_v2  ;;  %v7430_v2 = vld [vmem:[#allocation5 + $0x630] ss:$8 sps:$4 sm:$0xff]  }
 0x18e   :  { %5467 = vmatpush1.bf16.msra.mxu0 %v7349_v3  ;;  %4976 = vmatprep.subr.bf16.mxu1 %v7354_v4  ;;  %v7433_v3 = vld [vmem:[#allocation5 + $0x1230] ss:$8 sps:$4 sm:$0xff]   ;;  %v7438_v4 = vld [vmem:[#allocation5 + $0x644] ss:$8 sps:$4 sm:$0xff]  }
 0x18f   :  { %5468 = vmatprep.subr.bf16.mxu0 %v7357_v5  ;;  %v7441_v5 = vld [vmem:[#allocation5 + $0x1244] ss:$8 sps:$4 sm:$0xff]  }
 0x191   :  { %4977 = vmatpush1.bf16.msra.mxu1 %v7352_v6  ;;  %v7436_v6 = vld [vmem:[#allocation5 + $0x640] ss:$8 sps:$4 sm:$0xff]  }
 0x192   :  { %5469 = vmatpush1.bf16.msra.mxu0 %v7355_v7  ;;  %4978 = vmatprep.subr.bf16.mxu1 %v7360_v8  ;;  %v7439_v7 = vld [vmem:[#allocation5 + $0x1240] ss:$8 sps:$4 sm:$0xff]   ;;  %v7444_v8 = vld [vmem:[#allocation5 + $0x654] ss:$8 sps:$4 sm:$0xff]  }
 0x193   :  { %5470 = vmatprep.subr.bf16.mxu0 %v7363_v9  ;;  %v7447_v9 = vld [vmem:[#allocation5 + $0x1254] ss:$8 sps:$4 sm:$0xff]  }
 0x195   :  { %4979 = vmatpush1.bf16.msra.mxu1 %v7358_v10  ;;  %v7442_v10 = vld [vmem:[#allocation5 + $0x650] ss:$8 sps:$4 sm:$0xff]  }
 0x196   :  { %5471 = vmatpush1.bf16.msra.mxu0 %v7361_v11  ;;  %4980 = vmatprep.subr.bf16.mxu1 %v7366_v12  ;;  %v7445_v11 = vld [vmem:[#allocation5 + $0x1250] ss:$8 sps:$4 sm:$0xff]   ;;  %v7450_v12 = vld [vmem:[#allocation5 + $0x664] ss:$8 sps:$4 sm:$0xff]  }
 0x197   :  { %5472 = vmatprep.subr.bf16.mxu0 %v7369_v13  ;;  %v7453_v13 = vld [vmem:[#allocation5 + $0x1264] ss:$8 sps:$4 sm:$0xff]  }
 0x199   :  { %4981 = vmatpush1.bf16.msra.mxu1 %v7364_v14  ;;  %v7448_v14 = vld [vmem:[#allocation5 + $0x660] ss:$8 sps:$4 sm:$0xff]  }
 0x19a   :  { %5473 = vmatpush1.bf16.msra.mxu0 %v7367_v15  ;;  %4982 = vmatprep.subr.bf16.mxu1 %v7372_v16  ;;  %v7451_v15 = vld [vmem:[#allocation5 + $0x1260] ss:$8 sps:$4 sm:$0xff]   ;;  %v7456_v16 = vld [vmem:[#allocation5 + $0x674] ss:$8 sps:$4 sm:$0xff]  }
 0x19b   :  { %5474 = vmatprep.subr.bf16.mxu0 %v7375_v17  ;;  %v7459_v17 = vld [vmem:[#allocation5 + $0x1274] ss:$8 sps:$4 sm:$0xff]  }
 0x19d   :  { %4983 = vmatpush1.bf16.msra.mxu1 %v7370_v18  ;;  %v7454_v18 = vld [vmem:[#allocation5 + $0x670] ss:$8 sps:$4 sm:$0xff]  }
 0x19e   :  { %5475 = vmatpush1.bf16.msra.mxu0 %v7373_v19  ;;  %4984 = vmatprep.subr.bf16.mxu1 %v7378_v20  ;;  %v7457_v19 = vld [vmem:[#allocation5 + $0x1270] ss:$8 sps:$4 sm:$0xff]   ;;  %v7462_v20 = vld [vmem:[#allocation5 + $0x684] ss:$8 sps:$4 sm:$0xff]  }
 0x19f   :  { %5476 = vmatprep.subr.bf16.mxu0 %v7381_v21  ;;  %v7465_v21 = vld [vmem:[#allocation5 + $0x1284] ss:$8 sps:$4 sm:$0xff]  }
 0x1a1   :  { %4985 = vmatpush1.bf16.msra.mxu1 %v7376_v22  ;;  %v7460_v22 = vld [vmem:[#allocation5 + $0x680] ss:$8 sps:$4 sm:$0xff]  }
 0x1a2   :  { %5477 = vmatpush1.bf16.msra.mxu0 %v7379_v23  ;;  %4986 = vmatprep.subr.bf16.mxu1 %v7384_v24  ;;  %v7463_v23 = vld [vmem:[#allocation5 + $0x1280] ss:$8 sps:$4 sm:$0xff]   ;;  %v7468_v24 = vld [vmem:[#allocation5 + $0x694] ss:$8 sps:$4 sm:$0xff]  }
 0x1a3   :  { %5478 = vmatprep.subr.bf16.mxu0 %v7387_v25  ;;  %v7471_v25 = vld [vmem:[#allocation5 + $0x1294] ss:$8 sps:$4 sm:$0xff]  }
 0x1a5   :  { %4987 = vmatpush1.bf16.msra.mxu1 %v7382_v26  ;;  %v7466_v26 = vld [vmem:[#allocation5 + $0x690] ss:$8 sps:$4 sm:$0xff]  }
 0x1a6   :  { %5479 = vmatpush1.bf16.msra.mxu0 %v7385_v27  ;;  %4988 = vmatprep.subr.bf16.mxu1 %v7390_v28  ;;  %v7469_v27 = vld [vmem:[#allocation5 + $0x1290] ss:$8 sps:$4 sm:$0xff]   ;;  %v7474_v28 = vld [vmem:[#allocation5 + $0x6a4] ss:$8 sps:$4 sm:$0xff]  }
 0x1a7   :  { %5480 = vmatprep.subr.bf16.mxu0 %v7393_v29  ;;  %v7477_v29 = vld [vmem:[#allocation5 + $0x12a4] ss:$8 sps:$4 sm:$0xff]  }
 0x1a9   :  { %4989 = vmatpush1.bf16.msra.mxu1 %v7388_v30  ;;  %v7472_v30 = vld [vmem:[#allocation5 + $0x6a0] ss:$8 sps:$4 sm:$0xff]  }
 0x1aa   :  { %5481 = vmatpush1.bf16.msra.mxu0 %v7391_v31  ;;  %4990 = vmatprep.subr.bf16.mxu1 %v7396_v32  ;;  %v7475_v31 = vld [vmem:[#allocation5 + $0x12a0] ss:$8 sps:$4 sm:$0xff]   ;;  %v7480_v32 = vld [vmem:[#allocation5 + $0x6b4] ss:$8 sps:$4 sm:$0xff]  }
 0x1ab   :  { %5482 = vmatprep.subr.bf16.mxu0 %v7399_v33  ;;  %v7483_v33 = vld [vmem:[#allocation5 + $0x12b4] ss:$8 sps:$4 sm:$0xff]  }
 0x1ad   :  { %4991 = vmatpush1.bf16.msra.mxu1 %v7394_v34  ;;  %v7478_v34 = vld [vmem:[#allocation5 + $0x6b0] ss:$8 sps:$4 sm:$0xff]  }
 0x1ae   :  { %5483 = vmatpush1.bf16.msra.mxu0 %v7397_v35  ;;  %4992 = vmatprep.subr.bf16.mxu1 %v7402_v36  ;;  %v7481_v35 = vld [vmem:[#allocation5 + $0x12b0] ss:$8 sps:$4 sm:$0xff]   ;;  %v7486_v36 = vld [vmem:[#allocation5 + $0x6c4] ss:$8 sps:$4 sm:$0xff]  }
 0x1af   :  { %5484 = vmatprep.subr.bf16.mxu0 %v7405_v37  ;;  %v7489_v37 = vld [vmem:[#allocation5 + $0x12c4] ss:$8 sps:$4 sm:$0xff]  }
 0x1b1   :  { %4993 = vmatpush1.bf16.msra.mxu1 %v7400_v38  ;;  %v7484_v38 = vld [vmem:[#allocation5 + $0x6c0] ss:$8 sps:$4 sm:$0xff]  }
 0x1b2   :  { %5485 = vmatpush1.bf16.msra.mxu0 %v7403_v39  ;;  %4994 = vmatprep.subr.bf16.mxu1 %v7408_v40  ;;  %v7487_v39 = vld [vmem:[#allocation5 + $0x12c0] ss:$8 sps:$4 sm:$0xff]   ;;  %v7492_v40 = vld [vmem:[#allocation5 + $0x6d4] ss:$8 sps:$4 sm:$0xff]  }
 0x1b3   :  { %5486 = vmatprep.subr.bf16.mxu0 %v7411_v41  ;;  %v7495_v41 = vld [vmem:[#allocation5 + $0x12d4] ss:$8 sps:$4 sm:$0xff]  }
 0x1b5   :  { %4995 = vmatpush1.bf16.msra.mxu1 %v7406_v42  ;;  %v7490_v42 = vld [vmem:[#allocation5 + $0x6d0] ss:$8 sps:$4 sm:$0xff]  }
 0x1b6   :  { %5487 = vmatpush1.bf16.msra.mxu0 %v7409_v43  ;;  %5005 = vmatprep.subr.bf16.mxu1 %v7414_v44  ;;  %v7493_v43 = vld [vmem:[#allocation5 + $0x12d0] ss:$8 sps:$4 sm:$0xff]   ;;  %v7498_v44 = vld [vmem:[#allocation5 + $0x6e4] ss:$8 sps:$4 sm:$0xff]  }
 0x1b7   :  { %5497 = vmatprep.subr.bf16.mxu0 %v7417_v45  ;;  %v7501_v45 = vld [vmem:[#allocation5 + $0x12e4] ss:$8 sps:$4 sm:$0xff]  }
 0x1b8   :  { %4997 = vmatmul.mubr.bf16.vlgmr.msra.gmra.mrb[0].mxu1 %v113_v50  ;;  %v7502_v50 = vld [vmem:[#allocation5 + $0x6f0] ss:$8 sps:$4 sm:$0xff]  }
 0x1b9   :  { %5489 = vmatmul.mubr.bf16.vlgmr.msra.gmra.mrb[0].mxu0 %v137_v51  ;;  %5006 = vmatpush1.bf16.msra.mxu1 %v7412_v52  ;;  %v7505_v51 = vld [vmem:[#allocation5 + $0x12f0] ss:$8 sps:$4 sm:$0xff]   ;;  %v7510_v52 = vld [vmem:[#allocation5 + $0x704] ss:$8 sps:$4 sm:$0xff]  }
 0x1ba   :  { %5498 = vmatpush1.bf16.msra.mxu0 %v7415_v53  ;;  %5007 = vmatprep.subr.bf16.mxu1 %v7420_v54  ;;  %v7513_v53 = vld [vmem:[#allocation5 + $0x1304] ss:$8 sps:$4 sm:$0xff]  }
 0x1bb   :  { %5499 = vmatprep.subr.bf16.mxu0 %v7423_v55  ;;  %5037 = vmatprep.mubr.bf16.mxu1 %v116_v56  ;;  %v67_v54 = vld [vmem:[#allocation2 + $0x60] sm:$0xff]  ;;  %v70_v56 = vld [vmem:[#allocation2 + $0x78] sm:$0xff] }
 0x1bc   :  { %5529 = vmatprep.mubr.bf16.mxu0 %v140_v57  ;;  %v91_v55 = vld [vmem:[#allocation2 + $0x120] sm:$0xff]  ;;  %v94_v57 = vld [vmem:[#allocation2 + $0x138] sm:$0xff] }
 0x1bd   :  { %5008 = vmatpush1.bf16.msra.mxu1 %v7418_v58  ;;  %v115_v58 = vpack.c.bf16 %v67_v54, %v67_v54  ;;  %v7592_v54 = vld [vmem:[#allocation5 + $0x7e0] ss:$8 sps:$4 sm:$0xff]  }
 0x1be   :  { %5500 = vmatpush1.bf16.msra.mxu0 %v7421_v59  ;;  %5009 = vmatprep.subr.bf16.mxu1 %v7426_v60  ;;  %v139_v59 = vpack.c.bf16 %v91_v55, %v91_v55  ;;  %v7508_v60 = vld [vmem:[#allocation5 + $0x700] ss:$8 sps:$4 sm:$0xff]  }
 0x1bf   :  { %5501 = vmatprep.subr.bf16.mxu0 %v7429_v61  ;;  %v7511_v61 = vld [vmem:[#allocation5 + $0x1300] ss:$8 sps:$4 sm:$0xff]  }
 0x1c0   :  { %v7595_v55 = vld [vmem:[#allocation5 + $0x13e0] ss:$8 sps:$4 sm:$0xff]  }
 0x1c1   :  { %5010 = vmatpush1.bf16.msra.mxu1 %v7424_v62  ;;  %v7516_v62 = vld [vmem:[#allocation5 + $0x714] ss:$8 sps:$4 sm:$0xff]  }
 0x1c2   :  { %5502 = vmatpush1.bf16.msra.mxu0 %v7427_v63  ;;  %5011 = vmatprep.subr.bf16.mxu1 %v7432_v0  ;;  %v7519_v63 = vld [vmem:[#allocation5 + $0x1314] ss:$8 sps:$4 sm:$0xff]   ;;  %v118_v0 = vpack.c.bf16 %v70_v56, %v70_v56 }
 0x1c3   :  { %5503 = vmatprep.subr.bf16.mxu0 %v7435_v1  ;;  %v142_v1 = vpack.c.bf16 %v94_v57, %v94_v57  ;;  %v7600_v56 = vld [vmem:[#allocation5 + $0x7f4] ss:$8 sps:$4 sm:$0xff]  }
 0x1c4   :  { %v7603_v57 = vld [vmem:[#allocation5 + $0x13f4] ss:$8 sps:$4 sm:$0xff]  }
 0x1c5   :  { %5012 = vmatpush1.bf16.msra.mxu1 %v7430_v2  ;;  %v7514_v2 = vld [vmem:[#allocation5 + $0x710] ss:$8 sps:$4 sm:$0xff]  }
 0x1c6   :  { %5504 = vmatpush1.bf16.msra.mxu0 %v7433_v3  ;;  %5013 = vmatprep.subr.bf16.mxu1 %v7438_v4  ;;  %v7517_v3 = vld [vmem:[#allocation5 + $0x1310] ss:$8 sps:$4 sm:$0xff]   ;;  %v7522_v4 = vld [vmem:[#allocation5 + $0x724] ss:$8 sps:$4 sm:$0xff]  }
 0x1c7   :  { %5505 = vmatprep.subr.bf16.mxu0 %v7441_v5  ;;  %v7525_v5 = vld [vmem:[#allocation5 + $0x1324] ss:$8 sps:$4 sm:$0xff]  }
 0x1c9   :  { %5014 = vmatpush1.bf16.msra.mxu1 %v7436_v6  ;;  %v7520_v6 = vld [vmem:[#allocation5 + $0x720] ss:$8 sps:$4 sm:$0xff]  }
 0x1ca   :  { %5506 = vmatpush1.bf16.msra.mxu0 %v7439_v7  ;;  %5015 = vmatprep.subr.bf16.mxu1 %v7444_v8  ;;  %v7523_v7 = vld [vmem:[#allocation5 + $0x1320] ss:$8 sps:$4 sm:$0xff]   ;;  %v7528_v8 = vld [vmem:[#allocation5 + $0x734] ss:$8 sps:$4 sm:$0xff]  }
 0x1cb   :  { %5507 = vmatprep.subr.bf16.mxu0 %v7447_v9  ;;  %v7531_v9 = vld [vmem:[#allocation5 + $0x1334] ss:$8 sps:$4 sm:$0xff]  }
 0x1cd   :  { %5016 = vmatpush1.bf16.msra.mxu1 %v7442_v10  ;;  %v7526_v10 = vld [vmem:[#allocation5 + $0x730] ss:$8 sps:$4 sm:$0xff]  }
 0x1ce   :  { %5508 = vmatpush1.bf16.msra.mxu0 %v7445_v11  ;;  %5017 = vmatprep.subr.bf16.mxu1 %v7450_v12  ;;  %v7529_v11 = vld [vmem:[#allocation5 + $0x1330] ss:$8 sps:$4 sm:$0xff]   ;;  %v7534_v12 = vld [vmem:[#allocation5 + $0x744] ss:$8 sps:$4 sm:$0xff]  }
 0x1cf   :  { %5509 = vmatprep.subr.bf16.mxu0 %v7453_v13  ;;  %v7537_v13 = vld [vmem:[#allocation5 + $0x1344] ss:$8 sps:$4 sm:$0xff]  }
 0x1d1   :  { %5018 = vmatpush1.bf16.msra.mxu1 %v7448_v14  ;;  %v7532_v14 = vld [vmem:[#allocation5 + $0x740] ss:$8 sps:$4 sm:$0xff]  }
 0x1d2   :  { %5510 = vmatpush1.bf16.msra.mxu0 %v7451_v15  ;;  %5019 = vmatprep.subr.bf16.mxu1 %v7456_v16  ;;  %v7535_v15 = vld [vmem:[#allocation5 + $0x1340] ss:$8 sps:$4 sm:$0xff]   ;;  %v7540_v16 = vld [vmem:[#allocation5 + $0x754] ss:$8 sps:$4 sm:$0xff]  }
 0x1d3   :  { %5511 = vmatprep.subr.bf16.mxu0 %v7459_v17  ;;  %v7543_v17 = vld [vmem:[#allocation5 + $0x1354] ss:$8 sps:$4 sm:$0xff]  }
 0x1d5   :  { %5020 = vmatpush1.bf16.msra.mxu1 %v7454_v18  ;;  %v7538_v18 = vld [vmem:[#allocation5 + $0x750] ss:$8 sps:$4 sm:$0xff]  }
 0x1d6   :  { %5512 = vmatpush1.bf16.msra.mxu0 %v7457_v19  ;;  %5021 = vmatprep.subr.bf16.mxu1 %v7462_v20  ;;  %v7541_v19 = vld [vmem:[#allocation5 + $0x1350] ss:$8 sps:$4 sm:$0xff]   ;;  %v7546_v20 = vld [vmem:[#allocation5 + $0x764] ss:$8 sps:$4 sm:$0xff]  }
 0x1d7   :  { %5513 = vmatprep.subr.bf16.mxu0 %v7465_v21  ;;  %v7549_v21 = vld [vmem:[#allocation5 + $0x1364] ss:$8 sps:$4 sm:$0xff]  }
 0x1d9   :  { %5022 = vmatpush1.bf16.msra.mxu1 %v7460_v22  ;;  %v7544_v22 = vld [vmem:[#allocation5 + $0x760] ss:$8 sps:$4 sm:$0xff]  }
 0x1da   :  { %5514 = vmatpush1.bf16.msra.mxu0 %v7463_v23  ;;  %5023 = vmatprep.subr.bf16.mxu1 %v7468_v24  ;;  %v7547_v23 = vld [vmem:[#allocation5 + $0x1360] ss:$8 sps:$4 sm:$0xff]   ;;  %v7552_v24 = vld [vmem:[#allocation5 + $0x774] ss:$8 sps:$4 sm:$0xff]  }
 0x1db   :  { %5515 = vmatprep.subr.bf16.mxu0 %v7471_v25  ;;  %v7555_v25 = vld [vmem:[#allocation5 + $0x1374] ss:$8 sps:$4 sm:$0xff]  }
 0x1dd   :  { %5024 = vmatpush1.bf16.msra.mxu1 %v7466_v26  ;;  %v7550_v26 = vld [vmem:[#allocation5 + $0x770] ss:$8 sps:$4 sm:$0xff]  }
 0x1de   :  { %5516 = vmatpush1.bf16.msra.mxu0 %v7469_v27  ;;  %5025 = vmatprep.subr.bf16.mxu1 %v7474_v28  ;;  %v7553_v27 = vld [vmem:[#allocation5 + $0x1370] ss:$8 sps:$4 sm:$0xff]   ;;  %v7558_v28 = vld [vmem:[#allocation5 + $0x784] ss:$8 sps:$4 sm:$0xff]  }
 0x1df   :  { %5517 = vmatprep.subr.bf16.mxu0 %v7477_v29  ;;  %v7561_v29 = vld [vmem:[#allocation5 + $0x1384] ss:$8 sps:$4 sm:$0xff]  }
 0x1e1   :  { %5026 = vmatpush1.bf16.msra.mxu1 %v7472_v30  ;;  %v7556_v30 = vld [vmem:[#allocation5 + $0x780] ss:$8 sps:$4 sm:$0xff]  }
 0x1e2   :  { %5518 = vmatpush1.bf16.msra.mxu0 %v7475_v31  ;;  %5027 = vmatprep.subr.bf16.mxu1 %v7480_v32  ;;  %v7559_v31 = vld [vmem:[#allocation5 + $0x1380] ss:$8 sps:$4 sm:$0xff]   ;;  %v7564_v32 = vld [vmem:[#allocation5 + $0x794] ss:$8 sps:$4 sm:$0xff]  }
 0x1e3   :  { %5519 = vmatprep.subr.bf16.mxu0 %v7483_v33  ;;  %v7567_v33 = vld [vmem:[#allocation5 + $0x1394] ss:$8 sps:$4 sm:$0xff]  }
 0x1e5   :  { %5028 = vmatpush1.bf16.msra.mxu1 %v7478_v34  ;;  %v7562_v34 = vld [vmem:[#allocation5 + $0x790] ss:$8 sps:$4 sm:$0xff]  }
 0x1e6   :  { %5520 = vmatpush1.bf16.msra.mxu0 %v7481_v35  ;;  %5029 = vmatprep.subr.bf16.mxu1 %v7486_v36  ;;  %v7565_v35 = vld [vmem:[#allocation5 + $0x1390] ss:$8 sps:$4 sm:$0xff]   ;;  %v7570_v36 = vld [vmem:[#allocation5 + $0x7a4] ss:$8 sps:$4 sm:$0xff]  }
 0x1e7   :  { %5521 = vmatprep.subr.bf16.mxu0 %v7489_v37  ;;  %v7573_v37 = vld [vmem:[#allocation5 + $0x13a4] ss:$8 sps:$4 sm:$0xff]  }
 0x1e9   :  { %5030 = vmatpush1.bf16.msra.mxu1 %v7484_v38  ;;  %v7568_v38 = vld [vmem:[#allocation5 + $0x7a0] ss:$8 sps:$4 sm:$0xff]  }
 0x1ea   :  { %5522 = vmatpush1.bf16.msra.mxu0 %v7487_v39  ;;  %5031 = vmatprep.subr.bf16.mxu1 %v7492_v40  ;;  %v7571_v39 = vld [vmem:[#allocation5 + $0x13a0] ss:$8 sps:$4 sm:$0xff]   ;;  %v7576_v40 = vld [vmem:[#allocation5 + $0x7b4] ss:$8 sps:$4 sm:$0xff]  }
 0x1eb   :  { %5523 = vmatprep.subr.bf16.mxu0 %v7495_v41  ;;  %v7579_v41 = vld [vmem:[#allocation5 + $0x13b4] ss:$8 sps:$4 sm:$0xff]  }
 0x1ed   :  { %5032 = vmatpush1.bf16.msra.mxu1 %v7490_v42  ;;  %v7574_v42 = vld [vmem:[#allocation5 + $0x7b0] ss:$8 sps:$4 sm:$0xff]  }
 0x1ee   :  { %5524 = vmatpush1.bf16.msra.mxu0 %v7493_v43  ;;  %5033 = vmatprep.subr.bf16.mxu1 %v7498_v44  ;;  %v7577_v43 = vld [vmem:[#allocation5 + $0x13b0] ss:$8 sps:$4 sm:$0xff]   ;;  %v7582_v44 = vld [vmem:[#allocation5 + $0x7c4] ss:$8 sps:$4 sm:$0xff]  }
 0x1ef   :  { %5525 = vmatprep.subr.bf16.mxu0 %v7501_v45  ;;  %v7585_v45 = vld [vmem:[#allocation5 + $0x13c4] ss:$8 sps:$4 sm:$0xff]  }
 0x1f1   :  { %5034 = vmatpush1.bf16.msra.mxu1 %v7496_v46  ;;  %v7580_v46 = vld [vmem:[#allocation5 + $0x7c0] ss:$8 sps:$4 sm:$0xff]  }
 0x1f2   :  { %5526 = vmatpush1.bf16.msra.mxu0 %v7499_v47  ;;  %5035 = vmatprep.subr.bf16.mxu1 %v7504_v48  ;;  %v7583_v47 = vld [vmem:[#allocation5 + $0x13c0] ss:$8 sps:$4 sm:$0xff]   ;;  %v7588_v48 = vld [vmem:[#allocation5 + $0x7d4] ss:$8 sps:$4 sm:$0xff]  }
 0x1f3   :  { %5527 = vmatprep.subr.bf16.mxu0 %v7507_v49  ;;  %v7591_v49 = vld [vmem:[#allocation5 + $0x13d4] ss:$8 sps:$4 sm:$0xff]  }
 0x1f5   :  { %5036 = vmatpush1.bf16.msra.mxu1 %v7502_v50  ;;  %v7586_v50 = vld [vmem:[#allocation5 + $0x7d0] ss:$8 sps:$4 sm:$0xff]  }
 0x1f6   :  { %5528 = vmatpush1.bf16.msra.mxu0 %v7505_v51  ;;  %5046 = vmatprep.subr.bf16.mxu1 %v7510_v52  ;;  %v7589_v51 = vld [vmem:[#allocation5 + $0x13d0] ss:$8 sps:$4 sm:$0xff]   ;;  %v7594_v52 = vld [vmem:[#allocation5 + $0x7e4] ss:$8 sps:$4 sm:$0xff]  }
 0x1f7   :  { %5538 = vmatprep.subr.bf16.mxu0 %v7513_v53  ;;  %v7597_v53 = vld [vmem:[#allocation5 + $0x13e4] ss:$8 sps:$4 sm:$0xff]  }
 0x1f8   :  { %5038 = vmatmul.mubr.bf16.vlgmr.msra.gmra.mrb[0].mxu1 %v115_v58  ;;  %v7598_v58 = vld [vmem:[#allocation5 + $0x7f0] ss:$8 sps:$4 sm:$0xff]  }
 0x1f9   :  { %5530 = vmatmul.mubr.bf16.vlgmr.msra.gmra.mrb[0].mxu0 %v139_v59  ;;  %5047 = vmatpush1.bf16.msra.mxu1 %v7508_v60  ;;  %v7601_v59 = vld [vmem:[#allocation5 + $0x13f0] ss:$8 sps:$4 sm:$0xff]  }
 0x1fa   :  { %5539 = vmatpush1.bf16.msra.mxu0 %v7511_v61  ;;  %5048 = vmatprep.subr.bf16.mxu1 %v7516_v62  ;;  %v69_v60 = vld [vmem:[#allocation2 + $0x70] sm:$0xff]  ;;  %v7606_v62 = vld [vmem:[#allocation5 + $0x804] ss:$8 sps:$4 sm:$0xff]  }
 0x1fb   :  { %5540 = vmatprep.subr.bf16.mxu0 %v7519_v63  ;;  %5078 = vmatprep.mubr.bf16.mxu1 %v118_v0  ;;  %v93_v61 = vld [vmem:[#allocation2 + $0x130] sm:$0xff]  ;;  %v7609_v63 = vld [vmem:[#allocation5 + $0x1404] ss:$8 sps:$4 sm:$0xff]   ;;  %v117_v0 = vpack.c.bf16 %v69_v60, %v69_v60 }
 0x1fc   :  { %5570 = vmatprep.mubr.bf16.mxu0 %v142_v1  ;;  %v141_v1 = vpack.c.bf16 %v93_v61, %v93_v61  ;;  %v7690_v60 = vld [vmem:[#allocation5 + $0x8e4] ss:$8 sps:$4 sm:$0xff]  }
 0x1fd   :  { %5049 = vmatpush1.bf16.msra.mxu1 %v7514_v2  ;;  %v72_v2 = vld [vmem:[#allocation2 + $0x88] sm:$0xff] }
 0x1fe   :  { %5541 = vmatpush1.bf16.msra.mxu0 %v7517_v3  ;;  %5050 = vmatprep.subr.bf16.mxu1 %v7522_v4  ;;  %v96_v3 = vld [vmem:[#allocation2 + $0x148] sm:$0xff] }
 0x1ff   :  { %5542 = vmatprep.subr.bf16.mxu0 %v7525_v5  ;;  %v7604_v4 = vld [vmem:[#allocation5 + $0x800] ss:$8 sps:$4 sm:$0xff]   ;;  %v7693_v61 = vld [vmem:[#allocation5 + $0x14e4] ss:$8 sps:$4 sm:$0xff]  }
 0x200   :  { %v7607_v5 = vld [vmem:[#allocation5 + $0x1400] ss:$8 sps:$4 sm:$0xff]  }
 0x201   :  { %5051 = vmatpush1.bf16.msra.mxu1 %v7520_v6  ;;  %v7612_v6 = vld [vmem:[#allocation5 + $0x814] ss:$8 sps:$4 sm:$0xff]  }
 0x202   :  { %5543 = vmatpush1.bf16.msra.mxu0 %v7523_v7  ;;  %5052 = vmatprep.subr.bf16.mxu1 %v7528_v8  ;;  %v7615_v7 = vld [vmem:[#allocation5 + $0x1414] ss:$8 sps:$4 sm:$0xff]   ;;  %v120_v8 = vpack.c.bf16 %v72_v2, %v72_v2  ;;  %v7694_v2 = vld [vmem:[#allocation5 + $0x8f0] ss:$8 sps:$4 sm:$0xff]  }
 0x203   :  { %5544 = vmatprep.subr.bf16.mxu0 %v7531_v9  ;;  %v144_v9 = vpack.c.bf16 %v96_v3, %v96_v3  ;;  %v7697_v3 = vld [vmem:[#allocation5 + $0x14f0] ss:$8 sps:$4 sm:$0xff]  }
 0x205   :  { %5053 = vmatpush1.bf16.msra.mxu1 %v7526_v10  ;;  %v7610_v10 = vld [vmem:[#allocation5 + $0x810] ss:$8 sps:$4 sm:$0xff]  }
 0x206   :  { %5545 = vmatpush1.bf16.msra.mxu0 %v7529_v11  ;;  %5054 = vmatprep.subr.bf16.mxu1 %v7534_v12  ;;  %v7613_v11 = vld [vmem:[#allocation5 + $0x1410] ss:$8 sps:$4 sm:$0xff]   ;;  %v7618_v12 = vld [vmem:[#allocation5 + $0x824] ss:$8 sps:$4 sm:$0xff]  }
 0x207   :  { %5546 = vmatprep.subr.bf16.mxu0 %v7537_v13  ;;  %v7621_v13 = vld [vmem:[#allocation5 + $0x1424] ss:$8 sps:$4 sm:$0xff]  }
 0x209   :  { %5055 = vmatpush1.bf16.msra.mxu1 %v7532_v14  ;;  %v7616_v14 = vld [vmem:[#allocation5 + $0x820] ss:$8 sps:$4 sm:$0xff]  }
 0x20a   :  { %5547 = vmatpush1.bf16.msra.mxu0 %v7535_v15  ;;  %5056 = vmatprep.subr.bf16.mxu1 %v7540_v16  ;;  %v7619_v15 = vld [vmem:[#allocation5 + $0x1420] ss:$8 sps:$4 sm:$0xff]   ;;  %v7624_v16 = vld [vmem:[#allocation5 + $0x834] ss:$8 sps:$4 sm:$0xff]  }
 0x20b   :  { %5548 = vmatprep.subr.bf16.mxu0 %v7543_v17  ;;  %v7627_v17 = vld [vmem:[#allocation5 + $0x1434] ss:$8 sps:$4 sm:$0xff]  }
 0x20d   :  { %5057 = vmatpush1.bf16.msra.mxu1 %v7538_v18  ;;  %v7622_v18 = vld [vmem:[#allocation5 + $0x830] ss:$8 sps:$4 sm:$0xff]  }
 0x20e   :  { %5549 = vmatpush1.bf16.msra.mxu0 %v7541_v19  ;;  %5058 = vmatprep.subr.bf16.mxu1 %v7546_v20  ;;  %v7625_v19 = vld [vmem:[#allocation5 + $0x1430] ss:$8 sps:$4 sm:$0xff]   ;;  %v7630_v20 = vld [vmem:[#allocation5 + $0x844] ss:$8 sps:$4 sm:$0xff]  }
 0x20f   :  { %5550 = vmatprep.subr.bf16.mxu0 %v7549_v21  ;;  %v7633_v21 = vld [vmem:[#allocation5 + $0x1444] ss:$8 sps:$4 sm:$0xff]  }
 0x211   :  { %5059 = vmatpush1.bf16.msra.mxu1 %v7544_v22  ;;  %v7628_v22 = vld [vmem:[#allocation5 + $0x840] ss:$8 sps:$4 sm:$0xff]  }
 0x212   :  { %5551 = vmatpush1.bf16.msra.mxu0 %v7547_v23  ;;  %5060 = vmatprep.subr.bf16.mxu1 %v7552_v24  ;;  %v7631_v23 = vld [vmem:[#allocation5 + $0x1440] ss:$8 sps:$4 sm:$0xff]   ;;  %v7636_v24 = vld [vmem:[#allocation5 + $0x854] ss:$8 sps:$4 sm:$0xff]  }
 0x213   :  { %5552 = vmatprep.subr.bf16.mxu0 %v7555_v25  ;;  %v7639_v25 = vld [vmem:[#allocation5 + $0x1454] ss:$8 sps:$4 sm:$0xff]  }
 0x215   :  { %5061 = vmatpush1.bf16.msra.mxu1 %v7550_v26  ;;  %v7634_v26 = vld [vmem:[#allocation5 + $0x850] ss:$8 sps:$4 sm:$0xff]  }
 0x216   :  { %5553 = vmatpush1.bf16.msra.mxu0 %v7553_v27  ;;  %5062 = vmatprep.subr.bf16.mxu1 %v7558_v28  ;;  %v7637_v27 = vld [vmem:[#allocation5 + $0x1450] ss:$8 sps:$4 sm:$0xff]   ;;  %v7642_v28 = vld [vmem:[#allocation5 + $0x864] ss:$8 sps:$4 sm:$0xff]  }
 0x217   :  { %5554 = vmatprep.subr.bf16.mxu0 %v7561_v29  ;;  %v7645_v29 = vld [vmem:[#allocation5 + $0x1464] ss:$8 sps:$4 sm:$0xff]  }
 0x219   :  { %5063 = vmatpush1.bf16.msra.mxu1 %v7556_v30  ;;  %v7640_v30 = vld [vmem:[#allocation5 + $0x860] ss:$8 sps:$4 sm:$0xff]  }
 0x21a   :  { %5555 = vmatpush1.bf16.msra.mxu0 %v7559_v31  ;;  %5064 = vmatprep.subr.bf16.mxu1 %v7564_v32  ;;  %v7643_v31 = vld [vmem:[#allocation5 + $0x1460] ss:$8 sps:$4 sm:$0xff]   ;;  %v7648_v32 = vld [vmem:[#allocation5 + $0x874] ss:$8 sps:$4 sm:$0xff]  }
 0x21b   :  { %5556 = vmatprep.subr.bf16.mxu0 %v7567_v33  ;;  %v7651_v33 = vld [vmem:[#allocation5 + $0x1474] ss:$8 sps:$4 sm:$0xff]  }
 0x21d   :  { %5065 = vmatpush1.bf16.msra.mxu1 %v7562_v34  ;;  %v7646_v34 = vld [vmem:[#allocation5 + $0x870] ss:$8 sps:$4 sm:$0xff]  }
 0x21e   :  { %5557 = vmatpush1.bf16.msra.mxu0 %v7565_v35  ;;  %5066 = vmatprep.subr.bf16.mxu1 %v7570_v36  ;;  %v7649_v35 = vld [vmem:[#allocation5 + $0x1470] ss:$8 sps:$4 sm:$0xff]   ;;  %v7654_v36 = vld [vmem:[#allocation5 + $0x884] ss:$8 sps:$4 sm:$0xff]  }
 0x21f   :  { %5558 = vmatprep.subr.bf16.mxu0 %v7573_v37  ;;  %v7657_v37 = vld [vmem:[#allocation5 + $0x1484] ss:$8 sps:$4 sm:$0xff]  }
 0x221   :  { %5067 = vmatpush1.bf16.msra.mxu1 %v7568_v38  ;;  %v7652_v38 = vld [vmem:[#allocation5 + $0x880] ss:$8 sps:$4 sm:$0xff]  }
 0x222   :  { %5559 = vmatpush1.bf16.msra.mxu0 %v7571_v39  ;;  %5068 = vmatprep.subr.bf16.mxu1 %v7576_v40  ;;  %v7655_v39 = vld [vmem:[#allocation5 + $0x1480] ss:$8 sps:$4 sm:$0xff]   ;;  %v7660_v40 = vld [vmem:[#allocation5 + $0x894] ss:$8 sps:$4 sm:$0xff]  }
 0x223   :  { %5560 = vmatprep.subr.bf16.mxu0 %v7579_v41  ;;  %v7663_v41 = vld [vmem:[#allocation5 + $0x1494] ss:$8 sps:$4 sm:$0xff]  }
 0x225   :  { %5069 = vmatpush1.bf16.msra.mxu1 %v7574_v42  ;;  %v7658_v42 = vld [vmem:[#allocation5 + $0x890] ss:$8 sps:$4 sm:$0xff]  }
 0x226   :  { %5561 = vmatpush1.bf16.msra.mxu0 %v7577_v43  ;;  %5070 = vmatprep.subr.bf16.mxu1 %v7582_v44  ;;  %v7661_v43 = vld [vmem:[#allocation5 + $0x1490] ss:$8 sps:$4 sm:$0xff]   ;;  %v7666_v44 = vld [vmem:[#allocation5 + $0x8a4] ss:$8 sps:$4 sm:$0xff]  }
 0x227   :  { %5562 = vmatprep.subr.bf16.mxu0 %v7585_v45  ;;  %v7669_v45 = vld [vmem:[#allocation5 + $0x14a4] ss:$8 sps:$4 sm:$0xff]  }
 0x229   :  { %5071 = vmatpush1.bf16.msra.mxu1 %v7580_v46  ;;  %v7664_v46 = vld [vmem:[#allocation5 + $0x8a0] ss:$8 sps:$4 sm:$0xff]  }
 0x22a   :  { %5563 = vmatpush1.bf16.msra.mxu0 %v7583_v47  ;;  %5072 = vmatprep.subr.bf16.mxu1 %v7588_v48  ;;  %v7667_v47 = vld [vmem:[#allocation5 + $0x14a0] ss:$8 sps:$4 sm:$0xff]   ;;  %v7672_v48 = vld [vmem:[#allocation5 + $0x8b4] ss:$8 sps:$4 sm:$0xff]  }
 0x22b   :  { %5564 = vmatprep.subr.bf16.mxu0 %v7591_v49  ;;  %v7675_v49 = vld [vmem:[#allocation5 + $0x14b4] ss:$8 sps:$4 sm:$0xff]  }
 0x22d   :  { %5073 = vmatpush1.bf16.msra.mxu1 %v7586_v50  ;;  %v7670_v50 = vld [vmem:[#allocation5 + $0x8b0] ss:$8 sps:$4 sm:$0xff]  }
 0x22e   :  { %5565 = vmatpush1.bf16.msra.mxu0 %v7589_v51  ;;  %5074 = vmatprep.subr.bf16.mxu1 %v7594_v52  ;;  %v7673_v51 = vld [vmem:[#allocation5 + $0x14b0] ss:$8 sps:$4 sm:$0xff]   ;;  %v7678_v52 = vld [vmem:[#allocation5 + $0x8c4] ss:$8 sps:$4 sm:$0xff]  }
 0x22f   :  { %5566 = vmatprep.subr.bf16.mxu0 %v7597_v53  ;;  %v7681_v53 = vld [vmem:[#allocation5 + $0x14c4] ss:$8 sps:$4 sm:$0xff]  }
 0x231   :  { %5075 = vmatpush1.bf16.msra.mxu1 %v7592_v54  ;;  %v7676_v54 = vld [vmem:[#allocation5 + $0x8c0] ss:$8 sps:$4 sm:$0xff]  }
 0x232   :  { %5567 = vmatpush1.bf16.msra.mxu0 %v7595_v55  ;;  %5076 = vmatprep.subr.bf16.mxu1 %v7600_v56  ;;  %v7679_v55 = vld [vmem:[#allocation5 + $0x14c0] ss:$8 sps:$4 sm:$0xff]   ;;  %v7684_v56 = vld [vmem:[#allocation5 + $0x8d4] ss:$8 sps:$4 sm:$0xff]  }
 0x233   :  { %5568 = vmatprep.subr.bf16.mxu0 %v7603_v57  ;;  %v7687_v57 = vld [vmem:[#allocation5 + $0x14d4] ss:$8 sps:$4 sm:$0xff]  }
 0x235   :  { %5077 = vmatpush1.bf16.msra.mxu1 %v7598_v58  ;;  %v7682_v58 = vld [vmem:[#allocation5 + $0x8d0] ss:$8 sps:$4 sm:$0xff]  }
 0x236   :  { %5569 = vmatpush1.bf16.msra.mxu0 %v7601_v59  ;;  %5087 = vmatprep.subr.bf16.mxu1 %v7606_v62  ;;  %v7685_v59 = vld [vmem:[#allocation5 + $0x14d0] ss:$8 sps:$4 sm:$0xff]   ;;  %v7688_v62 = vld [vmem:[#allocation5 + $0x8e0] ss:$8 sps:$4 sm:$0xff]  }
 0x237   :  { %5579 = vmatprep.subr.bf16.mxu0 %v7609_v63  ;;  %v7691_v63 = vld [vmem:[#allocation5 + $0x14e0] ss:$8 sps:$4 sm:$0xff]  }
 0x238   :  { %5079 = vmatmul.mubr.bf16.vlgmr.msra.gmra.mrb[0].mxu1 %v117_v0  ;;  %v7696_v0 = vld [vmem:[#allocation5 + $0x8f4] ss:$8 sps:$4 sm:$0xff]  }
 0x239   :  { %5571 = vmatmul.mubr.bf16.vlgmr.msra.gmra.mrb[0].mxu0 %v141_v1  ;;  %5088 = vmatpush1.bf16.msra.mxu1 %v7604_v4  ;;  %v7699_v1 = vld [vmem:[#allocation5 + $0x14f4] ss:$8 sps:$4 sm:$0xff]   ;;  %v71_v4 = vld [vmem:[#allocation2 + $0x80] sm:$0xff] }
 0x23a   :  { %5580 = vmatpush1.bf16.msra.mxu0 %v7607_v5  ;;  %5089 = vmatprep.subr.bf16.mxu1 %v7612_v6  ;;  %v95_v5 = vld [vmem:[#allocation2 + $0x140] sm:$0xff] }
 0x23b   :  { %5581 = vmatprep.subr.bf16.mxu0 %v7615_v7  ;;  %5119 = vmatprep.mubr.bf16.mxu1 %v120_v8  ;;  %v7702_v6 = vld [vmem:[#allocation5 + $0x904] ss:$8 sps:$4 sm:$0xff]   ;;  %v119_v8 = vpack.c.bf16 %v71_v4, %v71_v4 }
 0x23c   :  { %5611 = vmatprep.mubr.bf16.mxu0 %v144_v9  ;;  %v7705_v7 = vld [vmem:[#allocation5 + $0x1504] ss:$8 sps:$4 sm:$0xff]   ;;  %v143_v9 = vpack.c.bf16 %v95_v5, %v95_v5 }
 0x23d   :  { %5090 = vmatpush1.bf16.msra.mxu1 %v7610_v10  ;;  %v74_v10 = vld [vmem:[#allocation2 + $0x98] sm:$0xff]  ;;  %v7786_v4 = vld [vmem:[#allocation5 + $0x9e4] ss:$8 sps:$4 sm:$0xff]  }
 0x23e   :  { %5582 = vmatpush1.bf16.msra.mxu0 %v7613_v11  ;;  %5091 = vmatprep.subr.bf16.mxu1 %v7618_v12  ;;  %v98_v11 = vld [vmem:[#allocation2 + $0x158] sm:$0xff]  ;;  %v7700_v12 = vld [vmem:[#allocation5 + $0x900] ss:$8 sps:$4 sm:$0xff]   ;;  %v7789_v5 = vld [vmem:[#allocation5 + $0x15e4] ss:$8 sps:$4 sm:$0xff]  }
 0x23f   :  { %5583 = vmatprep.subr.bf16.mxu0 %v7621_v13  ;;  %v7703_v13 = vld [vmem:[#allocation5 + $0x1500] ss:$8 sps:$4 sm:$0xff]  }
 0x241   :  { %5092 = vmatpush1.bf16.msra.mxu1 %v7616_v14  ;;  %v7708_v14 = vld [vmem:[#allocation5 + $0x914] ss:$8 sps:$4 sm:$0xff]  }
 0x242   :  { %5584 = vmatpush1.bf16.msra.mxu0 %v7619_v15  ;;  %5093 = vmatprep.subr.bf16.mxu1 %v7624_v16  ;;  %v7711_v15 = vld [vmem:[#allocation5 + $0x1514] ss:$8 sps:$4 sm:$0xff]   ;;  %v122_v16 = vpack.c.bf16 %v74_v10, %v74_v10  ;;  %v7790_v10 = vld [vmem:[#allocation5 + $0x9f0] ss:$8 sps:$4 sm:$0xff]  }
 0x243   :  { %5585 = vmatprep.subr.bf16.mxu0 %v7627_v17  ;;  %v146_v17 = vpack.c.bf16 %v98_v11, %v98_v11  ;;  %v7793_v11 = vld [vmem:[#allocation5 + $0x15f0] ss:$8 sps:$4 sm:$0xff]  }
 0x245   :  { %5094 = vmatpush1.bf16.msra.mxu1 %v7622_v18  ;;  %v7706_v18 = vld [vmem:[#allocation5 + $0x910] ss:$8 sps:$4 sm:$0xff]  }
 0x246   :  { %5586 = vmatpush1.bf16.msra.mxu0 %v7625_v19  ;;  %5095 = vmatprep.subr.bf16.mxu1 %v7630_v20  ;;  %v7709_v19 = vld [vmem:[#allocation5 + $0x1510] ss:$8 sps:$4 sm:$0xff]   ;;  %v7714_v20 = vld [vmem:[#allocation5 + $0x924] ss:$8 sps:$4 sm:$0xff]  }
 0x247   :  { %5587 = vmatprep.subr.bf16.mxu0 %v7633_v21  ;;  %v7717_v21 = vld [vmem:[#allocation5 + $0x1524] ss:$8 sps:$4 sm:$0xff]  }
 0x249   :  { %5096 = vmatpush1.bf16.msra.mxu1 %v7628_v22  ;;  %v7712_v22 = vld [vmem:[#allocation5 + $0x920] ss:$8 sps:$4 sm:$0xff]  }
 0x24a   :  { %5588 = vmatpush1.bf16.msra.mxu0 %v7631_v23  ;;  %5097 = vmatprep.subr.bf16.mxu1 %v7636_v24  ;;  %v7715_v23 = vld [vmem:[#allocation5 + $0x1520] ss:$8 sps:$4 sm:$0xff]   ;;  %v7720_v24 = vld [vmem:[#allocation5 + $0x934] ss:$8 sps:$4 sm:$0xff]  }
 0x24b   :  { %5589 = vmatprep.subr.bf16.mxu0 %v7639_v25  ;;  %v7723_v25 = vld [vmem:[#allocation5 + $0x1534] ss:$8 sps:$4 sm:$0xff]  }
 0x24d   :  { %5098 = vmatpush1.bf16.msra.mxu1 %v7634_v26  ;;  %v7718_v26 = vld [vmem:[#allocation5 + $0x930] ss:$8 sps:$4 sm:$0xff]  }
 0x24e   :  { %5590 = vmatpush1.bf16.msra.mxu0 %v7637_v27  ;;  %5099 = vmatprep.subr.bf16.mxu1 %v7642_v28  ;;  %v7721_v27 = vld [vmem:[#allocation5 + $0x1530] ss:$8 sps:$4 sm:$0xff]   ;;  %v7726_v28 = vld [vmem:[#allocation5 + $0x944] ss:$8 sps:$4 sm:$0xff]  }
 0x24f   :  { %5591 = vmatprep.subr.bf16.mxu0 %v7645_v29  ;;  %v7729_v29 = vld [vmem:[#allocation5 + $0x1544] ss:$8 sps:$4 sm:$0xff]  }
 0x251   :  { %5100 = vmatpush1.bf16.msra.mxu1 %v7640_v30  ;;  %v7724_v30 = vld [vmem:[#allocation5 + $0x940] ss:$8 sps:$4 sm:$0xff]  }
 0x252   :  { %5592 = vmatpush1.bf16.msra.mxu0 %v7643_v31  ;;  %5101 = vmatprep.subr.bf16.mxu1 %v7648_v32  ;;  %v7727_v31 = vld [vmem:[#allocation5 + $0x1540] ss:$8 sps:$4 sm:$0xff]   ;;  %v7732_v32 = vld [vmem:[#allocation5 + $0x954] ss:$8 sps:$4 sm:$0xff]  }
 0x253   :  { %5593 = vmatprep.subr.bf16.mxu0 %v7651_v33  ;;  %v7735_v33 = vld [vmem:[#allocation5 + $0x1554] ss:$8 sps:$4 sm:$0xff]  }
 0x255   :  { %5102 = vmatpush1.bf16.msra.mxu1 %v7646_v34  ;;  %v7730_v34 = vld [vmem:[#allocation5 + $0x950] ss:$8 sps:$4 sm:$0xff]  }
 0x256   :  { %5594 = vmatpush1.bf16.msra.mxu0 %v7649_v35  ;;  %5103 = vmatprep.subr.bf16.mxu1 %v7654_v36  ;;  %v7733_v35 = vld [vmem:[#allocation5 + $0x1550] ss:$8 sps:$4 sm:$0xff]   ;;  %v7738_v36 = vld [vmem:[#allocation5 + $0x964] ss:$8 sps:$4 sm:$0xff]  }
 0x257   :  { %5595 = vmatprep.subr.bf16.mxu0 %v7657_v37  ;;  %v7741_v37 = vld [vmem:[#allocation5 + $0x1564] ss:$8 sps:$4 sm:$0xff]  }
 0x259   :  { %5104 = vmatpush1.bf16.msra.mxu1 %v7652_v38  ;;  %v7736_v38 = vld [vmem:[#allocation5 + $0x960] ss:$8 sps:$4 sm:$0xff]  }
 0x25a   :  { %5596 = vmatpush1.bf16.msra.mxu0 %v7655_v39  ;;  %5105 = vmatprep.subr.bf16.mxu1 %v7660_v40  ;;  %v7739_v39 = vld [vmem:[#allocation5 + $0x1560] ss:$8 sps:$4 sm:$0xff]   ;;  %v7744_v40 = vld [vmem:[#allocation5 + $0x974] ss:$8 sps:$4 sm:$0xff]  }
 0x25b   :  { %5597 = vmatprep.subr.bf16.mxu0 %v7663_v41  ;;  %v7747_v41 = vld [vmem:[#allocation5 + $0x1574] ss:$8 sps:$4 sm:$0xff]  }
 0x25d   :  { %5106 = vmatpush1.bf16.msra.mxu1 %v7658_v42  ;;  %v7742_v42 = vld [vmem:[#allocation5 + $0x970] ss:$8 sps:$4 sm:$0xff]  }
 0x25e   :  { %5598 = vmatpush1.bf16.msra.mxu0 %v7661_v43  ;;  %5107 = vmatprep.subr.bf16.mxu1 %v7666_v44  ;;  %v7745_v43 = vld [vmem:[#allocation5 + $0x1570] ss:$8 sps:$4 sm:$0xff]   ;;  %v7750_v44 = vld [vmem:[#allocation5 + $0x984] ss:$8 sps:$4 sm:$0xff]  }
 0x25f   :  { %5599 = vmatprep.subr.bf16.mxu0 %v7669_v45  ;;  %v7753_v45 = vld [vmem:[#allocation5 + $0x1584] ss:$8 sps:$4 sm:$0xff]  }
 0x261   :  { %5108 = vmatpush1.bf16.msra.mxu1 %v7664_v46  ;;  %v7748_v46 = vld [vmem:[#allocation5 + $0x980] ss:$8 sps:$4 sm:$0xff]  }
 0x262   :  { %5600 = vmatpush1.bf16.msra.mxu0 %v7667_v47  ;;  %5109 = vmatprep.subr.bf16.mxu1 %v7672_v48  ;;  %v7751_v47 = vld [vmem:[#allocation5 + $0x1580] ss:$8 sps:$4 sm:$0xff]   ;;  %v7756_v48 = vld [vmem:[#allocation5 + $0x994] ss:$8 sps:$4 sm:$0xff]  }
 0x263   :  { %5601 = vmatprep.subr.bf16.mxu0 %v7675_v49  ;;  %v7759_v49 = vld [vmem:[#allocation5 + $0x1594] ss:$8 sps:$4 sm:$0xff]  }
 0x265   :  { %5110 = vmatpush1.bf16.msra.mxu1 %v7670_v50  ;;  %v7754_v50 = vld [vmem:[#allocation5 + $0x990] ss:$8 sps:$4 sm:$0xff]  }
 0x266   :  { %5602 = vmatpush1.bf16.msra.mxu0 %v7673_v51  ;;  %5111 = vmatprep.subr.bf16.mxu1 %v7678_v52  ;;  %v7757_v51 = vld [vmem:[#allocation5 + $0x1590] ss:$8 sps:$4 sm:$0xff]   ;;  %v7762_v52 = vld [vmem:[#allocation5 + $0x9a4] ss:$8 sps:$4 sm:$0xff]  }
 0x267   :  { %5603 = vmatprep.subr.bf16.mxu0 %v7681_v53  ;;  %v7765_v53 = vld [vmem:[#allocation5 + $0x15a4] ss:$8 sps:$4 sm:$0xff]  }
 0x269   :  { %5112 = vmatpush1.bf16.msra.mxu1 %v7676_v54  ;;  %v7760_v54 = vld [vmem:[#allocation5 + $0x9a0] ss:$8 sps:$4 sm:$0xff]  }
 0x26a   :  { %5604 = vmatpush1.bf16.msra.mxu0 %v7679_v55  ;;  %5113 = vmatprep.subr.bf16.mxu1 %v7684_v56  ;;  %v7763_v55 = vld [vmem:[#allocation5 + $0x15a0] ss:$8 sps:$4 sm:$0xff]   ;;  %v7768_v56 = vld [vmem:[#allocation5 + $0x9b4] ss:$8 sps:$4 sm:$0xff]  }
 0x26b   :  { %5605 = vmatprep.subr.bf16.mxu0 %v7687_v57  ;;  %v7771_v57 = vld [vmem:[#allocation5 + $0x15b4] ss:$8 sps:$4 sm:$0xff]  }
 0x26d   :  { %5114 = vmatpush1.bf16.msra.mxu1 %v7682_v58  ;;  %v7766_v58 = vld [vmem:[#allocation5 + $0x9b0] ss:$8 sps:$4 sm:$0xff]  }
 0x26e   :  { %5606 = vmatpush1.bf16.msra.mxu0 %v7685_v59  ;;  %5115 = vmatprep.subr.bf16.mxu1 %v7690_v60  ;;  %v7769_v59 = vld [vmem:[#allocation5 + $0x15b0] ss:$8 sps:$4 sm:$0xff]   ;;  %v7774_v60 = vld [vmem:[#allocation5 + $0x9c4] ss:$8 sps:$4 sm:$0xff]  }
 0x26f   :  { %5607 = vmatprep.subr.bf16.mxu0 %v7693_v61  ;;  %v7777_v61 = vld [vmem:[#allocation5 + $0x15c4] ss:$8 sps:$4 sm:$0xff]  }
 0x271   :  { %5116 = vmatpush1.bf16.msra.mxu1 %v7688_v62  ;;  %v7772_v62 = vld [vmem:[#allocation5 + $0x9c0] ss:$8 sps:$4 sm:$0xff]  }
 0x272   :  { %5608 = vmatpush1.bf16.msra.mxu0 %v7691_v63  ;;  %5117 = vmatprep.subr.bf16.mxu1 %v7696_v0  ;;  %v7775_v63 = vld [vmem:[#allocation5 + $0x15c0] ss:$8 sps:$4 sm:$0xff]   ;;  %v7780_v0 = vld [vmem:[#allocation5 + $0x9d4] ss:$8 sps:$4 sm:$0xff]  }
 0x273   :  { %5609 = vmatprep.subr.bf16.mxu0 %v7699_v1  ;;  %v7783_v1 = vld [vmem:[#allocation5 + $0x15d4] ss:$8 sps:$4 sm:$0xff]  }
 0x275   :  { %5118 = vmatpush1.bf16.msra.mxu1 %v7694_v2  ;;  %v7778_v2 = vld [vmem:[#allocation5 + $0x9d0] ss:$8 sps:$4 sm:$0xff]  }
 0x276   :  { %5610 = vmatpush1.bf16.msra.mxu0 %v7697_v3  ;;  %5128 = vmatprep.subr.bf16.mxu1 %v7702_v6  ;;  %v7781_v3 = vld [vmem:[#allocation5 + $0x15d0] ss:$8 sps:$4 sm:$0xff]   ;;  %v7784_v6 = vld [vmem:[#allocation5 + $0x9e0] ss:$8 sps:$4 sm:$0xff]  }
 0x277   :  { %5620 = vmatprep.subr.bf16.mxu0 %v7705_v7  ;;  %v7787_v7 = vld [vmem:[#allocation5 + $0x15e0] ss:$8 sps:$4 sm:$0xff]  }
 0x278   :  { %5120 = vmatmul.mubr.bf16.vlgmr.msra.gmra.mrb[0].mxu1 %v119_v8  ;;  %v7792_v8 = vld [vmem:[#allocation5 + $0x9f4] ss:$8 sps:$4 sm:$0xff]  }
 0x279   :  { %5612 = vmatmul.mubr.bf16.vlgmr.msra.gmra.mrb[0].mxu0 %v143_v9  ;;  %5129 = vmatpush1.bf16.msra.mxu1 %v7700_v12  ;;  %v7795_v9 = vld [vmem:[#allocation5 + $0x15f4] ss:$8 sps:$4 sm:$0xff]  }
 0x27a   :  { %5621 = vmatpush1.bf16.msra.mxu0 %v7703_v13  ;;  %5130 = vmatprep.subr.bf16.mxu1 %v7708_v14  ;;  %v73_v12 = vld [vmem:[#allocation2 + $0x90] sm:$0xff]  ;;  %v7798_v14 = vld [vmem:[#allocation5 + $0xa04] ss:$8 sps:$4 sm:$0xff]  }
 0x27b   :  { %5622 = vmatprep.subr.bf16.mxu0 %v7711_v15  ;;  %5160 = vmatprep.mubr.bf16.mxu1 %v122_v16  ;;  %v97_v13 = vld [vmem:[#allocation2 + $0x150] sm:$0xff]  ;;  %v7801_v15 = vld [vmem:[#allocation5 + $0x1604] ss:$8 sps:$4 sm:$0xff]   ;;  %v121_v16 = vpack.c.bf16 %v73_v12, %v73_v12 }
 0x27c   :  { %5652 = vmatprep.mubr.bf16.mxu0 %v146_v17  ;;  %v145_v17 = vpack.c.bf16 %v97_v13, %v97_v13  ;;  %v7882_v12 = vld [vmem:[#allocation5 + $0xae4] ss:$8 sps:$4 sm:$0xff]  }
 0x27d   :  { %5131 = vmatpush1.bf16.msra.mxu1 %v7706_v18  ;;  %v76_v18 = vld [vmem:[#allocation2 + $0xa8] sm:$0xff] }
 0x27e   :  { %5623 = vmatpush1.bf16.msra.mxu0 %v7709_v19  ;;  %5132 = vmatprep.subr.bf16.mxu1 %v7714_v20  ;;  %v100_v19 = vld [vmem:[#allocation2 + $0x168] sm:$0xff] }
 0x27f   :  { %5624 = vmatprep.subr.bf16.mxu0 %v7717_v21  ;;  %v7796_v20 = vld [vmem:[#allocation5 + $0xa00] ss:$8 sps:$4 sm:$0xff]   ;;  %v7885_v13 = vld [vmem:[#allocation5 + $0x16e4] ss:$8 sps:$4 sm:$0xff]  }
 0x280   :  { %v7799_v21 = vld [vmem:[#allocation5 + $0x1600] ss:$8 sps:$4 sm:$0xff]  }
 0x281   :  { %5133 = vmatpush1.bf16.msra.mxu1 %v7712_v22  ;;  %v7804_v22 = vld [vmem:[#allocation5 + $0xa14] ss:$8 sps:$4 sm:$0xff]  }
 0x282   :  { %5625 = vmatpush1.bf16.msra.mxu0 %v7715_v23  ;;  %5134 = vmatprep.subr.bf16.mxu1 %v7720_v24  ;;  %v7807_v23 = vld [vmem:[#allocation5 + $0x1614] ss:$8 sps:$4 sm:$0xff]   ;;  %v124_v24 = vpack.c.bf16 %v76_v18, %v76_v18  ;;  %v7886_v18 = vld [vmem:[#allocation5 + $0xaf0] ss:$8 sps:$4 sm:$0xff]  }
 0x283   :  { %5626 = vmatprep.subr.bf16.mxu0 %v7723_v25  ;;  %v148_v25 = vpack.c.bf16 %v100_v19, %v100_v19  ;;  %v7889_v19 = vld [vmem:[#allocation5 + $0x16f0] ss:$8 sps:$4 sm:$0xff]  }
 0x285   :  { %5135 = vmatpush1.bf16.msra.mxu1 %v7718_v26  ;;  %v7802_v26 = vld [vmem:[#allocation5 + $0xa10] ss:$8 sps:$4 sm:$0xff]  }
 0x286   :  { %5627 = vmatpush1.bf16.msra.mxu0 %v7721_v27  ;;  %5136 = vmatprep.subr.bf16.mxu1 %v7726_v28  ;;  %v7805_v27 = vld [vmem:[#allocation5 + $0x1610] ss:$8 sps:$4 sm:$0xff]   ;;  %v7810_v28 = vld [vmem:[#allocation5 + $0xa24] ss:$8 sps:$4 sm:$0xff]  }
 0x287   :  { %5628 = vmatprep.subr.bf16.mxu0 %v7729_v29  ;;  %v7813_v29 = vld [vmem:[#allocation5 + $0x1624] ss:$8 sps:$4 sm:$0xff]  }
 0x289   :  { %5137 = vmatpush1.bf16.msra.mxu1 %v7724_v30  ;;  %v7808_v30 = vld [vmem:[#allocation5 + $0xa20] ss:$8 sps:$4 sm:$0xff]  }
 0x28a   :  { %5629 = vmatpush1.bf16.msra.mxu0 %v7727_v31  ;;  %5138 = vmatprep.subr.bf16.mxu1 %v7732_v32  ;;  %v7811_v31 = vld [vmem:[#allocation5 + $0x1620] ss:$8 sps:$4 sm:$0xff]   ;;  %v7816_v32 = vld [vmem:[#allocation5 + $0xa34] ss:$8 sps:$4 sm:$0xff]  }
 0x28b   :  { %5630 = vmatprep.subr.bf16.mxu0 %v7735_v33  ;;  %v7819_v33 = vld [vmem:[#allocation5 + $0x1634] ss:$8 sps:$4 sm:$0xff]  }
 0x28d   :  { %5139 = vmatpush1.bf16.msra.mxu1 %v7730_v34  ;;  %v7814_v34 = vld [vmem:[#allocation5 + $0xa30] ss:$8 sps:$4 sm:$0xff]  }
 0x28e   :  { %5631 = vmatpush1.bf16.msra.mxu0 %v7733_v35  ;;  %5140 = vmatprep.subr.bf16.mxu1 %v7738_v36  ;;  %v7817_v35 = vld [vmem:[#allocation5 + $0x1630] ss:$8 sps:$4 sm:$0xff]   ;;  %v7822_v36 = vld [vmem:[#allocation5 + $0xa44] ss:$8 sps:$4 sm:$0xff]  }
 0x28f   :  { %5632 = vmatprep.subr.bf16.mxu0 %v7741_v37  ;;  %v7825_v37 = vld [vmem:[#allocation5 + $0x1644] ss:$8 sps:$4 sm:$0xff]  }
 0x291   :  { %5141 = vmatpush1.bf16.msra.mxu1 %v7736_v38  ;;  %v7820_v38 = vld [vmem:[#allocation5 + $0xa40] ss:$8 sps:$4 sm:$0xff]  }
 0x292   :  { %5633 = vmatpush1.bf16.msra.mxu0 %v7739_v39  ;;  %5142 = vmatprep.subr.bf16.mxu1 %v7744_v40  ;;  %v7823_v39 = vld [vmem:[#allocation5 + $0x1640] ss:$8 sps:$4 sm:$0xff]   ;;  %v7828_v40 = vld [vmem:[#allocation5 + $0xa54] ss:$8 sps:$4 sm:$0xff]  }
 0x293   :  { %5634 = vmatprep.subr.bf16.mxu0 %v7747_v41  ;;  %v7831_v41 = vld [vmem:[#allocation5 + $0x1654] ss:$8 sps:$4 sm:$0xff]  }
 0x295   :  { %5143 = vmatpush1.bf16.msra.mxu1 %v7742_v42  ;;  %v7826_v42 = vld [vmem:[#allocation5 + $0xa50] ss:$8 sps:$4 sm:$0xff]  }
 0x296   :  { %5635 = vmatpush1.bf16.msra.mxu0 %v7745_v43  ;;  %5144 = vmatprep.subr.bf16.mxu1 %v7750_v44  ;;  %v7829_v43 = vld [vmem:[#allocation5 + $0x1650] ss:$8 sps:$4 sm:$0xff]   ;;  %v7834_v44 = vld [vmem:[#allocation5 + $0xa64] ss:$8 sps:$4 sm:$0xff]  }
 0x297   :  { %5636 = vmatprep.subr.bf16.mxu0 %v7753_v45  ;;  %v7837_v45 = vld [vmem:[#allocation5 + $0x1664] ss:$8 sps:$4 sm:$0xff]  }
 0x299   :  { %5145 = vmatpush1.bf16.msra.mxu1 %v7748_v46  ;;  %v7832_v46 = vld [vmem:[#allocation5 + $0xa60] ss:$8 sps:$4 sm:$0xff]  }
 0x29a   :  { %5637 = vmatpush1.bf16.msra.mxu0 %v7751_v47  ;;  %5146 = vmatprep.subr.bf16.mxu1 %v7756_v48  ;;  %v7835_v47 = vld [vmem:[#allocation5 + $0x1660] ss:$8 sps:$4 sm:$0xff]   ;;  %v7840_v48 = vld [vmem:[#allocation5 + $0xa74] ss:$8 sps:$4 sm:$0xff]  }
 0x29b   :  { %5638 = vmatprep.subr.bf16.mxu0 %v7759_v49  ;;  %v7843_v49 = vld [vmem:[#allocation5 + $0x1674] ss:$8 sps:$4 sm:$0xff]  }
 0x29d   :  { %5147 = vmatpush1.bf16.msra.mxu1 %v7754_v50  ;;  %v7838_v50 = vld [vmem:[#allocation5 + $0xa70] ss:$8 sps:$4 sm:$0xff]  }
 0x29e   :  { %5639 = vmatpush1.bf16.msra.mxu0 %v7757_v51  ;;  %5148 = vmatprep.subr.bf16.mxu1 %v7762_v52  ;;  %v7841_v51 = vld [vmem:[#allocation5 + $0x1670] ss:$8 sps:$4 sm:$0xff]   ;;  %v7846_v52 = vld [vmem:[#allocation5 + $0xa84] ss:$8 sps:$4 sm:$0xff]  }
 0x29f   :  { %5640 = vmatprep.subr.bf16.mxu0 %v7765_v53  ;;  %v7849_v53 = vld [vmem:[#allocation5 + $0x1684] ss:$8 sps:$4 sm:$0xff]  }
 0x2a1   :  { %5149 = vmatpush1.bf16.msra.mxu1 %v7760_v54  ;;  %v7844_v54 = vld [vmem:[#allocation5 + $0xa80] ss:$8 sps:$4 sm:$0xff]  }
 0x2a2   :  { %5641 = vmatpush1.bf16.msra.mxu0 %v7763_v55  ;;  %5150 = vmatprep.subr.bf16.mxu1 %v7768_v56  ;;  %v7847_v55 = vld [vmem:[#allocation5 + $0x1680] ss:$8 sps:$4 sm:$0xff]   ;;  %v7852_v56 = vld [vmem:[#allocation5 + $0xa94] ss:$8 sps:$4 sm:$0xff]  }
 0x2a3   :  { %5642 = vmatprep.subr.bf16.mxu0 %v7771_v57  ;;  %v7855_v57 = vld [vmem:[#allocation5 + $0x1694] ss:$8 sps:$4 sm:$0xff]  }
 0x2a5   :  { %5151 = vmatpush1.bf16.msra.mxu1 %v7766_v58  ;;  %v7850_v58 = vld [vmem:[#allocation5 + $0xa90] ss:$8 sps:$4 sm:$0xff]  }
 0x2a6   :  { %5643 = vmatpush1.bf16.msra.mxu0 %v7769_v59  ;;  %5152 = vmatprep.subr.bf16.mxu1 %v7774_v60  ;;  %v7853_v59 = vld [vmem:[#allocation5 + $0x1690] ss:$8 sps:$4 sm:$0xff]   ;;  %v7858_v60 = vld [vmem:[#allocation5 + $0xaa4] ss:$8 sps:$4 sm:$0xff]  }
 0x2a7   :  { %5644 = vmatprep.subr.bf16.mxu0 %v7777_v61  ;;  %v7861_v61 = vld [vmem:[#allocation5 + $0x16a4] ss:$8 sps:$4 sm:$0xff]  }
 0x2a9   :  { %5153 = vmatpush1.bf16.msra.mxu1 %v7772_v62  ;;  %v7856_v62 = vld [vmem:[#allocation5 + $0xaa0] ss:$8 sps:$4 sm:$0xff]  }
 0x2aa   :  { %5645 = vmatpush1.bf16.msra.mxu0 %v7775_v63  ;;  %5154 = vmatprep.subr.bf16.mxu1 %v7780_v0  ;;  %v7859_v63 = vld [vmem:[#allocation5 + $0x16a0] ss:$8 sps:$4 sm:$0xff]   ;;  %v7864_v0 = vld [vmem:[#allocation5 + $0xab4] ss:$8 sps:$4 sm:$0xff]  }
 0x2ab   :  { %5646 = vmatprep.subr.bf16.mxu0 %v7783_v1  ;;  %v7867_v1 = vld [vmem:[#allocation5 + $0x16b4] ss:$8 sps:$4 sm:$0xff]  }
 0x2ad   :  { %5155 = vmatpush1.bf16.msra.mxu1 %v7778_v2  ;;  %v7862_v2 = vld [vmem:[#allocation5 + $0xab0] ss:$8 sps:$4 sm:$0xff]  }
 0x2ae   :  { %5647 = vmatpush1.bf16.msra.mxu0 %v7781_v3  ;;  %5156 = vmatprep.subr.bf16.mxu1 %v7786_v4  ;;  %v7865_v3 = vld [vmem:[#allocation5 + $0x16b0] ss:$8 sps:$4 sm:$0xff]   ;;  %v7870_v4 = vld [vmem:[#allocation5 + $0xac4] ss:$8 sps:$4 sm:$0xff]  }
 0x2af   :  { %5648 = vmatprep.subr.bf16.mxu0 %v7789_v5  ;;  %v7873_v5 = vld [vmem:[#allocation5 + $0x16c4] ss:$8 sps:$4 sm:$0xff]  }
 0x2b1   :  { %5157 = vmatpush1.bf16.msra.mxu1 %v7784_v6  ;;  %v7868_v6 = vld [vmem:[#allocation5 + $0xac0] ss:$8 sps:$4 sm:$0xff]  }
 0x2b2   :  { %5649 = vmatpush1.bf16.msra.mxu0 %v7787_v7  ;;  %5158 = vmatprep.subr.bf16.mxu1 %v7792_v8  ;;  %v7871_v7 = vld [vmem:[#allocation5 + $0x16c0] ss:$8 sps:$4 sm:$0xff]   ;;  %v7876_v8 = vld [vmem:[#allocation5 + $0xad4] ss:$8 sps:$4 sm:$0xff]  }
 0x2b3   :  { %5650 = vmatprep.subr.bf16.mxu0 %v7795_v9  ;;  %v7879_v9 = vld [vmem:[#allocation5 + $0x16d4] ss:$8 sps:$4 sm:$0xff]  }
 0x2b5   :  { %5159 = vmatpush1.bf16.msra.mxu1 %v7790_v10  ;;  %v7874_v10 = vld [vmem:[#allocation5 + $0xad0] ss:$8 sps:$4 sm:$0xff]  }
 0x2b6   :  { %5651 = vmatpush1.bf16.msra.mxu0 %v7793_v11  ;;  %5169 = vmatprep.subr.bf16.mxu1 %v7798_v14  ;;  %v7877_v11 = vld [vmem:[#allocation5 + $0x16d0] ss:$8 sps:$4 sm:$0xff]   ;;  %v7880_v14 = vld [vmem:[#allocation5 + $0xae0] ss:$8 sps:$4 sm:$0xff]  }
 0x2b7   :  { %5661 = vmatprep.subr.bf16.mxu0 %v7801_v15  ;;  %v7883_v15 = vld [vmem:[#allocation5 + $0x16e0] ss:$8 sps:$4 sm:$0xff]  }
 0x2b8   :  { %5161 = vmatmul.mubr.bf16.vlgmr.msra.gmra.mrb[0].mxu1 %v121_v16  ;;  %v7888_v16 = vld [vmem:[#allocation5 + $0xaf4] ss:$8 sps:$4 sm:$0xff]  }
 0x2b9   :  { %5653 = vmatmul.mubr.bf16.vlgmr.msra.gmra.mrb[0].mxu0 %v145_v17  ;;  %5170 = vmatpush1.bf16.msra.mxu1 %v7796_v20  ;;  %v7891_v17 = vld [vmem:[#allocation5 + $0x16f4] ss:$8 sps:$4 sm:$0xff]   ;;  %v75_v20 = vld [vmem:[#allocation2 + $0xa0] sm:$0xff] }
 0x2ba   :  { %5662 = vmatpush1.bf16.msra.mxu0 %v7799_v21  ;;  %5171 = vmatprep.subr.bf16.mxu1 %v7804_v22  ;;  %v99_v21 = vld [vmem:[#allocation2 + $0x160] sm:$0xff] }
 0x2bb   :  { %5663 = vmatprep.subr.bf16.mxu0 %v7807_v23  ;;  %5201 = vmatprep.mubr.bf16.mxu1 %v124_v24  ;;  %v7894_v22 = vld [vmem:[#allocation5 + $0xb04] ss:$8 sps:$4 sm:$0xff]   ;;  %v123_v24 = vpack.c.bf16 %v75_v20, %v75_v20 }
 0x2bc   :  { %5693 = vmatprep.mubr.bf16.mxu0 %v148_v25  ;;  %v7897_v23 = vld [vmem:[#allocation5 + $0x1704] ss:$8 sps:$4 sm:$0xff]   ;;  %v147_v25 = vpack.c.bf16 %v99_v21, %v99_v21 }
 0x2bd   :  { %5172 = vmatpush1.bf16.msra.mxu1 %v7802_v26  ;;  %v78_v26 = vld [vmem:[#allocation2 + $0xb8] sm:$0xff]  ;;  %v7978_v20 = vld [vmem:[#allocation5 + $0xbe4] ss:$8 sps:$4 sm:$0xff]  }
 0x2be   :  { %5664 = vmatpush1.bf16.msra.mxu0 %v7805_v27  ;;  %5173 = vmatprep.subr.bf16.mxu1 %v7810_v28  ;;  %v102_v27 = vld [vmem:[#allocation2 + $0x178] sm:$0xff]  ;;  %v7892_v28 = vld [vmem:[#allocation5 + $0xb00] ss:$8 sps:$4 sm:$0xff]   ;;  %v7981_v21 = vld [vmem:[#allocation5 + $0x17e4] ss:$8 sps:$4 sm:$0xff]  }
 0x2bf   :  { %5665 = vmatprep.subr.bf16.mxu0 %v7813_v29  ;;  %v7895_v29 = vld [vmem:[#allocation5 + $0x1700] ss:$8 sps:$4 sm:$0xff]  }
 0x2c1   :  { %5174 = vmatpush1.bf16.msra.mxu1 %v7808_v30  ;;  %v7900_v30 = vld [vmem:[#allocation5 + $0xb14] ss:$8 sps:$4 sm:$0xff]  }
 0x2c2   :  { %5666 = vmatpush1.bf16.msra.mxu0 %v7811_v31  ;;  %5175 = vmatprep.subr.bf16.mxu1 %v7816_v32  ;;  %v7903_v31 = vld [vmem:[#allocation5 + $0x1714] ss:$8 sps:$4 sm:$0xff]   ;;  %v126_v32 = vpack.c.bf16 %v78_v26, %v78_v26  ;;  %v7982_v26 = vld [vmem:[#allocation5 + $0xbf0] ss:$8 sps:$4 sm:$0xff]  }
 0x2c3   :  { %5667 = vmatprep.subr.bf16.mxu0 %v7819_v33  ;;  %v150_v33 = vpack.c.bf16 %v102_v27, %v102_v27  ;;  %v7985_v27 = vld [vmem:[#allocation5 + $0x17f0] ss:$8 sps:$4 sm:$0xff]  }
 0x2c5   :  { %5176 = vmatpush1.bf16.msra.mxu1 %v7814_v34  ;;  %v7898_v34 = vld [vmem:[#allocation5 + $0xb10] ss:$8 sps:$4 sm:$0xff]  }
 0x2c6   :  { %5668 = vmatpush1.bf16.msra.mxu0 %v7817_v35  ;;  %5177 = vmatprep.subr.bf16.mxu1 %v7822_v36  ;;  %v7901_v35 = vld [vmem:[#allocation5 + $0x1710] ss:$8 sps:$4 sm:$0xff]   ;;  %v7906_v36 = vld [vmem:[#allocation5 + $0xb24] ss:$8 sps:$4 sm:$0xff]  }
 0x2c7   :  { %5669 = vmatprep.subr.bf16.mxu0 %v7825_v37  ;;  %v7909_v37 = vld [vmem:[#allocation5 + $0x1724] ss:$8 sps:$4 sm:$0xff]  }
 0x2c9   :  { %5178 = vmatpush1.bf16.msra.mxu1 %v7820_v38  ;;  %v7904_v38 = vld [vmem:[#allocation5 + $0xb20] ss:$8 sps:$4 sm:$0xff]  }
 0x2ca   :  { %5670 = vmatpush1.bf16.msra.mxu0 %v7823_v39  ;;  %5179 = vmatprep.subr.bf16.mxu1 %v7828_v40  ;;  %v7907_v39 = vld [vmem:[#allocation5 + $0x1720] ss:$8 sps:$4 sm:$0xff]   ;;  %v7912_v40 = vld [vmem:[#allocation5 + $0xb34] ss:$8 sps:$4 sm:$0xff]  }
 0x2cb   :  { %5671 = vmatprep.subr.bf16.mxu0 %v7831_v41  ;;  %v7915_v41 = vld [vmem:[#allocation5 + $0x1734] ss:$8 sps:$4 sm:$0xff]  }
 0x2cd   :  { %5180 = vmatpush1.bf16.msra.mxu1 %v7826_v42  ;;  %v7910_v42 = vld [vmem:[#allocation5 + $0xb30] ss:$8 sps:$4 sm:$0xff]  }
 0x2ce   :  { %5672 = vmatpush1.bf16.msra.mxu0 %v7829_v43  ;;  %5181 = vmatprep.subr.bf16.mxu1 %v7834_v44  ;;  %v7913_v43 = vld [vmem:[#allocation5 + $0x1730] ss:$8 sps:$4 sm:$0xff]   ;;  %v7918_v44 = vld [vmem:[#allocation5 + $0xb44] ss:$8 sps:$4 sm:$0xff]  }
 0x2cf   :  { %5673 = vmatprep.subr.bf16.mxu0 %v7837_v45  ;;  %v7921_v45 = vld [vmem:[#allocation5 + $0x1744] ss:$8 sps:$4 sm:$0xff]  }
 0x2d1   :  { %5182 = vmatpush1.bf16.msra.mxu1 %v7832_v46  ;;  %v7916_v46 = vld [vmem:[#allocation5 + $0xb40] ss:$8 sps:$4 sm:$0xff]  }
 0x2d2   :  { %5674 = vmatpush1.bf16.msra.mxu0 %v7835_v47  ;;  %5183 = vmatprep.subr.bf16.mxu1 %v7840_v48  ;;  %v7919_v47 = vld [vmem:[#allocation5 + $0x1740] ss:$8 sps:$4 sm:$0xff]   ;;  %v7924_v48 = vld [vmem:[#allocation5 + $0xb54] ss:$8 sps:$4 sm:$0xff]  }
 0x2d3   :  { %5675 = vmatprep.subr.bf16.mxu0 %v7843_v49  ;;  %v7927_v49 = vld [vmem:[#allocation5 + $0x1754] ss:$8 sps:$4 sm:$0xff]  }
 0x2d5   :  { %5184 = vmatpush1.bf16.msra.mxu1 %v7838_v50  ;;  %v7922_v50 = vld [vmem:[#allocation5 + $0xb50] ss:$8 sps:$4 sm:$0xff]  }
 0x2d6   :  { %5676 = vmatpush1.bf16.msra.mxu0 %v7841_v51  ;;  %5185 = vmatprep.subr.bf16.mxu1 %v7846_v52  ;;  %v7925_v51 = vld [vmem:[#allocation5 + $0x1750] ss:$8 sps:$4 sm:$0xff]   ;;  %v7930_v52 = vld [vmem:[#allocation5 + $0xb64] ss:$8 sps:$4 sm:$0xff]  }
 0x2d7   :  { %5677 = vmatprep.subr.bf16.mxu0 %v7849_v53  ;;  %v7933_v53 = vld [vmem:[#allocation5 + $0x1764] ss:$8 sps:$4 sm:$0xff]  }
 0x2d9   :  { %5186 = vmatpush1.bf16.msra.mxu1 %v7844_v54  ;;  %v7928_v54 = vld [vmem:[#allocation5 + $0xb60] ss:$8 sps:$4 sm:$0xff]  }
 0x2da   :  { %5678 = vmatpush1.bf16.msra.mxu0 %v7847_v55  ;;  %5187 = vmatprep.subr.bf16.mxu1 %v7852_v56  ;;  %v7931_v55 = vld [vmem:[#allocation5 + $0x1760] ss:$8 sps:$4 sm:$0xff]   ;;  %v7936_v56 = vld [vmem:[#allocation5 + $0xb74] ss:$8 sps:$4 sm:$0xff]  }
 0x2db   :  { %5679 = vmatprep.subr.bf16.mxu0 %v7855_v57  ;;  %v7939_v57 = vld [vmem:[#allocation5 + $0x1774] ss:$8 sps:$4 sm:$0xff]  }
 0x2dd   :  { %5188 = vmatpush1.bf16.msra.mxu1 %v7850_v58  ;;  %v7934_v58 = vld [vmem:[#allocation5 + $0xb70] ss:$8 sps:$4 sm:$0xff]  }
 0x2de   :  { %5680 = vmatpush1.bf16.msra.mxu0 %v7853_v59  ;;  %5189 = vmatprep.subr.bf16.mxu1 %v7858_v60  ;;  %v7937_v59 = vld [vmem:[#allocation5 + $0x1770] ss:$8 sps:$4 sm:$0xff]   ;;  %v7942_v60 = vld [vmem:[#allocation5 + $0xb84] ss:$8 sps:$4 sm:$0xff]  }
 0x2df   :  { %5681 = vmatprep.subr.bf16.mxu0 %v7861_v61  ;;  %v7945_v61 = vld [vmem:[#allocation5 + $0x1784] ss:$8 sps:$4 sm:$0xff]  }
 0x2e1   :  { %5190 = vmatpush1.bf16.msra.mxu1 %v7856_v62  ;;  %v7940_v62 = vld [vmem:[#allocation5 + $0xb80] ss:$8 sps:$4 sm:$0xff]  }
 0x2e2   :  { %5682 = vmatpush1.bf16.msra.mxu0 %v7859_v63  ;;  %5191 = vmatprep.subr.bf16.mxu1 %v7864_v0  ;;  %v7943_v63 = vld [vmem:[#allocation5 + $0x1780] ss:$8 sps:$4 sm:$0xff]   ;;  %v7948_v0 = vld [vmem:[#allocation5 + $0xb94] ss:$8 sps:$4 sm:$0xff]  }
 0x2e3   :  { %5683 = vmatprep.subr.bf16.mxu0 %v7867_v1  ;;  %v7951_v1 = vld [vmem:[#allocation5 + $0x1794] ss:$8 sps:$4 sm:$0xff]  }
 0x2e5   :  { %5192 = vmatpush1.bf16.msra.mxu1 %v7862_v2  ;;  %v7946_v2 = vld [vmem:[#allocation5 + $0xb90] ss:$8 sps:$4 sm:$0xff]  }
 0x2e6   :  { %5684 = vmatpush1.bf16.msra.mxu0 %v7865_v3  ;;  %5193 = vmatprep.subr.bf16.mxu1 %v7870_v4  ;;  %v7949_v3 = vld [vmem:[#allocation5 + $0x1790] ss:$8 sps:$4 sm:$0xff]   ;;  %v7954_v4 = vld [vmem:[#allocation5 + $0xba4] ss:$8 sps:$4 sm:$0xff]  }
 0x2e7   :  { %5685 = vmatprep.subr.bf16.mxu0 %v7873_v5  ;;  %v7957_v5 = vld [vmem:[#allocation5 + $0x17a4] ss:$8 sps:$4 sm:$0xff]  }
 0x2e9   :  { %5194 = vmatpush1.bf16.msra.mxu1 %v7868_v6  ;;  %v7952_v6 = vld [vmem:[#allocation5 + $0xba0] ss:$8 sps:$4 sm:$0xff]  }
 0x2ea   :  { %5686 = vmatpush1.bf16.msra.mxu0 %v7871_v7  ;;  %5195 = vmatprep.subr.bf16.mxu1 %v7876_v8  ;;  %v7955_v7 = vld [vmem:[#allocation5 + $0x17a0] ss:$8 sps:$4 sm:$0xff]   ;;  %v7960_v8 = vld [vmem:[#allocation5 + $0xbb4] ss:$8 sps:$4 sm:$0xff]  }
 0x2eb   :  { %5687 = vmatprep.subr.bf16.mxu0 %v7879_v9  ;;  %v7963_v9 = vld [vmem:[#allocation5 + $0x17b4] ss:$8 sps:$4 sm:$0xff]  }
 0x2ed   :  { %5196 = vmatpush1.bf16.msra.mxu1 %v7874_v10  ;;  %v7958_v10 = vld [vmem:[#allocation5 + $0xbb0] ss:$8 sps:$4 sm:$0xff]  }
 0x2ee   :  { %5688 = vmatpush1.bf16.msra.mxu0 %v7877_v11  ;;  %5197 = vmatprep.subr.bf16.mxu1 %v7882_v12  ;;  %v7961_v11 = vld [vmem:[#allocation5 + $0x17b0] ss:$8 sps:$4 sm:$0xff]   ;;  %v7966_v12 = vld [vmem:[#allocation5 + $0xbc4] ss:$8 sps:$4 sm:$0xff]  }
 0x2ef   :  { %5689 = vmatprep.subr.bf16.mxu0 %v7885_v13  ;;  %v7969_v13 = vld [vmem:[#allocation5 + $0x17c4] ss:$8 sps:$4 sm:$0xff]  }
 0x2f1   :  { %5198 = vmatpush1.bf16.msra.mxu1 %v7880_v14  ;;  %v7964_v14 = vld [vmem:[#allocation5 + $0xbc0] ss:$8 sps:$4 sm:$0xff]  }
 0x2f2   :  { %5690 = vmatpush1.bf16.msra.mxu0 %v7883_v15  ;;  %5199 = vmatprep.subr.bf16.mxu1 %v7888_v16  ;;  %v7967_v15 = vld [vmem:[#allocation5 + $0x17c0] ss:$8 sps:$4 sm:$0xff]   ;;  %v7972_v16 = vld [vmem:[#allocation5 + $0xbd4] ss:$8 sps:$4 sm:$0xff]  }
 0x2f3   :  { %5691 = vmatprep.subr.bf16.mxu0 %v7891_v17  ;;  %v7975_v17 = vld [vmem:[#allocation5 + $0x17d4] ss:$8 sps:$4 sm:$0xff]  }
 0x2f5   :  { %5200 = vmatpush1.bf16.msra.mxu1 %v7886_v18  ;;  %v7970_v18 = vld [vmem:[#allocation5 + $0xbd0] ss:$8 sps:$4 sm:$0xff]  }
 0x2f6   :  { %5692 = vmatpush1.bf16.msra.mxu0 %v7889_v19  ;;  %5210 = vmatprep.subr.bf16.mxu1 %v7894_v22  ;;  %v7973_v19 = vld [vmem:[#allocation5 + $0x17d0] ss:$8 sps:$4 sm:$0xff]   ;;  %v7976_v22 = vld [vmem:[#allocation5 + $0xbe0] ss:$8 sps:$4 sm:$0xff]  }
 0x2f7   :  { %5702 = vmatprep.subr.bf16.mxu0 %v7897_v23  ;;  %v7979_v23 = vld [vmem:[#allocation5 + $0x17e0] ss:$8 sps:$4 sm:$0xff]  }
 0x2f8   :  { %5202 = vmatmul.mubr.bf16.vlgmr.msra.gmra.mrb[0].mxu1 %v123_v24  ;;  %v7984_v24 = vld [vmem:[#allocation5 + $0xbf4] ss:$8 sps:$4 sm:$0xff]  }
 0x2f9   :  { %5694 = vmatmul.mubr.bf16.vlgmr.msra.gmra.mrb[0].mxu0 %v147_v25  ;;  %5211 = vmatpush1.bf16.msra.mxu1 %v7892_v28  ;;  %v7987_v25 = vld [vmem:[#allocation5 + $0x17f4] ss:$8 sps:$4 sm:$0xff]  }
 0x2fa   :  { %5703 = vmatpush1.bf16.msra.mxu0 %v7895_v29  ;;  %5212 = vmatprep.subr.bf16.mxu1 %v7900_v30  ;;  %v77_v28 = vld [vmem:[#allocation2 + $0xb0] sm:$0xff]  ;;  %v7988_v30 = vld [vmem:[#allocation7 + $0x40] sm:$0xff]  }
 0x2fb   :  { %5704 = vmatprep.subr.bf16.mxu0 %v7903_v31  ;;  %5242 = vmatprep.mubr.bf16.mxu1 %v126_v32  ;;  %v101_v29 = vld [vmem:[#allocation2 + $0x170] sm:$0xff]  ;;  %v125_v31 = vpack.c.bf16 %v77_v28, %v77_v28 }
 0x2fc   :  { %5734 = vmatprep.mubr.bf16.mxu0 %v150_v33  ;;  %v149_v32 = vpack.c.bf16 %v101_v29, %v101_v29  ;;  %v7989_v33 = vld [vmem:[#allocation7] sm:$0xff]  }
 0x2fd   :  { %5213 = vmatpush1.bf16.msra.mxu1 %v7898_v34  ;;  %v7990_v34 = vld [vmem:[#allocation7 + $0x48] sm:$0xff]  }
 0x2fe   :  { %5705 = vmatpush1.bf16.msra.mxu0 %v7901_v35  ;;  %5214 = vmatprep.subr.bf16.mxu1 %v7906_v36  ;;  %v7991_v35 = vld [vmem:[#allocation7 + $0x8] sm:$0xff]   ;;  %v7992_v36 = vld [vmem:[#allocation7 + $0x50] sm:$0xff]  }
 0x2ff   :  { %5706 = vmatprep.subr.bf16.mxu0 %v7909_v37  ;;  %v7993_v37 = vld [vmem:[#allocation7 + $0x10] sm:$0xff]  }
 0x301   :  { %5215 = vmatpush1.bf16.msra.mxu1 %v7904_v38  ;;  %v7994_v38 = vld [vmem:[#allocation7 + $0x58] sm:$0xff]  }
 0x302   :  { %5707 = vmatpush1.bf16.msra.mxu0 %v7907_v39  ;;  %5216 = vmatprep.subr.bf16.mxu1 %v7912_v40  ;;  %v7995_v39 = vld [vmem:[#allocation7 + $0x18] sm:$0xff]   ;;  %v7996_v40 = vld [vmem:[#allocation7 + $0x60] sm:$0xff]  }
 0x303   :  { %5708 = vmatprep.subr.bf16.mxu0 %v7915_v41  ;;  %v7997_v41 = vld [vmem:[#allocation7 + $0x20] sm:$0xff]  }
 0x305   :  { %5217 = vmatpush1.bf16.msra.mxu1 %v7910_v42  ;;  %v7998_v42 = vld [vmem:[#allocation7 + $0x68] sm:$0xff]  }
 0x306   :  { %5709 = vmatpush1.bf16.msra.mxu0 %v7913_v43  ;;  %5218 = vmatprep.subr.bf16.mxu1 %v7918_v44  ;;  %v7999_v43 = vld [vmem:[#allocation7 + $0x28] sm:$0xff]   ;;  %v8000_v44 = vld [vmem:[#allocation7 + $0x70] sm:$0xff]  }
 0x307   :  { %5710 = vmatprep.subr.bf16.mxu0 %v7921_v45  ;;  %v8001_v45 = vld [vmem:[#allocation7 + $0x30] sm:$0xff]  }
 0x309   :  { %5219 = vmatpush1.bf16.msra.mxu1 %v7916_v46  ;;  %v8002_v46 = vld [vmem:[#allocation7 + $0x78] sm:$0xff]  }
 0x30a   :  { %5711 = vmatpush1.bf16.msra.mxu0 %v7919_v47  ;;  %5220 = vmatprep.subr.bf16.mxu1 %v7924_v48  ;;  %v8003_v47 = vld [vmem:[#allocation7 + $0x38] sm:$0xff]  }
 0x30b   :  { %5712 = vmatprep.subr.bf16.mxu0 %v7927_v49 }
 0x30d   :  { %5221 = vmatpush1.bf16.msra.mxu1 %v7922_v50 }
 0x30e   :  { %5713 = vmatpush1.bf16.msra.mxu0 %v7925_v51  ;;  %5222 = vmatprep.subr.bf16.mxu1 %v7930_v52 }
 0x30f   :  { %5714 = vmatprep.subr.bf16.mxu0 %v7933_v53 }
 0x311   :  { %5223 = vmatpush1.bf16.msra.mxu1 %v7928_v54 }
 0x312   :  { %5715 = vmatpush1.bf16.msra.mxu0 %v7931_v55  ;;  %5224 = vmatprep.subr.bf16.mxu1 %v7936_v56 }
 0x313   :  { %5716 = vmatprep.subr.bf16.mxu0 %v7939_v57 }
 0x315   :  { %5225 = vmatpush1.bf16.msra.mxu1 %v7934_v58 }
 0x316   :  { %5717 = vmatpush1.bf16.msra.mxu0 %v7937_v59  ;;  %5226 = vmatprep.subr.bf16.mxu1 %v7942_v60 }
 0x317   :  { %5718 = vmatprep.subr.bf16.mxu0 %v7945_v61 }
 0x319   :  { %5227 = vmatpush1.bf16.msra.mxu1 %v7940_v62 }
 0x31a   :  { %5719 = vmatpush1.bf16.msra.mxu0 %v7943_v63  ;;  %5228 = vmatprep.subr.bf16.mxu1 %v7948_v0 }
 0x31b   :  { %5720 = vmatprep.subr.bf16.mxu0 %v7951_v1 }
 0x31d   :  { %5229 = vmatpush1.bf16.msra.mxu1 %v7946_v2 }
 0x31e   :  { %5721 = vmatpush1.bf16.msra.mxu0 %v7949_v3  ;;  %5230 = vmatprep.subr.bf16.mxu1 %v7954_v4 }
 0x31f   :  { %5722 = vmatprep.subr.bf16.mxu0 %v7957_v5 }
 0x321   :  { %5231 = vmatpush1.bf16.msra.mxu1 %v7952_v6 }
 0x322   :  { %5723 = vmatpush1.bf16.msra.mxu0 %v7955_v7  ;;  %5232 = vmatprep.subr.bf16.mxu1 %v7960_v8 }
 0x323   :  { %5724 = vmatprep.subr.bf16.mxu0 %v7963_v9 }
 0x325   :  { %5233 = vmatpush1.bf16.msra.mxu1 %v7958_v10 }
 0x326   :  { %5725 = vmatpush1.bf16.msra.mxu0 %v7961_v11  ;;  %5234 = vmatprep.subr.bf16.mxu1 %v7966_v12 }
 0x327   :  { %5726 = vmatprep.subr.bf16.mxu0 %v7969_v13 }
 0x329   :  { %5235 = vmatpush1.bf16.msra.mxu1 %v7964_v14 }
 0x32a   :  { %5727 = vmatpush1.bf16.msra.mxu0 %v7967_v15  ;;  %5236 = vmatprep.subr.bf16.mxu1 %v7972_v16 }
 0x32b   :  { %5728 = vmatprep.subr.bf16.mxu0 %v7975_v17 }
 0x32d   :  { %5237 = vmatpush1.bf16.msra.mxu1 %v7970_v18 }
 0x32e   :  { %5729 = vmatpush1.bf16.msra.mxu0 %v7973_v19  ;;  %5238 = vmatprep.subr.bf16.mxu1 %v7978_v20 }
 0x32f   :  { %5730 = vmatprep.subr.bf16.mxu0 %v7981_v21 }
 0x331   :  { %5239 = vmatpush1.bf16.msra.mxu1 %v7976_v22 }
 0x332   :  { %5731 = vmatpush1.bf16.msra.mxu0 %v7979_v23  ;;  %5240 = vmatprep.subr.bf16.mxu1 %v7984_v24 }
 0x333   :  { %5732 = vmatprep.subr.bf16.mxu0 %v7987_v25 }
 0x335   :  { %5241 = vmatpush1.bf16.msra.mxu1 %v7982_v26 }
 0x336   :  { %5733 = vmatpush1.bf16.msra.mxu0 %v7985_v27  ;;  %6716 = vmatprep.subr.bf16.mxu1 %v7988_v30 }
 0x338   :  { %5243 = vmatmul.mubr.bf16.vlgmr.msra.gmra.mrb[0].mxu1 %v125_v31 }
 0x339   :  { %5735 = vmatmul.mubr.bf16.vlgmr.msra.gmra.mrb[0].mxu0 %v149_v32  ;;  %6717 = vmatpush3.bf16.msra.mxu1 %v7989_v33 }
 0x33a   :  { %6718 = vmatprep.subr.bf16.mxu1 %v7990_v34 }
 0x33d   :  { %6719 = vmatpush3.bf16.msra.mxu1 %v7991_v35 }
 0x33e   :  { %6720 = vmatprep.subr.bf16.mxu1 %v7992_v36 }
 0x341   :  { %6721 = vmatpush3.bf16.msra.mxu1 %v7993_v37 }
 0x342   :  { %6722 = vmatprep.subr.bf16.mxu1 %v7994_v38 }
 0x345   :  { %6723 = vmatpush3.bf16.msra.mxu1 %v7995_v39 }
 0x346   :  { %6724 = vmatprep.subr.bf16.mxu1 %v7996_v40 }
 0x349   :  { %6725 = vmatpush3.bf16.msra.mxu1 %v7997_v41 }
 0x34a   :  { %6726 = vmatprep.subr.bf16.mxu1 %v7998_v42 }
 0x34d   :  { %6727 = vmatpush3.bf16.msra.mxu1 %v7999_v43 }
 0x34e   :  { %6728 = vmatprep.subr.bf16.mxu1 %v8000_v44 }
 0x351   :  { %6729 = vmatpush3.bf16.msra.mxu1 %v8001_v45 }
 0x352   :  { %6730 = vmatprep.subr.bf16.mxu1 %v8002_v46 }
 0x355   :  { %6731 = vmatpush3.bf16.msra.mxu1 %v8003_v47 }
 0x40b   :  { %v5244_v48 = vpop.f32.mrb[0].mxu1 }
 0x40c   :  { %v5736_v49 = vpop.f32.mrb[0].mxu0  ;;  %v5246_v51 = vpop.f32.mrb[1].mxu1 }
 0x40d   :  { %v6738_v50 = vadd.f32 %v5736_v49, %v5244_v48  ;;  %v5738_v52 = vpop.f32.mrb[1].mxu0  ;;  %v5248_v54 = vpop.f32.mrb[2].mxu1 }
 0x40e   :  { %v6739_v53 = vadd.f32 %v5738_v52, %v5246_v51  ;;  %v5740_v55 = vpop.f32.mrb[2].mxu0  ;;  %v5249_v57 = vpop.f32.mrb[3].mxu1 }
 0x40f   :  { %v5743_v56 = vmax.f32 %v6738_v50, 0.0  ;;  %v5741_v58 = vpop.f32.mrb[3].mxu0 }
 0x410   :  { %v5744_v59 = vmax.f32 %v6739_v53, 0.0 }
 0x411   :  { %v5745_v61 = vpack.c.bf16 %v5743_v56, %v5743_v56 }
 0x412   :  { %v5746_v60 = vpack.c.bf16 %v5744_v59, %v5744_v59 }
 0x414   :  { %5907 = vmatprep.mubr.bf16.mxu1 %v5746_v60 }
 0x415   :  { %5908 = vmatmul.mubr.bf16.vlgmr.msra.gmra.mrb[4].mxu1 %v5745_v61 }
 0x4e8   :  { %v6732_v62 = vpop.f32.mrb[4].mxu1 }
 0x4e9   :  { %v6733_v63 = vpop.f32.mrb[5].mxu1 }
 0x4ea   :  { %v6734_v0 = vadd.f32 %v6733_v63, %v6732_v62  ;;  %v6735_v1 = vpop.f32.mrb[6].mxu1 }
 0x4eb   :  { %v6736_v2 = vpop.f32.mrb[7].mxu1 }
 0x4ec   :  { %5915 = vst [vmem:[#allocation8] sm:$0xff] %v6734_v0 }
 0x4ed   :  { %8081 = shalt.err (!%p8078_p0)
}
 0x4ee   :  { %s8082_s27 = scalar_lea.hbm %s8177_s3, 128 }
 0x4ef   :  { %p8083_p1 = scmp.ne.s32.totalorder %s8177_s3, %s8082_s27  ;;  %p8086_p2 = scmp.lt.u32.totalorder %s8082_s27, %s8177_s3 }
 0x4f1   :  { %p8088_p3 = pnand %p8086_p2, %p8083_p1 }
 0x4f3   :  { %8091 = shalt.err (!%p8088_p3)
}
 0x4f4   :  { %5925 = dma.vmem_to_hbm [thread:$0]  %s5923_s23, 128, %s8177_s3, [#allocation4]  }
 0x4f5   :  { %8096 = dma.done.wait [#allocation4], 128  }
 0x4f6   :  { %8097 = vsyncadd [#allocation4], 4294967168 }
 0x4f7   :  { %5929 = vsyncpa [#allocation3], 1 }
 0x4f8   :  { %5930 = vsyncpa [#allocation6], 1 }
 0x4f9   :  { %5931 = vsyncpa [#allocation4], 1 }

</bundles_post_ra>
